<compile_context>
chip_gen: v6e
topology: v6e:2x2x1
jax: 0.10.0
libtpu: 0.0.40
codegen_flags: <defaults>
</compile_context>

<pallas_src>
import jax
import jax.numpy as jnp
from jax.experimental import pallas as pl
from jax.experimental.pallas import tpu as pltpu


DILATIONS = (6, 12, 18)


def _contributing_taps(H, W, d):
    """(kh, kw) taps of a 3x3 dilated conv whose window overlaps the image.

    A tap shifted by (kh-1)*d / (kw-1)*d reads only zero padding (and can be
    skipped bit-identically) iff the shift is >= H (resp. W) in magnitude.
    """
    taps = []
    for kh in range(3):
        if abs(kh - 1) * d >= H:
            continue
        for kw in range(3):
            if abs(kw - 1) * d >= W:
                continue
            taps.append((kh, kw))
    return taps


# ----------------------------- Pallas kernel --------------------------------

def _make_aspp_kernel(H, W, C, pad_lo, taps_per_branch):
    """Builds the fused per-batch-element ASPP kernel (all sizes static)."""
    M = H * W

    def kernel(x_ref, w0_ref, b0_ref, w1_ref, b1_ref,
               wd0_ref, wd1_ref, wd2_ref, bd_ref,
               o_ref, xpad_ref, col_ref):
        # x_ref : (1, H, W, C) f32        input tile (one batch element)
        # w0/w1 : (C, C) bf16             1x1 conv weights (x @ w layout)
        # b0/b1 : (1, C) f32
        # wd*   : (ntaps*C, C) bf16       packed dilated weights (contributing taps)
        # bd    : (3, 1, C) f32
        # o_ref : (1, H, W, 5C) f32
        # xpad  : (hp, wp, C) bf16  VMEM  zero-border-padded activations
        # col   : (M, max_taps*C) bf16 VMEM  im2col slab
        hp, wp, _ = xpad_ref.shape
        pad_hi_h = hp - pad_lo - H
        pad_hi_w = wp - pad_lo - W

        # ---- zero only the border strips (interior overwritten below) ------
        if pad_lo > 0:
            xpad_ref[:pad_lo, :, :] = jnp.zeros((pad_lo, wp, C), jnp.bfloat16)
            xpad_ref[pad_lo:pad_lo + H, :pad_lo, :] = (
                jnp.zeros((H, pad_lo, C), jnp.bfloat16))
        if pad_hi_h > 0:
            xpad_ref[pad_lo + H:, :, :] = (
                jnp.zeros((pad_hi_h, wp, C), jnp.bfloat16))
        if pad_hi_w > 0:
            xpad_ref[pad_lo:pad_lo + H, pad_lo + W:, :] = (
                jnp.zeros((H, pad_hi_w, C), jnp.bfloat16))

        xc = x_ref[0]                                   # (H, W, C) f32
        xflat_f32 = xc.reshape(M, C)                    # (M, C)  f32
        xflat = xflat_f32.astype(jnp.bfloat16)          # (M, C)  bf16
        xpad_ref[pad_lo:pad_lo + H, pad_lo:pad_lo + W, :] = xflat.reshape(H, W, C)

        # ---- branch 0: global avg-pool -> 1x1 -> ReLU -> broadcast ----------
        pooled = jnp.mean(xflat_f32, axis=0, keepdims=True)          # (1, C) f32
        g = jnp.dot(pooled.astype(jnp.bfloat16), w0_ref[...],
                    preferred_element_type=jnp.float32)
        g = jnp.maximum(g + b0_ref[...], 0.0)
        o_ref[0, :, :, 0:C] = jnp.broadcast_to(
            g.reshape(1, 1, C), (H, W, C)).astype(o_ref.dtype)

        # ---- branch 1: 1x1 conv + ReLU --------------------------------------
        y1 = jnp.dot(xflat, w1_ref[...], preferred_element_type=jnp.float32)
        y1 = jnp.maximum(y1 + b1_ref[...], 0.0)
        o_ref[0, :, :, C:2 * C] = y1.reshape(H, W, C).astype(o_ref.dtype)

        # ---- branches 2..4: dilated 3x3 convs, ONE matmul per branch --------
        wd_refs = (wd0_ref, wd1_ref, wd2_ref)
        for bi, d in enumerate(DILATIONS):
            taps = taps_per_branch[bi]
            if len(taps) == 1 and taps[0] == (1, 1):
                col = xflat                                   # center tap only
            else:
                for t, (kh, kw) in enumerate(taps):
                    if (kh, kw) == (1, 1):
                        col_ref[:, t * C:(t + 1) * C] = xflat
                    else:
                        r0 = pad_lo + (kh - 1) * d
                        c0 = pad_lo + (kw - 1) * d
                        col_ref[:, t * C:(t + 1) * C] = (
                            xpad_ref[r0:r0 + H, c0:c0 + W, :].reshape(M, C))
                col = col_ref[:, :len(taps) * C]
            y = jnp.dot(col, wd_refs[bi][...],
                        preferred_element_type=jnp.float32)
            y = jnp.maximum(y + bd_ref[bi], 0.0)
            lo = (2 + bi) * C
            o_ref[0, :, :, lo:lo + C] = y.reshape(H, W, C).astype(o_ref.dtype)

    return kernel


# ------------------------------ wrapper --------------------------------------

def aspp_drop_forward(x_nchw, params):
    """Forward pass of ASPP_Drop (eval mode). Input/output are NCHW (PyTorch)."""
    N, C, H, W = x_nchw.shape
    x = jnp.transpose(x_nchw, (0, 2, 3, 1))                    # -> NHWC, f32

    # Static tap analysis: drop taps whose window is entirely zero padding and
    # size the padded scratch from the taps that actually contribute.
    taps_per_branch = tuple(_contributing_taps(H, W, d) for d in DILATIONS)
    reach = 0
    for taps, d in zip(taps_per_branch, DILATIONS):
        for kh, kw in taps:
            reach = max(reach, abs(kh - 1) * d, abs(kw - 1) * d)
    pad_lo = -(-reach // 16) * 16          # 16-aligned (bf16 sublane packing)
    pad_hi = reach
    hp, wp = H + pad_lo + pad_hi, W + pad_lo + pad_hi
    max_taps = max(len(t) for t in taps_per_branch)

    # Per-branch weight slab holding only the contributing taps: (ntaps*C, C).
    wbr = [
        jnp.concatenate([params["wd"][bi, kh * 3 + kw] for kh, kw in taps],
                        axis=0)
        for bi, taps in enumerate(taps_per_branch)
    ]

    kernel = _make_aspp_kernel(H, W, C, pad_lo, taps_per_branch)
    const2 = lambda n: (0, 0)
    const3 = lambda n: (0, 0, 0)

    out_nhwc = pl.pallas_call(
        kernel,
        out_shape=jax.ShapeDtypeStruct((N, H, W, 5 * C), jnp.float32),
        grid_spec=pltpu.PrefetchScalarGridSpec(
            num_scalar_prefetch=0,
            grid=(N,),
            in_specs=[
                pl.BlockSpec((1, H, W, C), lambda n: (n, 0, 0, 0)),   # x
                pl.BlockSpec((C, C), const2),                         # w0
                pl.BlockSpec((1, C), const2),                         # b0
                pl.BlockSpec((C, C), const2),                         # w1
                pl.BlockSpec((1, C), const2),                         # b1
                pl.BlockSpec(wbr[0].shape, const2),                   # wd d=6
                pl.BlockSpec(wbr[1].shape, const2),                   # wd d=12
                pl.BlockSpec(wbr[2].shape, const2),                   # wd d=18
                pl.BlockSpec((3, 1, C), const3),                      # bd
            ],
            out_specs=pl.BlockSpec((1, H, W, 5 * C), lambda n: (n, 0, 0, 0)),
            scratch_shapes=[
                pltpu.VMEM((hp, wp, C), jnp.bfloat16),                # padded x
                pltpu.VMEM((H * W, max_taps * C), jnp.bfloat16),      # im2col
            ],
        ),
        compiler_params=pltpu.CompilerParams(
            dimension_semantics=("parallel",)),
    )(x, params["w0"], params["b0"], params["w1"], params["b1"],
      wbr[0], wbr[1], wbr[2], params["bd"])

    return jnp.transpose(out_nhwc, (0, 3, 1, 2))                # -> NCHW


# ------------------------------ parameters -----------------------------------

def init_params(key, C):
    """Parameters mirroring the PyTorch module shapes / init.

    kaiming_normal_ for conv weights (std = sqrt(2 / fan_in)); conv bias uses
    PyTorch's default uniform(-1/sqrt(fan_in), 1/sqrt(fan_in)).

    Weights are stored in x@w layout, taps ordered kh*3 + kw.  Importing a
    real PyTorch Conv2d checkpoint ((Cout, Cin, kh, kw)) requires an explicit
    permute to (kh, kw, Cin, Cout) / x@w layout.
    """
    keys = jax.random.split(key, 10)

    def kaiming(k, shape, fan_in):
        return jax.random.normal(k, shape, jnp.float32) * jnp.sqrt(2.0 / fan_in)

    def bias(k, fan_in, shape):
        bound = 1.0 / jnp.sqrt(fan_in)
        return jax.random.uniform(k, shape, jnp.float32, -bound, bound)

    params = {
        "w0": kaiming(keys[0], (C, C), C).astype(jnp.bfloat16),   # global 1x1
        "b0": bias(keys[1], C, (1, C)),
        "w1": kaiming(keys[2], (C, C), C).astype(jnp.bfloat16),   # layer6_1
        "b1": bias(keys[3], C, (1, C)),
    }
    wd, bd = [], []
    for kw_i, kb_i in ((4, 5), (6, 7), (8, 9)):
        w = kaiming(keys[kw_i], (3, 3, C, C), 9 * C)   # (kh, kw, Cin, Cout)
        wd.append(w.reshape(9, C, C))                  # tap-major: kh*3 + kw
        bd.append(bias(keys[kb_i], 9 * C, (1, C)))
    params["wd"] = jnp.stack(wd, axis=0).astype(jnp.bfloat16)   # (3, 9, C, C)
    params["bd"] = jnp.stack(bd, axis=0)                        # (3, 1, C)
    return params


# ----------------------------------- main ------------------------------------

if __name__ == "__main__":
    key = jax.random.PRNGKey(0)
    k_x, k_p = jax.random.split(key)

    # C = 128 keeps every per-branch channel block exactly one lane-tile wide
    # (aligned, unmasked stores) and the matmul dims MXU-friendly.
    # N = 2 keeps both v7x TensorCores busy under the "parallel" grid axis.
    N, C, H, W = 2, 128, 16, 16
    x = jax.random.normal(k_x, (N, C, H, W), jnp.float32)
    params = init_params(k_p, C)

    out = jax.jit(aspp_drop_forward)(x, params)
    out = jax.block_until_ready(out)

    assert out.shape == (N, 5 * C, H, W), out.shape
    assert out.dtype == jnp.float32
    assert bool(jnp.all(jnp.isfinite(out)))
    print("KERNEL_OK")
</pallas_src>

<mosaic_0001>
module attributes {stable_mosaic.version = 11 : i64} {
  func.func @kernel(%arg0: i32, %arg1: memref<1x16x16x128xf32, #tpu.memory_space<vmem>>, %arg2: memref<128x128xbf16, #tpu.memory_space<vmem>>, %arg3: memref<1x128xf32, #tpu.memory_space<vmem>>, %arg4: memref<128x128xbf16, #tpu.memory_space<vmem>>, %arg5: memref<1x128xf32, #tpu.memory_space<vmem>>, %arg6: memref<1152x128xbf16, #tpu.memory_space<vmem>>, %arg7: memref<1152x128xbf16, #tpu.memory_space<vmem>>, %arg8: memref<128x128xbf16, #tpu.memory_space<vmem>>, %arg9: memref<3x1x128xf32, #tpu.memory_space<vmem>>, %arg10: memref<1x16x16x640xf32, #tpu.memory_space<vmem>>, %arg11: memref<44x44x128xbf16, #tpu.memory_space<vmem>>, %arg12: memref<256x1152xbf16, #tpu.memory_space<vmem>>) attributes {dimension_semantics = [#tpu.dimension_semantics<parallel>], iteration_bounds = array<i64: 2>, scalar_prefetch = 0 : i64, scratch_operands = 2 : i64, tpu.core_type = #tpu.core_type<tc>, window_params = [{transform_indices = @transform_0, window_bounds = array<i64: 1, 16, 16, 128>}, {pipeline_mode = #tpu.pipeline_mode<synchronous>, transform_indices = @transform_1, window_bounds = array<i64: 128, 128>}, {pipeline_mode = #tpu.pipeline_mode<synchronous>, transform_indices = @transform_2, window_bounds = array<i64: 1, 128>}, {pipeline_mode = #tpu.pipeline_mode<synchronous>, transform_indices = @transform_3, window_bounds = array<i64: 128, 128>}, {pipeline_mode = #tpu.pipeline_mode<synchronous>, transform_indices = @transform_4, window_bounds = array<i64: 1, 128>}, {pipeline_mode = #tpu.pipeline_mode<synchronous>, transform_indices = @transform_5, window_bounds = array<i64: 1152, 128>}, {pipeline_mode = #tpu.pipeline_mode<synchronous>, transform_indices = @transform_6, window_bounds = array<i64: 1152, 128>}, {pipeline_mode = #tpu.pipeline_mode<synchronous>, transform_indices = @transform_7, window_bounds = array<i64: 128, 128>}, {pipeline_mode = #tpu.pipeline_mode<synchronous>, transform_indices = @transform_8, window_bounds = array<i64: 3, 1, 128>}, {transform_indices = @transform_9, window_bounds = array<i64: 1, 16, 16, 640>}]} {
    %cst = arith.constant 0.000000e+00 : bf16
    %0 = vector.broadcast %cst : bf16 to vector<16x44x128xbf16>
    %c0 = arith.constant 0 : index
    %c0_0 = arith.constant 0 : index
    %c0_1 = arith.constant 0 : index
    %1 = vector.load %arg11[%c0, %c0_0, %c0_1] : memref<44x44x128xbf16, #tpu.memory_space<vmem>>, vector<16x44x128xbf16>
    tpu.vector_store %arg11[%c0, %c0_0, %c0_1], %0 {strides = array<i32>} : memref<44x44x128xbf16, #tpu.memory_space<vmem>>, vector<16x44x128xbf16>,
    %cst_2 = arith.constant 0.000000e+00 : bf16
    %2 = vector.broadcast %cst_2 : bf16 to vector<16x16x128xbf16>
    %c16 = arith.constant 16 : index
    %c0_3 = arith.constant 0 : index
    %c0_4 = arith.constant 0 : index
    %3 = vector.load %arg11[%c16, %c0_3, %c0_4] : memref<44x44x128xbf16, #tpu.memory_space<vmem>>, vector<16x16x128xbf16>
    tpu.vector_store %arg11[%c16, %c0_3, %c0_4], %2 {strides = array<i32>} : memref<44x44x128xbf16, #tpu.memory_space<vmem>>, vector<16x16x128xbf16>,
    %cst_5 = arith.constant 0.000000e+00 : bf16
    %4 = vector.broadcast %cst_5 : bf16 to vector<12x44x128xbf16>
    %c32 = arith.constant 32 : index
    %c0_6 = arith.constant 0 : index
    %c0_7 = arith.constant 0 : index
    %5 = vector.load %arg11[%c32, %c0_6, %c0_7] : memref<44x44x128xbf16, #tpu.memory_space<vmem>>, vector<12x44x128xbf16>
    tpu.vector_store %arg11[%c32, %c0_6, %c0_7], %4 {strides = array<i32>} : memref<44x44x128xbf16, #tpu.memory_space<vmem>>, vector<12x44x128xbf16>,
    %cst_8 = arith.constant 0.000000e+00 : bf16
    %6 = vector.broadcast %cst_8 : bf16 to vector<16x12x128xbf16>
    %c16_9 = arith.constant 16 : index
    %c32_10 = arith.constant 32 : index
    %c0_11 = arith.constant 0 : index
    %7 = vector.load %arg11[%c16_9, %c32_10, %c0_11] : memref<44x44x128xbf16, #tpu.memory_space<vmem>>, vector<16x12x128xbf16>
    tpu.vector_store %arg11[%c16_9, %c32_10, %c0_11], %6 {strides = array<i32>} : memref<44x44x128xbf16, #tpu.memory_space<vmem>>, vector<16x12x128xbf16>,
    %c0_12 = arith.constant 0 : index
    %c0_13 = arith.constant 0 : index
    %c0_14 = arith.constant 0 : index
    %c0_15 = arith.constant 0 : index
    %8 = vector.load %arg1[%c0_12, %c0_13, %c0_14, %c0_15] : memref<1x16x16x128xf32, #tpu.memory_space<vmem>>, vector<1x16x16x128xf32>
    %9 = vector.shape_cast %8 : vector<1x16x16x128xf32> to vector<16x16x128xf32>
    %10 = vector.shape_cast %9 : vector<16x16x128xf32> to vector<256x128xf32>
    %11 = arith.truncf %10 : vector<256x128xf32> to vector<256x128xbf16>
    %12 = vector.shape_cast %11 : vector<256x128xbf16> to vector<16x16x128xbf16>
    %c16_16 = arith.constant 16 : index
    %c16_17 = arith.constant 16 : index
    %c0_18 = arith.constant 0 : index
    %13 = vector.load %arg11[%c16_16, %c16_17, %c0_18] : memref<44x44x128xbf16, #tpu.memory_space<vmem>>, vector<16x16x128xbf16>
    tpu.vector_store %arg11[%c16_16, %c16_17, %c0_18], %12 {strides = array<i32>} : memref<44x44x128xbf16, #tpu.memory_space<vmem>>, vector<16x16x128xbf16>,
    %cst_19 = arith.constant dense<0.000000e+00> : vector<128xf32>
    %14 = vector.multi_reduction <add>, %10, %cst_19 [0] : vector<256x128xf32> to vector<128xf32>
    %15 = vector.shape_cast %14 : vector<128xf32> to vector<1x128xf32>
    %cst_20 = arith.constant 2.560000e+02 : f32
    %16 = vector.broadcast %cst_20 : f32 to vector<1x128xf32>
    %17 = arith.divf %15, %16 : vector<1x128xf32>
    %18 = arith.truncf %17 : vector<1x128xf32> to vector<1x128xbf16>
    %c0_21 = arith.constant 0 : index
    %c0_22 = arith.constant 0 : index
    %19 = vector.load %arg2[%c0_21, %c0_22] : memref<128x128xbf16, #tpu.memory_space<vmem>>, vector<128x128xbf16>
    %cst_23 = arith.constant dense<0.000000e+00> : vector<1x128xf32>
    %20 = tpu.matmul %18, %19, %cst_23 {dimension_numbers = #tpu.dot_dimension_numbers<[1], [0], [0], [1], [0, 0, 1, 1], [], []>} : vector<1x128xbf16>, vector<128x128xbf16>, vector<1x128xf32> -> vector<1x128xf32>
    %c0_24 = arith.constant 0 : index
    %c0_25 = arith.constant 0 : index
    %21 = vector.load %arg3[%c0_24, %c0_25] : memref<1x128xf32, #tpu.memory_space<vmem>>, vector<1x128xf32>
    %22 = arith.addf %20, %21 : vector<1x128xf32>
    %cst_26 = arith.constant 0.000000e+00 : f32
    %23 = vector.broadcast %cst_26 : f32 to vector<1x128xf32>
    %24 = arith.maximumf %22, %23 : vector<1x128xf32>
    %25 = vector.shape_cast %24 : vector<1x128xf32> to vector<1x1x128xf32>
    %26 = vector.shape_cast %25 : vector<1x1x128xf32> to vector<1x1x128xf32>
    %27 = vector.broadcast %26 : vector<1x1x128xf32> to vector<16x16x128xf32>
    %c0_27 = arith.constant 0 : index
    %c0_28 = arith.constant 0 : index
    %c0_29 = arith.constant 0 : index
    %c0_30 = arith.constant 0 : index
    %28 = vector.load %arg10[%c0_27, %c0_28, %c0_29, %c0_30] : memref<1x16x16x640xf32, #tpu.memory_space<vmem>>, vector<1x16x16x128xf32>
    %29 = vector.shape_cast %28 : vector<1x16x16x128xf32> to vector<16x16x128xf32>
    %30 = vector.shape_cast %27 : vector<16x16x128xf32> to vector<1x16x16x128xf32>
    tpu.vector_store %arg10[%c0_27, %c0_28, %c0_29, %c0_30], %30 {strides = array<i32>} : memref<1x16x16x640xf32, #tpu.memory_space<vmem>>, vector<1x16x16x128xf32>,
    %c0_31 = arith.constant 0 : index
    %c0_32 = arith.constant 0 : index
    %31 = vector.load %arg4[%c0_31, %c0_32] : memref<128x128xbf16, #tpu.memory_space<vmem>>, vector<128x128xbf16>
    %cst_33 = arith.constant dense<0.000000e+00> : vector<256x128xf32>
    %32 = tpu.matmul %11, %31, %cst_33 {dimension_numbers = #tpu.dot_dimension_numbers<[1], [0], [0], [1], [0, 0, 1, 1], [], []>} : vector<256x128xbf16>, vector<128x128xbf16>, vector<256x128xf32> -> vector<256x128xf32>
    %c0_34 = arith.constant 0 : index
    %c0_35 = arith.constant 0 : index
    %33 = vector.load %arg5[%c0_34, %c0_35] : memref<1x128xf32, #tpu.memory_space<vmem>>, vector<1x128xf32>
    %34 = vector.broadcast %33 : vector<1x128xf32> to vector<256x128xf32>
    %35 = arith.addf %32, %34 : vector<256x128xf32>
    %cst_36 = arith.constant 0.000000e+00 : f32
    %36 = vector.broadcast %cst_36 : f32 to vector<256x128xf32>
    %37 = arith.maximumf %35, %36 : vector<256x128xf32>
    %38 = vector.shape_cast %37 : vector<256x128xf32> to vector<16x16x128xf32>
    %c0_37 = arith.constant 0 : index
    %c0_38 = arith.constant 0 : index
    %c0_39 = arith.constant 0 : index
    %c128 = arith.constant 128 : index
    %39 = vector.load %arg10[%c0_37, %c0_38, %c0_39, %c128] : memref<1x16x16x640xf32, #tpu.memory_space<vmem>>, vector<1x16x16x128xf32>
    %40 = vector.shape_cast %39 : vector<1x16x16x128xf32> to vector<16x16x128xf32>
    %41 = vector.shape_cast %38 : vector<16x16x128xf32> to vector<1x16x16x128xf32>
    tpu.vector_store %arg10[%c0_37, %c0_38, %c0_39, %c128], %41 {strides = array<i32>} : memref<1x16x16x640xf32, #tpu.memory_space<vmem>>, vector<1x16x16x128xf32>,
    %c10 = arith.constant 10 : index
    %c10_40 = arith.constant 10 : index
    %c0_41 = arith.constant 0 : index
    %42 = vector.load %arg11[%c10, %c10_40, %c0_41] : memref<44x44x128xbf16, #tpu.memory_space<vmem>>, vector<16x16x128xbf16>
    %43 = vector.shape_cast %42 : vector<16x16x128xbf16> to vector<256x128xbf16>
    %c0_42 = arith.constant 0 : index
    %c0_43 = arith.constant 0 : index
    %44 = vector.load %arg12[%c0_42, %c0_43] : memref<256x1152xbf16, #tpu.memory_space<vmem>>, vector<256x128xbf16>
    tpu.vector_store %arg12[%c0_42, %c0_43], %43 {strides = array<i32>} : memref<256x1152xbf16, #tpu.memory_space<vmem>>, vector<256x128xbf16>,
    %c10_44 = arith.constant 10 : index
    %c16_45 = arith.constant 16 : index
    %c0_46 = arith.constant 0 : index
    %45 = vector.load %arg11[%c10_44, %c16_45, %c0_46] : memref<44x44x128xbf16, #tpu.memory_space<vmem>>, vector<16x16x128xbf16>
    %46 = vector.shape_cast %45 : vector<16x16x128xbf16> to vector<256x128xbf16>
    %c0_47 = arith.constant 0 : index
    %c128_48 = arith.constant 128 : index
    %47 = vector.load %arg12[%c0_47, %c128_48] : memref<256x1152xbf16, #tpu.memory_space<vmem>>, vector<256x128xbf16>
    tpu.vector_store %arg12[%c0_47, %c128_48], %46 {strides = array<i32>} : memref<256x1152xbf16, #tpu.memory_space<vmem>>, vector<256x128xbf16>,
    %c10_49 = arith.constant 10 : index
    %c22 = arith.constant 22 : index
    %c0_50 = arith.constant 0 : index
    %48 = vector.load %arg11[%c10_49, %c22, %c0_50] : memref<44x44x128xbf16, #tpu.memory_space<vmem>>, vector<16x16x128xbf16>
    %49 = vector.shape_cast %48 : vector<16x16x128xbf16> to vector<256x128xbf16>
    %c0_51 = arith.constant 0 : index
    %c256 = arith.constant 256 : index
    %50 = vector.load %arg12[%c0_51, %c256] : memref<256x1152xbf16, #tpu.memory_space<vmem>>, vector<256x128xbf16>
    tpu.vector_store %arg12[%c0_51, %c256], %49 {strides = array<i32>} : memref<256x1152xbf16, #tpu.memory_space<vmem>>, vector<256x128xbf16>,
    %c16_52 = arith.constant 16 : index
    %c10_53 = arith.constant 10 : index
    %c0_54 = arith.constant 0 : index
    %51 = vector.load %arg11[%c16_52, %c10_53, %c0_54] : memref<44x44x128xbf16, #tpu.memory_space<vmem>>, vector<16x16x128xbf16>
    %52 = vector.shape_cast %51 : vector<16x16x128xbf16> to vector<256x128xbf16>
    %c0_55 = arith.constant 0 : index
    %c384 = arith.constant 384 : index
    %53 = vector.load %arg12[%c0_55, %c384] : memref<256x1152xbf16, #tpu.memory_space<vmem>>, vector<256x128xbf16>
    tpu.vector_store %arg12[%c0_55, %c384], %52 {strides = array<i32>} : memref<256x1152xbf16, #tpu.memory_space<vmem>>, vector<256x128xbf16>,
    %c0_56 = arith.constant 0 : index
    %c512 = arith.constant 512 : index
    %54 = vector.load %arg12[%c0_56, %c512] : memref<256x1152xbf16, #tpu.memory_space<vmem>>, vector<256x128xbf16>
    tpu.vector_store %arg12[%c0_56, %c512], %11 {strides = array<i32>} : memref<256x1152xbf16, #tpu.memory_space<vmem>>, vector<256x128xbf16>,
    %c16_57 = arith.constant 16 : index
    %c22_58 = arith.constant 22 : index
    %c0_59 = arith.constant 0 : index
    %55 = vector.load %arg11[%c16_57, %c22_58, %c0_59] : memref<44x44x128xbf16, #tpu.memory_space<vmem>>, vector<16x16x128xbf16>
    %56 = vector.shape_cast %55 : vector<16x16x128xbf16> to vector<256x128xbf16>
    %c0_60 = arith.constant 0 : index
    %c640 = arith.constant 640 : index
    %57 = vector.load %arg12[%c0_60, %c640] : memref<256x1152xbf16, #tpu.memory_space<vmem>>, vector<256x128xbf16>
    tpu.vector_store %arg12[%c0_60, %c640], %56 {strides = array<i32>} : memref<256x1152xbf16, #tpu.memory_space<vmem>>, vector<256x128xbf16>,
    %c22_61 = arith.constant 22 : index
    %c10_62 = arith.constant 10 : index
    %c0_63 = arith.constant 0 : index
    %58 = vector.load %arg11[%c22_61, %c10_62, %c0_63] : memref<44x44x128xbf16, #tpu.memory_space<vmem>>, vector<16x16x128xbf16>
    %59 = vector.shape_cast %58 : vector<16x16x128xbf16> to vector<256x128xbf16>
    %c0_64 = arith.constant 0 : index
    %c768 = arith.constant 768 : index
    %60 = vector.load %arg12[%c0_64, %c768] : memref<256x1152xbf16, #tpu.memory_space<vmem>>, vector<256x128xbf16>
    tpu.vector_store %arg12[%c0_64, %c768], %59 {strides = array<i32>} : memref<256x1152xbf16, #tpu.memory_space<vmem>>, vector<256x128xbf16>,
    %c22_65 = arith.constant 22 : index
    %c16_66 = arith.constant 16 : index
    %c0_67 = arith.constant 0 : index
    %61 = vector.load %arg11[%c22_65, %c16_66, %c0_67] : memref<44x44x128xbf16, #tpu.memory_space<vmem>>, vector<16x16x128xbf16>
    %62 = vector.shape_cast %61 : vector<16x16x128xbf16> to vector<256x128xbf16>
    %c0_68 = arith.constant 0 : index
    %c896 = arith.constant 896 : index
    %63 = vector.load %arg12[%c0_68, %c896] : memref<256x1152xbf16, #tpu.memory_space<vmem>>, vector<256x128xbf16>
    tpu.vector_store %arg12[%c0_68, %c896], %62 {strides = array<i32>} : memref<256x1152xbf16, #tpu.memory_space<vmem>>, vector<256x128xbf16>,
    %c22_69 = arith.constant 22 : index
    %c22_70 = arith.constant 22 : index
    %c0_71 = arith.constant 0 : index
    %64 = vector.load %arg11[%c22_69, %c22_70, %c0_71] : memref<44x44x128xbf16, #tpu.memory_space<vmem>>, vector<16x16x128xbf16>
    %65 = vector.shape_cast %64 : vector<16x16x128xbf16> to vector<256x128xbf16>
    %c0_72 = arith.constant 0 : index
    %c1024 = arith.constant 1024 : index
    %66 = vector.load %arg12[%c0_72, %c1024] : memref<256x1152xbf16, #tpu.memory_space<vmem>>, vector<256x128xbf16>
    tpu.vector_store %arg12[%c0_72, %c1024], %65 {strides = array<i32>} : memref<256x1152xbf16, #tpu.memory_space<vmem>>, vector<256x128xbf16>,
    %c0_73 = arith.constant 0 : index
    %c0_74 = arith.constant 0 : index
    %67 = vector.load %arg12[%c0_73, %c0_74] : memref<256x1152xbf16, #tpu.memory_space<vmem>>, vector<256x1152xbf16>
    %c0_75 = arith.constant 0 : index
    %c0_76 = arith.constant 0 : index
    %68 = vector.load %arg6[%c0_75, %c0_76] : memref<1152x128xbf16, #tpu.memory_space<vmem>>, vector<1152x128xbf16>
    %cst_77 = arith.constant dense<0.000000e+00> : vector<256x128xf32>
    %69 = tpu.matmul %67, %68, %cst_77 {dimension_numbers = #tpu.dot_dimension_numbers<[1], [0], [0], [1], [0, 0, 1, 1], [], []>} : vector<256x1152xbf16>, vector<1152x128xbf16>, vector<256x128xf32> -> vector<256x128xf32>
    %c0_78 = arith.constant 0 : index
    %c0_79 = arith.constant 0 : index
    %c0_80 = arith.constant 0 : index
    %70 = vector.load %arg9[%c0_78, %c0_79, %c0_80] : memref<3x1x128xf32, #tpu.memory_space<vmem>>, vector<1x1x128xf32>
    %71 = vector.shape_cast %70 : vector<1x1x128xf32> to vector<1x128xf32>
    %72 = vector.broadcast %71 : vector<1x128xf32> to vector<256x128xf32>
    %73 = arith.addf %69, %72 : vector<256x128xf32>
    %cst_81 = arith.constant 0.000000e+00 : f32
    %74 = vector.broadcast %cst_81 : f32 to vector<256x128xf32>
    %75 = arith.maximumf %73, %74 : vector<256x128xf32>
    %76 = vector.shape_cast %75 : vector<256x128xf32> to vector<16x16x128xf32>
    %c0_82 = arith.constant 0 : index
    %c0_83 = arith.constant 0 : index
    %c0_84 = arith.constant 0 : index
    %c256_85 = arith.constant 256 : index
    %77 = vector.load %arg10[%c0_82, %c0_83, %c0_84, %c256_85] : memref<1x16x16x640xf32, #tpu.memory_space<vmem>>, vector<1x16x16x128xf32>
    %78 = vector.shape_cast %77 : vector<1x16x16x128xf32> to vector<16x16x128xf32>
    %79 = vector.shape_cast %76 : vector<16x16x128xf32> to vector<1x16x16x128xf32>
    tpu.vector_store %arg10[%c0_82, %c0_83, %c0_84, %c256_85], %79 {strides = array<i32>} : memref<1x16x16x640xf32, #tpu.memory_space<vmem>>, vector<1x16x16x128xf32>,
    %c4 = arith.constant 4 : index
    %c4_86 = arith.constant 4 : index
    %c0_87 = arith.constant 0 : index
    %80 = vector.load %arg11[%c4, %c4_86, %c0_87] : memref<44x44x128xbf16, #tpu.memory_space<vmem>>, vector<16x16x128xbf16>
    %81 = vector.shape_cast %80 : vector<16x16x128xbf16> to vector<256x128xbf16>
    %c0_88 = arith.constant 0 : index
    %c0_89 = arith.constant 0 : index
    %82 = vector.load %arg12[%c0_88, %c0_89] : memref<256x1152xbf16, #tpu.memory_space<vmem>>, vector<256x128xbf16>
    tpu.vector_store %arg12[%c0_88, %c0_89], %81 {strides = array<i32>} : memref<256x1152xbf16, #tpu.memory_space<vmem>>, vector<256x128xbf16>,
    %c4_90 = arith.constant 4 : index
    %c16_91 = arith.constant 16 : index
    %c0_92 = arith.constant 0 : index
    %83 = vector.load %arg11[%c4_90, %c16_91, %c0_92] : memref<44x44x128xbf16, #tpu.memory_space<vmem>>, vector<16x16x128xbf16>
    %84 = vector.shape_cast %83 : vector<16x16x128xbf16> to vector<256x128xbf16>
    %c0_93 = arith.constant 0 : index
    %c128_94 = arith.constant 128 : index
    %85 = vector.load %arg12[%c0_93, %c128_94] : memref<256x1152xbf16, #tpu.memory_space<vmem>>, vector<256x128xbf16>
    tpu.vector_store %arg12[%c0_93, %c128_94], %84 {strides = array<i32>} : memref<256x1152xbf16, #tpu.memory_space<vmem>>, vector<256x128xbf16>,
    %c4_95 = arith.constant 4 : index
    %c28 = arith.constant 28 : index
    %c0_96 = arith.constant 0 : index
    %86 = vector.load %arg11[%c4_95, %c28, %c0_96] : memref<44x44x128xbf16, #tpu.memory_space<vmem>>, vector<16x16x128xbf16>
    %87 = vector.shape_cast %86 : vector<16x16x128xbf16> to vector<256x128xbf16>
    %c0_97 = arith.constant 0 : index
    %c256_98 = arith.constant 256 : index
    %88 = vector.load %arg12[%c0_97, %c256_98] : memref<256x1152xbf16, #tpu.memory_space<vmem>>, vector<256x128xbf16>
    tpu.vector_store %arg12[%c0_97, %c256_98], %87 {strides = array<i32>} : memref<256x1152xbf16, #tpu.memory_space<vmem>>, vector<256x128xbf16>,
    %c16_99 = arith.constant 16 : index
    %c4_100 = arith.constant 4 : index
    %c0_101 = arith.constant 0 : index
    %89 = vector.load %arg11[%c16_99, %c4_100, %c0_101] : memref<44x44x128xbf16, #tpu.memory_space<vmem>>, vector<16x16x128xbf16>
    %90 = vector.shape_cast %89 : vector<16x16x128xbf16> to vector<256x128xbf16>
    %c0_102 = arith.constant 0 : index
    %c384_103 = arith.constant 384 : index
    %91 = vector.load %arg12[%c0_102, %c384_103] : memref<256x1152xbf16, #tpu.memory_space<vmem>>, vector<256x128xbf16>
    tpu.vector_store %arg12[%c0_102, %c384_103], %90 {strides = array<i32>} : memref<256x1152xbf16, #tpu.memory_space<vmem>>, vector<256x128xbf16>,
    %c0_104 = arith.constant 0 : index
    %c512_105 = arith.constant 512 : index
    %92 = vector.load %arg12[%c0_104, %c512_105] : memref<256x1152xbf16, #tpu.memory_space<vmem>>, vector<256x128xbf16>
    tpu.vector_store %arg12[%c0_104, %c512_105], %11 {strides = array<i32>} : memref<256x1152xbf16, #tpu.memory_space<vmem>>, vector<256x128xbf16>,
    %c16_106 = arith.constant 16 : index
    %c28_107 = arith.constant 28 : index
    %c0_108 = arith.constant 0 : index
    %93 = vector.load %arg11[%c16_106, %c28_107, %c0_108] : memref<44x44x128xbf16, #tpu.memory_space<vmem>>, vector<16x16x128xbf16>
    %94 = vector.shape_cast %93 : vector<16x16x128xbf16> to vector<256x128xbf16>
    %c0_109 = arith.constant 0 : index
    %c640_110 = arith.constant 640 : index
    %95 = vector.load %arg12[%c0_109, %c640_110] : memref<256x1152xbf16, #tpu.memory_space<vmem>>, vector<256x128xbf16>
    tpu.vector_store %arg12[%c0_109, %c640_110], %94 {strides = array<i32>} : memref<256x1152xbf16, #tpu.memory_space<vmem>>, vector<256x128xbf16>,
    %c28_111 = arith.constant 28 : index
    %c4_112 = arith.constant 4 : index
    %c0_113 = arith.constant 0 : index
    %96 = vector.load %arg11[%c28_111, %c4_112, %c0_113] : memref<44x44x128xbf16, #tpu.memory_space<vmem>>, vector<16x16x128xbf16>
    %97 = vector.shape_cast %96 : vector<16x16x128xbf16> to vector<256x128xbf16>
    %c0_114 = arith.constant 0 : index
    %c768_115 = arith.constant 768 : index
    %98 = vector.load %arg12[%c0_114, %c768_115] : memref<256x1152xbf16, #tpu.memory_space<vmem>>, vector<256x128xbf16>
    tpu.vector_store %arg12[%c0_114, %c768_115], %97 {strides = array<i32>} : memref<256x1152xbf16, #tpu.memory_space<vmem>>, vector<256x128xbf16>,
    %c28_116 = arith.constant 28 : index
    %c16_117 = arith.constant 16 : index
    %c0_118 = arith.constant 0 : index
    %99 = vector.load %arg11[%c28_116, %c16_117, %c0_118] : memref<44x44x128xbf16, #tpu.memory_space<vmem>>, vector<16x16x128xbf16>
    %100 = vector.shape_cast %99 : vector<16x16x128xbf16> to vector<256x128xbf16>
    %c0_119 = arith.constant 0 : index
    %c896_120 = arith.constant 896 : index
    %101 = vector.load %arg12[%c0_119, %c896_120] : memref<256x1152xbf16, #tpu.memory_space<vmem>>, vector<256x128xbf16>
    tpu.vector_store %arg12[%c0_119, %c896_120], %100 {strides = array<i32>} : memref<256x1152xbf16, #tpu.memory_space<vmem>>, vector<256x128xbf16>,
    %c28_121 = arith.constant 28 : index
    %c28_122 = arith.constant 28 : index
    %c0_123 = arith.constant 0 : index
    %102 = vector.load %arg11[%c28_121, %c28_122, %c0_123] : memref<44x44x128xbf16, #tpu.memory_space<vmem>>, vector<16x16x128xbf16>
    %103 = vector.shape_cast %102 : vector<16x16x128xbf16> to vector<256x128xbf16>
    %c0_124 = arith.constant 0 : index
    %c1024_125 = arith.constant 1024 : index
    %104 = vector.load %arg12[%c0_124, %c1024_125] : memref<256x1152xbf16, #tpu.memory_space<vmem>>, vector<256x128xbf16>
    tpu.vector_store %arg12[%c0_124, %c1024_125], %103 {strides = array<i32>} : memref<256x1152xbf16, #tpu.memory_space<vmem>>, vector<256x128xbf16>,
    %c0_126 = arith.constant 0 : index
    %c0_127 = arith.constant 0 : index
    %105 = vector.load %arg12[%c0_126, %c0_127] : memref<256x1152xbf16, #tpu.memory_space<vmem>>, vector<256x1152xbf16>
    %c0_128 = arith.constant 0 : index
    %c0_129 = arith.constant 0 : index
    %106 = vector.load %arg7[%c0_128, %c0_129] : memref<1152x128xbf16, #tpu.memory_space<vmem>>, vector<1152x128xbf16>
    %cst_130 = arith.constant dense<0.000000e+00> : vector<256x128xf32>
    %107 = tpu.matmul %105, %106, %cst_130 {dimension_numbers = #tpu.dot_dimension_numbers<[1], [0], [0], [1], [0, 0, 1, 1], [], []>} : vector<256x1152xbf16>, vector<1152x128xbf16>, vector<256x128xf32> -> vector<256x128xf32>
    %c1 = arith.constant 1 : index
    %c0_131 = arith.constant 0 : index
    %c0_132 = arith.constant 0 : index
    %108 = vector.load %arg9[%c1, %c0_131, %c0_132] : memref<3x1x128xf32, #tpu.memory_space<vmem>>, vector<1x1x128xf32>
    %109 = vector.shape_cast %108 : vector<1x1x128xf32> to vector<1x128xf32>
    %110 = vector.broadcast %109 : vector<1x128xf32> to vector<256x128xf32>
    %111 = arith.addf %107, %110 : vector<256x128xf32>
    %cst_133 = arith.constant 0.000000e+00 : f32
    %112 = vector.broadcast %cst_133 : f32 to vector<256x128xf32>
    %113 = arith.maximumf %111, %112 : vector<256x128xf32>
    %114 = vector.shape_cast %113 : vector<256x128xf32> to vector<16x16x128xf32>
    %c0_134 = arith.constant 0 : index
    %c0_135 = arith.constant 0 : index
    %c0_136 = arith.constant 0 : index
    %c384_137 = arith.constant 384 : index
    %115 = vector.load %arg10[%c0_134, %c0_135, %c0_136, %c384_137] : memref<1x16x16x640xf32, #tpu.memory_space<vmem>>, vector<1x16x16x128xf32>
    %116 = vector.shape_cast %115 : vector<1x16x16x128xf32> to vector<16x16x128xf32>
    %117 = vector.shape_cast %114 : vector<16x16x128xf32> to vector<1x16x16x128xf32>
    tpu.vector_store %arg10[%c0_134, %c0_135, %c0_136, %c384_137], %117 {strides = array<i32>} : memref<1x16x16x640xf32, #tpu.memory_space<vmem>>, vector<1x16x16x128xf32>,
    %c0_138 = arith.constant 0 : index
    %c0_139 = arith.constant 0 : index
    %118 = vector.load %arg8[%c0_138, %c0_139] : memref<128x128xbf16, #tpu.memory_space<vmem>>, vector<128x128xbf16>
    %cst_140 = arith.constant dense<0.000000e+00> : vector<256x128xf32>
    %119 = tpu.matmul %11, %118, %cst_140 {dimension_numbers = #tpu.dot_dimension_numbers<[1], [0], [0], [1], [0, 0, 1, 1], [], []>} : vector<256x128xbf16>, vector<128x128xbf16>, vector<256x128xf32> -> vector<256x128xf32>
    %c2 = arith.constant 2 : index
    %c0_141 = arith.constant 0 : index
    %c0_142 = arith.constant 0 : index
    %120 = vector.load %arg9[%c2, %c0_141, %c0_142] : memref<3x1x128xf32, #tpu.memory_space<vmem>>, vector<1x1x128xf32>
    %121 = vector.shape_cast %120 : vector<1x1x128xf32> to vector<1x128xf32>
    %122 = vector.broadcast %121 : vector<1x128xf32> to vector<256x128xf32>
    %123 = arith.addf %119, %122 : vector<256x128xf32>
    %cst_143 = arith.constant 0.000000e+00 : f32
    %124 = vector.broadcast %cst_143 : f32 to vector<256x128xf32>
    %125 = arith.maximumf %123, %124 : vector<256x128xf32>
    %126 = vector.shape_cast %125 : vector<256x128xf32> to vector<16x16x128xf32>
    %c0_144 = arith.constant 0 : index
    %c0_145 = arith.constant 0 : index
    %c0_146 = arith.constant 0 : index
    %c512_147 = arith.constant 512 : index
    %127 = vector.load %arg10[%c0_144, %c0_145, %c0_146, %c512_147] : memref<1x16x16x640xf32, #tpu.memory_space<vmem>>, vector<1x16x16x128xf32>
    %128 = vector.shape_cast %127 : vector<1x16x16x128xf32> to vector<16x16x128xf32>
    %129 = vector.shape_cast %126 : vector<16x16x128xf32> to vector<1x16x16x128xf32>
    tpu.vector_store %arg10[%c0_144, %c0_145, %c0_146, %c512_147], %129 {strides = array<i32>} : memref<1x16x16x640xf32, #tpu.memory_space<vmem>>, vector<1x16x16x128xf32>,
    return
  }
  func.func @transform_0(%arg0: i32) -> (i32, i32, i32, i32) {
    %c0_i32 = arith.constant 0 : i32
    %c0_i32_0 = arith.constant 0 : i32
    %c0_i32_1 = arith.constant 0 : i32
    %c0_i32_2 = arith.constant 0 : i32
    return %arg0, %c0_i32, %c0_i32_0, %c0_i32_1 : i32, i32, i32, i32
  }
  func.func @transform_1(%arg0: i32) -> (i32, i32) {
    %c0_i32 = arith.constant 0 : i32
    %c0_i32_0 = arith.constant 0 : i32
    %c0_i32_1 = arith.constant 0 : i32
    return %c0_i32, %c0_i32_0 : i32, i32
  }
  func.func @transform_2(%arg0: i32) -> (i32, i32) {
    %c0_i32 = arith.constant 0 : i32
    %c0_i32_0 = arith.constant 0 : i32
    %c0_i32_1 = arith.constant 0 : i32
    return %c0_i32, %c0_i32_0 : i32, i32
  }
  func.func @transform_3(%arg0: i32) -> (i32, i32) {
    %c0_i32 = arith.constant 0 : i32
    %c0_i32_0 = arith.constant 0 : i32
    %c0_i32_1 = arith.constant 0 : i32
    return %c0_i32, %c0_i32_0 : i32, i32
  }
  func.func @transform_4(%arg0: i32) -> (i32, i32) {
    %c0_i32 = arith.constant 0 : i32
    %c0_i32_0 = arith.constant 0 : i32
    %c0_i32_1 = arith.constant 0 : i32
    return %c0_i32, %c0_i32_0 : i32, i32
  }
  func.func @transform_5(%arg0: i32) -> (i32, i32) {
    %c0_i32 = arith.constant 0 : i32
    %c0_i32_0 = arith.constant 0 : i32
    %c0_i32_1 = arith.constant 0 : i32
    return %c0_i32, %c0_i32_0 : i32, i32
  }
  func.func @transform_6(%arg0: i32) -> (i32, i32) {
    %c0_i32 = arith.constant 0 : i32
    %c0_i32_0 = arith.constant 0 : i32
    %c0_i32_1 = arith.constant 0 : i32
    return %c0_i32, %c0_i32_0 : i32, i32
  }
  func.func @transform_7(%arg0: i32) -> (i32, i32) {
    %c0_i32 = arith.constant 0 : i32
    %c0_i32_0 = arith.constant 0 : i32
    %c0_i32_1 = arith.constant 0 : i32
    return %c0_i32, %c0_i32_0 : i32, i32
  }
  func.func @transform_8(%arg0: i32) -> (i32, i32, i32) {
    %c0_i32 = arith.constant 0 : i32
    %c0_i32_0 = arith.constant 0 : i32
    %c0_i32_1 = arith.constant 0 : i32
    %c0_i32_2 = arith.constant 0 : i32
    return %c0_i32, %c0_i32_0, %c0_i32_1 : i32, i32, i32
  }
  func.func @transform_9(%arg0: i32) -> (i32, i32, i32, i32) {
    %c0_i32 = arith.constant 0 : i32
    %c0_i32_0 = arith.constant 0 : i32
    %c0_i32_1 = arith.constant 0 : i32
    %c0_i32_2 = arith.constant 0 : i32
    return %arg0, %c0_i32, %c0_i32_0, %c0_i32_1 : i32, i32, i32, i32
  }
}

</mosaic_0001>

<bundles_post_ra>
// kernel: aspp_drop_forward.1
= control target key start
LH: loop header
LB: loop body
LE: loop exit
PB: predicated region body
PF: predicated region fallthrough
CT: control target
= control target key end

     0   :  { %s16762_s0 = inlined_call_operand.vmem [shape: f32[2,16,16,128], index: 0, kind: input, shape index: {}]   ;;  %s16763_s1 = inlined_call_operand.hbm [shape: bf16[128,128], index: 1, kind: input, shape index: {}]   ;;  %s16764_s2 = inlined_call_operand.hbm [shape: f32[1,128], index: 2, kind: input, shape index: {}]   ;;  %s16765_s3 = inlined_call_operand.hbm [shape: bf16[128,128], index: 3, kind: input, shape index: {}]   ;;  %s16766_s4 = inlined_call_operand.hbm [shape: f32[1,128], index: 4, kind: input, shape index: {}]   ;;  %s16767_s5 = inlined_call_operand.vmem [shape: bf16[1152,128], index: 5, kind: input, shape index: {}]   ;;  %s16768_s6 = inlined_call_operand.vmem [shape: bf16[1152,128], index: 6, kind: input, shape index: {}]   ;;  %s16769_s7 = inlined_call_operand.vmem [shape: bf16[128,128], index: 7, kind: input, shape index: {}]   ;;  %s16770_s8 = inlined_call_operand.hbm [shape: f32[3,1,128], index: 8, kind: input, shape index: {}]   ;;  %s16771_s9 = inlined_call_operand.hbm [shape: f32[2,16,16,640], index: 9, kind: output, shape index: {}]  }
   0x1   :  { %16804 = sst [smem:[#allocation68_spill]] %s16764_s2 }
   0x2   :  { %16805 = sst [smem:[#allocation69_spill]] %s16766_s4 }
   0x3   :  { %14 = vsyncpa [#allocation5], 0 }
   0x4   :  { %15 = vsyncpa [#allocation8], 0 }
   0x5   :  { %16 = vsyncpa [#allocation11], 0 }
   0x6   :  { %17 = vsyncpa [#allocation6], 0 }
   0x7   :  { %19 = vsyncpa [#allocation6 + $0x1], 0  ;;  %s12997_s30 = smov 0   ;;  %s12999_s10 = smov 0  }
   0x8   :  { %s13001_s11 = smov 0   ;;  %s13003_s12 = smov 0  }
   0x9 LB: > { %s13018_s13 = sadd.s32 4294967295, %s12930_s12   ;;  %s10022_s14 = sadd.s32 4294967294, %s12930_s12   ;;  %s12930_s12 = sphi %s13003_s12, %s16964_s12   ;;  %s12926_s11 = sphi %s13001_s11, %s16963_s11   ;;  %s12922_s10 = sphi %s12999_s10, %s16962_s10   ;;  %s12918_s30 = sphi %s12997_s30, %s16961_s30  }
   0xa   : > { %s13022_s15 = sadd.s32 1, %s12930_s12   ;;  %s226_s16 = sadd.s32 1, %s12926_s11 }
   0xb   : > { %s223_s17 = ssub.s32 %s12930_s12, %s13022_s15  ;;  %p236_p0 = scmp.ne.s32.totalorder %s12926_s11, %s12922_s10 }
   0xc   : > { %p224_p1 = scmp.eq.s32.totalorder %s223_s17, 0  ;;  %p237_p2 = scmp.eq.s32.totalorder %s13018_s13, 1 }
   0xd   : > { %p242_p3 = scmp.ne.s32.totalorder %s12922_s10, %s12918_s30  ;;  %p243_p4 = scmp.eq.s32.totalorder %s10022_s14, 1 }
   0xe   : > { %s13033_s18 = scalar_select %p224_p1, %s12926_s11, %s226_s16  }
   0xf   : > { %p13035_p5 = por %p237_p2, %p236_p0  ;;  %p13039_p6 = por %p243_p4, %p242_p3 }
  0x10   : > { %p10023_p7 = scmp.ge.s32.totalorder %s12930_s12, 1  ;;  %p250_p8 = scmp.lt.s32.totalorder %s12930_s12, 3 }
  0x11   : > { %s16806_s19 = scalar_select %p13035_p5, 1, 0 }
  0x12   : > { %s16807_s20 = scalar_select %p13039_p6, 1, 0 }
  0x13   : > { %p16772_p9 = scmp.eq.s32.totalorder %s13018_s13, 0  ;;  %p13046_p10 = pnand %p10023_p7, %p250_p8 }
  0x14   : > { %s12932_s22 = smov [#allocation7]   ;;  %s12933_s24 = smov [#allocation10]  }
  0x15   : > { %s16808_s21 = scalar_select %p13046_p10, 1, 0 }
  0x16   : > { %s276_s23 = sshll.u32 %s12932_s22, 4  ;;  %p12107_p11 = pneg %p13046_p10  ;;  %s277_s23 = int_to_ptr.vmem [resolvable:$true] %s276_s23 }
  0x17   : > { %s300_s25 = sshll.u32 %s12933_s24, 4  ;;  %s12934_s27 = smov [#allocation4]   ;;  %s301_s25 = int_to_ptr.vmem [resolvable:$true] %s300_s25 }
  0x18   : > { %p13054_p12 = pnand %p16772_p9, %p12107_p11  ;;  %s262_s28 = sshll.u32 %s12934_s27, 4  ;;  %s13058_s28 = int_to_ptr.vmem [resolvable:$true] %s262_s28 }
  0x19   : > { %s12739_s14 = scalar_lea.vmem %s277_s23, 16  ;;  %s12746_s16 = scalar_lea.vmem %s277_s23, 32 }
  0x1a   : > { %p13062_p13 = pneg %p13054_p12  ;;  %p12740_p0 = scmp.ne.s32.totalorder %s277_s23, %s12739_s14 }
  0x1b   : > { %p12747_p3 = scmp.lt.s32.totalorder %s277_s23, %s277_s23  ;;  %p12748_p4 = scmp.lt.s32.totalorder %s12746_s16, %s12739_s14 }
  0x1c   : > { %p12742_p1 = pnand %p12740_p0, %p13062_p13 }
  0x1d   : > { %p12749_p7 = por %p12748_p4, %p12747_p3 }
  0x1e   : > { %p12743_p2 = pneg %p12742_p1 }
  0x20   : > { %p12750_p8 = pnand %p12749_p7, %p12743_p2 }
  0x22   : > { %12753 = shalt.err (!%p12750_p8)
}
  0x23   : > { %s16811_s2 = sld [smem:[#allocation68_spill]]  ;;  %s12765_s24 = scalar_lea.vmem %s301_s25, 16 }
  0x24   : > { %p12766_p11 = scmp.ne.s32.totalorder %s301_s25, %s12765_s24  ;;  %s12772_s27 = scalar_lea.vmem %s301_s25, 32 }
  0x25   : > { %p12773_p0 = scmp.lt.s32.totalorder %s301_s25, %s301_s25  ;;  %p12774_p1 = scmp.lt.s32.totalorder %s12772_s27, %s12765_s24 }
  0x26   : > { %p12768_p9 = pnand %p12766_p11, %p13062_p13 }
  0x27   : > { %p12775_p5 = por %p12774_p1, %p12773_p0 }
  0x28   : > { %p12769_p6 = pneg %p12768_p9 }
  0x29   : > { %12113 = dma.hbm_to_vmem [thread:$0]  (!%p13054_p12), %s16811_s2, 16, %s277_s23, [#allocation8]  }
  0x2a   : > { %p12776_p10 = pnand %p12775_p5, %p12769_p6 }
  0x2c   : > { %12779 = shalt.err (!%p12776_p10)
}
  0x2d   : > { %s16812_s4 = sld [smem:[#allocation69_spill]]  ;;  %s12791_s23 = scalar_lea.vmem %s13058_s28, 1024 }
  0x2e   : > { %p12792_p2 = scmp.ne.s32.totalorder %s13058_s28, %s12791_s23  ;;  %p12799_p4 = scmp.lt.s32.totalorder %s13058_s28, %s13058_s28 }
  0x2f   : > { %p12800_p7 = scmp.lt.s32.totalorder %s12791_s23, %s12791_s23 }
  0x30   : > { %p12794_p9 = pnand %p12792_p2, %p13062_p13 }
  0x31   : > { %p12801_p5 = por %p12800_p7, %p12799_p4 }
  0x32   : > { %p12795_p3 = pneg %p12794_p9 }
  0x33   : > { %12119 = dma.hbm_to_vmem [thread:$0]  (!%p13054_p12), %s16812_s4, 16, %s301_s25, [#allocation11]  }
  0x34   : > { %p12802_p6 = pnand %p12801_p5, %p12795_p3 }
  0x36   : > { %12805 = shalt.err (!%p12802_p6)
}
  0x37   : > { %s12935_s17 = smov 64   ;;  %s12936_s22 = smov 4  }
  0x38   : > { %12110 = dma.hbm_to_vmem [thread:$0]  (!%p13054_p12), %s16763_s1, 1024, %s13058_s28, [#allocation5], %s12935_s17, %s12935_s17, %s12936_s22  }
  0x39   : > { %s12937_s25 = smov [#allocation9]   ;;  %s12938_s16 = smov [#allocation12]  }
  0x3a   : > { %s286_s14 = sshll.u32 %s12937_s25, 4  ;;  %s319_s2 = sshll.u32 %s12938_s16, 4  ;;  %s287_s14 = int_to_ptr.vmem [resolvable:$true] %s286_s14  ;;  %s320_s2 = int_to_ptr.vmem [resolvable:$true] %s319_s2 }
  0x3b   : > { %s12817_s4 = scalar_lea.vmem %s287_s14, 1024  ;;  %p12825_p0 = scmp.lt.s32.totalorder %s287_s14, %s287_s14 }
  0x3c   : > { %p12818_p10 = scmp.ne.s32.totalorder %s287_s14, %s12817_s4  ;;  %p12826_p1 = scmp.lt.s32.totalorder %s12817_s4, %s12817_s4 }
  0x3e   : > { %p12820_p8 = pnand %p12818_p10, %p13062_p13  ;;  %p12827_p2 = por %p12826_p1, %p12825_p0 }
  0x40   : > { %p12821_p11 = pneg %p12820_p8 }
  0x42   : > { %p12828_p9 = pnand %p12827_p2, %p12821_p11 }
  0x44   : > { %12831 = shalt.err (!%p12828_p9)
}
  0x45   : > { %12116 = dma.hbm_to_vmem [thread:$0]  (!%p13054_p12), %s16765_s3, 1024, %s287_s14, [#allocation8], %s12935_s17, %s12935_s17, %s12936_s22  }
  0x46   : > { %s12843_s28 = scalar_lea.vmem %s320_s2, 48  ;;  %s12850_s27 = scalar_lea.vmem %s320_s2, 64 }
  0x47   : > { %p12844_p3 = scmp.ne.s32.totalorder %s320_s2, %s12843_s28  ;;  %p12851_p5 = scmp.lt.s32.totalorder %s320_s2, %s320_s2 }
  0x48   : > { %p12852_p6 = scmp.lt.s32.totalorder %s12850_s27, %s12843_s28 }
  0x49   : > { %p12846_p4 = pnand %p12844_p3, %p13062_p13 }
  0x4a   : > { %p12853_p10 = por %p12852_p6, %p12851_p5 }
  0x4b   : > { %p12847_p7 = pneg %p12846_p4 }
  0x4d   : > { %p12854_p8 = pnand %p12853_p10, %p12847_p7 }
  0x4f   : > { %12857 = shalt.err (!%p12854_p8)
}
  0x50   : > { %s12939_s4 = smov 16   ;;  %s12940_s25 = smov 1  }
  0x51   : > { %12122 = dma.hbm_to_vmem [thread:$0]  (!%p13054_p12), %s16770_s8, 48, %s320_s2, [#allocation11], %s12939_s4, %s12939_s4, %s12940_s25  }
  0x52   : > { %p16813_p11 = scmp.ne.s32.totalorder %s16808_s21, 0 }
  0x54   : > { %343 = sbr.rel (%p16813_p11) target bundleno = 1436 (0x59c), region = 56 }
  0x59   : > { %p16814_p13 = scmp.eq.s32.totalorder %s13018_s13, 0 }
  0x5b   : > { %12901 = dma.done.wait (%p16814_p13), [#allocation5], 1024   ;;  %p16815_p0 = pmov %p16814_p13 }
  0x5d   : > { %12903 = vsyncadd (%p16815_p0), [#allocation5], 4294966272  ;;  %p16816_p1 = pmov %p16815_p0 }
  0x5e   : > { %p16817_p2 = pmov %p16815_p0 }
  0x5f   : > { %12905 = dma.done.wait (%p16816_p1), [#allocation8], 1040  }
  0x60   : > { %12907 = vsyncadd (%p16817_p2), [#allocation8], 4294966256  ;;  %p16818_p9 = pmov %p16815_p0 }
  0x61   : > { %p16819_p12 = pmov %p16815_p0 }
  0x62   : > { %12909 = dma.done.wait (%p16818_p9), [#allocation11], 64  }
  0x63   : > { %12911 = vsyncadd (%p16819_p12), [#allocation11], 4294967232  ;;  %v12941_v0 = vmov 0   ;;  %p395_p3 = scmp.lt.s32.totalorder %s13018_s13, 1  ;;  %v16775_v1 = vmov 0.0   ;;  %vm12943_vm0 = vmmov 0  }
  0x64   : > { %425 = vst [vmem:[#allocation2 + $0x60] sm:$0xf] %v12941_v0  ;;  %426 = vst [vmem:[#allocation2 + $0x64] sm:$0xf] %v12941_v0  ;;  %11855 = vmatprep.subr.bf16.mxu0 %v16775_v1  ;;  %11871 = vmatprep.mubr.msk.bf16.mxu0 %vm12943_vm0, %v16775_v1  ;;  %v12184_v2 = vld [vmem:[#allocation9 + $0x38] sm:$0xff]   ;;  %v12185_v3 = vld [vmem:[#allocation9 + $0x30] sm:$0xff]  }
  0x65   : > { %427 = vst [vmem:[#allocation2 + $0x68] sm:$0xf] %v12941_v0  ;;  %428 = vst [vmem:[#allocation2 + $0x6c] sm:$0xf] %v12941_v0  ;;  %s396_s2 = scalar_select %p395_p3, %s13018_s13, 1  ;;  %11875 = vmatprep.subr.bf16.mxu1 %v12184_v2  ;;  %v12186_v4 = vld [vmem:[#allocation9 + $0x28] sm:$0xff]  }
  0x66   : > { %429 = vst [vmem:[#allocation2 + $0x70] sm:$0xf] %v12941_v0  ;;  %430 = vst [vmem:[#allocation2 + $0x74] sm:$0x3] %v12941_v0  ;;  %11876 = vmatpush3.bf16.msra.mxu1 %v12184_v2  ;;  %v12187_v5 = vld [vmem:[#allocation9 + $0x20] sm:$0xff]   ;;  %v13347_v16 = vld [vmem:[#allocation9 + $0x18] sm:$0xff]  }
  0x67   : > { %431 = vst [vmem:[#allocation2 + $0x78] sm:$0xf] %v12941_v0  ;;  %432 = vst [vmem:[#allocation2 + $0x7c] sm:$0xf] %v12941_v0  ;;  %s10725_s21 = sshll.u32 %s396_s2, 8  ;;  %11877 = vmatprep.subr.bf16.mxu1 %v12185_v3  ;;  %v12192_v26 = vld [vmem:[#allocation4 + $0x38] sm:$0xff]  }
  0x68   : > { %433 = vst [vmem:[#allocation2 + $0x80] sm:$0xf] %v12941_v0  ;;  %434 = vst [vmem:[#allocation2 + $0x84] sm:$0xf] %v12941_v0  ;;  %s13335_s17 = scalar_lea.vmem %s16762_s0, %s10725_s21  ;;  %11856 = vmatpush3.bf16.msra.mxu0 %v12192_v26  ;;  %v12193_v36 = vld [vmem:[#allocation4 + $0x30] sm:$0xff]   ;;  %v12194_v46 = vld [vmem:[#allocation4 + $0x28] sm:$0xff]  }
  0x69   : > { %435 = vst [vmem:[#allocation2 + $0x88] sm:$0xf] %v12941_v0  ;;  %436 = vst [vmem:[#allocation2 + $0x8c] sm:$0x3] %v12941_v0  ;;  %v635_v6 = vld [vmem:[%s13335_s17] sm:$0xff]  ;;  %v636_v7 = vld [vmem:[%s13335_s17 + $0x8] sm:$0xff]  ;;  %11857 = vmatprep.subr.bf16.mxu0 %v16775_v1 }
  0x6a   : > { %437 = vst [vmem:[#allocation2 + $0x90] sm:$0xf] %v12941_v0  ;;  %438 = vst [vmem:[#allocation2 + $0x94] sm:$0xf] %v12941_v0  ;;  %11878 = vmatpush3.bf16.msra.mxu1 %v12185_v3  ;;  %v637_v8 = vld [vmem:[%s13335_s17 + $0x10] sm:$0xff]  ;;  %v667_v9 = vpack.c.bf16 %v636_v7, %v635_v6  ;;  %v13340_v10 = vpack.c.bf16 %v635_v6, %v635_v6  ;;  %v13342_v11 = vpack.c.bf16 %v636_v7, %v636_v7  ;;  %v638_v13 = vld [vmem:[%s13335_s17 + $0x18] sm:$0xff] }
  0x6b   : > { %439 = vst [vmem:[#allocation2 + $0x98] sm:$0xf] %v12941_v0  ;;  %440 = vst [vmem:[#allocation2 + $0x9c] sm:$0xf] %v12941_v0  ;;  %11879 = vmatprep.subr.bf16.mxu1 %v12186_v4  ;;  %v827_v12 = vadd.f32 %v636_v7, %v635_v6  ;;  %v639_v14 = vld [vmem:[%s13335_s17 + $0x20] sm:$0xff]  ;;  %v640_v15 = vld [vmem:[%s13335_s17 + $0x28] sm:$0xff]  ;;  %v13349_v17 = vpack.c.bf16 %v638_v13, %v637_v8  ;;  %v13351_v18 = vpack.c.bf16 %v637_v8, %v637_v8 }
  0x6c   : > { %441 = vst [vmem:[#allocation2 + $0xa0] sm:$0xf] %v12941_v0  ;;  %442 = vst [vmem:[#allocation2 + $0xa4] sm:$0x3] %v12941_v0  ;;  %v13353_v19 = vpack.c.bf16 %v638_v13, %v638_v13  ;;  %v13355_v20 = vpack.c.bf16 %v640_v15, %v639_v14  ;;  %v13358_v21 = vld [vmem:[%s13335_s17 + $0x30] sm:$0xff]  ;;  %v13361_v22 = vld [vmem:[%s13335_s17 + $0x38] sm:$0xff]  ;;  %11891 = vmatprep.mubr.bf16.mxu1 %v667_v9  ;;  %v13365_v24 = vpack.c.bf16 %v639_v14, %v639_v14 }
  0x6d   : > { %443 = vst [vmem:[#allocation2 + $0xa8] sm:$0xf] %v12941_v0  ;;  %444 = vst [vmem:[#allocation2 + $0xac] sm:$0xf] %v12941_v0  ;;  %v828_v23 = vadd.f32 %v827_v12, %v637_v8  ;;  %v13367_v25 = vpack.c.bf16 %v640_v15, %v640_v15  ;;  %v13370_v27 = vld [vmem:[%s13335_s17 + $0x40] sm:$0xff]  ;;  %v13378_v28 = vpack.c.bf16 %v13361_v22, %v13358_v21  ;;  %v13389_v31 = vld [vmem:[%s13335_s17 + $0x48] sm:$0xff]  ;;  %11858 = vmatpush3.bf16.msra.mxu0 %v12193_v36 }
  0x6e   : > { %445 = vst [vmem:[#allocation2 + $0xb0] sm:$0xf] %v12941_v0  ;;  %446 = vst [vmem:[#allocation2 + $0xb4] sm:$0xf] %v12941_v0  ;;  %11880 = vmatpush3.bf16.msra.mxu1 %v12186_v4  ;;  %v13382_v29 = vpack.c.bf16 %v13358_v21, %v13358_v21  ;;  %v13386_v30 = vpack.c.bf16 %v13361_v22, %v13361_v22  ;;  %v13393_v32 = vpack.c.bf16 %v13370_v27, %v13370_v27  ;;  %v13406_v37 = vld [vmem:[%s13335_s17 + $0x50] sm:$0xff]  ;;  %v13409_v38 = vld [vmem:[%s13335_s17 + $0x58] sm:$0xff] }
  0x6f   : > { %447 = vst [vmem:[#allocation2 + $0xb8] sm:$0xf] %v12941_v0  ;;  %448 = vst [vmem:[#allocation2 + $0xbc] sm:$0x3] %v12941_v0  ;;  %11881 = vmatprep.subr.bf16.mxu1 %v12187_v5  ;;  %v829_v33 = vadd.f32 %v828_v23, %v638_v13  ;;  %v13399_v34 = vpack.c.bf16 %v13389_v31, %v13370_v27  ;;  %v13403_v35 = vpack.c.bf16 %v13389_v31, %v13389_v31  ;;  %v12189_v39 = vld [vmem:[#allocation9 + $0x10] sm:$0xff]   ;;  %v13431_v44 = vld [vmem:[%s13335_s17 + $0x60] sm:$0xff] }
  0x70   : > { %449 = vst [vmem:[#allocation2 + $0xc0] sm:$0xf] %v12941_v0  ;;  %450 = vst [vmem:[#allocation2 + $0xc4] sm:$0xf] %v12941_v0  ;;  %v13418_v40 = vpack.c.bf16 %v13409_v38, %v13406_v37  ;;  %v13422_v41 = vpack.c.bf16 %v13406_v37, %v13406_v37  ;;  %v13426_v42 = vpack.c.bf16 %v13409_v38, %v13409_v38  ;;  %v13434_v45 = vld [vmem:[%s13335_s17 + $0x68] sm:$0xff]  ;;  %v13453_v50 = vld [vmem:[%s13335_s17 + $0x70] sm:$0xff]  ;;  %11859 = vmatprep.subr.bf16.mxu0 %v16775_v1 }
  0x71   : > { %451 = vst [vmem:[#allocation2 + $0xc8] sm:$0xf] %v12941_v0  ;;  %452 = vst [vmem:[#allocation2 + $0xcc] sm:$0xf] %v12941_v0  ;;  %v830_v43 = vadd.f32 %v829_v33, %v639_v14  ;;  %v13442_v47 = vpack.c.bf16 %v13434_v45, %v13431_v44  ;;  %v13446_v48 = vpack.c.bf16 %v13431_v44, %v13431_v44  ;;  %v13456_v52 = vld [vmem:[%s13335_s17 + $0x78] sm:$0xff]  ;;  %v13475_v56 = vld [vmem:[%s13335_s17 + $0x80] sm:$0xff]  ;;  %11860 = vmatpush3.bf16.msra.mxu0 %v12194_v46 }
  0x72   : > { %453 = vst [vmem:[#allocation2 + $0xd0] sm:$0xf] %v12941_v0  ;;  %454 = vst [vmem:[#allocation2 + $0xd4] sm:$0x3] %v12941_v0  ;;  %11882 = vmatpush3.bf16.msra.mxu1 %v12187_v5  ;;  %v13450_v49 = vpack.c.bf16 %v13434_v45, %v13434_v45  ;;  %v13460_v53 = vpack.c.bf16 %v13453_v50, %v13453_v50  ;;  %v13468_v54 = vpack.c.bf16 %v13456_v52, %v13453_v50  ;;  %v13478_v57 = vld [vmem:[%s13335_s17 + $0x88] sm:$0xff]  ;;  %v13498_v63 = vld [vmem:[%s13335_s17 + $0x90] sm:$0xff] }
  0x73   : > { %455 = vst [vmem:[#allocation2 + $0xd8] sm:$0xf] %v12941_v0  ;;  %456 = vst [vmem:[#allocation2 + $0xdc] sm:$0xf] %v12941_v0  ;;  %11883 = vmatprep.subr.bf16.mxu1 %v13347_v16  ;;  %v831_v51 = vadd.f32 %v830_v43, %v640_v15  ;;  %v13472_v55 = vpack.c.bf16 %v13456_v52, %v13456_v52  ;;  %v12190_v58 = vld [vmem:[#allocation9 + $0x8] sm:$0xff]   ;;  %v13485_v60 = vpack.c.bf16 %v13478_v57, %v13475_v56  ;;  %v12195_v3 = vld [vmem:[#allocation4 + $0x20] sm:$0xff]  }
  0x74   : > { %457 = vst [vmem:[#allocation2 + $0xe0] sm:$0xf] %v12941_v0  ;;  %458 = vst [vmem:[#allocation2 + $0xe4] sm:$0xf] %v12941_v0  ;;  %v13489_v61 = vpack.c.bf16 %v13475_v56, %v13475_v56  ;;  %v13493_v62 = vpack.c.bf16 %v13478_v57, %v13478_v57  ;;  %v13513_v5 = vpack.c.bf16 %v13498_v63, %v13498_v63  ;;  %11861 = vmatprep.subr.bf16.mxu0 %v16775_v1  ;;  %v12191_v8 = vld [vmem:[#allocation9] sm:$0xff]   ;;  %v12196_v12 = vld [vmem:[#allocation4 + $0x18] sm:$0xff]  }
  0x75   : > { %459 = vst [vmem:[#allocation2 + $0xe8] sm:$0xf] %v12941_v0  ;;  %460 = vst [vmem:[#allocation2 + $0xec] sm:$0x3] %v12941_v0  ;;  %v832_v59 = vadd.f32 %v831_v51, %v13358_v21  ;;  %11862 = vmatpush3.bf16.msra.mxu0 %v12195_v3  ;;  %v13526_v13 = vld [vmem:[%s13335_s17 + $0xa0] sm:$0xff]  ;;  %v13530_v14 = vld [vmem:[%s13335_s17 + $0xa8] sm:$0xff] }
  0x76   : > { %461 = vst [vmem:[#allocation2 + $0xf0] sm:$0xf] %v12941_v0  ;;  %462 = vst [vmem:[#allocation2 + $0xf4] sm:$0xf] %v12941_v0  ;;  %11884 = vmatpush3.bf16.msra.mxu1 %v13347_v16  ;;  %11863 = vmatprep.subr.bf16.mxu0 %v16775_v1  ;;  %v13534_v15 = vpack.c.bf16 %v13526_v13, %v13526_v13  ;;  %v12197_v21 = vld [vmem:[#allocation4 + $0x10] sm:$0xff]   ;;  %v13542_v23 = vpack.c.bf16 %v13530_v14, %v13526_v13  ;;  %v13556_v33 = vld [vmem:[%s13335_s17 + $0xc0] sm:$0xff] }
  0x77   : > { %463 = vst [vmem:[#allocation2 + $0xf8] sm:$0xf] %v12941_v0  ;;  %464 = vst [vmem:[#allocation2 + $0xfc] sm:$0xf] %v12941_v0  ;;  %11885 = vmatprep.subr.bf16.mxu1 %v12189_v39  ;;  %v833_v2 = vadd.f32 %v832_v59, %v13361_v22  ;;  %v12198_v22 = vld [vmem:[%s16767_s5 + $0xf8] sm:$0xff]   ;;  %v13546_v26 = vpack.c.bf16 %v13530_v14, %v13530_v14  ;;  %v13559_v36 = vld [vmem:[%s13335_s17 + $0xc8] sm:$0xff]  ;;  %v13584_v59 = vpack.c.bf16 %v13556_v33, %v13556_v33 }
  0x78   : > { %465 = vst [vmem:[#allocation2 + $0x100] sm:$0xf] %v12941_v0  ;;  %466 = vst [vmem:[#allocation2 + $0x104] sm:$0x3] %v12941_v0  ;;  %v13592_v3 = vpack.c.bf16 %v13559_v36, %v13556_v33  ;;  %vm1741_vm1 = vcmask 1040384   ;;  %vm1742_vm2 = vcmask 1044484  }
  0x79   : > { %467 = vst [vmem:[#allocation2 + $0x108] sm:$0xf] %v12941_v0  ;;  %468 = vst [vmem:[#allocation2 + $0x10c] sm:$0xf] %v12941_v0  ;;  %v834_v7 = vadd.f32 %v833_v2, %v13370_v27  ;;  %v13549_v27 = vld [vmem:[%s13335_s17 + $0xb0] sm:$0xff]  ;;  %11864 = vmatpush3.bf16.msra.mxu0 %v12196_v12  ;;  %v13588_v2 = vpack.c.bf16 %v13559_v36, %v13559_v36  ;;  %v12200_v12 = vld [vmem:[#allocation4 + $0x8] sm:$0xff]  }
  0x7a   : > { %469 = vst [vmem:[#allocation2 + $0x110] sm:$0xf] %v12941_v0  ;;  %470 = vst [vmem:[#allocation2 + $0x114] sm:$0xf] %v12941_v0  ;;  %11886 = vmatpush3.bf16.msra.mxu1 %v12189_v39  ;;  %v13570_v43 = vpack.c.bf16 %v13549_v27, %v13549_v27  ;;  %11865 = vmatprep.subr.bf16.mxu0 %v16775_v1  ;;  %v13613_v1 = vld [vmem:[%s13335_s17 + $0xe0] sm:$0xff]  ;;  %vm1402_vm4 = vcmask 1042432  }
  0x7b   : > { %471 = vst [vmem:[#allocation2 + $0x118] sm:$0xf] %v12941_v0  ;;  %472 = vst [vmem:[#allocation2 + $0x11c] sm:$0x3] %v12941_v0  ;;  %11887 = vmatprep.subr.bf16.mxu1 %v12190_v58  ;;  %vm1403_vm5 = vcmask 1046532   ;;  %vm5550_vm6 = vcmask 1041408  }
  0x7c   : > { %473 = vst [vmem:[#allocation2 + $0x120] sm:$0xf] %v12941_v0  ;;  %474 = vst [vmem:[#allocation2 + $0x124] sm:$0xf] %v12941_v0  ;;  %vm5551_vm8 = vcmask 1045508   ;;  %s392_s24 = sand.u32 1, %s12922_s10  }
  0x7d   : > { %475 = vst [vmem:[#allocation2 + $0x128] sm:$0xf] %v12941_v0  ;;  %476 = vst [vmem:[#allocation2 + $0x12c] sm:$0xf] %v12941_v0  ;;  %11866 = vmatpush3.bf16.msra.mxu0 %v12197_v21  ;;  %s14386_s28 = smul.u32 1280, %s392_s24  ;;  %p16959_p7 = scmp.ne.s32.totalorder %s16806_s19, 0 }
  0x7e   : > { %477 = vst [vmem:[#allocation2 + $0x130] sm:$0xf] %v12941_v0  ;;  %478 = vst [vmem:[#allocation2 + $0x134] sm:$0x3] %v12941_v0  ;;  %11888 = vmatpush3.bf16.msra.mxu1 %v12190_v58  ;;  %v13580_v58 = vld [vmem:[%s13335_s17 + $0xd8] sm:$0xff]  ;;  %s12084_s14 = smul.u32 20480, %s13018_s13 }
  0x7f   : > { %479 = vst [vmem:[#allocation2 + $0x138] sm:$0xf] %v12941_v0  ;;  %480 = vst [vmem:[#allocation2 + $0x13c] sm:$0xf] %v12941_v0  ;;  %11889 = vmatprep.subr.bf16.mxu1 %v12191_v8  ;;  %s14439_s27 = scalar_lea.vmem [#allocation13], %s14386_s28  ;;  %s16722_s13 = scalar_lea.sflag [#allocation6], %s392_s24 }
  0x80   : > { %481 = vst [vmem:[#allocation2 + $0x140] sm:$0xf] %v12941_v0  ;;  %482 = vst [vmem:[#allocation2 + $0x144] sm:$0xf] %v12941_v0  ;;  %s9910_s28 = sshll.u32 %s14439_s27, 4  ;;  %s16714_s16 = scalar_lea.hbm %s16771_s9, %s12084_s14  ;;  %s16716_s28 = int_to_ptr.vmem [resolvable:$true] %s9910_s28 }
  0x81   : > { %483 = vst [vmem:[#allocation2 + $0x148] sm:$0xf] %v12941_v0  ;;  %484 = vst [vmem:[#allocation2 + $0x14c] sm:$0x3] %v12941_v0  ;;  %s12858_s23 = scalar_lea.vmem %s16716_s28, 20480 }
  0x82   : > { %485 = vst [vmem:[#allocation2 + $0x150] sm:$0xf] %v12941_v0  ;;  %486 = vst [vmem:[#allocation2 + $0x154] sm:$0xf] %v12941_v0  ;;  %11890 = vmatpush3.bf16.msra.mxu1 %v12191_v8  ;;  %v13621_v8 = vld [vmem:[%s13335_s17 + $0xf0] sm:$0xff]  ;;  %p12859_p4 = scmp.ne.s32.totalorder %s16716_s28, %s12858_s23 }
  0x83   : > { %487 = vst [vmem:[#allocation2 + $0x158] sm:$0xf] %v12941_v0  ;;  %488 = vst [vmem:[#allocation2 + $0x15c] sm:$0xf] %v12941_v0  ;;  %10999 = vmatprep.subr.bf16.mxu1 %v12198_v22 }
  0x84   : > { %489 = vst [vmem:[#allocation2 + $0x160] sm:$0xf] %v12941_v0  ;;  %490 = vst [vmem:[#allocation2 + $0x164] sm:$0x3] %v12941_v0  ;;  %p12860_p5 = pnand %p12859_p4, %p16959_p7 }
  0x85   : > { %491 = vst [vmem:[#allocation2 + $0x168] sm:$0xf] %v12941_v0  ;;  %492 = vst [vmem:[#allocation2 + $0x16c] sm:$0xf] %v12941_v0  ;;  %11892 = vmatmul.mubr.bf16.vlgmr.msra.gmra.mxu1 %v13349_v17 }
  0x86   : > { %493 = vst [vmem:[#allocation2 + $0x170] sm:$0xf] %v12941_v0  ;;  %494 = vst [vmem:[#allocation2 + $0x174] sm:$0xf] %v12941_v0  ;;  %11895 = vmatprep.mubr.bf16.mxu1 %v13355_v20  ;;  %p12861_p6 = pneg %p12860_p5 }
  0x87   : > { %495 = vst [vmem:[#allocation2 + $0x178] sm:$0xf] %v12941_v0  ;;  %496 = vst [vmem:[#allocation2 + $0x17c] sm:$0x3] %v12941_v0 }
  0x88   : > { %498 = vst [vmem:[#allocation2 + $0x180] sm:$0xf] %v12941_v0  ;;  %499 = vst [vmem:[#allocation2 + $0x184] sm:$0xf] %v12941_v0 }
  0x89   : > { %500 = vst [vmem:[#allocation2 + $0x198] sm:$0xf] %v12941_v0  ;;  %501 = vst [vmem:[#allocation2 + $0x19c] sm:$0xf] %v12941_v0 }
  0x8a   : > { %502 = vst [vmem:[#allocation2 + $0x1b0] sm:$0xf] %v12941_v0  ;;  %503 = vst [vmem:[#allocation2 + $0x1b4] sm:$0xf] %v12941_v0 }
  0x8b   : > { %504 = vst [vmem:[#allocation2 + $0x1c8] sm:$0xf] %v12941_v0  ;;  %505 = vst [vmem:[#allocation2 + $0x1cc] sm:$0xf] %v12941_v0 }
  0x8c   : > { %506 = vst [vmem:[#allocation2 + $0x1e0] sm:$0xf] %v12941_v0  ;;  %507 = vst [vmem:[#allocation2 + $0x1e4] sm:$0xf] %v12941_v0 }
  0x8d   : > { %508 = vst [vmem:[#allocation2 + $0x1f8] sm:$0xf] %v12941_v0  ;;  %509 = vst [vmem:[#allocation2 + $0x1fc] sm:$0xf] %v12941_v0  ;;  %11896 = vmatmul.mubr.bf16.gmra.mxu1 %v13378_v28 }
  0x8e   : > { %510 = vst [vmem:[#allocation2 + $0x210] sm:$0xf] %v12941_v0  ;;  %511 = vst [vmem:[#allocation2 + $0x214] sm:$0xf] %v12941_v0  ;;  %11899 = vmatprep.mubr.bf16.mxu1 %v13399_v34 }
  0x8f   : > { %512 = vst [vmem:[#allocation2 + $0x228] sm:$0xf] %v12941_v0  ;;  %513 = vst [vmem:[#allocation2 + $0x22c] sm:$0xf] %v12941_v0 }
  0x90   : > { %514 = vst [vmem:[#allocation2 + $0x240] sm:$0xf] %v12941_v0  ;;  %515 = vst [vmem:[#allocation2 + $0x244] sm:$0xf] %v12941_v0 }
  0x91   : > { %516 = vst [vmem:[#allocation2 + $0x258] sm:$0xf] %v12941_v0  ;;  %517 = vst [vmem:[#allocation2 + $0x25c] sm:$0xf] %v12941_v0 }
  0x92   : > { %518 = vst [vmem:[#allocation2 + $0x270] sm:$0xf] %v12941_v0  ;;  %519 = vst [vmem:[#allocation2 + $0x274] sm:$0xf] %v12941_v0 }
  0x93   : > { %520 = vst [vmem:[#allocation2 + $0x288] sm:$0xf] %v12941_v0  ;;  %521 = vst [vmem:[#allocation2 + $0x28c] sm:$0xf] %v12941_v0 }
  0x94   : > { %522 = vst [vmem:[#allocation2 + $0x2a0] sm:$0xf] %v12941_v0  ;;  %523 = vst [vmem:[#allocation2 + $0x2a4] sm:$0xf] %v12941_v0 }
  0x95   : > { %524 = vst [vmem:[#allocation2 + $0x2b8] sm:$0xf] %v12941_v0  ;;  %525 = vst [vmem:[#allocation2 + $0x2bc] sm:$0xf] %v12941_v0  ;;  %11900 = vmatmul.mubr.bf16.gmra.mxu1 %v13418_v40 }
  0x96   : > { %526 = vst [vmem:[#allocation2 + $0x2d0] sm:$0xf] %v12941_v0  ;;  %527 = vst [vmem:[#allocation2 + $0x2d4] sm:$0xf] %v12941_v0  ;;  %11903 = vmatprep.mubr.bf16.mxu1 %v13442_v47 }
  0x97   : > { %528 = vst [vmem:[#allocation2 + $0x2e8] sm:$0xf] %v12941_v0  ;;  %529 = vst [vmem:[#allocation2 + $0x2ec] sm:$0xf] %v12941_v0 }
  0x98   : > { %531 = vst [vmem:[#allocation2 + $0x300] sm:$0xf] %v12941_v0  ;;  %532 = vst [vmem:[#allocation2 + $0x304] sm:$0xf] %v12941_v0 }
  0x99   : > { %533 = vst [vmem:[#allocation2 + $0x308] sm:$0xf] %v12941_v0  ;;  %534 = vst [vmem:[#allocation2 + $0x30c] sm:$0xf] %v12941_v0 }
  0x9a   : > { %535 = vst [vmem:[#allocation2 + $0x310] sm:$0xf] %v12941_v0  ;;  %536 = vst [vmem:[#allocation2 + $0x314] sm:$0x3] %v12941_v0 }
  0x9b   : > { %537 = vst [vmem:[#allocation2 + $0x318] sm:$0xf] %v12941_v0  ;;  %538 = vst [vmem:[#allocation2 + $0x31c] sm:$0xf] %v12941_v0 }
  0x9c   : > { %539 = vst [vmem:[#allocation2 + $0x320] sm:$0xf] %v12941_v0  ;;  %540 = vst [vmem:[#allocation2 + $0x324] sm:$0xf] %v12941_v0 }
  0x9d   : > { %541 = vst [vmem:[#allocation2 + $0x328] sm:$0xf] %v12941_v0  ;;  %542 = vst [vmem:[#allocation2 + $0x32c] sm:$0x3] %v12941_v0  ;;  %11904 = vmatmul.mubr.bf16.gmra.mxu1 %v13468_v54 }
  0x9e   : > { %543 = vst [vmem:[#allocation2 + $0x330] sm:$0xf] %v12941_v0  ;;  %544 = vst [vmem:[#allocation2 + $0x334] sm:$0xf] %v12941_v0  ;;  %11907 = vmatprep.mubr.bf16.mxu1 %v13485_v60 }
  0x9f   : > { %545 = vst [vmem:[#allocation2 + $0x338] sm:$0xf] %v12941_v0  ;;  %546 = vst [vmem:[#allocation2 + $0x33c] sm:$0xf] %v12941_v0 }
  0xa0   : > { %547 = vst [vmem:[#allocation2 + $0x340] sm:$0xf] %v12941_v0  ;;  %548 = vst [vmem:[#allocation2 + $0x344] sm:$0x3] %v12941_v0 }
  0xa1   : > { %549 = vst [vmem:[#allocation2 + $0x348] sm:$0xf] %v12941_v0  ;;  %550 = vst [vmem:[#allocation2 + $0x34c] sm:$0xf] %v12941_v0 }
  0xa2   : > { %551 = vst [vmem:[#allocation2 + $0x350] sm:$0xf] %v12941_v0  ;;  %552 = vst [vmem:[#allocation2 + $0x354] sm:$0xf] %v12941_v0 }
  0xa3   : > { %553 = vst [vmem:[#allocation2 + $0x358] sm:$0xf] %v12941_v0  ;;  %554 = vst [vmem:[#allocation2 + $0x35c] sm:$0x3] %v12941_v0 }
  0xa4   : > { %555 = vst [vmem:[#allocation2 + $0x360] sm:$0xf] %v12941_v0  ;;  %556 = vst [vmem:[#allocation2 + $0x364] sm:$0xf] %v12941_v0 }
  0xa5   : > { %557 = vst [vmem:[#allocation2 + $0x368] sm:$0xf] %v12941_v0  ;;  %558 = vst [vmem:[#allocation2 + $0x36c] sm:$0xf] %v12941_v0 }
  0xa6   : > { %559 = vst [vmem:[#allocation2 + $0x370] sm:$0xf] %v12941_v0  ;;  %560 = vst [vmem:[#allocation2 + $0x374] sm:$0x3] %v12941_v0 }
  0xa7   : > { %561 = vst [vmem:[#allocation2 + $0x378] sm:$0xf] %v12941_v0  ;;  %562 = vst [vmem:[#allocation2 + $0x37c] sm:$0xf] %v12941_v0 }
  0xa8   : > { %563 = vst [vmem:[#allocation2 + $0x380] sm:$0xf] %v12941_v0  ;;  %564 = vst [vmem:[#allocation2 + $0x384] sm:$0xf] %v12941_v0 }
  0xa9   : > { %565 = vst [vmem:[#allocation2 + $0x388] sm:$0xf] %v12941_v0  ;;  %566 = vst [vmem:[#allocation2 + $0x38c] sm:$0x3] %v12941_v0 }
  0xaa   : > { %567 = vst [vmem:[#allocation2 + $0x390] sm:$0xf] %v12941_v0  ;;  %568 = vst [vmem:[#allocation2 + $0x394] sm:$0xf] %v12941_v0 }
  0xab   : > { %569 = vst [vmem:[#allocation2 + $0x398] sm:$0xf] %v12941_v0  ;;  %570 = vst [vmem:[#allocation2 + $0x39c] sm:$0xf] %v12941_v0 }
  0xac   : > { %571 = vst [vmem:[#allocation2 + $0x3a0] sm:$0xf] %v12941_v0  ;;  %572 = vst [vmem:[#allocation2 + $0x3a4] sm:$0x3] %v12941_v0 }
  0xad   : > { %573 = vst [vmem:[#allocation2 + $0x3a8] sm:$0xf] %v12941_v0  ;;  %574 = vst [vmem:[#allocation2 + $0x3ac] sm:$0xf] %v12941_v0 }
  0xae   : > { %575 = vst [vmem:[#allocation2 + $0x3b0] sm:$0xf] %v12941_v0  ;;  %576 = vst [vmem:[#allocation2 + $0x3b4] sm:$0xf] %v12941_v0 }
  0xaf   : > { %577 = vst [vmem:[#allocation2 + $0x3b8] sm:$0xf] %v12941_v0  ;;  %578 = vst [vmem:[#allocation2 + $0x3bc] sm:$0x3] %v12941_v0 }
  0xb0   : > { %579 = vst [vmem:[#allocation2 + $0x3c0] sm:$0xf] %v12941_v0  ;;  %580 = vst [vmem:[#allocation2 + $0x3c4] sm:$0xf] %v12941_v0 }
  0xb1   : > { %581 = vst [vmem:[#allocation2 + $0x3c8] sm:$0xf] %v12941_v0  ;;  %582 = vst [vmem:[#allocation2 + $0x3cc] sm:$0xf] %v12941_v0 }
  0xb2   : > { %583 = vst [vmem:[#allocation2 + $0x3d0] sm:$0xf] %v12941_v0  ;;  %584 = vst [vmem:[#allocation2 + $0x3d4] sm:$0x3] %v12941_v0 }
  0xb3   : > { %585 = vst [vmem:[#allocation2 + $0x3d8] sm:$0xf] %v12941_v0  ;;  %586 = vst [vmem:[#allocation2 + $0x3dc] sm:$0xf] %v12941_v0 }
  0xb4   : > { %587 = vst [vmem:[#allocation2 + $0x3e0] sm:$0xf] %v12941_v0  ;;  %588 = vst [vmem:[#allocation2 + $0x3e4] sm:$0xf] %v12941_v0 }
  0xb5   : > { %589 = vst [vmem:[#allocation2 + $0x3e8] sm:$0xf] %v12941_v0  ;;  %590 = vst [vmem:[#allocation2 + $0x3ec] sm:$0x3] %v12941_v0 }
  0xb6   : > { %591 = vst [vmem:[#allocation2 + $0x3f0] sm:$0xf] %v12941_v0  ;;  %592 = vst [vmem:[#allocation2 + $0x3f4] sm:$0xf] %v12941_v0 }
  0xb7   : > { %593 = vst [vmem:[#allocation2 + $0x3f8] sm:$0xf] %v12941_v0  ;;  %594 = vst [vmem:[#allocation2 + $0x3fc] sm:$0xf] %v12941_v0 }
  0xb8   : > { %595 = vst [vmem:[#allocation2 + $0x400] sm:$0xf] %v12941_v0  ;;  %596 = vst [vmem:[#allocation2 + $0x404] sm:$0x3] %v12941_v0 }
  0xb9   : > { %597 = vst [vmem:[#allocation2 + $0x408] sm:$0xf] %v12941_v0  ;;  %598 = vst [vmem:[#allocation2 + $0x40c] sm:$0xf] %v12941_v0 }
  0xba   : > { %599 = vst [vmem:[#allocation2 + $0x410] sm:$0xf] %v12941_v0  ;;  %600 = vst [vmem:[#allocation2 + $0x414] sm:$0xf] %v12941_v0 }
  0xbb   : > { %601 = vst [vmem:[#allocation2 + $0x418] sm:$0xf] %v12941_v0  ;;  %602 = vst [vmem:[#allocation2 + $0x41c] sm:$0x3] %v12941_v0 }
  0xbc   : > { %603 = vst [vmem:[#allocation2 + $0x190] sm:$0xf] %v12941_v0  ;;  %604 = vst [vmem:[#allocation2 + $0x194] sm:$0x3] %v12941_v0 }
  0xbd   : > { %605 = vst [vmem:[#allocation2 + $0x1a8] sm:$0xf] %v12941_v0  ;;  %606 = vst [vmem:[#allocation2 + $0x1ac] sm:$0x3] %v12941_v0 }
  0xbe   : > { %607 = vst [vmem:[#allocation2 + $0x1c0] sm:$0xf] %v12941_v0  ;;  %608 = vst [vmem:[#allocation2 + $0x1c4] sm:$0x3] %v12941_v0 }
  0xbf   : > { %609 = vst [vmem:[#allocation2 + $0x1d8] sm:$0xf] %v12941_v0  ;;  %610 = vst [vmem:[#allocation2 + $0x1dc] sm:$0x3] %v12941_v0 }
  0xc0   : > { %611 = vst [vmem:[#allocation2 + $0x1f0] sm:$0xf] %v12941_v0  ;;  %612 = vst [vmem:[#allocation2 + $0x1f4] sm:$0x3] %v12941_v0 }
  0xc1   : > { %613 = vst [vmem:[#allocation2 + $0x208] sm:$0xf] %v12941_v0  ;;  %614 = vst [vmem:[#allocation2 + $0x20c] sm:$0x3] %v12941_v0 }
  0xc2   : > { %615 = vst [vmem:[#allocation2 + $0x220] sm:$0xf] %v12941_v0  ;;  %616 = vst [vmem:[#allocation2 + $0x224] sm:$0x3] %v12941_v0 }
  0xc3   : > { %617 = vst [vmem:[#allocation2 + $0x238] sm:$0xf] %v12941_v0  ;;  %618 = vst [vmem:[#allocation2 + $0x23c] sm:$0x3] %v12941_v0 }
  0xc4   : > { %619 = vst [vmem:[#allocation2 + $0x250] sm:$0xf] %v12941_v0  ;;  %620 = vst [vmem:[#allocation2 + $0x254] sm:$0x3] %v12941_v0 }
  0xc5   : > { %621 = vst [vmem:[#allocation2 + $0x268] sm:$0xf] %v12941_v0  ;;  %622 = vst [vmem:[#allocation2 + $0x26c] sm:$0x3] %v12941_v0 }
  0xc6   : > { %623 = vst [vmem:[#allocation2 + $0x280] sm:$0xf] %v12941_v0  ;;  %624 = vst [vmem:[#allocation2 + $0x284] sm:$0x3] %v12941_v0 }
  0xc7   : > { %625 = vst [vmem:[#allocation2 + $0x298] sm:$0xf] %v12941_v0  ;;  %626 = vst [vmem:[#allocation2 + $0x29c] sm:$0x3] %v12941_v0 }
  0xc8   : > { %627 = vst [vmem:[#allocation2 + $0x2b0] sm:$0xf] %v12941_v0  ;;  %628 = vst [vmem:[#allocation2 + $0x2b4] sm:$0x3] %v12941_v0 }
  0xc9   : > { %629 = vst [vmem:[#allocation2 + $0x2c8] sm:$0xf] %v12941_v0  ;;  %630 = vst [vmem:[#allocation2 + $0x2cc] sm:$0x3] %v12941_v0 }
  0xca   : > { %631 = vst [vmem:[#allocation2 + $0x2e0] sm:$0xf] %v12941_v0  ;;  %632 = vst [vmem:[#allocation2 + $0x2e4] sm:$0x3] %v12941_v0 }
  0xcb   : > { %633 = vst [vmem:[#allocation2 + $0x2f8] sm:$0xf] %v12941_v0  ;;  %634 = vst [vmem:[#allocation2 + $0x2fc] sm:$0x3] %v12941_v0  ;;  %v13501_v0 = vld [vmem:[%s13335_s17 + $0x98] sm:$0xff] }
  0xcc   : > { %10838 = vst [vmem:[#allocation2 + $0x188] sm:$0xff] %v667_v9   ;;  %2192 = vst [vmem:[#allocation3 + $0x10] sm:$0xf] %v13340_v10  ;;  %v13509_v4 = vpack.c.bf16 %v13501_v0, %v13498_v63  ;;  %v13517_v6 = vpack.c.bf16 %v13501_v0, %v13501_v0  ;;  %v835_v9 = vadd.f32 %v834_v7, %v13389_v31  ;;  %v13552_v31 = vld [vmem:[%s13335_s17 + $0xb8] sm:$0xff] }
  0xcd   : > { %2193 = vst [vmem:[#allocation3 + $0x34] sm:$0xf] %v13342_v11  ;;  %10839 = vst [vmem:[#allocation2 + $0x1a0] sm:$0xff] %v13349_v17   ;;  %v13566_v39 = vpack.c.bf16 %v13552_v31, %v13549_v27  ;;  %v13574_v46 = vpack.c.bf16 %v13552_v31, %v13552_v31  ;;  %v12202_v17 = vld [vmem:[%s16767_s5 + $0xb0] sm:$0xff]  }
  0xce   : > { %2194 = vst [vmem:[#allocation3 + $0x58] sm:$0xf] %v13351_v18  ;;  %2195 = vst [vmem:[#allocation3 + $0x7c] sm:$0xf] %v13353_v19  ;;  %v836_v16 = vadd.f32 %v835_v9, %v13406_v37  ;;  %v13562_v37 = vld [vmem:[%s13335_s17 + $0xd0] sm:$0xff]  ;;  %11908 = vmatmul.mubr.bf16.gmra.mxu1 %v13509_v4 }
  0xcf   : > { %10840 = vst [vmem:[#allocation2 + $0x1b8] sm:$0xff] %v13355_v20   ;;  %16820 = vst [vmem:[#allocation18_spill] sm:$0xff] %v13382_v29  ;;  %v13603_v7 = vpack.c.bf16 %v13580_v58, %v13562_v37  ;;  %11911 = vmatprep.mubr.bf16.mxu1 %v13542_v23 }
  0xd0   : > { %16821 = vst [vmem:[#allocation19_spill] sm:$0xff] %v13386_v30  ;;  %16822 = vst [vmem:[#allocation20_spill] sm:$0xff] %v13393_v32  ;;  %v837_v51 = vadd.f32 %v836_v16, %v13409_v38  ;;  %v12199_v38 = vld [vmem:[%s16767_s5 + $0xb8] sm:$0xff]   ;;  %v12201_v16 = vld [vmem:[%s16767_s5 + $0xf0] sm:$0xff]  }
  0xd1   : > { %2196 = vst [vmem:[#allocation3 + $0xa0] sm:$0xf] %v13365_v24  ;;  %2197 = vst [vmem:[#allocation3 + $0xc4] sm:$0xf] %v13367_v25  ;;  %11000 = vmatpush3.bf16.msra.mxu1 %v12199_v38  ;;  %v12206_v38 = vld [vmem:[%s16767_s5 + $0x78] sm:$0xff]  }
  0xd2   : > { %16823 = vst [vmem:[#allocation21_spill] sm:$0xff] %v13403_v35  ;;  %10841 = vst [vmem:[#allocation2 + $0x1d0] sm:$0xff] %v13378_v28   ;;  %v838_v9 = vadd.f32 %v837_v51, %v13431_v44  ;;  %v13624_v51 = vld [vmem:[%s13335_s17 + $0xf8] sm:$0xff]  ;;  %11001 = vmatprep.subr.bf16.mxu1 %v12201_v16 }
  0xd3   : > { %2198 = vst [vmem:[#allocation3 + $0xe8] sm:$0xf] %v13382_v29  ;;  %2199 = vst [vmem:[#allocation3 + $0x10c] sm:$0xf] %v13386_v30  ;;  %v13642_v21 = vpack.c.bf16 %v13624_v51, %v13621_v8 }
  0xd4   : > { %2200 = vst [vmem:[#allocation3 + $0x130] sm:$0xf] %v13393_v32  ;;  %16824 = vst [vmem:[#allocation22_spill] sm:$0xff] %v13422_v41  ;;  %v839_v44 = vadd.f32 %v838_v9, %v13434_v45  ;;  %v13638_v45 = vpack.c.bf16 %v13624_v51, %v13624_v51 }
  0xd5   : > { %16825 = vst [vmem:[#allocation23_spill] sm:$0xff] %v13426_v42  ;;  %10842 = vst [vmem:[#allocation2 + $0x1e8] sm:$0xff] %v13399_v34   ;;  %11002 = vmatpush3.bf16.msra.mxu1 %v12202_v17  ;;  %v12213_v34 = vld [vmem:[%s16767_s5 + $0x98] sm:$0xff]   ;;  %v12217_v17 = vld [vmem:[%s16767_s5 + $0x90] sm:$0xff]  }
  0xd6   : > { %2201 = vst [vmem:[#allocation3 + $0x154] sm:$0xf] %v13403_v35  ;;  %10843 = vst [vmem:[#allocation2 + $0x200] sm:$0xff] %v13418_v40   ;;  %v840_v9 = vadd.f32 %v839_v44, %v13453_v50  ;;  %v12203_v50 = vld [vmem:[#allocation4] sm:$0xff]   ;;  %v12205_v44 = vld [vmem:[%s16767_s5 + $0xa8] sm:$0xff]   ;;  %11912 = vmatmul.mubr.bf16.gmra.mxu1 %v13566_v39 }
  0xd7   : > { %2202 = vst [vmem:[#allocation3 + $0x178] sm:$0xf] %v13422_v41  ;;  %2203 = vst [vmem:[#allocation3 + $0x19c] sm:$0xf] %v13426_v42  ;;  %11915 = vmatprep.mubr.bf16.mxu1 %v13592_v3  ;;  %v1965_v42 = vld [vmem:[#allocation2 + $0x2ec] sm:$0xe] }
  0xd8   : > { %16826 = vst [vmem:[#allocation24_spill] sm:$0xff] %v13446_v48  ;;  %16827 = vst [vmem:[#allocation25_spill] sm:$0xff] %v13450_v49  ;;  %v841_v20 = vadd.f32 %v840_v9, %v13456_v52  ;;  %v12208_v52 = vld [vmem:[%s16767_s5 + $0xe0] sm:$0xff]  }
  0xd9   : > { %16828 = vst [vmem:[#allocation26_spill] sm:$0xff] %v13460_v53  ;;  %10844 = vst [vmem:[#allocation2 + $0x218] sm:$0xff] %v13442_v47   ;;  %v12221_v47 = vld [vmem:[%s16767_s5 + $0x88] sm:$0xff]  }
  0xda   : > { %2204 = vst [vmem:[#allocation3 + $0x1c0] sm:$0xf] %v13446_v48  ;;  %2205 = vst [vmem:[#allocation3 + $0x1e4] sm:$0xf] %v13450_v49  ;;  %v842_v16 = vadd.f32 %v841_v20, %v13475_v56  ;;  %v1645_v20 = vld [vmem:[#allocation2 + $0xf8] sm:$0x8] }
  0xdb   : > { %16829 = vst [vmem:[#allocation27_spill] sm:$0xff] %v13472_v55  ;;  %2206 = vst [vmem:[#allocation3 + $0x208] sm:$0xf] %v13460_v53 }
  0xdc   : > { %16830 = vst [vmem:[#allocation28_spill] sm:$0xff] %v13489_v61  ;;  %16831 = vst [vmem:[#allocation29_spill] sm:$0xff] %v13493_v62 }
  0xdd   : > { %10845 = vst [vmem:[#allocation2 + $0x230] sm:$0xff] %v13468_v54   ;;  %2207 = vst [vmem:[#allocation3 + $0x22c] sm:$0xf] %v13472_v55 }
  0xde   : > { %10846 = vst [vmem:[#allocation2 + $0x248] sm:$0xff] %v13485_v60   ;;  %2208 = vst [vmem:[#allocation3 + $0x250] sm:$0xf] %v13489_v61  ;;  %11916 = vmatmul.mubr.bf16.gmra.mxu1 %v13603_v7 }
  0xdf   : > { %2209 = vst [vmem:[#allocation3 + $0x274] sm:$0xf] %v13493_v62  ;;  %16832 = vst [vmem:[#allocation30_spill] sm:$0xff] %v13513_v5  ;;  %v5836_v62 = vld [vmem:[#allocation2 + $0x1c0] sm:$0xf] }
  0xe0   : > { %16833 = vst [vmem:[#allocation31_spill] sm:$0xff] %v13517_v6  ;;  %10847 = vst [vmem:[#allocation2 + $0x260] sm:$0xff] %v13509_v4   ;;  %v5797_v4 = vld [vmem:[#allocation2 + $0x88] sm:$0xf]  ;;  %v5989_v55 = vrot.slane %v5836_v62, 6 }
  0xe1   : > { %2210 = vst [vmem:[#allocation3 + $0x298] sm:$0xf] %v13513_v5  ;;  %2211 = vst [vmem:[#allocation3 + $0x2bc] sm:$0xf] %v13517_v6  ;;  %v5835_v5 = vld [vmem:[#allocation2 + $0x1bc] sm:$0xc] }
  0xe2   : > { %16834 = vst [vmem:[#allocation32_spill] sm:$0xff] %v13534_v15  ;;  %16835 = vst [vmem:[#allocation33_spill] sm:$0xff] %v13546_v26 }
  0xe3   : > { %2212 = vst [vmem:[#allocation3 + $0x2e0] sm:$0xf] %v13534_v15  ;;  %16836 = vst [vmem:[#allocation34_spill] sm:$0xff] %v13570_v43  ;;  %v1605_v15 = vld [vmem:[#allocation2 + $0x218] sm:$0xf] }
  0xe4   : > { %16837 = vst [vmem:[#allocation35_spill] sm:$0xff] %v13574_v46  ;;  %10848 = vst [vmem:[#allocation2 + $0x278] sm:$0xff] %v13542_v23  }
  0xe5   : > { %2213 = vst [vmem:[#allocation3 + $0x304] sm:$0xf] %v13546_v26  ;;  %16838 = vst [vmem:[#allocation36_spill] sm:$0xff] %v13584_v59 }
  0xe6   : > { %16839 = vst [vmem:[#allocation37_spill] sm:$0xff] %v13588_v2  ;;  %10849 = vst [vmem:[#allocation2 + $0x290] sm:$0xff] %v13566_v39   ;;  %v5455_v39 = vld [vmem:[#allocation2 + $0x64] sm:$0xf] }
  0xe7   : > { %2214 = vst [vmem:[#allocation3 + $0x328] sm:$0xf] %v13570_v43  ;;  %2215 = vst [vmem:[#allocation3 + $0x34c] sm:$0xf] %v13574_v46  ;;  %v13616_v46 = vld [vmem:[%s13335_s17 + $0xe8] sm:$0xff] }
  0xe8   : > { %2216 = vst [vmem:[#allocation3 + $0x370] sm:$0xf] %v13584_v59  ;;  %2217 = vst [vmem:[#allocation3 + $0x394] sm:$0xf] %v13588_v2  ;;  %v13628_v22 = vpack.c.bf16 %v13616_v46, %v13613_v1  ;;  %v16840_v2 = vmov 0.0   ;;  %v13634_v59 = vpack.c.bf16 %v13621_v8, %v13621_v8  ;;  %v12204_v43 = vld [vmem:[%s16767_s5 + $0xe8] sm:$0xff]  }
  0xe9   : > { %10850 = vst [vmem:[#allocation2 + $0x2a8] sm:$0xff] %v13592_v3   ;;  %10851 = vst [vmem:[#allocation2 + $0x2c0] sm:$0xff] %v13603_v7   ;;  %11867 = vmatprep.subr.bf16.mxu0 %v16840_v2  ;;  %11003 = vmatprep.subr.bf16.mxu1 %v12204_v43  ;;  %v12212_v43 = vld [vmem:[%s16767_s5 + $0xd8] sm:$0xff]  }
  0xea   : > { %16841 = vst [vmem:[#allocation38_spill] sm:$0xff] %v13634_v59  ;;  %16842 = vst [vmem:[#allocation39_spill] sm:$0xff] %v13638_v45  ;;  %11868 = vmatpush3.bf16.msra.mxu0 %v12200_v12  ;;  %v843_v12 = vadd.f32 %v842_v16, %v13478_v57  ;;  %11004 = vmatpush3.bf16.msra.mxu1 %v12205_v44  ;;  %v10103_v16 = vrot.slane %v1645_v20, 11  ;;  %v12207_v7 = vld [vmem:[%s16767_s5 + $0x38] sm:$0xff]  }
  0xeb   : > { %10852 = vst [vmem:[#allocation2 + $0x2d8] sm:$0xff] %v13628_v22   ;;  %2222 = vst [vmem:[#allocation3 + $0x448] sm:$0xf] %v13634_v59  ;;  %11869 = vmatprep.subr.bf16.mxu0 %v16840_v2  ;;  %v12209_v2 = vld [vmem:[%s16767_s5 + $0xa0] sm:$0xff]   ;;  %11005 = vmatprep.subr.bf16.mxu1 %v12208_v52 }
  0xec   : > { %2223 = vst [vmem:[#allocation3 + $0x46c] sm:$0xf] %v13638_v45  ;;  %10853 = vst [vmem:[#allocation2 + $0x2f0] sm:$0xff] %v13642_v21   ;;  %v844_v56 = vadd.f32 %v843_v12, %v13498_v63  ;;  %v12216_v63 = vld [vmem:[%s16767_s5 + $0xd0] sm:$0xff]   ;;  %11919 = vmatprep.mubr.bf16.mxu1 %v13628_v22  ;;  %v5800_v22 = vld [vmem:[#allocation2 + $0xa0] sm:$0xf] }
  0xed   : > { %vm13688_vm3 = vmor %vm1741_vm1, %vm1742_vm2  ;;  %11920 = vmatmul.mubr.bf16.gmra.mxu1 %v13642_v21  ;;  %1637 = vst [vmem:[#allocation3 + $0x364] sm:$0xf] %v1605_v15 }
  0xee   : > { %11870 = vmatpush3.bf16.msra.mxu0 %v12203_v50  ;;  %v845_v57 = vadd.f32 %v844_v56, %v13501_v0  ;;  %11006 = vmatpush3.bf16.msra.mxu1 %v12209_v2  ;;  %v1646_v50 = vld [vmem:[#allocation2 + $0xfc] sm:$0xf]  ;;  %vm13708_vm7 = vmor %vm1402_vm4, %vm1403_vm5  ;;  %v1920_v56 = vld [vmem:[#allocation2 + $0x184] sm:$0xe] }
  0xef   : > { %10887 = vmatprep.subr.bf16.mxu0 %v12206_v38  ;;  %11007 = vmatprep.subr.bf16.mxu1 %v12212_v43  ;;  %v1647_v38 = vld [vmem:[#allocation2 + $0x100] sm:$0x7]  ;;  %v1921_v2 = vld [vmem:[#allocation2 + $0x188] sm:$0xf]  ;;  %v1922_v43 = vld [vmem:[#allocation2 + $0x18c] sm:$0x1] }
  0xf0   : > { %v846_v28 = vadd.f32 %v845_v57, %v13526_v13  ;;  %v1749_v12 = vrot.slane %v1647_v38, 7  ;;  %v10119_v57 = vrot.slane %v1920_v56, 9  ;;  %v6065_v38 = vld [vmem:[#allocation2 + $0x180] sm:$0xc]  ;;  %v6067_v56 = vld [vmem:[#allocation2 + $0x188] sm:$0x3]  ;;  %vm13730_vm9 = vmor %vm5550_vm6, %vm5551_vm8 }
  0xf2   : > { %v847_v9 = vadd.f32 %v846_v28, %v13530_v14  ;;  %11008 = vmatpush3.bf16.msra.mxu1 %v12213_v34  ;;  %v12220_v14 = vld [vmem:[%s16767_s5 + $0xc8] sm:$0xff]   ;;  %v2018_v28 = vrot.slane %v1921_v2, 5 }
  0xf3   : > { %11009 = vmatprep.subr.bf16.mxu1 %v12216_v63  ;;  %v5793_v34 = vld [vmem:[#allocation2 + $0x6c] sm:$0xc]  ;;  %v1966_v41 = vld [vmem:[#allocation2 + $0x2f0] sm:$0xf] }
  0xf4   : > { %v848_v13 = vadd.f32 %v847_v9, %v13549_v27  ;;  %v12224_v27 = vld [vmem:[%s16767_s5 + $0xc0] sm:$0xff]   ;;  %v2019_v20 = vsel %vm13708_vm7, %v10119_v57, %v2018_v28  ;;  %v10432_v57 = vrot.slane %v6065_v38, 10  ;;  %v1923_v38 = vld [vmem:[#allocation2 + $0x19c] sm:$0xe] }
  0xf5   : > { %2160 = vst [vmem:[#allocation3 + $0xc] sm:$0xf] %v2019_v20 }
  0xf6   : > { %v849_v40 = vadd.f32 %v848_v13, %v13552_v31  ;;  %11010 = vmatpush3.bf16.msra.mxu1 %v12217_v17  ;;  %v1746_v31 = vrot.slane %v1646_v50, 7  ;;  %v2021_v13 = vrot.slane %v1922_v43, 5  ;;  %v5794_v17 = vld [vmem:[#allocation2 + $0x70] sm:$0xf] }
  0xf7   : > { %11011 = vmatprep.subr.bf16.mxu1 %v12220_v14  ;;  %v2020_v14 = vrot.slane %v2018_v28, 4  ;;  %v5891_v50 = vrot.slane %v5794_v17, 6 }
  0xf8   : > { %v850_v44 = vadd.f32 %v849_v40, %v13556_v33  ;;  %v1747_v9 = vsel %vm13688_vm3, %v10103_v16, %v1746_v31  ;;  %v1748_v33 = vrot.slane %v1746_v31, 4  ;;  %v5795_v40 = vld [vmem:[#allocation2 + $0x74] sm:$0x3]  ;;  %v12225_v16 = vld [vmem:[%s16767_s5 + $0x80] sm:$0xff]  }
  0xf9   : > { %1888 = vst [vmem:[#allocation3 + $0x8] sm:$0xf] %v1747_v9  ;;  %v6066_v31 = vld [vmem:[#allocation2 + $0x184] sm:$0xf]  ;;  %v2022_v2 = vsel %vm13708_vm7, %v2020_v14, %v2021_v13  ;;  %v5894_v60 = vrot.slane %v5795_v40, 6 }
  0xfa   : > { %v851_v63 = vadd.f32 %v850_v44, %v13559_v36  ;;  %11012 = vmatpush3.bf16.msra.mxu1 %v12221_v47  ;;  %v1750_v54 = vsel %vm13688_vm3, %v1748_v33, %v1749_v12  ;;  %v10416_v44 = vrot.slane %v5793_v34, 10  ;;  %v6163_v43 = vrot.slane %v6066_v31, 6  ;;  %2161 = vst [vmem:[#allocation3 + $0x30] sm:$0xf] %v2022_v2  ;;  %v1649_v33 = vld [vmem:[#allocation2 + $0x114] sm:$0xf] }
  0xfb   : > { %11013 = vmatprep.subr.bf16.mxu1 %v12224_v27  ;;  %1889 = vst [vmem:[#allocation3 + $0x2c] sm:$0xf] %v1750_v54  ;;  %v5893_v47 = vrot.slane %v5891_v50, 4  ;;  %v6166_v34 = vrot.slane %v6067_v56, 6  ;;  %v1753_v20 = vrot.slane %v1649_v33, 7  ;;  %v10120_v54 = vrot.slane %v1923_v38, 9 }
  0xfc   : > { %v852_v36 = vadd.f32 %v851_v63, %v13562_v37  ;;  %v6165_v28 = vrot.slane %v6163_v43, 4  ;;  %v1648_v63 = vld [vmem:[#allocation2 + $0x110] sm:$0x8]  ;;  %v5892_v9 = vsel %vm13730_vm9, %v10416_v44, %v5891_v50  ;;  %v5898_v33 = vrot.slane %v5797_v4, 6  ;;  %v1306_v38 = vld [vmem:[#allocation2 + $0xf4] sm:$0xe] }
  0xfd   : > { %v10104_v13 = vrot.slane %v1648_v63, 11  ;;  %v5895_v40 = vsel %vm13730_vm9, %v5893_v47, %v5894_v60  ;;  %v1755_v56 = vrot.slane %v1753_v20, 4  ;;  %v5796_v60 = vld [vmem:[#allocation2 + $0x84] sm:$0xc]  ;;  %6033 = vst [vmem:[#allocation3 + $0x8] sm:$0xf] %v5892_v9 }
  0xfe   : > { %v853_v37 = vadd.f32 %v852_v36, %v13580_v58  ;;  %11014 = vmatpush3.bf16.msra.mxu1 %v12225_v16  ;;  %v1650_v58 = vld [vmem:[#allocation2 + $0x118] sm:$0x7]  ;;  %v1924_v36 = vld [vmem:[#allocation2 + $0x1a0] sm:$0xf]  ;;  %v6167_v50 = vsel %vm13730_vm9, %v6165_v28, %v6166_v34  ;;  %v1925_v16 = vld [vmem:[#allocation2 + $0x1a4] sm:$0x1] }
  0xff   : > { %v1756_v14 = vrot.slane %v1650_v58, 7  ;;  %v2025_v44 = vrot.slane %v1924_v36, 5  ;;  %v1754_v31 = vsel %vm13688_vm3, %v10104_v13, %v1753_v20  ;;  %v2028_v2 = vrot.slane %v1925_v16, 5  ;;  %6034 = vst [vmem:[#allocation3 + $0x2c] sm:$0xf] %v5895_v40 }
 0x100   : > { %v854_v27 = vadd.f32 %v853_v37, %v13613_v1  ;;  %v6164_v1 = vsel %vm13730_vm9, %v10432_v57, %v6163_v43  ;;  %1890 = vst [vmem:[#allocation3 + $0x50] sm:$0xf] %v1754_v31  ;;  %v5798_v57 = vld [vmem:[#allocation2 + $0x8c] sm:$0x3]  ;;  %v6069_v34 = vld [vmem:[#allocation2 + $0x19c] sm:$0xf] }
 0x101   : > { %v13749_v37 = vld [vmem:[#allocation3 + $0xc] ss:$36 sps:$4 sm:$0xff]   ;;  %v2026_v43 = vsel %vm13708_vm7, %v10120_v54, %v2025_v44  ;;  %v2027_v47 = vrot.slane %v2025_v44, 4  ;;  %v1757_v23 = vsel %vm13688_vm3, %v1755_v56, %v1756_v14  ;;  %v10417_v63 = vrot.slane %v5796_v60, 10  ;;  %v6070_v58 = vld [vmem:[#allocation2 + $0x1a0] sm:$0x3] }
 0x102   : > { %v855_v17 = vadd.f32 %v854_v27, %v13616_v46  ;;  %6305 = vst [vmem:[#allocation3 + $0xc] sm:$0xf] %v6164_v1  ;;  %6306 = vst [vmem:[#allocation3 + $0x30] sm:$0xf] %v6167_v50  ;;  %v5900_v40 = vrot.slane %v5898_v33, 4  ;;  %v6173_v20 = vrot.slane %v6070_v58, 6  ;;  %4777 = vmatprep.mubr.bf16.mxu1 %v13749_v37 }
 0x103   : > { %2162 = vst [vmem:[#allocation3 + $0x54] sm:$0xf] %v2026_v43  ;;  %1891 = vst [vmem:[#allocation3 + $0x74] sm:$0xf] %v1757_v23  ;;  %v2029_v27 = vsel %vm13708_vm7, %v2027_v47, %v2028_v2  ;;  %v1307_v1 = vld [vmem:[#allocation2 + $0xf8] sm:$0xf]  ;;  %v5899_v2 = vsel %vm13730_vm9, %v10417_v63, %v5898_v33 }
 0x104   : > { %v856_v46 = vadd.f32 %v855_v17, %v13621_v8  ;;  %v6068_v8 = vld [vmem:[#allocation2 + $0x198] sm:$0xc]  ;;  %2163 = vst [vmem:[#allocation3 + $0x78] sm:$0xf] %v2029_v27  ;;  %v6170_v17 = vrot.slane %v6069_v34, 6  ;;  %v10087_v16 = vrot.slane %v1306_v38, 9 }
 0x105   : > { %v10433_v9 = vrot.slane %v6068_v8, 10  ;;  %v1308_v50 = vld [vmem:[#allocation2 + $0xfc] sm:$0x1]  ;;  %v1407_v54 = vrot.slane %v1307_v1, 5  ;;  %v5454_v43 = vld [vmem:[#allocation2 + $0x60] sm:$0xc] }
 0x106   : > { %v857_v28 = vadd.f32 %v856_v46, %v13624_v51  ;;  %v5901_v51 = vrot.slane %v5798_v57, 6  ;;  %v6172_v14 = vrot.slane %v6170_v17, 4  ;;  %v1410_v44 = vrot.slane %v1308_v50, 5  ;;  %v1581_v46 = vld [vmem:[#allocation2 + $0xf8] sm:$0xf] }
 0x107   : > { %v1582_v31 = vld [vmem:[#allocation2 + $0xfc] sm:$0xf]  ;;  %v6171_v4 = vsel %vm13730_vm9, %v10433_v9, %v6170_v17  ;;  %1613 = vst [vmem:[#allocation3 + $0x4] sm:$0xf] %v1581_v46  ;;  %v1408_v57 = vsel %vm13708_vm7, %v10087_v16, %v1407_v54  ;;  %v5456_v23 = vld [vmem:[#allocation2 + $0x68] sm:$0x3] }
 0x108   : > { %v858_v13 = vrot.slane %v857_v28, 4  ;;  %v5902_v60 = vsel %vm13730_vm9, %v5900_v40, %v5901_v51  ;;  %1614 = vst [vmem:[#allocation3 + $0x28] sm:$0xf] %v1582_v31  ;;  %v12259_v47 = vld [vmem:[%s16767_s5 + $0x1f8] sm:$0xff]   ;;  %v6174_v3 = vsel %vm13730_vm9, %v6172_v14, %v6173_v20  ;;  %v5555_v8 = vrot.slane %v5455_v39, 6 }
 0x109   : > { %1549 = vst [vmem:[#allocation3] sm:$0xf] %v1408_v57  ;;  %11223 = vmatprep.subr.bf16.mxu1 %v12259_v47  ;;  %v10400_v33 = vrot.slane %v5454_v43, 10  ;;  %v5558_v58 = vrot.slane %v5456_v23, 6  ;;  %6035 = vst [vmem:[#allocation3 + $0x50] sm:$0xf] %v5899_v2 }
 0x10a   : > { %v859_v36 = vadd.f32 %v858_v13, %v857_v28  ;;  %v1409_v28 = vrot.slane %v1407_v54, 4  ;;  %6036 = vst [vmem:[#allocation3 + $0x74] sm:$0xf] %v5902_v60  ;;  %v5557_v51 = vrot.slane %v5555_v8, 4  ;;  %v1651_v9 = vld [vmem:[#allocation2 + $0x128] sm:$0x8] }
 0x10b   : > { %v13773_v27 = vld [vmem:[#allocation3 + $0x54] ss:$36 sps:$4 sm:$0xff]   ;;  %v1652_v17 = vld [vmem:[#allocation2 + $0x12c] sm:$0xf]  ;;  %v1653_v20 = vld [vmem:[#allocation2 + $0x130] sm:$0x7]  ;;  %v5556_v43 = vsel %vm13730_vm9, %v10400_v33, %v5555_v8 }
 0x10c   : > { %v860_v56 = vrot.slane %v859_v36, 2  ;;  %v1411_v63 = vsel %vm13708_vm7, %v1409_v28, %v1410_v44  ;;  %6307 = vst [vmem:[#allocation3 + $0x54] sm:$0xf] %v6171_v4  ;;  %6308 = vst [vmem:[#allocation3 + $0x78] sm:$0xf] %v6174_v3  ;;  %v10105_v38 = vrot.slane %v1651_v9, 11  ;;  %v5559_v39 = vsel %vm13730_vm9, %v5557_v51, %v5558_v58 }
 0x10d   : > { %1550 = vst [vmem:[#allocation3 + $0x24] sm:$0xf] %v1411_v63  ;;  %v1926_v14 = vld [vmem:[#allocation2 + $0x1b4] sm:$0xe]  ;;  %v5729_v1 = vld [vmem:[#allocation2 + $0x68] sm:$0xf] }
 0x10e   : > { %v861_v34 = vadd.f32 %v860_v56, %v859_v36  ;;  %v1760_v36 = vrot.slane %v1652_v17, 7  ;;  %v5730_v50 = vld [vmem:[#allocation2 + $0x6c] sm:$0xf]  ;;  %v1763_v16 = vrot.slane %v1653_v20, 7  ;;  %v1927_v54 = vld [vmem:[#allocation2 + $0x1b8] sm:$0xf] }
 0x10f   : > { %v1928_v44 = vld [vmem:[#allocation2 + $0x1bc] sm:$0x1]  ;;  %v10121_v46 = vrot.slane %v1926_v14, 9  ;;  %v2032_v60 = vrot.slane %v1927_v54, 5  ;;  %v13781_v4 = vld [vmem:[#allocation2 + $0x9c] sm:$0xc] }
 0x110   : > { %v862_v13 = vrot.slane %v861_v34, 1  ;;  %v1761_v56 = vsel %vm13688_vm3, %v10105_v38, %v1760_v36  ;;  %v1762_v2 = vrot.slane %v1760_v36, 4  ;;  %v2035_v47 = vrot.slane %v1928_v44, 5  ;;  %v5801_v3 = vld [vmem:[#allocation2 + $0xa4] sm:$0x3]  ;;  %v12210_v28 = vld [vmem:[%s16767_s5 + $0x70] sm:$0xff]  }
 0x111   : > { %1892 = vst [vmem:[#allocation3 + $0x98] sm:$0xf] %v1761_v56  ;;  %v2034_v63 = vrot.slane %v2032_v60, 4  ;;  %v6071_v8 = vld [vmem:[#allocation2 + $0x1b0] sm:$0xc]  ;;  %v10418_v51 = vrot.slane %v13781_v4, 10 }
 0x112   : > { %v863_v40 = vadd.f32 %v862_v13, %v861_v34  ;;  %v1764_v23 = vsel %vm13688_vm3, %v1762_v2, %v1763_v16  ;;  %v2033_v34 = vsel %vm13708_vm7, %v10121_v46, %v2032_v60  ;;  %v6072_v33 = vld [vmem:[#allocation2 + $0x1b4] sm:$0xf]  ;;  %v12236_v13 = vld [vmem:[#allocation3 + $0x4] ss:$36 sps:$4 sm:$0xff]   ;;  %v5905_v9 = vrot.slane %v5800_v22, 6  ;;  %v13806_v20 = vld [vmem:[#allocation3 + $0x2c] sm:$0xff] }
 0x113   : > { %v12211_v58 = vld [vmem:[%s16767_s5 + $0x30] sm:$0xff]   ;;  %1893 = vst [vmem:[#allocation3 + $0xbc] sm:$0xf] %v1764_v23  ;;  %2164 = vst [vmem:[#allocation3 + $0x9c] sm:$0xf] %v2033_v34  ;;  %v12214_v17 = vld [vmem:[%s16767_s5 + $0x68] sm:$0xff]   ;;  %v2036_v38 = vsel %vm13708_vm7, %v2034_v63, %v2035_v47 }
 0x114   : > { %v865_v31 = vmul.f32 0.00390625, %v863_v40  ;;  %v13804_v40 = vld [vmem:[#allocation3 + $0x8] sm:$0xff]  ;;  %5697 = vst [vmem:[#allocation3] sm:$0xf] %v5556_v43  ;;  %5698 = vst [vmem:[#allocation3 + $0x24] sm:$0xf] %v5559_v39  ;;  %v5906_v23 = vsel %vm13730_vm9, %v10418_v51, %v5905_v9 }
 0x115   : > { %5761 = vst [vmem:[#allocation3 + $0x4] sm:$0xf] %v5729_v1  ;;  %5762 = vst [vmem:[#allocation3 + $0x28] sm:$0xf] %v5730_v50  ;;  %v5908_v36 = vrot.slane %v5801_v3, 6  ;;  %v6177_v16 = vrot.slane %v6072_v33, 6  ;;  %v10186_v21 = vcombine.low %v13804_v40, %v13806_v20 }
 0x116   : > { %v866_v57 = vpack.c.bf16 %v865_v31, %v865_v31  ;;  %v6073_v14 = vld [vmem:[#allocation2 + $0x1b8] sm:$0x3]  ;;  %v1309_v54 = vld [vmem:[#allocation2 + $0x10c] sm:$0xe]  ;;  %2165 = vst [vmem:[#allocation3 + $0xc0] sm:$0xf] %v2036_v38 }
 0x117   : > { %v5907_v44 = vrot.slane %v5905_v9, 4  ;;  %v10434_v46 = vrot.slane %v6071_v8, 10  ;;  %v1310_v31 = vld [vmem:[#allocation2 + $0x110] sm:$0xf]  ;;  %v1311_v56 = vld [vmem:[#allocation2 + $0x114] sm:$0x1]  ;;  %4778 = vmatmul.mubr.bf16.vlgmr.msra.gmra.mxu1 %v10186_v21 }
 0x118   : > { %11872 = vmatmul.mubr.bf16.vlgmr.msra.gmra.mxu0 %v866_v57  ;;  %v6179_v2 = vrot.slane %v6177_v16, 4  ;;  %v6180_v60 = vrot.slane %v6073_v14, 6  ;;  %v10088_v4 = vrot.slane %v1309_v54, 9  ;;  %v1414_v1 = vrot.slane %v1310_v31, 5  ;;  %v1583_v50 = vld [vmem:[#allocation2 + $0x110] sm:$0xf]  ;;  %4785 = vmatprep.mubr.bf16.mxu1 %v13773_v27 }
 0x119   : > { %10888 = vmatpush3.bf16.msra.mxu0 %v12207_v7  ;;  %4616 = vmatprep.mubr.bf16.mxu0 %v12236_v13  ;;  %v1417_v43 = vrot.slane %v1311_v56, 5  ;;  %v1584_v39 = vld [vmem:[#allocation2 + $0x114] sm:$0xf]  ;;  %1615 = vst [vmem:[#allocation3 + $0x4c] sm:$0xf] %v1583_v50  ;;  %v6178_v37 = vsel %vm13730_vm9, %v10434_v46, %v6177_v16  ;;  %v12218_v63 = vld [vmem:[%s16767_s5 + $0x60] sm:$0xff]   ;;  %v5909_v8 = vsel %vm13730_vm9, %v5907_v44, %v5908_v36 }
 0x11a   : > { %10889 = vmatprep.subr.bf16.mxu0 %v12210_v28  ;;  %v5457_v47 = vld [vmem:[#allocation2 + $0x78] sm:$0xc]  ;;  %v1415_v7 = vsel %vm13708_vm7, %v10088_v4, %v1414_v1  ;;  %v1416_v22 = vrot.slane %v1414_v1, 4  ;;  %1616 = vst [vmem:[#allocation3 + $0x70] sm:$0xf] %v1584_v39  ;;  %v12215_v28 = vld [vmem:[%s16767_s5 + $0x28] sm:$0xff]   ;;  %v6181_v33 = vsel %vm13730_vm9, %v6179_v2, %v6180_v60 }
 0x11b   : > { %v5458_v3 = vld [vmem:[#allocation2 + $0x7c] sm:$0xf]  ;;  %v5459_v57 = vld [vmem:[#allocation2 + $0x80] sm:$0x3]  ;;  %1551 = vst [vmem:[#allocation3 + $0x48] sm:$0xf] %v1415_v7 }
 0x11c   : > { %v5562_v34 = vrot.slane %v5458_v3, 6  ;;  %v10401_v13 = vrot.slane %v5457_v47, 10  ;;  %v1654_v51 = vld [vmem:[#allocation2 + $0x140] sm:$0x8]  ;;  %v1655_v9 = vld [vmem:[#allocation2 + $0x144] sm:$0xf] }
 0x11d   : > { %10890 = vmatpush3.bf16.msra.mxu0 %v12211_v58  ;;  %v1418_v58 = vsel %vm13708_vm7, %v1416_v22, %v1417_v43  ;;  %v5565_v20 = vrot.slane %v5459_v57, 6  ;;  %v1656_v38 = vld [vmem:[#allocation2 + $0x148] sm:$0x7]  ;;  %v10106_v14 = vrot.slane %v1654_v51, 11  ;;  %v1767_v16 = vrot.slane %v1655_v9, 7  ;;  %v12222_v36 = vld [vmem:[%s16767_s5 + $0x58] sm:$0xff]  }
 0x11e   : > { %10891 = vmatprep.subr.bf16.mxu0 %v12214_v17  ;;  %v12219_v17 = vld [vmem:[%s16767_s5 + $0x20] sm:$0xff]   ;;  %1552 = vst [vmem:[#allocation3 + $0x6c] sm:$0xf] %v1418_v58  ;;  %v5564_v40 = vrot.slane %v5562_v34, 4  ;;  %v1770_v44 = vrot.slane %v1656_v38, 7  ;;  %v12261_v31 = vld [vmem:[%s16767_s5 + $0x1b8] sm:$0xff]  }
 0x11f   : > { %v13838_v54 = vld [vmem:[#allocation3 + $0x9c] ss:$36 sps:$4 sm:$0xff]   ;;  %v1929_v46 = vld [vmem:[#allocation2 + $0x1cc] sm:$0xe]  ;;  %6037 = vst [vmem:[#allocation3 + $0x98] sm:$0xf] %v5906_v23  ;;  %v1768_v56 = vsel %vm13688_vm3, %v10106_v14, %v1767_v16  ;;  %v5563_v23 = vsel %vm13730_vm9, %v10401_v13, %v5562_v34  ;;  %11224 = vmatpush3.bf16.msra.mxu1 %v12261_v31 }
 0x120   : > { %6038 = vst [vmem:[#allocation3 + $0xbc] sm:$0xf] %v5909_v8  ;;  %6309 = vst [vmem:[#allocation3 + $0x9c] sm:$0xf] %v6178_v37  ;;  %v1769_v2 = vrot.slane %v1767_v16, 4  ;;  %v12271_v1 = vld [vmem:[%s16767_s5 + $0x1f0] sm:$0xff]   ;;  %v5566_v37 = vsel %vm13730_vm9, %v5564_v40, %v5565_v20 }
 0x121   : > { %10892 = vmatpush3.bf16.msra.mxu0 %v12215_v28  ;;  %6310 = vst [vmem:[#allocation3 + $0xc0] sm:$0xf] %v6181_v33  ;;  %v1930_v60 = vld [vmem:[#allocation2 + $0x1d0] sm:$0xf]  ;;  %v1931_v4 = vld [vmem:[#allocation2 + $0x1d4] sm:$0x1]  ;;  %11225 = vmatprep.subr.bf16.mxu1 %v12271_v1 }
 0x122   : > { %10893 = vmatprep.subr.bf16.mxu0 %v12218_v63  ;;  %v13848_v50 = vld [vmem:[#allocation3 + $0x50] sm:$0xff]  ;;  %v5731_v39 = vld [vmem:[#allocation2 + $0x80] sm:$0xf]  ;;  %1894 = vst [vmem:[#allocation3 + $0xe0] sm:$0xf] %v1768_v56  ;;  %v10122_v47 = vrot.slane %v1929_v46, 9  ;;  %v1771_v8 = vsel %vm13688_vm3, %v1769_v2, %v1770_v44 }
 0x123   : > { %v13850_v43 = vld [vmem:[#allocation3 + $0x74] sm:$0xff]  ;;  %v2039_v7 = vrot.slane %v1930_v60, 5  ;;  %v2042_v22 = vrot.slane %v1931_v4, 5  ;;  %v5732_v63 = vld [vmem:[#allocation2 + $0x84] sm:$0xf]  ;;  %v12283_v20 = vld [vmem:[%s16767_s5 + $0x1e8] sm:$0xff]  }
 0x124   : > { %v13852_v3 = vld [vmem:[#allocation2 + $0xb4] sm:$0xc]  ;;  %v12223_v28 = vld [vmem:[%s16767_s5 + $0x18] sm:$0xff]   ;;  %1895 = vst [vmem:[#allocation3 + $0x104] sm:$0xf] %v1771_v8  ;;  %v12285_v2 = vld [vmem:[%s16767_s5 + $0x1a8] sm:$0xff]  }
 0x125   : > { %v12273_v57 = vld [vmem:[%s16767_s5 + $0x1b0] sm:$0xff]   ;;  %v5803_v33 = vld [vmem:[#allocation2 + $0xb8] sm:$0xf]  ;;  %v13866_v58 = vld [vmem:[#allocation2 + $0xbc] sm:$0x3]  ;;  %v2040_v21 = vsel %vm13708_vm7, %v10122_v47, %v2039_v7  ;;  %v2041_v34 = vrot.slane %v2039_v7, 4  ;;  %10894 = vmatpush3.bf16.msra.mxu0 %v12219_v17  ;;  %v10195_v17 = vcombine.low %v13848_v50, %v13850_v43 }
 0x126   : > { %v12226_v51 = vld [vmem:[%s16767_s5 + $0x50] sm:$0xff]   ;;  %v10419_v13 = vrot.slane %v13852_v3, 10  ;;  %v5912_v9 = vrot.slane %v5803_v33, 6  ;;  %v6074_v40 = vld [vmem:[#allocation2 + $0x1c8] sm:$0xc]  ;;  %v5915_v38 = vrot.slane %v13866_v58, 6  ;;  %10895 = vmatprep.subr.bf16.mxu0 %v12222_v36  ;;  %11226 = vmatpush3.bf16.msra.mxu1 %v12273_v57 }
 0x127   : > { %2166 = vst [vmem:[#allocation3 + $0xe4] sm:$0xf] %v2040_v21  ;;  %v6075_v14 = vld [vmem:[#allocation2 + $0x1cc] sm:$0xf]  ;;  %v6076_v27 = vld [vmem:[#allocation2 + $0x1d0] sm:$0x3]  ;;  %v2043_v44 = vsel %vm13708_vm7, %v2041_v34, %v2042_v22  ;;  %11227 = vmatprep.subr.bf16.mxu1 %v12283_v20  ;;  %4786 = vmatmul.mubr.bf16.gmra.mxu1 %v10195_v17 }
 0x128   : > { %v13879_v16 = vld [vmem:[#allocation3 + $0x4c] ss:$36 sps:$4 sm:$0xff]   ;;  %v5914_v46 = vrot.slane %v5912_v9, 4  ;;  %v10435_v56 = vrot.slane %v6074_v40, 10  ;;  %v6184_v31 = vrot.slane %v6075_v14, 6  ;;  %v6187_v36 = vrot.slane %v6076_v27, 6  ;;  %4793 = vmatprep.mubr.bf16.mxu1 %v13838_v54 }
 0x129   : > { %5699 = vst [vmem:[#allocation3 + $0x48] sm:$0xf] %v5563_v23  ;;  %5700 = vst [vmem:[#allocation3 + $0x6c] sm:$0xf] %v5566_v37  ;;  %v1312_v60 = vld [vmem:[#allocation2 + $0x124] sm:$0xe]  ;;  %10896 = vmatpush3.bf16.msra.mxu0 %v12223_v28  ;;  %v5913_v28 = vsel %vm13730_vm9, %v10419_v13, %v5912_v9 }
 0x12a   : > { %5763 = vst [vmem:[#allocation3 + $0x4c] sm:$0xf] %v5731_v39  ;;  %5764 = vst [vmem:[#allocation3 + $0x70] sm:$0xf] %v5732_v63  ;;  %v1313_v4 = vld [vmem:[#allocation2 + $0x128] sm:$0xf]  ;;  %10897 = vmatprep.subr.bf16.mxu0 %v12226_v51  ;;  %v5916_v20 = vsel %vm13730_vm9, %v5914_v46, %v5915_v38  ;;  %v6185_v13 = vsel %vm13730_vm9, %v10435_v56, %v6184_v31  ;;  %11228 = vmatpush3.bf16.msra.mxu1 %v12285_v2 }
 0x12b   : > { %2167 = vst [vmem:[#allocation3 + $0x108] sm:$0xf] %v2043_v44  ;;  %v6186_v1 = vrot.slane %v6184_v31, 4  ;;  %v1314_v47 = vld [vmem:[#allocation2 + $0x12c] sm:$0x1]  ;;  %v10089_v7 = vrot.slane %v1312_v60, 9 }
 0x12c   : > { %v1585_v22 = vld [vmem:[#allocation2 + $0x128] sm:$0xf]  ;;  %v12229_v3 = vld [vmem:[%s16767_s5 + $0x10] sm:$0xff]   ;;  %v1421_v43 = vrot.slane %v1313_v4, 5  ;;  %v1424_v39 = vrot.slane %v1314_v47, 5  ;;  %v12232_v51 = vld [vmem:[%s16767_s5 + $0x40] sm:$0xff]  }
 0x12d   : > { %v12230_v50 = vld [vmem:[%s16767_s5 + $0x48] sm:$0xff]   ;;  %1617 = vst [vmem:[#allocation3 + $0x94] sm:$0xf] %v1585_v22  ;;  %v5460_v37 = vld [vmem:[#allocation2 + $0x90] sm:$0xc]  ;;  %v3126_v34 = vld [vmem:[#allocation3 + $0x98] sm:$0xff]  ;;  %v6188_v9 = vsel %vm13730_vm9, %v6186_v1, %v6187_v36  ;;  %10898 = vmatpush3.bf16.msra.mxu0 %v12229_v3 }
 0x12e   : > { %v1586_v23 = vld [vmem:[#allocation2 + $0x12c] sm:$0xf]  ;;  %v5461_v63 = vld [vmem:[#allocation2 + $0x94] sm:$0xf]  ;;  %v1422_v8 = vsel %vm13708_vm7, %v10089_v7, %v1421_v43  ;;  %v1423_v33 = vrot.slane %v1421_v43, 4  ;;  %v3131_v40 = vld [vmem:[#allocation3 + $0xbc] sm:$0xff]  ;;  %10899 = vmatprep.subr.bf16.mxu0 %v12230_v50 }
 0x12f   : > { %1618 = vst [vmem:[#allocation3 + $0xb8] sm:$0xf] %v1586_v23  ;;  %v12231_v57 = vld [vmem:[%s16767_s5 + $0x8] sm:$0xff]   ;;  %v5462_v58 = vld [vmem:[#allocation2 + $0x98] sm:$0x3]  ;;  %v5569_v21 = vrot.slane %v5461_v63, 6  ;;  %v10204_v31 = vcombine.low %v3126_v34, %v3131_v40 }
 0x130   : > { %1553 = vst [vmem:[#allocation3 + $0x90] sm:$0xf] %v1422_v8  ;;  %v1425_v14 = vsel %vm13708_vm7, %v1423_v33, %v1424_v39  ;;  %v10402_v27 = vrot.slane %v5460_v37, 10  ;;  %v13913_v44 = vld [vmem:[#allocation3] sm:$0xff]  ;;  %v5572_v46 = vrot.slane %v5462_v58, 6  ;;  %v12238_v4 = vld [vmem:[%s16767_s5 + $0x178] sm:$0xff]  }
 0x131   : > { %v13915_v54 = vld [vmem:[#allocation3 + $0x24] sm:$0xff]  ;;  %1554 = vst [vmem:[#allocation3 + $0xb4] sm:$0xf] %v1425_v14  ;;  %v5571_v38 = vrot.slane %v5569_v21, 4  ;;  %6039 = vst [vmem:[#allocation3 + $0xe0] sm:$0xf] %v5913_v28  ;;  %10900 = vmatpush3.bf16.msra.mxu0 %v12231_v57  ;;  %4794 = vmatmul.mubr.bf16.gmra.mxu1 %v10204_v31 }
 0x132   : > { %v12244_v17 = vld [vmem:[#allocation3 + $0xe4] ss:$36 sps:$4 sm:$0xff]   ;;  %6040 = vst [vmem:[#allocation3 + $0x104] sm:$0xf] %v5916_v20  ;;  %v1657_v2 = vld [vmem:[#allocation2 + $0x158] sm:$0x8]  ;;  %10901 = vmatprep.subr.bf16.mxu0 %v12232_v51  ;;  %v10184_v34 = vcombine.low %v13913_v44, %v13915_v54  ;;  %v5570_v51 = vsel %vm13730_vm9, %v10402_v27, %v5569_v21 }
 0x133   : > { %v12235_v56 = vld [vmem:[%s16767_s5] sm:$0xff]   ;;  %6311 = vst [vmem:[#allocation3 + $0xe4] sm:$0xf] %v6185_v13  ;;  %6312 = vst [vmem:[#allocation3 + $0x108] sm:$0xf] %v6188_v9  ;;  %v10107_v1 = vrot.slane %v1657_v2, 11  ;;  %v5573_v20 = vsel %vm13730_vm9, %v5571_v38, %v5572_v46  ;;  %4801 = vmatprep.mubr.bf16.mxu1 %v12244_v17 }
 0x134   : > { %v1658_v36 = vld [vmem:[#allocation2 + $0x15c] sm:$0xf]  ;;  %v1659_v60 = vld [vmem:[#allocation2 + $0x160] sm:$0x7]  ;;  %v1932_v22 = vld [vmem:[#allocation2 + $0x1e4] sm:$0xe] }
 0x135   : > { %v1774_v47 = vrot.slane %v1658_v36, 7  ;;  %v1777_v7 = vrot.slane %v1659_v60, 7  ;;  %v5733_v3 = vld [vmem:[#allocation2 + $0x98] sm:$0xf]  ;;  %v5734_v50 = vld [vmem:[#allocation2 + $0x9c] sm:$0xf]  ;;  %10902 = vmatpush3.bf16.msra.mxu0 %v12235_v56 }
 0x136   : > { %v1933_v43 = vld [vmem:[#allocation2 + $0x1e8] sm:$0xf]  ;;  %v1934_v39 = vld [vmem:[#allocation2 + $0x1ec] sm:$0x1]  ;;  %v10123_v23 = vrot.slane %v1932_v22, 9  ;;  %v12239_v57 = vld [vmem:[%s16767_s5 + $0x138] sm:$0xff]   ;;  %11111 = vmatprep.subr.bf16.mxu0 %v12238_v4 }
 0x137   : > { %v1775_v63 = vsel %vm13688_vm3, %v10107_v1, %v1774_v47  ;;  %v1776_v28 = vrot.slane %v1774_v47, 4  ;;  %v2046_v8 = vrot.slane %v1933_v43, 5  ;;  %v2049_v33 = vrot.slane %v1934_v39, 5  ;;  %v13927_v58 = vld [vmem:[#allocation2 + $0xcc] sm:$0xc]  ;;  %v12248_v14 = vld [vmem:[%s16767_s5 + $0x170] sm:$0xff]  }
 0x138   : > { %1896 = vst [vmem:[#allocation3 + $0x128] sm:$0xf] %v1775_v63  ;;  %v5806_v13 = vld [vmem:[#allocation2 + $0xd0] sm:$0xf]  ;;  %v5807_v9 = vld [vmem:[#allocation2 + $0xd4] sm:$0x3]  ;;  %4617 = vmatmul.mubr.bf16.vlgmr.msra.gmra.mxu0 %v10184_v34 }
 0x139   : > { %v1778_v44 = vsel %vm13688_vm3, %v1776_v28, %v1777_v7  ;;  %v2047_v54 = vsel %vm13708_vm7, %v10123_v23, %v2046_v8  ;;  %v2048_v31 = vrot.slane %v2046_v8, 4  ;;  %v5919_v2 = vrot.slane %v5806_v13, 6  ;;  %v6077_v21 = vld [vmem:[#allocation2 + $0x1e0] sm:$0xc]  ;;  %v6078_v27 = vld [vmem:[#allocation2 + $0x1e4] sm:$0xf]  ;;  %11112 = vmatpush3.bf16.msra.mxu0 %v12239_v57  ;;  %4624 = vmatprep.mubr.bf16.mxu0 %v13879_v16 }
 0x13a   : > { %v13923_v37 = vld [vmem:[#allocation3 + $0xe0] sm:$0xff]  ;;  %v13945_v38 = vld [vmem:[#allocation3 + $0x48] sm:$0xff]  ;;  %v13949_v17 = vld [vmem:[#allocation3 + $0x94] ss:$36 sps:$4 sm:$0xff]   ;;  %1897 = vst [vmem:[#allocation3 + $0x14c] sm:$0xf] %v1778_v44  ;;  %11113 = vmatprep.subr.bf16.mxu0 %v12248_v14 }
 0x13b   : > { %v3141_v40 = vld [vmem:[#allocation3 + $0x104] sm:$0xff]  ;;  %v13947_v46 = vld [vmem:[#allocation3 + $0x6c] sm:$0xff]  ;;  %2168 = vst [vmem:[#allocation3 + $0x12c] sm:$0xf] %v2047_v54  ;;  %v10420_v36 = vrot.slane %v13927_v58, 10  ;;  %v5922_v60 = vrot.slane %v5807_v9, 6  ;;  %v2050_v56 = vsel %vm13708_vm7, %v2048_v31, %v2049_v33 }
 0x13c   : > { %v6079_v1 = vld [vmem:[#allocation2 + $0x1e8] sm:$0x3]  ;;  %v10213_v47 = vcombine.low %v13923_v37, %v3141_v40  ;;  %5701 = vst [vmem:[#allocation3 + $0x90] sm:$0xf] %v5570_v51  ;;  %5702 = vst [vmem:[#allocation3 + $0xb4] sm:$0xf] %v5573_v20  ;;  %v10193_v34 = vcombine.low %v13945_v38, %v13947_v46 }
 0x13d   : > { %5765 = vst [vmem:[#allocation3 + $0x94] sm:$0xf] %v5733_v3  ;;  %5766 = vst [vmem:[#allocation3 + $0xb8] sm:$0xf] %v5734_v50  ;;  %v5921_v7 = vrot.slane %v5919_v2, 4  ;;  %v12295_v39 = vld [vmem:[%s16767_s5 + $0x1e0] sm:$0xff]   ;;  %v5920_v31 = vsel %vm13730_vm9, %v10420_v36, %v5919_v2 }
 0x13e   : > { %v1315_v22 = vld [vmem:[#allocation2 + $0x13c] sm:$0xe]  ;;  %v1316_v43 = vld [vmem:[#allocation2 + $0x140] sm:$0xf]  ;;  %2169 = vst [vmem:[#allocation3 + $0x150] sm:$0xf] %v2050_v56  ;;  %11229 = vmatprep.subr.bf16.mxu1 %v12295_v39  ;;  %4802 = vmatmul.mubr.bf16.gmra.mxu1 %v10213_v47 }
 0x13f   : > { %v10436_v23 = vrot.slane %v6077_v21, 10  ;;  %v6191_v63 = vrot.slane %v6078_v27, 6  ;;  %v6194_v4 = vrot.slane %v6079_v1, 6  ;;  %v1317_v28 = vld [vmem:[#allocation2 + $0x144] sm:$0x1]  ;;  %v10090_v37 = vrot.slane %v1315_v22, 9 }
 0x140   : > { %v1428_v8 = vrot.slane %v1316_v43, 5  ;;  %v1431_v3 = vrot.slane %v1317_v28, 5  ;;  %v1587_v50 = vld [vmem:[#allocation2 + $0x140] sm:$0xf]  ;;  %v1588_v58 = vld [vmem:[#allocation2 + $0x144] sm:$0xf]  ;;  %v5923_v14 = vsel %vm13730_vm9, %v5921_v7, %v5922_v60  ;;  %4625 = vmatmul.mubr.bf16.gmra.mxu0 %v10193_v34 }
 0x141   : > { %v12249_v33 = vld [vmem:[%s16767_s5 + $0x130] sm:$0xff]   ;;  %v6193_v40 = vrot.slane %v6191_v63, 4  ;;  %1619 = vst [vmem:[#allocation3 + $0xdc] sm:$0xf] %v1587_v50  ;;  %1620 = vst [vmem:[#allocation3 + $0x100] sm:$0xf] %v1588_v58  ;;  %v6192_v1 = vsel %vm13730_vm9, %v10436_v23, %v6191_v63  ;;  %4632 = vmatprep.mubr.bf16.mxu0 %v13949_v17 }
 0x142   : > { %v5463_v51 = vld [vmem:[#allocation2 + $0xa8] sm:$0xc]  ;;  %v5464_v20 = vld [vmem:[#allocation2 + $0xac] sm:$0xf]  ;;  %v1429_v13 = vsel %vm13708_vm7, %v10090_v37, %v1428_v8  ;;  %v1430_v9 = vrot.slane %v1428_v8, 4  ;;  %v12297_v54 = vld [vmem:[%s16767_s5 + $0x1a0] sm:$0xff]   ;;  %11114 = vmatpush3.bf16.msra.mxu0 %v12249_v33 }
 0x143   : > { %v5465_v57 = vld [vmem:[#allocation2 + $0xb0] sm:$0x3]  ;;  %v5576_v44 = vrot.slane %v5464_v20, 6  ;;  %v12258_v16 = vld [vmem:[%s16767_s5 + $0x168] sm:$0xff]   ;;  %1555 = vst [vmem:[#allocation3 + $0xd8] sm:$0xf] %v1429_v13  ;;  %v6195_v47 = vsel %vm13730_vm9, %v6193_v40, %v6194_v4  ;;  %11230 = vmatpush3.bf16.msra.mxu1 %v12297_v54 }
 0x144   : > { %v10403_v21 = vrot.slane %v5463_v51, 10  ;;  %v5579_v27 = vrot.slane %v5465_v57, 6  ;;  %v12260_v38 = vld [vmem:[%s16767_s5 + $0x128] sm:$0xff]   ;;  %v1432_v2 = vsel %vm13708_vm7, %v1430_v9, %v1431_v3  ;;  %v1660_v56 = vld [vmem:[#allocation2 + $0x170] sm:$0x8]  ;;  %v12270_v7 = vld [vmem:[%s16767_s5 + $0x160] sm:$0xff]   ;;  %11115 = vmatprep.subr.bf16.mxu0 %v12258_v16 }
 0x145   : > { %v3146_v46 = vld [vmem:[#allocation3 + $0x128] sm:$0xff]  ;;  %v5578_v36 = vrot.slane %v5576_v44, 4  ;;  %v1661_v60 = vld [vmem:[#allocation2 + $0x174] sm:$0xf]  ;;  %1556 = vst [vmem:[#allocation3 + $0xfc] sm:$0xf] %v1432_v2 }
 0x146   : > { %v1662_v22 = vld [vmem:[#allocation2 + $0x178] sm:$0x7]  ;;  %v10108_v43 = vrot.slane %v1660_v56, 11  ;;  %v1781_v39 = vrot.slane %v1661_v60, 7  ;;  %v1935_v23 = vld [vmem:[#allocation2 + $0x1fc] sm:$0xe]  ;;  %11116 = vmatpush3.bf16.msra.mxu0 %v12260_v38 }
 0x147   : > { %v3151_v63 = vld [vmem:[#allocation3 + $0x14c] sm:$0xff]  ;;  %v1784_v4 = vrot.slane %v1662_v22, 7  ;;  %v1936_v37 = vld [vmem:[#allocation2 + $0x200] sm:$0xf]  ;;  %v13990_v3 = vld [vmem:[#allocation3 + $0xb4] sm:$0xff]  ;;  %v10124_v51 = vrot.slane %v1935_v23, 9  ;;  %v5580_v56 = vsel %vm13730_vm9, %v5578_v36, %v5579_v27  ;;  %11117 = vmatprep.subr.bf16.mxu0 %v12270_v7 }
 0x148   : > { %v12250_v28 = vld [vmem:[#allocation3 + $0x12c] ss:$36 sps:$4 sm:$0xff]   ;;  %6041 = vst [vmem:[#allocation3 + $0x128] sm:$0xf] %v5920_v31  ;;  %6042 = vst [vmem:[#allocation3 + $0x14c] sm:$0xf] %v5923_v14  ;;  %v10222_v50 = vcombine.low %v3146_v46, %v3151_v63  ;;  %v1782_v58 = vsel %vm13688_vm3, %v10108_v43, %v1781_v39  ;;  %v5577_v46 = vsel %vm13730_vm9, %v10403_v21, %v5576_v44 }
 0x149   : > { %v13988_v8 = vld [vmem:[#allocation3 + $0x90] sm:$0xff]  ;;  %6313 = vst [vmem:[#allocation3 + $0x12c] sm:$0xf] %v6192_v1  ;;  %6314 = vst [vmem:[#allocation3 + $0x150] sm:$0xf] %v6195_v47  ;;  %v1783_v33 = vrot.slane %v1781_v39, 4  ;;  %4809 = vmatprep.mubr.bf16.mxu1 %v12250_v28 }
 0x14a   : > { %v1937_v40 = vld [vmem:[#allocation2 + $0x204] sm:$0x1]  ;;  %v13994_v20 = vld [vmem:[#allocation2 + $0xe4] sm:$0xc]  ;;  %v5735_v9 = vld [vmem:[#allocation2 + $0xb0] sm:$0xf]  ;;  %4810 = vmatmul.mubr.bf16.gmra.mxu1 %v10222_v50  ;;  %v10202_v38 = vcombine.low %v13988_v8, %v13990_v3 }
 0x14b   : > { %v12272_v13 = vld [vmem:[%s16767_s5 + $0x120] sm:$0xff]   ;;  %1898 = vst [vmem:[#allocation3 + $0x170] sm:$0xf] %v1782_v58  ;;  %v2053_v57 = vrot.slane %v1936_v37, 5  ;;  %v2056_v16 = vrot.slane %v1937_v40, 5  ;;  %v12282_v14 = vld [vmem:[%s16767_s5 + $0x158] sm:$0xff]   ;;  %v1785_v34 = vsel %vm13688_vm3, %v1783_v33, %v1784_v4 }
 0x14c   : > { %v5809_v54 = vld [vmem:[#allocation2 + $0xe8] sm:$0xf]  ;;  %v5810_v31 = vld [vmem:[#allocation2 + $0xec] sm:$0x3]  ;;  %v5736_v1 = vld [vmem:[#allocation2 + $0xb4] sm:$0xf]  ;;  %11118 = vmatpush3.bf16.msra.mxu0 %v12272_v13 }
 0x14d   : > { %v5926_v47 = vrot.slane %v5809_v54, 6  ;;  %v6080_v2 = vld [vmem:[#allocation2 + $0x1f8] sm:$0xc]  ;;  %1899 = vst [vmem:[#allocation3 + $0x194] sm:$0xf] %v1785_v34  ;;  %v2054_v60 = vsel %vm13708_vm7, %v10124_v51, %v2053_v57  ;;  %v2055_v22 = vrot.slane %v2053_v57, 4  ;;  %11119 = vmatprep.subr.bf16.mxu0 %v12282_v14  ;;  %4633 = vmatmul.mubr.bf16.gmra.mxu0 %v10202_v38 }
 0x14e   : > { %v10421_v17 = vrot.slane %v13994_v20, 10  ;;  %v6081_v43 = vld [vmem:[#allocation2 + $0x1fc] sm:$0xf]  ;;  %v6082_v39 = vld [vmem:[#allocation2 + $0x200] sm:$0x3]  ;;  %v5929_v21 = vrot.slane %v5810_v31, 6 }
 0x14f   : > { %2170 = vst [vmem:[#allocation3 + $0x174] sm:$0xf] %v2054_v60  ;;  %v5928_v44 = vrot.slane %v5926_v47, 4  ;;  %v6198_v23 = vrot.slane %v6081_v43, 6  ;;  %v1318_v63 = vld [vmem:[#allocation2 + $0x154] sm:$0xe]  ;;  %v2057_v28 = vsel %vm13708_vm7, %v2055_v22, %v2056_v16 }
 0x150   : > { %v12284_v27 = vld [vmem:[%s16767_s5 + $0x118] sm:$0xff]   ;;  %v10437_v4 = vrot.slane %v6080_v2, 10  ;;  %v6201_v37 = vrot.slane %v6082_v39, 6  ;;  %v12294_v50 = vld [vmem:[%s16767_s5 + $0x150] sm:$0xff]   ;;  %5703 = vst [vmem:[#allocation3 + $0xd8] sm:$0xf] %v5577_v46  ;;  %v5927_v14 = vsel %vm13730_vm9, %v10421_v17, %v5926_v47 }
 0x151   : > { %v12252_v36 = vld [vmem:[#allocation3 + $0xdc] ss:$36 sps:$4 sm:$0xff]   ;;  %v1319_v7 = vld [vmem:[#allocation2 + $0x158] sm:$0xf]  ;;  %5704 = vst [vmem:[#allocation3 + $0xfc] sm:$0xf] %v5580_v56  ;;  %v5930_v2 = vsel %vm13730_vm9, %v5928_v44, %v5929_v21  ;;  %11120 = vmatpush3.bf16.msra.mxu0 %v12284_v27 }
 0x152   : > { %5767 = vst [vmem:[#allocation3 + $0xdc] sm:$0xf] %v5735_v9  ;;  %5768 = vst [vmem:[#allocation3 + $0x100] sm:$0xf] %v5736_v1  ;;  %v6200_v58 = vrot.slane %v6198_v23, 4  ;;  %v10091_v8 = vrot.slane %v1318_v63, 9  ;;  %4640 = vmatprep.mubr.bf16.mxu0 %v12252_v36  ;;  %v6199_v43 = vsel %vm13730_vm9, %v10437_v4, %v6198_v23  ;;  %11121 = vmatprep.subr.bf16.mxu0 %v12294_v50 }
 0x153   : > { %2171 = vst [vmem:[#allocation3 + $0x198] sm:$0xf] %v2057_v28  ;;  %v1320_v33 = vld [vmem:[#allocation2 + $0x15c] sm:$0x1]  ;;  %v1589_v40 = vld [vmem:[#allocation2 + $0x158] sm:$0xf] }
 0x154   : > { %v1435_v3 = vrot.slane %v1319_v7, 5  ;;  %v1438_v51 = vrot.slane %v1320_v33, 5  ;;  %v1590_v20 = vld [vmem:[#allocation2 + $0x15c] sm:$0xf]  ;;  %1621 = vst [vmem:[#allocation3 + $0x124] sm:$0xf] %v1589_v40  ;;  %v6202_v39 = vsel %vm13730_vm9, %v6200_v58, %v6201_v37 }
 0x155   : > { %1622 = vst [vmem:[#allocation3 + $0x148] sm:$0xf] %v1590_v20  ;;  %v5466_v57 = vld [vmem:[#allocation2 + $0xc0] sm:$0xc]  ;;  %v5467_v16 = vld [vmem:[#allocation2 + $0xc4] sm:$0xf] }
 0x156   : > { %v5468_v54 = vld [vmem:[#allocation2 + $0xc8] sm:$0x3]  ;;  %v1436_v9 = vsel %vm13708_vm7, %v10091_v8, %v1435_v3  ;;  %v1437_v46 = vrot.slane %v1435_v3, 4  ;;  %v5583_v1 = vrot.slane %v5467_v16, 6  ;;  %v12296_v13 = vld [vmem:[%s16767_s5 + $0x110] sm:$0xff]   ;;  %v10404_v56 = vrot.slane %v5466_v57, 10 }
 0x157   : > { %1557 = vst [vmem:[#allocation3 + $0x120] sm:$0xf] %v1436_v9  ;;  %v5586_v60 = vrot.slane %v5468_v54, 6  ;;  %v3156_v22 = vld [vmem:[#allocation3 + $0x170] sm:$0xff]  ;;  %v1663_v27 = vld [vmem:[#allocation2 + $0x188] sm:$0x8]  ;;  %11122 = vmatpush3.bf16.msra.mxu0 %v12296_v13 }
 0x158   : > { %v1439_v63 = vsel %vm13708_vm7, %v1437_v46, %v1438_v51  ;;  %v5585_v38 = vrot.slane %v5583_v1, 4  ;;  %6043 = vst [vmem:[#allocation3 + $0x170] sm:$0xf] %v5927_v14  ;;  %v1664_v36 = vld [vmem:[#allocation2 + $0x18c] sm:$0xf]  ;;  %v10109_v37 = vrot.slane %v1663_v27, 11  ;;  %v5584_v50 = vsel %vm13730_vm9, %v10404_v56, %v5583_v1 }
 0x159   : > { %v3135_v31 = vld [vmem:[#allocation3 + $0xd8] sm:$0xff]  ;;  %1558 = vst [vmem:[#allocation3 + $0x144] sm:$0xf] %v1439_v63  ;;  %v5737_v23 = vld [vmem:[#allocation2 + $0xc8] sm:$0xf]  ;;  %v1788_v7 = vrot.slane %v1664_v36, 7 }
 0x15a   : > { %v3140_v34 = vld [vmem:[#allocation3 + $0xfc] sm:$0xff]  ;;  %v3161_v17 = vld [vmem:[#allocation3 + $0x194] sm:$0xff]  ;;  %v5738_v28 = vld [vmem:[#allocation2 + $0xcc] sm:$0xf]  ;;  %v5587_v33 = vsel %vm13730_vm9, %v5585_v38, %v5586_v60 }
 0x15b   : > { %v10211_v47 = vcombine.low %v3135_v31, %v3140_v34  ;;  %v12254_v44 = vld [vmem:[#allocation3 + $0x174] ss:$36 sps:$4 sm:$0xff]   ;;  %6044 = vst [vmem:[#allocation3 + $0x194] sm:$0xf] %v5930_v2  ;;  %v10231_v21 = vcombine.low %v3156_v22, %v3161_v17  ;;  %v1665_v4 = vld [vmem:[#allocation2 + $0x190] sm:$0x7]  ;;  %v1789_v57 = vsel %vm13688_vm3, %v10109_v37, %v1788_v7 }
 0x15c   : > { %6315 = vst [vmem:[#allocation3 + $0x174] sm:$0xf] %v6199_v43  ;;  %6316 = vst [vmem:[#allocation3 + $0x198] sm:$0xf] %v6202_v39  ;;  %4817 = vmatprep.mubr.bf16.mxu1 %v12254_v44  ;;  %v1938_v58 = vld [vmem:[#allocation2 + $0x214] sm:$0xe] }
 0x15d   : > { %4818 = vmatmul.mubr.bf16.gmra.mxu1 %v10231_v21  ;;  %v1791_v40 = vrot.slane %v1665_v4, 7  ;;  %v1939_v8 = vld [vmem:[#allocation2 + $0x218] sm:$0xf]  ;;  %v1940_v3 = vld [vmem:[#allocation2 + $0x21c] sm:$0x1]  ;;  %v10125_v51 = vrot.slane %v1938_v58, 9  ;;  %4641 = vmatmul.mubr.bf16.gmra.mxu0 %v10211_v47 }
 0x15e   : > { %v3145_v20 = vld [vmem:[#allocation3 + $0x120] sm:$0xff]  ;;  %v1790_v16 = vrot.slane %v1788_v7, 4  ;;  %v2060_v54 = vrot.slane %v1939_v8, 5  ;;  %v2063_v31 = vrot.slane %v1940_v3, 5  ;;  %v5811_v9 = vld [vmem:[#allocation2 + $0xfc] sm:$0xc] }
 0x15f   : > { %1900 = vst [vmem:[#allocation3 + $0x1b8] sm:$0xf] %v1789_v57  ;;  %v5812_v46 = vld [vmem:[#allocation2 + $0x100] sm:$0xf]  ;;  %v5813_v13 = vld [vmem:[#allocation2 + $0x104] sm:$0x3] }
 0x160   : > { %v10422_v1 = vrot.slane %v5811_v9, 10  ;;  %v12306_v34 = vld [vmem:[%s16767_s5 + $0x148] sm:$0xff]   ;;  %v1792_v56 = vsel %vm13688_vm3, %v1790_v16, %v1791_v40  ;;  %v2061_v60 = vsel %vm13708_vm7, %v10125_v51, %v2060_v54  ;;  %v2062_v22 = vrot.slane %v2060_v54, 4  ;;  %v12307_v39 = vld [vmem:[%s16767_s5 + $0x1d8] sm:$0xff]   ;;  %5705 = vst [vmem:[#allocation3 + $0x120] sm:$0xf] %v5584_v50 }
 0x161   : > { %v3150_v14 = vld [vmem:[#allocation3 + $0x144] sm:$0xff]  ;;  %v5933_v43 = vrot.slane %v5812_v46, 6  ;;  %1901 = vst [vmem:[#allocation3 + $0x1dc] sm:$0xf] %v1792_v56  ;;  %2172 = vst [vmem:[#allocation3 + $0x1bc] sm:$0xf] %v2061_v60  ;;  %11123 = vmatprep.subr.bf16.mxu0 %v12306_v34  ;;  %11231 = vmatprep.subr.bf16.mxu1 %v12307_v39 }
 0x162   : > { %v12256_v2 = vld [vmem:[#allocation3 + $0x124] ss:$36 sps:$4 sm:$0xff]   ;;  %5706 = vst [vmem:[#allocation3 + $0x144] sm:$0xf] %v5587_v33  ;;  %v5936_v63 = vrot.slane %v5813_v13, 6  ;;  %v10220_v44 = vcombine.low %v3145_v20, %v3150_v14  ;;  %v2064_v21 = vsel %vm13708_vm7, %v2062_v22, %v2063_v31  ;;  %v12309_v3 = vld [vmem:[%s16767_s5 + $0x198] sm:$0xff]  }
 0x163   : > { %5769 = vst [vmem:[#allocation3 + $0x124] sm:$0xf] %v5737_v23  ;;  %5770 = vst [vmem:[#allocation3 + $0x148] sm:$0xf] %v5738_v28  ;;  %v6083_v38 = vld [vmem:[#allocation2 + $0x210] sm:$0xc]  ;;  %4648 = vmatprep.mubr.bf16.mxu0 %v12256_v2  ;;  %11232 = vmatpush3.bf16.msra.mxu1 %v12309_v3  ;;  %v5934_v46 = vsel %vm13730_vm9, %v10422_v1, %v5933_v43 }
 0x164   : > { %v6084_v47 = vld [vmem:[#allocation2 + $0x214] sm:$0xf]  ;;  %v12308_v17 = vld [vmem:[%s16767_s5 + $0x108] sm:$0xff]   ;;  %v5935_v27 = vrot.slane %v5933_v43, 4  ;;  %v6085_v36 = vld [vmem:[#allocation2 + $0x218] sm:$0x3] }
 0x165   : > { %v10438_v4 = vrot.slane %v6083_v38, 10  ;;  %v1321_v23 = vld [vmem:[#allocation2 + $0x16c] sm:$0xe]  ;;  %2173 = vst [vmem:[#allocation3 + $0x1e0] sm:$0xf] %v2064_v21  ;;  %v6205_v28 = vrot.slane %v6084_v47, 6  ;;  %11124 = vmatpush3.bf16.msra.mxu0 %v12308_v17 }
 0x166   : > { %v6208_v37 = vrot.slane %v6085_v36, 6  ;;  %v1322_v7 = vld [vmem:[#allocation2 + $0x170] sm:$0xf]  ;;  %v1323_v58 = vld [vmem:[#allocation2 + $0x174] sm:$0x1]  ;;  %v10092_v50 = vrot.slane %v1321_v23, 9  ;;  %4649 = vmatmul.mubr.bf16.gmra.mxu0 %v10220_v44  ;;  %v5937_v13 = vsel %vm13730_vm9, %v5935_v27, %v5936_v63 }
 0x167   : > { %v1442_v33 = vrot.slane %v1322_v7, 5  ;;  %v1445_v40 = vrot.slane %v1323_v58, 5  ;;  %v1591_v8 = vld [vmem:[#allocation2 + $0x170] sm:$0xf]  ;;  %v6207_v51 = vrot.slane %v6205_v28, 4  ;;  %v6206_v56 = vsel %vm13730_vm9, %v10438_v4, %v6205_v28 }
 0x168   : > { %v1592_v20 = vld [vmem:[#allocation2 + $0x174] sm:$0xf]  ;;  %1623 = vst [vmem:[#allocation3 + $0x16c] sm:$0xf] %v1591_v8  ;;  %v5469_v57 = vld [vmem:[#allocation2 + $0xd8] sm:$0xc] }
 0x169   : > { %v1443_v16 = vsel %vm13708_vm7, %v10092_v50, %v1442_v33  ;;  %v1444_v54 = vrot.slane %v1442_v33, 4  ;;  %1624 = vst [vmem:[#allocation3 + $0x190] sm:$0xf] %v1592_v20  ;;  %v5470_v31 = vld [vmem:[#allocation2 + $0xdc] sm:$0xf]  ;;  %v10405_v34 = vrot.slane %v5469_v57, 10  ;;  %v6209_v60 = vsel %vm13730_vm9, %v6207_v51, %v6208_v37 }
 0x16a   : > { %v5471_v9 = vld [vmem:[#allocation2 + $0xe0] sm:$0x3]  ;;  %1559 = vst [vmem:[#allocation3 + $0x168] sm:$0xf] %v1443_v16  ;;  %v5590_v14 = vrot.slane %v5470_v31, 6  ;;  %v3166_v2 = vld [vmem:[#allocation3 + $0x1b8] sm:$0xff] }
 0x16b   : > { %v1446_v22 = vsel %vm13708_vm7, %v1444_v54, %v1445_v40  ;;  %v5593_v39 = vrot.slane %v5471_v9, 6  ;;  %v1666_v38 = vld [vmem:[#allocation2 + $0x1a0] sm:$0x8]  ;;  %v1667_v47 = vld [vmem:[#allocation2 + $0x1a4] sm:$0xf]  ;;  %v12314_v9 = vld [vmem:[%s16767_s5 + $0x1d0] sm:$0xff]  }
 0x16c   : > { %1560 = vst [vmem:[#allocation3 + $0x18c] sm:$0xf] %v1446_v22  ;;  %v5592_v1 = vrot.slane %v5590_v14, 4  ;;  %v1668_v43 = vld [vmem:[#allocation2 + $0x1a8] sm:$0x7]  ;;  %v10110_v63 = vrot.slane %v1666_v38, 11  ;;  %v5591_v51 = vsel %vm13730_vm9, %v10405_v34, %v5590_v14  ;;  %11233 = vmatprep.subr.bf16.mxu1 %v12314_v9 }
 0x16d   : > { %v1795_v17 = vrot.slane %v1667_v47, 7  ;;  %v3171_v44 = vld [vmem:[#allocation3 + $0x1dc] sm:$0xff]  ;;  %v1798_v27 = vrot.slane %v1668_v43, 7  ;;  %v1941_v36 = vld [vmem:[#allocation2 + $0x22c] sm:$0xe]  ;;  %v12315_v38 = vld [vmem:[%s16767_s5 + $0x190] sm:$0xff]  }
 0x16e   : > { %v12262_v21 = vld [vmem:[#allocation3 + $0x1bc] ss:$36 sps:$4 sm:$0xff]   ;;  %6045 = vst [vmem:[#allocation3 + $0x1b8] sm:$0xf] %v5934_v46  ;;  %6046 = vst [vmem:[#allocation3 + $0x1dc] sm:$0xf] %v5937_v13  ;;  %v10240_v4 = vcombine.low %v3166_v2, %v3171_v44  ;;  %v5594_v20 = vsel %vm13730_vm9, %v5592_v1, %v5593_v39  ;;  %11234 = vmatpush3.bf16.msra.mxu1 %v12315_v38 }
 0x16f   : > { %6317 = vst [vmem:[#allocation3 + $0x1bc] sm:$0xf] %v6206_v56  ;;  %6318 = vst [vmem:[#allocation3 + $0x1e0] sm:$0xf] %v6209_v60  ;;  %v1796_v23 = vsel %vm13688_vm3, %v10110_v63, %v1795_v17  ;;  %v1797_v28 = vrot.slane %v1795_v17, 4  ;;  %4825 = vmatprep.mubr.bf16.mxu1 %v12262_v21  ;;  %v10126_v33 = vrot.slane %v1941_v36, 9 }
 0x170   : > { %v1942_v37 = vld [vmem:[#allocation2 + $0x230] sm:$0xf]  ;;  %v1943_v7 = vld [vmem:[#allocation2 + $0x234] sm:$0x1]  ;;  %v5739_v58 = vld [vmem:[#allocation2 + $0xe0] sm:$0xf]  ;;  %4826 = vmatmul.mubr.bf16.gmra.mxu1 %v10240_v4 }
 0x171   : > { %v5740_v50 = vld [vmem:[#allocation2 + $0xe4] sm:$0xf]  ;;  %1902 = vst [vmem:[#allocation3 + $0x200] sm:$0xf] %v1796_v23  ;;  %v2067_v40 = vrot.slane %v1942_v37, 5  ;;  %v2070_v8 = vrot.slane %v1943_v7, 5  ;;  %v1799_v57 = vsel %vm13688_vm3, %v1797_v28, %v1798_v27 }
 0x172   : > { %v5814_v3 = vld [vmem:[#allocation2 + $0x114] sm:$0xc]  ;;  %v5815_v16 = vld [vmem:[#allocation2 + $0x118] sm:$0xf]  ;;  %v5816_v54 = vld [vmem:[#allocation2 + $0x11c] sm:$0x3] }
 0x173   : > { %v10423_v31 = vrot.slane %v5814_v3, 10  ;;  %v3155_v46 = vld [vmem:[#allocation3 + $0x168] sm:$0xff]  ;;  %1903 = vst [vmem:[#allocation3 + $0x224] sm:$0xf] %v1799_v57  ;;  %v2068_v13 = vsel %vm13708_vm7, %v10126_v33, %v2067_v40  ;;  %v2069_v2 = vrot.slane %v2067_v40, 4  ;;  %v5940_v34 = vrot.slane %v5815_v16, 6 }
 0x174   : > { %v5943_v14 = vrot.slane %v5816_v54, 6  ;;  %v6086_v56 = vld [vmem:[#allocation2 + $0x228] sm:$0xc]  ;;  %2174 = vst [vmem:[#allocation3 + $0x204] sm:$0xf] %v2068_v13  ;;  %v3160_v47 = vld [vmem:[#allocation3 + $0x18c] sm:$0xff] }
 0x175   : > { %v6087_v60 = vld [vmem:[#allocation2 + $0x22c] sm:$0xf]  ;;  %v6088_v22 = vld [vmem:[#allocation2 + $0x230] sm:$0x3]  ;;  %v10439_v39 = vrot.slane %v6086_v56, 10  ;;  %v2071_v43 = vsel %vm13708_vm7, %v2069_v2, %v2070_v8  ;;  %v5942_v63 = vrot.slane %v5940_v34, 4  ;;  %v10229_v44 = vcombine.low %v3155_v46, %v3160_v47 }
 0x176   : > { %v12264_v1 = vld [vmem:[#allocation3 + $0x16c] ss:$36 sps:$4 sm:$0xff]   ;;  %v6212_v17 = vrot.slane %v6087_v60, 6  ;;  %5707 = vst [vmem:[#allocation3 + $0x168] sm:$0xf] %v5591_v51  ;;  %v6215_v21 = vrot.slane %v6088_v22, 6  ;;  %v5941_v3 = vsel %vm13730_vm9, %v10423_v31, %v5940_v34 }
 0x177   : > { %5708 = vst [vmem:[#allocation3 + $0x18c] sm:$0xf] %v5594_v20  ;;  %5771 = vst [vmem:[#allocation3 + $0x16c] sm:$0xf] %v5739_v58  ;;  %v1324_v27 = vld [vmem:[#allocation2 + $0x184] sm:$0xe]  ;;  %4656 = vmatprep.mubr.bf16.mxu0 %v12264_v1  ;;  %v5944_v54 = vsel %vm13730_vm9, %v5942_v63, %v5943_v14 }
 0x178   : > { %5772 = vst [vmem:[#allocation3 + $0x190] sm:$0xf] %v5740_v50  ;;  %2175 = vst [vmem:[#allocation3 + $0x228] sm:$0xf] %v2071_v43  ;;  %v1325_v36 = vld [vmem:[#allocation2 + $0x188] sm:$0xf]  ;;  %4657 = vmatmul.mubr.bf16.gmra.mxu0 %v10229_v44  ;;  %v6213_v9 = vsel %vm13730_vm9, %v10439_v39, %v6212_v17 }
 0x179   : > { %v6214_v4 = vrot.slane %v6212_v17, 4  ;;  %v1326_v23 = vld [vmem:[#allocation2 + $0x18c] sm:$0x1]  ;;  %v10093_v28 = vrot.slane %v1324_v27, 9  ;;  %v1593_v37 = vld [vmem:[#allocation2 + $0x188] sm:$0xf] }
 0x17a   : > { %v1449_v7 = vrot.slane %v1325_v36, 5  ;;  %v1452_v33 = vrot.slane %v1326_v23, 5  ;;  %v1594_v40 = vld [vmem:[#allocation2 + $0x18c] sm:$0xf]  ;;  %1625 = vst [vmem:[#allocation3 + $0x1b4] sm:$0xf] %v1593_v37 }
 0x17b   : > { %v5472_v8 = vld [vmem:[#allocation2 + $0xf0] sm:$0xc]  ;;  %1626 = vst [vmem:[#allocation3 + $0x1d8] sm:$0xf] %v1594_v40  ;;  %v5473_v58 = vld [vmem:[#allocation2 + $0xf4] sm:$0xf]  ;;  %v6216_v46 = vsel %vm13730_vm9, %v6214_v4, %v6215_v21 }
 0x17c   : > { %v5474_v50 = vld [vmem:[#allocation2 + $0xf8] sm:$0x3]  ;;  %v1450_v51 = vsel %vm13708_vm7, %v10093_v28, %v1449_v7  ;;  %v1451_v20 = vrot.slane %v1449_v7, 4  ;;  %v5597_v57 = vrot.slane %v5473_v58, 6  ;;  %v3176_v16 = vld [vmem:[#allocation3 + $0x200] sm:$0xff]  ;;  %v10406_v13 = vrot.slane %v5472_v8, 10 }
 0x17d   : > { %1561 = vst [vmem:[#allocation3 + $0x1b0] sm:$0xf] %v1450_v51  ;;  %v5600_v2 = vrot.slane %v5474_v50, 6  ;;  %v12318_v34 = vld [vmem:[%s16767_s5 + $0x1c8] sm:$0xff]   ;;  %6047 = vst [vmem:[#allocation3 + $0x200] sm:$0xf] %v5941_v3 }
 0x17e   : > { %v1453_v31 = vsel %vm13708_vm7, %v1451_v20, %v1452_v33  ;;  %v5599_v14 = vrot.slane %v5597_v57, 4  ;;  %11235 = vmatprep.subr.bf16.mxu1 %v12318_v34  ;;  %v1669_v39 = vld [vmem:[#allocation2 + $0x1b8] sm:$0x8]  ;;  %v1670_v38 = vld [vmem:[#allocation2 + $0x1bc] sm:$0xf]  ;;  %v5598_v21 = vsel %vm13730_vm9, %v10406_v13, %v5597_v57  ;;  %v12319_v20 = vld [vmem:[%s16767_s5 + $0x188] sm:$0xff]  }
 0x17f   : > { %v3181_v56 = vld [vmem:[#allocation3 + $0x224] sm:$0xff]  ;;  %1562 = vst [vmem:[#allocation3 + $0x1d4] sm:$0xf] %v1453_v31  ;;  %v5741_v47 = vld [vmem:[#allocation2 + $0xf8] sm:$0xf]  ;;  %v10111_v63 = vrot.slane %v1669_v39, 11  ;;  %11236 = vmatpush3.bf16.msra.mxu1 %v12319_v20 }
 0x180   : > { %v12266_v60 = vld [vmem:[#allocation3 + $0x204] ss:$36 sps:$4 sm:$0xff]   ;;  %6048 = vst [vmem:[#allocation3 + $0x224] sm:$0xf] %v5944_v54  ;;  %v10249_v22 = vcombine.low %v3176_v16, %v3181_v56  ;;  %v5742_v1 = vld [vmem:[#allocation2 + $0xfc] sm:$0xf]  ;;  %v5601_v27 = vsel %vm13730_vm9, %v5599_v14, %v5600_v2 }
 0x181   : > { %6319 = vst [vmem:[#allocation3 + $0x204] sm:$0xf] %v6213_v9  ;;  %6320 = vst [vmem:[#allocation3 + $0x228] sm:$0xf] %v6216_v46  ;;  %4833 = vmatprep.mubr.bf16.mxu1 %v12266_v60  ;;  %v1671_v43 = vld [vmem:[#allocation2 + $0x1c0] sm:$0x7] }
 0x182   : > { %4834 = vmatmul.mubr.bf16.gmra.mxu1 %v10249_v22  ;;  %v1802_v17 = vrot.slane %v1670_v38, 7  ;;  %v1944_v44 = vld [vmem:[#allocation2 + $0x244] sm:$0xe]  ;;  %v1805_v36 = vrot.slane %v1671_v43, 7  ;;  %v1945_v4 = vld [vmem:[#allocation2 + $0x248] sm:$0xf] }
 0x183   : > { %v1946_v23 = vld [vmem:[#allocation2 + $0x24c] sm:$0x1]  ;;  %v10127_v28 = vrot.slane %v1944_v44, 9  ;;  %v2074_v40 = vrot.slane %v1945_v4, 5  ;;  %v5817_v58 = vld [vmem:[#allocation2 + $0x12c] sm:$0xc] }
 0x184   : > { %v3165_v37 = vld [vmem:[#allocation3 + $0x1b0] sm:$0xff]  ;;  %v1803_v7 = vsel %vm13688_vm3, %v10111_v63, %v1802_v17  ;;  %v1804_v33 = vrot.slane %v1802_v17, 4  ;;  %v2077_v8 = vrot.slane %v1946_v23, 5  ;;  %v10424_v51 = vrot.slane %v5817_v58, 10  ;;  %v12324_v31 = vld [vmem:[%s16767_s5 + $0x1c0] sm:$0xff]  }
 0x185   : > { %1904 = vst [vmem:[#allocation3 + $0x248] sm:$0xf] %v1803_v7  ;;  %v5818_v50 = vld [vmem:[#allocation2 + $0x130] sm:$0xf]  ;;  %v5819_v3 = vld [vmem:[#allocation2 + $0x134] sm:$0x3]  ;;  %v2075_v9 = vsel %vm13708_vm7, %v10127_v28, %v2074_v40  ;;  %11237 = vmatprep.subr.bf16.mxu1 %v12324_v31 }
 0x186   : > { %v3170_v57 = vld [vmem:[#allocation3 + $0x1d4] sm:$0xff]  ;;  %v1806_v54 = vsel %vm13688_vm3, %v1804_v33, %v1805_v36  ;;  %v2076_v46 = vrot.slane %v2074_v40, 4  ;;  %v5947_v13 = vrot.slane %v5818_v50, 6  ;;  %5709 = vst [vmem:[#allocation3 + $0x1b0] sm:$0xf] %v5598_v21  ;;  %v5950_v34 = vrot.slane %v5819_v3, 6 }
 0x187   : > { %v12268_v16 = vld [vmem:[#allocation3 + $0x1b4] ss:$36 sps:$4 sm:$0xff]   ;;  %5710 = vst [vmem:[#allocation3 + $0x1d4] sm:$0xf] %v5601_v27  ;;  %v10238_v2 = vcombine.low %v3165_v37, %v3170_v57  ;;  %1905 = vst [vmem:[#allocation3 + $0x26c] sm:$0xf] %v1806_v54 }
 0x188   : > { %5773 = vst [vmem:[#allocation3 + $0x1b4] sm:$0xf] %v5741_v47  ;;  %5774 = vst [vmem:[#allocation3 + $0x1d8] sm:$0xf] %v5742_v1  ;;  %v6089_v56 = vld [vmem:[#allocation2 + $0x240] sm:$0xc]  ;;  %4664 = vmatprep.mubr.bf16.mxu0 %v12268_v16  ;;  %v2078_v22 = vsel %vm13708_vm7, %v2076_v46, %v2077_v8  ;;  %v5948_v3 = vsel %vm13730_vm9, %v10424_v51, %v5947_v13 }
 0x189   : > { %2176 = vst [vmem:[#allocation3 + $0x24c] sm:$0xf] %v2075_v9  ;;  %v6090_v60 = vld [vmem:[#allocation2 + $0x244] sm:$0xf]  ;;  %v5949_v39 = vrot.slane %v5947_v13, 4  ;;  %v10440_v43 = vrot.slane %v6089_v56, 10  ;;  %4665 = vmatmul.mubr.bf16.gmra.mxu0 %v10238_v2 }
 0x18a   : > { %v12322_v14 = vld [vmem:[%s16767_s5 + $0x140] sm:$0xff]   ;;  %v6091_v38 = vld [vmem:[#allocation2 + $0x248] sm:$0x3]  ;;  %v1327_v47 = vld [vmem:[#allocation2 + $0x19c] sm:$0xe]  ;;  %v6219_v1 = vrot.slane %v6090_v60, 6 }
 0x18b   : > { %2177 = vst [vmem:[#allocation3 + $0x270] sm:$0xf] %v2078_v22  ;;  %v6222_v63 = vrot.slane %v6091_v38, 6  ;;  %v1328_v17 = vld [vmem:[#allocation2 + $0x1a0] sm:$0xf]  ;;  %11125 = vmatprep.subr.bf16.mxu0 %v12322_v14  ;;  %v10094_v21 = vrot.slane %v1327_v47, 9  ;;  %v5951_v20 = vsel %vm13730_vm9, %v5949_v39, %v5950_v34 }
 0x18c   : > { %v1329_v44 = vld [vmem:[#allocation2 + $0x1a4] sm:$0x1]  ;;  %v1456_v27 = vrot.slane %v1328_v17, 5  ;;  %v1595_v4 = vld [vmem:[#allocation2 + $0x1a0] sm:$0xf]  ;;  %v6221_v28 = vrot.slane %v6219_v1, 4  ;;  %v6220_v54 = vsel %vm13730_vm9, %v10440_v43, %v6219_v1 }
 0x18d   : > { %v1459_v36 = vrot.slane %v1329_v44, 5  ;;  %v12323_v23 = vld [vmem:[%s16767_s5 + $0x100] sm:$0xff]   ;;  %1627 = vst [vmem:[#allocation3 + $0x1fc] sm:$0xf] %v1595_v4  ;;  %v5475_v7 = vld [vmem:[#allocation2 + $0x108] sm:$0xc] }
 0x18e   : > { %v1596_v37 = vld [vmem:[#allocation2 + $0x1a4] sm:$0xf]  ;;  %v1457_v40 = vsel %vm13708_vm7, %v10094_v21, %v1456_v27  ;;  %v1458_v8 = vrot.slane %v1456_v27, 4  ;;  %v5476_v58 = vld [vmem:[#allocation2 + $0x10c] sm:$0xf]  ;;  %11126 = vmatpush3.bf16.msra.mxu0 %v12323_v23  ;;  %v6223_v9 = vsel %vm13730_vm9, %v6221_v28, %v6222_v63  ;;  %v10407_v31 = vrot.slane %v5475_v7, 10 }
 0x18f   : > { %v12325_v33 = vld [vmem:[%s16767_s5 + $0x180] sm:$0xff]   ;;  %1628 = vst [vmem:[#allocation3 + $0x220] sm:$0xf] %v1596_v37  ;;  %v5477_v50 = vld [vmem:[#allocation2 + $0x110] sm:$0x3]  ;;  %v5604_v57 = vrot.slane %v5476_v58, 6 }
 0x190   : > { %1563 = vst [vmem:[#allocation3 + $0x1f8] sm:$0xf] %v1457_v40  ;;  %11238 = vmatpush3.bf16.msra.mxu1 %v12325_v33  ;;  %v3186_v16 = vld [vmem:[#allocation3 + $0x248] sm:$0xff]  ;;  %v1460_v46 = vsel %vm13708_vm7, %v1458_v8, %v1459_v36  ;;  %v1672_v2 = vld [vmem:[#allocation2 + $0x1d0] sm:$0x8]  ;;  %v5607_v13 = vrot.slane %v5477_v50, 6 }
 0x191   : > { %v1673_v56 = vld [vmem:[#allocation2 + $0x1d4] sm:$0xf]  ;;  %1564 = vst [vmem:[#allocation3 + $0x21c] sm:$0xf] %v1460_v46  ;;  %v5606_v51 = vrot.slane %v5604_v57, 4  ;;  %v10112_v60 = vrot.slane %v1672_v2, 11  ;;  %v5605_v37 = vsel %vm13730_vm9, %v10407_v31, %v5604_v57 }
 0x192   : > { %v1674_v34 = vld [vmem:[#allocation2 + $0x1d8] sm:$0x7]  ;;  %v1809_v14 = vrot.slane %v1673_v56, 7  ;;  %v3191_v22 = vld [vmem:[#allocation3 + $0x26c] sm:$0xff]  ;;  %v1947_v47 = vld [vmem:[#allocation2 + $0x25c] sm:$0xe] }
 0x193   : > { %v12274_v39 = vld [vmem:[#allocation3 + $0x24c] ss:$36 sps:$4 sm:$0xff]   ;;  %v1812_v38 = vrot.slane %v1674_v34, 7  ;;  %6049 = vst [vmem:[#allocation3 + $0x248] sm:$0xf] %v5948_v3  ;;  %v10258_v43 = vcombine.low %v3186_v16, %v3191_v22  ;;  %v10128_v36 = vrot.slane %v1947_v47, 9  ;;  %v5608_v7 = vsel %vm13730_vm9, %v5606_v51, %v5607_v13 }
 0x194   : > { %6050 = vst [vmem:[#allocation3 + $0x26c] sm:$0xf] %v5951_v20  ;;  %6321 = vst [vmem:[#allocation3 + $0x24c] sm:$0xf] %v6220_v54  ;;  %v1810_v1 = vsel %vm13688_vm3, %v10112_v60, %v1809_v14  ;;  %v1811_v63 = vrot.slane %v1809_v14, 4  ;;  %4841 = vmatprep.mubr.bf16.mxu1 %v12274_v39 }
 0x195   : > { %6322 = vst [vmem:[#allocation3 + $0x270] sm:$0xf] %v6223_v9  ;;  %v1948_v17 = vld [vmem:[#allocation2 + $0x260] sm:$0xf]  ;;  %v1949_v44 = vld [vmem:[#allocation2 + $0x264] sm:$0x1]  ;;  %4842 = vmatmul.mubr.bf16.gmra.mxu1 %v10258_v43 }
 0x196   : > { %v5743_v21 = vld [vmem:[#allocation2 + $0x110] sm:$0xf]  ;;  %v5744_v27 = vld [vmem:[#allocation2 + $0x114] sm:$0xf]  ;;  %1906 = vst [vmem:[#allocation3 + $0x290] sm:$0xf] %v1810_v1  ;;  %v1813_v33 = vsel %vm13688_vm3, %v1811_v63, %v1812_v38 }
 0x197   : > { %v2081_v4 = vrot.slane %v1948_v17, 5  ;;  %v2084_v23 = vrot.slane %v1949_v44, 5  ;;  %v5820_v28 = vld [vmem:[#allocation2 + $0x144] sm:$0xc]  ;;  %v5821_v40 = vld [vmem:[#allocation2 + $0x148] sm:$0xf] }
 0x198   : > { %v5822_v8 = vld [vmem:[#allocation2 + $0x14c] sm:$0x3]  ;;  %v10425_v58 = vrot.slane %v5820_v28, 10  ;;  %v3175_v50 = vld [vmem:[#allocation3 + $0x1f8] sm:$0xff]  ;;  %1907 = vst [vmem:[#allocation3 + $0x2b4] sm:$0xf] %v1813_v33 }
 0x199   : > { %v2082_v3 = vsel %vm13708_vm7, %v10128_v36, %v2081_v4  ;;  %v2083_v20 = vrot.slane %v2081_v4, 4  ;;  %v5954_v16 = vrot.slane %v5821_v40, 6  ;;  %v5957_v54 = vrot.slane %v5822_v8, 6  ;;  %v6092_v9 = vld [vmem:[#allocation2 + $0x258] sm:$0xc]  ;;  %v3180_v2 = vld [vmem:[#allocation3 + $0x21c] sm:$0xff] }
 0x19a   : > { %2178 = vst [vmem:[#allocation3 + $0x294] sm:$0xf] %v2082_v3  ;;  %v6093_v57 = vld [vmem:[#allocation2 + $0x25c] sm:$0xf]  ;;  %v6094_v46 = vld [vmem:[#allocation2 + $0x260] sm:$0x3]  ;;  %v10247_v60 = vcombine.low %v3175_v50, %v3180_v2 }
 0x19b   : > { %v10441_v31 = vrot.slane %v6092_v9, 10  ;;  %v12276_v56 = vld [vmem:[#allocation3 + $0x1fc] ss:$36 sps:$4 sm:$0xff]   ;;  %v2085_v51 = vsel %vm13708_vm7, %v2083_v20, %v2084_v23  ;;  %v5956_v13 = vrot.slane %v5954_v16, 4  ;;  %v6226_v34 = vrot.slane %v6093_v57, 6 }
 0x19c   : > { %5711 = vst [vmem:[#allocation3 + $0x1f8] sm:$0xf] %v5605_v37  ;;  %5712 = vst [vmem:[#allocation3 + $0x21c] sm:$0xf] %v5608_v7  ;;  %v6229_v14 = vrot.slane %v6094_v46, 6  ;;  %4672 = vmatprep.mubr.bf16.mxu0 %v12276_v56 }
 0x19d   : > { %5775 = vst [vmem:[#allocation3 + $0x1fc] sm:$0xf] %v5743_v21  ;;  %5776 = vst [vmem:[#allocation3 + $0x220] sm:$0xf] %v5744_v27  ;;  %v1330_v22 = vld [vmem:[#allocation2 + $0x1b4] sm:$0xe]  ;;  %4673 = vmatmul.mubr.bf16.gmra.mxu0 %v10247_v60  ;;  %v5955_v27 = vsel %vm13730_vm9, %v10425_v58, %v5954_v16  ;;  %v5958_v33 = vsel %vm13730_vm9, %v5956_v13, %v5957_v54  ;;  %v6227_v40 = vsel %vm13730_vm9, %v10441_v31, %v6226_v34 }
 0x19e   : > { %2179 = vst [vmem:[#allocation3 + $0x2b8] sm:$0xf] %v2085_v51  ;;  %v1331_v39 = vld [vmem:[#allocation2 + $0x1b8] sm:$0xf]  ;;  %v6228_v38 = vrot.slane %v6226_v34, 4  ;;  %v10095_v43 = vrot.slane %v1330_v22, 9 }
 0x19f   : > { %v1332_v47 = vld [vmem:[#allocation2 + $0x1bc] sm:$0x1]  ;;  %v1597_v1 = vld [vmem:[#allocation2 + $0x1b8] sm:$0xf]  ;;  %v1463_v63 = vrot.slane %v1331_v39, 5 }
 0x1a0   : > { %v1466_v17 = vrot.slane %v1332_v47, 5  ;;  %v1598_v44 = vld [vmem:[#allocation2 + $0x1bc] sm:$0xf]  ;;  %1629 = vst [vmem:[#allocation3 + $0x244] sm:$0xf] %v1597_v1  ;;  %v6230_v8 = vsel %vm13730_vm9, %v6228_v38, %v6229_v14 }
 0x1a1   : > { %v5478_v36 = vld [vmem:[#allocation2 + $0x120] sm:$0xc]  ;;  %1630 = vst [vmem:[#allocation3 + $0x268] sm:$0xf] %v1598_v44  ;;  %v5479_v4 = vld [vmem:[#allocation2 + $0x124] sm:$0xf]  ;;  %v1464_v23 = vsel %vm13708_vm7, %v10095_v43, %v1463_v63 }
 0x1a2   : > { %v5480_v21 = vld [vmem:[#allocation2 + $0x128] sm:$0x3]  ;;  %v1465_v28 = vrot.slane %v1463_v63, 4  ;;  %v5611_v37 = vrot.slane %v5479_v4, 6  ;;  %v3196_v7 = vld [vmem:[#allocation3 + $0x290] sm:$0xff]  ;;  %v10408_v50 = vrot.slane %v5478_v36, 10 }
 0x1a3   : > { %1565 = vst [vmem:[#allocation3 + $0x240] sm:$0xf] %v1464_v23  ;;  %v5614_v3 = vrot.slane %v5480_v21, 6  ;;  %6051 = vst [vmem:[#allocation3 + $0x290] sm:$0xf] %v5955_v27  ;;  %v12334_v23 = vld [vmem:[%s16767_s5 + $0x238] sm:$0xff]  }
 0x1a4   : > { %v1467_v58 = vsel %vm13708_vm7, %v1465_v28, %v1466_v17  ;;  %v5613_v9 = vrot.slane %v5611_v37, 4  ;;  %v1675_v57 = vld [vmem:[#allocation2 + $0x1e8] sm:$0x8]  ;;  %v1676_v46 = vld [vmem:[#allocation2 + $0x1ec] sm:$0xf]  ;;  %v5612_v60 = vsel %vm13730_vm9, %v10408_v50, %v5611_v37  ;;  %11923 = vmatprep.subr.bf16.mxu0 %v12334_v23 }
 0x1a5   : > { %v3201_v20 = vld [vmem:[#allocation3 + $0x2b4] sm:$0xff]  ;;  %1566 = vst [vmem:[#allocation3 + $0x264] sm:$0xf] %v1467_v58  ;;  %v5745_v31 = vld [vmem:[#allocation2 + $0x128] sm:$0xf]  ;;  %v10113_v51 = vrot.slane %v1675_v57, 11 }
 0x1a6   : > { %v12278_v16 = vld [vmem:[#allocation3 + $0x294] ss:$36 sps:$4 sm:$0xff]   ;;  %6052 = vst [vmem:[#allocation3 + $0x2b4] sm:$0xf] %v5958_v33  ;;  %v10267_v54 = vcombine.low %v3196_v7, %v3201_v20  ;;  %v5746_v2 = vld [vmem:[#allocation2 + $0x12c] sm:$0xf]  ;;  %v5615_v14 = vsel %vm13730_vm9, %v5613_v9, %v5614_v3 }
 0x1a7   : > { %6323 = vst [vmem:[#allocation3 + $0x294] sm:$0xf] %v6227_v40  ;;  %6324 = vst [vmem:[#allocation3 + $0x2b8] sm:$0xf] %v6230_v8  ;;  %4849 = vmatprep.mubr.bf16.mxu1 %v12278_v16  ;;  %v1677_v56 = vld [vmem:[#allocation2 + $0x1f0] sm:$0x7] }
 0x1a8   : > { %4850 = vmatmul.mubr.bf16.gmra.mxu1 %v10267_v54  ;;  %v1816_v13 = vrot.slane %v1676_v46, 7  ;;  %v1950_v34 = vld [vmem:[#allocation2 + $0x274] sm:$0xe]  ;;  %v1819_v22 = vrot.slane %v1677_v56, 7  ;;  %v1951_v39 = vld [vmem:[#allocation2 + $0x278] sm:$0xf] }
 0x1a9   : > { %v1952_v38 = vld [vmem:[#allocation2 + $0x27c] sm:$0x1]  ;;  %v10129_v47 = vrot.slane %v1950_v34, 9  ;;  %v2088_v17 = vrot.slane %v1951_v39, 5  ;;  %v5823_v36 = vld [vmem:[#allocation2 + $0x15c] sm:$0xc] }
 0x1aa   : > { %v3185_v43 = vld [vmem:[#allocation3 + $0x240] sm:$0xff]  ;;  %v1817_v1 = vsel %vm13688_vm3, %v10113_v51, %v1816_v13  ;;  %v1818_v63 = vrot.slane %v1816_v13, 4  ;;  %v2091_v44 = vrot.slane %v1952_v38, 5  ;;  %v10426_v27 = vrot.slane %v5823_v36, 10  ;;  %v6095_v3 = vld [vmem:[#allocation2 + $0x270] sm:$0xc] }
 0x1ab   : > { %1908 = vst [vmem:[#allocation3 + $0x2d8] sm:$0xf] %v1817_v1  ;;  %v5824_v4 = vld [vmem:[#allocation2 + $0x160] sm:$0xf]  ;;  %v5825_v21 = vld [vmem:[#allocation2 + $0x164] sm:$0x3]  ;;  %v2089_v33 = vsel %vm13708_vm7, %v10129_v47, %v2088_v17 }
 0x1ac   : > { %v3190_v28 = vld [vmem:[#allocation3 + $0x264] sm:$0xff]  ;;  %v1820_v7 = vsel %vm13688_vm3, %v1818_v63, %v1819_v22  ;;  %v2090_v40 = vrot.slane %v2088_v17, 4  ;;  %v5961_v8 = vrot.slane %v5824_v4, 6  ;;  %5713 = vst [vmem:[#allocation3 + $0x240] sm:$0xf] %v5612_v60  ;;  %v5964_v58 = vrot.slane %v5825_v21, 6 }
 0x1ad   : > { %v12280_v37 = vld [vmem:[#allocation3 + $0x244] ss:$36 sps:$4 sm:$0xff]   ;;  %5714 = vst [vmem:[#allocation3 + $0x264] sm:$0xf] %v5615_v14  ;;  %v10256_v50 = vcombine.low %v3185_v43, %v3190_v28  ;;  %1909 = vst [vmem:[#allocation3 + $0x2fc] sm:$0xf] %v1820_v7 }
 0x1ae   : > { %5777 = vst [vmem:[#allocation3 + $0x244] sm:$0xf] %v5745_v31  ;;  %5778 = vst [vmem:[#allocation3 + $0x268] sm:$0xf] %v5746_v2  ;;  %v6096_v20 = vld [vmem:[#allocation2 + $0x274] sm:$0xf]  ;;  %4680 = vmatprep.mubr.bf16.mxu0 %v12280_v37  ;;  %v2092_v16 = vsel %vm13708_vm7, %v2090_v40, %v2091_v44  ;;  %v5962_v17 = vsel %vm13730_vm9, %v10426_v27, %v5961_v8 }
 0x1af   : > { %2180 = vst [vmem:[#allocation3 + $0x2dc] sm:$0xf] %v2089_v33  ;;  %v5963_v9 = vrot.slane %v5961_v8, 4  ;;  %v6097_v54 = vld [vmem:[#allocation2 + $0x278] sm:$0x3]  ;;  %v10442_v57 = vrot.slane %v6095_v3, 10  ;;  %4681 = vmatmul.mubr.bf16.gmra.mxu0 %v10256_v50 }
 0x1b0   : > { %v1333_v46 = vld [vmem:[#allocation2 + $0x1cc] sm:$0xe]  ;;  %2181 = vst [vmem:[#allocation3 + $0x300] sm:$0xf] %v2092_v16  ;;  %v6233_v56 = vrot.slane %v6096_v20, 6  ;;  %v6236_v31 = vrot.slane %v6097_v54, 6 }
 0x1b1   : > { %v1334_v2 = vld [vmem:[#allocation2 + $0x1d0] sm:$0xf]  ;;  %v1335_v51 = vld [vmem:[#allocation2 + $0x1d4] sm:$0x1]  ;;  %v10096_v13 = vrot.slane %v1333_v46, 9  ;;  %v5965_v44 = vsel %vm13730_vm9, %v5963_v9, %v5964_v58 }
 0x1b2   : > { %v1470_v34 = vrot.slane %v1334_v2, 5  ;;  %v1473_v60 = vrot.slane %v1335_v51, 5  ;;  %v1599_v14 = vld [vmem:[#allocation2 + $0x1d0] sm:$0xf]  ;;  %v6235_v22 = vrot.slane %v6233_v56, 4  ;;  %v6234_v23 = vsel %vm13730_vm9, %v10442_v57, %v6233_v56 }
 0x1b3   : > { %v1600_v39 = vld [vmem:[#allocation2 + $0x1d4] sm:$0xf]  ;;  %1631 = vst [vmem:[#allocation3 + $0x28c] sm:$0xf] %v1599_v14  ;;  %v5481_v38 = vld [vmem:[#allocation2 + $0x138] sm:$0xc] }
 0x1b4   : > { %v1471_v47 = vsel %vm13708_vm7, %v10096_v13, %v1470_v34  ;;  %v1472_v43 = vrot.slane %v1470_v34, 4  ;;  %1632 = vst [vmem:[#allocation3 + $0x2b0] sm:$0xf] %v1600_v39  ;;  %v5482_v1 = vld [vmem:[#allocation2 + $0x13c] sm:$0xf]  ;;  %v10409_v36 = vrot.slane %v5481_v38, 10  ;;  %v6237_v28 = vsel %vm13730_vm9, %v6235_v22, %v6236_v31 }
 0x1b5   : > { %v5483_v63 = vld [vmem:[#allocation2 + $0x140] sm:$0x3]  ;;  %1567 = vst [vmem:[#allocation3 + $0x288] sm:$0xf] %v1471_v47  ;;  %v5618_v4 = vrot.slane %v5482_v1, 6 }
 0x1b6   : > { %v3206_v21 = vld [vmem:[#allocation3 + $0x2d8] sm:$0xff]  ;;  %v1474_v37 = vsel %vm13708_vm7, %v1472_v43, %v1473_v60  ;;  %v5621_v7 = vrot.slane %v5483_v63, 6  ;;  %v1678_v33 = vld [vmem:[#allocation2 + $0x200] sm:$0x8]  ;;  %v1679_v40 = vld [vmem:[#allocation2 + $0x204] sm:$0xf] }
 0x1b7   : > { %1568 = vst [vmem:[#allocation3 + $0x2ac] sm:$0xf] %v1474_v37  ;;  %v5620_v27 = vrot.slane %v5618_v4, 4  ;;  %v1680_v8 = vld [vmem:[#allocation2 + $0x208] sm:$0x7]  ;;  %v10114_v50 = vrot.slane %v1678_v33, 11  ;;  %v5619_v14 = vsel %vm13730_vm9, %v10409_v36, %v5618_v4 }
 0x1b8   : > { %v1823_v58 = vrot.slane %v1679_v40, 7  ;;  %v3211_v3 = vld [vmem:[#allocation3 + $0x2fc] sm:$0xff]  ;;  %v1826_v16 = vrot.slane %v1680_v8, 7  ;;  %v1953_v9 = vld [vmem:[#allocation2 + $0x28c] sm:$0xe] }
 0x1b9   : > { %v12286_v20 = vld [vmem:[#allocation3 + $0x2dc] ss:$36 sps:$4 sm:$0xff]   ;;  %6053 = vst [vmem:[#allocation3 + $0x2d8] sm:$0xf] %v5962_v17  ;;  %6054 = vst [vmem:[#allocation3 + $0x2fc] sm:$0xf] %v5965_v44  ;;  %v10276_v54 = vcombine.low %v3206_v21, %v3211_v3  ;;  %v5622_v1 = vsel %vm13730_vm9, %v5620_v27, %v5621_v7 }
 0x1ba   : > { %6325 = vst [vmem:[#allocation3 + $0x2dc] sm:$0xf] %v6234_v23  ;;  %6326 = vst [vmem:[#allocation3 + $0x300] sm:$0xf] %v6237_v28  ;;  %v1824_v57 = vsel %vm13688_vm3, %v10114_v50, %v1823_v58  ;;  %v1825_v46 = vrot.slane %v1823_v58, 4  ;;  %4857 = vmatprep.mubr.bf16.mxu1 %v12286_v20  ;;  %v10130_v51 = vrot.slane %v1953_v9, 9 }
 0x1bb   : > { %v1954_v56 = vld [vmem:[#allocation2 + $0x290] sm:$0xf]  ;;  %v1955_v31 = vld [vmem:[#allocation2 + $0x294] sm:$0x1]  ;;  %v5747_v2 = vld [vmem:[#allocation2 + $0x140] sm:$0xf]  ;;  %4858 = vmatmul.mubr.bf16.gmra.mxu1 %v10276_v54 }
 0x1bc   : > { %1910 = vst [vmem:[#allocation3 + $0x320] sm:$0xf] %v1824_v57  ;;  %v2095_v13 = vrot.slane %v1954_v56, 5  ;;  %v2098_v34 = vrot.slane %v1955_v31, 5  ;;  %v5826_v60 = vld [vmem:[#allocation2 + $0x174] sm:$0xc]  ;;  %v1827_v39 = vsel %vm13688_vm3, %v1825_v46, %v1826_v16 }
 0x1bd   : > { %v5748_v22 = vld [vmem:[#allocation2 + $0x144] sm:$0xf]  ;;  %v5827_v38 = vld [vmem:[#allocation2 + $0x178] sm:$0xf]  ;;  %v5828_v47 = vld [vmem:[#allocation2 + $0x17c] sm:$0x3] }
 0x1be   : > { %v3195_v43 = vld [vmem:[#allocation3 + $0x288] sm:$0xff]  ;;  %1911 = vst [vmem:[#allocation3 + $0x344] sm:$0xf] %v1827_v39  ;;  %v2096_v63 = vsel %vm13708_vm7, %v10130_v51, %v2095_v13  ;;  %v2097_v17 = vrot.slane %v2095_v13, 4  ;;  %v5968_v44 = vrot.slane %v5827_v38, 6  ;;  %v10427_v23 = vrot.slane %v5826_v60, 10  ;;  %v14208_v13 = vpop.f32.mrf.mxu1 }
 0x1bf   : > { %v6098_v21 = vld [vmem:[#allocation2 + $0x288] sm:$0xc]  ;;  %2182 = vst [vmem:[#allocation3 + $0x324] sm:$0xf] %v2096_v63  ;;  %v6099_v36 = vld [vmem:[#allocation2 + $0x28c] sm:$0xf] }
 0x1c0   : > { %v6100_v4 = vld [vmem:[#allocation2 + $0x290] sm:$0x3]  ;;  %v2099_v33 = vsel %vm13708_vm7, %v2097_v17, %v2098_v34  ;;  %v5971_v40 = vrot.slane %v5828_v47, 6  ;;  %v10443_v8 = vrot.slane %v6098_v21, 10  ;;  %v6240_v50 = vrot.slane %v6099_v36, 6  ;;  %v14212_v39 = vpop.f32.mrf.mxu1 }
 0x1c1   : > { %v3200_v28 = vld [vmem:[#allocation3 + $0x2ac] sm:$0xff]  ;;  %5715 = vst [vmem:[#allocation3 + $0x288] sm:$0xf] %v5619_v14  ;;  %2183 = vst [vmem:[#allocation3 + $0x348] sm:$0xf] %v2099_v33  ;;  %v5970_v27 = vrot.slane %v5968_v44, 4  ;;  %v5969_v47 = vsel %vm13730_vm9, %v10427_v23, %v5968_v44 }
 0x1c2   : > { %v12288_v37 = vld [vmem:[#allocation3 + $0x28c] ss:$36 sps:$4 sm:$0xff]   ;;  %5716 = vst [vmem:[#allocation3 + $0x2ac] sm:$0xf] %v5622_v1  ;;  %v10265_v7 = vcombine.low %v3195_v43, %v3200_v28  ;;  %v6243_v58 = vrot.slane %v6100_v4, 6  ;;  %v6242_v16 = vrot.slane %v6240_v50, 4  ;;  %v6241_v1 = vsel %vm13730_vm9, %v10443_v8, %v6240_v50  ;;  %v14224_v4 = vpop.f32.mrf.mxu1 }
 0x1c3   : > { %5779 = vst [vmem:[#allocation3 + $0x28c] sm:$0xf] %v5747_v2  ;;  %5780 = vst [vmem:[#allocation3 + $0x2b0] sm:$0xf] %v5748_v22  ;;  %v1336_v3 = vld [vmem:[#allocation2 + $0x1e4] sm:$0xe]  ;;  %4688 = vmatprep.mubr.bf16.mxu0 %v12288_v37  ;;  %v5972_v43 = vsel %vm13730_vm9, %v5970_v27, %v5971_v40 }
 0x1c4   : > { %v1337_v20 = vld [vmem:[#allocation2 + $0x1e8] sm:$0xf]  ;;  %v1338_v9 = vld [vmem:[#allocation2 + $0x1ec] sm:$0x1]  ;;  %v10097_v54 = vrot.slane %v1336_v3, 9  ;;  %4689 = vmatmul.mubr.bf16.gmra.mxu0 %v10265_v7  ;;  %v6244_v63 = vsel %vm13730_vm9, %v6242_v16, %v6243_v58  ;;  %v14226_v33 = vpop.f32.mrf.mxu1 }
 0x1c5   : > { %v1601_v57 = vld [vmem:[#allocation2 + $0x1e8] sm:$0xf]  ;;  %v1477_v46 = vrot.slane %v1337_v20, 5  ;;  %v1480_v56 = vrot.slane %v1338_v9, 5  ;;  %v1602_v31 = vld [vmem:[#allocation2 + $0x1ec] sm:$0xf] }
 0x1c6   : > { %1633 = vst [vmem:[#allocation3 + $0x2d4] sm:$0xf] %v1601_v57  ;;  %v5484_v51 = vld [vmem:[#allocation2 + $0x150] sm:$0xc]  ;;  %1634 = vst [vmem:[#allocation3 + $0x2f8] sm:$0xf] %v1602_v31  ;;  %v14228_v16 = vpop.f32.mrf.mxu1 }
 0x1c7   : > { %v5485_v2 = vld [vmem:[#allocation2 + $0x154] sm:$0xf]  ;;  %v5486_v34 = vld [vmem:[#allocation2 + $0x158] sm:$0x3]  ;;  %v1478_v60 = vsel %vm13708_vm7, %v10097_v54, %v1477_v46  ;;  %v1479_v14 = vrot.slane %v1477_v46, 4  ;;  %v3216_v38 = vld [vmem:[#allocation3 + $0x320] sm:$0xff] }
 0x1c8   : > { %v5625_v22 = vrot.slane %v5485_v2, 6  ;;  %1569 = vst [vmem:[#allocation3 + $0x2d0] sm:$0xf] %v1478_v60  ;;  %v10410_v21 = vrot.slane %v5484_v51, 10  ;;  %v5628_v36 = vrot.slane %v5486_v34, 6  ;;  %v3221_v28 = vld [vmem:[#allocation3 + $0x344] sm:$0xff] }
 0x1c9   : > { %v1481_v17 = vsel %vm13708_vm7, %v1479_v14, %v1480_v56  ;;  %v12290_v37 = vld [vmem:[#allocation3 + $0x324] ss:$36 sps:$4 sm:$0xff]   ;;  %6055 = vst [vmem:[#allocation3 + $0x320] sm:$0xf] %v5969_v47  ;;  %6056 = vst [vmem:[#allocation3 + $0x344] sm:$0xf] %v5972_v43  ;;  %v10285_v23 = vcombine.low %v3216_v38, %v3221_v28  ;;  %v14236_v47 = vpop.f32.mrf.mxu1 }
 0x1ca   : > { %1570 = vst [vmem:[#allocation3 + $0x2f4] sm:$0xf] %v1481_v17  ;;  %v5627_v44 = vrot.slane %v5625_v22, 4  ;;  %6327 = vst [vmem:[#allocation3 + $0x324] sm:$0xf] %v6241_v1  ;;  %4865 = vmatprep.mubr.bf16.mxu1 %v12290_v37  ;;  %v5626_v9 = vsel %vm13730_vm9, %v10410_v21, %v5625_v22 }
 0x1cb   : > { %6328 = vst [vmem:[#allocation3 + $0x348] sm:$0xf] %v6244_v63  ;;  %v1681_v40 = vld [vmem:[#allocation2 + $0x218] sm:$0x8]  ;;  %v1682_v8 = vld [vmem:[#allocation2 + $0x21c] sm:$0xf]  ;;  %4866 = vmatmul.mubr.bf16.gmra.mxu1 %v10285_v23 }
 0x1cc   : > { %v5749_v50 = vld [vmem:[#allocation2 + $0x158] sm:$0xf]  ;;  %v5750_v7 = vld [vmem:[#allocation2 + $0x15c] sm:$0xf]  ;;  %v1683_v27 = vld [vmem:[#allocation2 + $0x220] sm:$0x7]  ;;  %v5629_v54 = vsel %vm13730_vm9, %v5627_v44, %v5628_v36  ;;  %v14242_v44 = vpop.f32.mrf.mxu1 }
 0x1cd   : > { %v10115_v58 = vrot.slane %v1681_v40, 11  ;;  %v1830_v3 = vrot.slane %v1682_v8, 7  ;;  %v1956_v20 = vld [vmem:[#allocation2 + $0x2a4] sm:$0xe]  ;;  %v1833_v57 = vrot.slane %v1683_v27, 7 }
 0x1ce   : > { %v1957_v46 = vld [vmem:[#allocation2 + $0x2a8] sm:$0xf]  ;;  %v1958_v56 = vld [vmem:[#allocation2 + $0x2ac] sm:$0x1]  ;;  %v10131_v31 = vrot.slane %v1956_v20, 9 }
 0x1cf   : > { %v3205_v51 = vld [vmem:[#allocation3 + $0x2d0] sm:$0xff]  ;;  %v1831_v2 = vsel %vm13688_vm3, %v10115_v58, %v1830_v3  ;;  %v1832_v34 = vrot.slane %v1830_v3, 4  ;;  %v2102_v60 = vrot.slane %v1957_v46, 5  ;;  %v2105_v14 = vrot.slane %v1958_v56, 5  ;;  %v5829_v38 = vld [vmem:[#allocation2 + $0x18c] sm:$0xc]  ;;  %v14246_v56 = vpop.f32.mrf.mxu1 }
 0x1d0   : > { %1912 = vst [vmem:[#allocation3 + $0x368] sm:$0xf] %v1831_v2  ;;  %v5830_v43 = vld [vmem:[#allocation2 + $0x190] sm:$0xf]  ;;  %v5831_v22 = vld [vmem:[#allocation2 + $0x194] sm:$0x3] }
 0x1d1   : > { %v10428_v1 = vrot.slane %v5829_v38, 10  ;;  %v3210_v63 = vld [vmem:[#allocation3 + $0x2f4] sm:$0xff]  ;;  %v1834_v21 = vsel %vm13688_vm3, %v1832_v34, %v1833_v57  ;;  %v2103_v36 = vsel %vm13708_vm7, %v10131_v31, %v2102_v60  ;;  %v2104_v28 = vrot.slane %v2102_v60, 4  ;;  %5717 = vst [vmem:[#allocation3 + $0x2d0] sm:$0xf] %v5626_v9  ;;  %v14248_v60 = vpop.f32.mrf.mxu1 }
 0x1d2   : > { %v12292_v17 = vld [vmem:[#allocation3 + $0x2d4] ss:$36 sps:$4 sm:$0xff]   ;;  %v5975_v37 = vrot.slane %v5830_v43, 6  ;;  %5718 = vst [vmem:[#allocation3 + $0x2f4] sm:$0xf] %v5629_v54  ;;  %v10274_v23 = vcombine.low %v3205_v51, %v3210_v63  ;;  %v5978_v40 = vrot.slane %v5831_v22, 6 }
 0x1d3   : > { %5781 = vst [vmem:[#allocation3 + $0x2d4] sm:$0xf] %v5749_v50  ;;  %5782 = vst [vmem:[#allocation3 + $0x2f8] sm:$0xf] %v5750_v7  ;;  %v6101_v8 = vld [vmem:[#allocation2 + $0x2a0] sm:$0xc]  ;;  %4696 = vmatprep.mubr.bf16.mxu0 %v12292_v17  ;;  %v2106_v58 = vsel %vm13708_vm7, %v2104_v28, %v2105_v14 }
 0x1d4   : > { %1913 = vst [vmem:[#allocation3 + $0x38c] sm:$0xf] %v1834_v21  ;;  %2184 = vst [vmem:[#allocation3 + $0x36c] sm:$0xf] %v2103_v36  ;;  %v6102_v27 = vld [vmem:[#allocation2 + $0x2a4] sm:$0xf]  ;;  %4697 = vmatmul.mubr.bf16.gmra.mxu0 %v10274_v23  ;;  %v14252_v36 = vpop.f32.mrf.mxu1  ;;  %v5976_v28 = vsel %vm13730_vm9, %v10428_v1, %v5975_v37 }
 0x1d5   : > { %v5977_v3 = vrot.slane %v5975_v37, 4  ;;  %v6103_v20 = vld [vmem:[#allocation2 + $0x2a8] sm:$0x3]  ;;  %v10444_v57 = vrot.slane %v6101_v8, 10  ;;  %v1339_v46 = vld [vmem:[#allocation2 + $0x1fc] sm:$0xe] }
 0x1d6   : > { %2185 = vst [vmem:[#allocation3 + $0x390] sm:$0xf] %v2106_v58  ;;  %v6247_v50 = vrot.slane %v6102_v27, 6  ;;  %v6250_v7 = vrot.slane %v6103_v20, 6  ;;  %v1340_v9 = vld [vmem:[#allocation2 + $0x200] sm:$0xf] }
 0x1d7   : > { %v1341_v54 = vld [vmem:[#allocation2 + $0x204] sm:$0x1]  ;;  %v10098_v31 = vrot.slane %v1339_v46, 9  ;;  %v1484_v51 = vrot.slane %v1340_v9, 5  ;;  %v1603_v34 = vld [vmem:[#allocation2 + $0x200] sm:$0xf]  ;;  %v5979_v23 = vsel %vm13730_vm9, %v5977_v3, %v5978_v40 }
 0x1d8   : > { %v1487_v2 = vrot.slane %v1341_v54, 5  ;;  %v6249_v38 = vrot.slane %v6247_v50, 4  ;;  %v1604_v14 = vld [vmem:[#allocation2 + $0x204] sm:$0xf]  ;;  %1635 = vst [vmem:[#allocation3 + $0x31c] sm:$0xf] %v1603_v34  ;;  %v6248_v58 = vsel %vm13730_vm9, %v10444_v57, %v6247_v50 }
 0x1d9   : > { %v5487_v43 = vld [vmem:[#allocation2 + $0x168] sm:$0xc]  ;;  %v1485_v22 = vsel %vm13708_vm7, %v10098_v31, %v1484_v51  ;;  %v1486_v63 = vrot.slane %v1484_v51, 4  ;;  %1636 = vst [vmem:[#allocation3 + $0x340] sm:$0xf] %v1604_v14  ;;  %v14264_v51 = vpop.f32.mrf.mxu1 }
 0x1da   : > { %v5488_v17 = vld [vmem:[#allocation2 + $0x16c] sm:$0xf]  ;;  %v5489_v21 = vld [vmem:[#allocation2 + $0x170] sm:$0x3]  ;;  %1571 = vst [vmem:[#allocation3 + $0x318] sm:$0xf] %v1485_v22  ;;  %v6251_v20 = vsel %vm13730_vm9, %v6249_v38, %v6250_v7 }
 0x1db   : > { %v5632_v8 = vrot.slane %v5488_v17, 6  ;;  %v3226_v27 = vld [vmem:[#allocation3 + $0x368] sm:$0xff]  ;;  %v1488_v46 = vsel %vm13708_vm7, %v1486_v63, %v1487_v2  ;;  %v10411_v9 = vrot.slane %v5487_v43, 10  ;;  %v1684_v54 = vld [vmem:[#allocation2 + $0x230] sm:$0x8]  ;;  %v5635_v37 = vrot.slane %v5489_v21, 6  ;;  %v14266_v17 = vpop.f32.mrf.mxu1 }
 0x1dc   : > { %v1685_v31 = vld [vmem:[#allocation2 + $0x234] sm:$0xf]  ;;  %1572 = vst [vmem:[#allocation3 + $0x33c] sm:$0xf] %v1488_v46  ;;  %v1686_v40 = vld [vmem:[#allocation2 + $0x238] sm:$0x7] }
 0x1dd   : > { %v5634_v1 = vrot.slane %v5632_v8, 4  ;;  %v10116_v3 = vrot.slane %v1684_v54, 11  ;;  %v1837_v34 = vrot.slane %v1685_v31, 7  ;;  %v3231_v14 = vld [vmem:[#allocation3 + $0x38c] sm:$0xff]  ;;  %v1840_v57 = vrot.slane %v1686_v40, 7  ;;  %v12353_v21 = vld [vmem:[%s16768_s6 + $0x78] sm:$0xff]  }
 0x1de   : > { %v12298_v22 = vld [vmem:[#allocation3 + $0x36c] ss:$36 sps:$4 sm:$0xff]   ;;  %v1959_v50 = vld [vmem:[#allocation2 + $0x2bc] sm:$0xe]  ;;  %6057 = vst [vmem:[#allocation3 + $0x368] sm:$0xf] %v5976_v28  ;;  %v10294_v7 = vcombine.low %v3226_v27, %v3231_v14  ;;  %v5633_v27 = vsel %vm13730_vm9, %v10411_v9, %v5632_v8  ;;  %11359 = vmatprep.subr.bf16.mxu1 %v12353_v21 }
 0x1df   : > { %6058 = vst [vmem:[#allocation3 + $0x38c] sm:$0xf] %v5979_v23  ;;  %6329 = vst [vmem:[#allocation3 + $0x36c] sm:$0xf] %v6248_v58  ;;  %v1838_v2 = vsel %vm13688_vm3, %v10116_v3, %v1837_v34  ;;  %v1839_v38 = vrot.slane %v1837_v34, 4  ;;  %4873 = vmatprep.mubr.bf16.mxu1 %v12298_v22  ;;  %v10132_v54 = vrot.slane %v1959_v50, 9  ;;  %v14273_v58 = vpop.f32.mrf.mxu1 }
 0x1e0   : > { %6330 = vst [vmem:[#allocation3 + $0x390] sm:$0xf] %v6251_v20  ;;  %v1960_v43 = vld [vmem:[#allocation2 + $0x2c0] sm:$0xf]  ;;  %v1961_v63 = vld [vmem:[#allocation2 + $0x2c4] sm:$0x1]  ;;  %4874 = vmatmul.mubr.bf16.gmra.mxu1 %v10294_v7  ;;  %v5636_v20 = vsel %vm13730_vm9, %v5634_v1, %v5635_v37 }
 0x1e1   : > { %v5751_v46 = vld [vmem:[#allocation2 + $0x170] sm:$0xf]  ;;  %1914 = vst [vmem:[#allocation3 + $0x3b0] sm:$0xf] %v1838_v2  ;;  %v2109_v31 = vrot.slane %v1960_v43, 5  ;;  %v2112_v28 = vrot.slane %v1961_v63, 5  ;;  %v1841_v3 = vsel %vm13688_vm3, %v1839_v38, %v1840_v57  ;;  %v14283_v8 = vpop.f32.mrf.mxu1 }
 0x1e2   : > { %v5832_v23 = vld [vmem:[#allocation2 + $0x1a4] sm:$0xc]  ;;  %v5752_v40 = vld [vmem:[#allocation2 + $0x174] sm:$0xf]  ;;  %v5833_v34 = vld [vmem:[#allocation2 + $0x1a8] sm:$0xf] }
 0x1e3   : > { %v5834_v14 = vld [vmem:[#allocation2 + $0x1ac] sm:$0x3]  ;;  %v3215_v22 = vld [vmem:[#allocation3 + $0x318] sm:$0xff]  ;;  %1915 = vst [vmem:[#allocation3 + $0x3d4] sm:$0xf] %v1841_v3  ;;  %v2110_v50 = vsel %vm13708_vm7, %v10132_v54, %v2109_v31  ;;  %v2111_v2 = vrot.slane %v2109_v31, 4  ;;  %v14287_v26 = vpop.f32.mrf.mxu1 }
 0x1e4   : > { %v10429_v7 = vrot.slane %v5832_v23, 10  ;;  %v5982_v43 = vrot.slane %v5833_v34, 6  ;;  %v6104_v63 = vld [vmem:[#allocation2 + $0x2b8] sm:$0xc]  ;;  %2186 = vst [vmem:[#allocation3 + $0x3b4] sm:$0xf] %v2110_v50 }
 0x1e5   : > { %v5985_v9 = vrot.slane %v5834_v14, 6  ;;  %v6105_v1 = vld [vmem:[#allocation2 + $0x2bc] sm:$0xf]  ;;  %v6106_v37 = vld [vmem:[#allocation2 + $0x2c0] sm:$0x3]  ;;  %v10445_v45 = vrot.slane %v6104_v63, 10  ;;  %v2113_v21 = vsel %vm13708_vm7, %v2111_v2, %v2112_v28  ;;  %v14289_v6 = vpop.f32.mrf.mxu1 }
 0x1e6   : > { %v3220_v57 = vld [vmem:[#allocation3 + $0x33c] sm:$0xff]  ;;  %v5984_v3 = vrot.slane %v5982_v43, 4  ;;  %v6254_v59 = vrot.slane %v6105_v1, 6  ;;  %5719 = vst [vmem:[#allocation3 + $0x318] sm:$0xf] %v5633_v27  ;;  %v6257_v31 = vrot.slane %v6106_v37, 6 }
 0x1e7   : > { %v12300_v38 = vld [vmem:[#allocation3 + $0x31c] ss:$36 sps:$4 sm:$0xff]   ;;  %5720 = vst [vmem:[#allocation3 + $0x33c] sm:$0xf] %v5636_v20  ;;  %v10283_v54 = vcombine.low %v3215_v22, %v3220_v57  ;;  %2187 = vst [vmem:[#allocation3 + $0x3d8] sm:$0xf] %v2113_v21  ;;  %v5983_v21 = vsel %vm13730_vm9, %v10429_v7, %v5982_v43 }
 0x1e8   : > { %5783 = vst [vmem:[#allocation3 + $0x31c] sm:$0xf] %v5751_v46  ;;  %5784 = vst [vmem:[#allocation3 + $0x340] sm:$0xf] %v5752_v40  ;;  %v1342_v23 = vld [vmem:[#allocation2 + $0x214] sm:$0xe]  ;;  %4704 = vmatprep.mubr.bf16.mxu0 %v12300_v38  ;;  %v14291_v40 = vpop.f32.mrf.mxu1  ;;  %v6255_v15 = vsel %vm13730_vm9, %v10445_v45, %v6254_v59 }
 0x1e9   : > { %v1343_v34 = vld [vmem:[#allocation2 + $0x218] sm:$0xf]  ;;  %v6256_v14 = vrot.slane %v6254_v59, 4  ;;  %v1344_v50 = vld [vmem:[#allocation2 + $0x21c] sm:$0x1]  ;;  %v10099_v63 = vrot.slane %v1342_v23, 9  ;;  %4705 = vmatmul.mubr.bf16.gmra.mxu0 %v10283_v54  ;;  %v5986_v54 = vsel %vm13730_vm9, %v5984_v3, %v5985_v9 }
 0x1ea   : > { %v1491_v28 = vrot.slane %v1343_v34, 5  ;;  %v1494_v2 = vrot.slane %v1344_v50, 5  ;;  %v1606_v1 = vld [vmem:[#allocation2 + $0x21c] sm:$0xf]  ;;  %v5490_v27 = vld [vmem:[#allocation2 + $0x180] sm:$0xc]  ;;  %v14303_v34 = vpop.f32.mrf.mxu1 }
 0x1eb   : > { %1638 = vst [vmem:[#allocation3 + $0x388] sm:$0xf] %v1606_v1  ;;  %v5491_v46 = vld [vmem:[#allocation2 + $0x184] sm:$0xf]  ;;  %v5492_v20 = vld [vmem:[#allocation2 + $0x188] sm:$0x3]  ;;  %v6258_v23 = vsel %vm13730_vm9, %v6256_v14, %v6257_v31 }
 0x1ec   : > { %v1492_v22 = vsel %vm13708_vm7, %v10099_v63, %v1491_v28  ;;  %v1493_v37 = vrot.slane %v1491_v28, 4  ;;  %v5639_v57 = vrot.slane %v5491_v46, 6  ;;  %v3236_v38 = vld [vmem:[#allocation3 + $0x3b0] sm:$0xff]  ;;  %v10412_v63 = vrot.slane %v5490_v27, 10  ;;  %v14307_v43 = vpop.f32.mrf.mxu1  ;;  %v1687_v45 = vld [vmem:[#allocation2 + $0x248] sm:$0x8] }
 0x1ed   : > { %1573 = vst [vmem:[#allocation3 + $0x360] sm:$0xf] %v1492_v22  ;;  %v5642_v28 = vrot.slane %v5492_v20, 6  ;;  %6059 = vst [vmem:[#allocation3 + $0x3b0] sm:$0xf] %v5983_v21  ;;  %v10117_v27 = vrot.slane %v1687_v45, 11 }
 0x1ee   : > { %v1495_v50 = vsel %vm13708_vm7, %v1493_v37, %v1494_v2  ;;  %v3241_v1 = vld [vmem:[#allocation3 + $0x3d4] sm:$0xff]  ;;  %v5641_v7 = vrot.slane %v5639_v57, 4  ;;  %v1688_v9 = vld [vmem:[#allocation2 + $0x24c] sm:$0xf]  ;;  %v14309_v3 = vpop.f32.mrf.mxu1  ;;  %v5753_v31 = vld [vmem:[#allocation2 + $0x188] sm:$0xf]  ;;  %v5640_v37 = vsel %vm13730_vm9, %v10412_v63, %v5639_v57 }
 0x1ef   : > { %v12302_v46 = vld [vmem:[#allocation3 + $0x3b4] ss:$36 sps:$4 sm:$0xff]   ;;  %1574 = vst [vmem:[#allocation3 + $0x384] sm:$0xf] %v1495_v50  ;;  %6060 = vst [vmem:[#allocation3 + $0x3d4] sm:$0xf] %v5986_v54  ;;  %v10303_v59 = vcombine.low %v3236_v38, %v3241_v1 }
 0x1f0   : > { %6331 = vst [vmem:[#allocation3 + $0x3b4] sm:$0xf] %v6255_v15  ;;  %6332 = vst [vmem:[#allocation3 + $0x3d8] sm:$0xf] %v6258_v23  ;;  %4881 = vmatprep.mubr.bf16.mxu1 %v12302_v46  ;;  %v5754_v14 = vld [vmem:[#allocation2 + $0x18c] sm:$0xf]  ;;  %v5643_v21 = vsel %vm13730_vm9, %v5641_v7, %v5642_v28  ;;  %v14315_v50 = vpop.f32.mrf.mxu1 }
 0x1f1   : > { %4882 = vmatmul.mubr.bf16.gmra.mxu1 %v10303_v59  ;;  %v1689_v2 = vld [vmem:[#allocation2 + $0x250] sm:$0x7]  ;;  %v1844_v20 = vrot.slane %v1688_v9, 7  ;;  %v1962_v22 = vld [vmem:[#allocation2 + $0x2d4] sm:$0xe] }
 0x1f2   : > { %v1847_v54 = vrot.slane %v1689_v2, 7  ;;  %v1963_v38 = vld [vmem:[#allocation2 + $0x2d8] sm:$0xf]  ;;  %v1964_v15 = vld [vmem:[#allocation2 + $0x2dc] sm:$0x1]  ;;  %v10133_v23 = vrot.slane %v1962_v22, 9  ;;  %v14319_v63 = vpop.f32.mrf.mxu1 }
 0x1f3   : > { %v1845_v46 = vsel %vm13688_vm3, %v10117_v27, %v1844_v20  ;;  %v1846_v59 = vrot.slane %v1844_v20, 4  ;;  %v2116_v45 = vrot.slane %v1963_v38, 5  ;;  %v2119_v9 = vrot.slane %v1964_v15, 5  ;;  %v5837_v57 = vld [vmem:[#allocation2 + $0x1c4] sm:$0x3] }
 0x1f4   : > { %v3225_v1 = vld [vmem:[#allocation3 + $0x360] sm:$0xff]  ;;  %1916 = vst [vmem:[#allocation3 + $0x3f8] sm:$0xf] %v1845_v46  ;;  %v10430_v20 = vrot.slane %v5835_v5, 10  ;;  %v5992_v38 = vrot.slane %v5837_v57, 6  ;;  %v14325_v53 = vpop.f32.mrf.mxu1 }
 0x1f5   : > { %v12304_v7 = vld [vmem:[#allocation3 + $0x364] ss:$36 sps:$4 sm:$0xff]   ;;  %v1848_v2 = vsel %vm13688_vm3, %v1846_v59, %v1847_v54  ;;  %v2117_v22 = vsel %vm13708_vm7, %v10133_v23, %v2116_v45  ;;  %v2118_v61 = vrot.slane %v2116_v45, 4  ;;  %5721 = vst [vmem:[#allocation3 + $0x360] sm:$0xf] %v5640_v37  ;;  %v5991_v23 = vrot.slane %v5989_v55, 4 }
 0x1f6   : > { %v3230_v28 = vld [vmem:[#allocation3 + $0x384] sm:$0xff]  ;;  %5785 = vst [vmem:[#allocation3 + $0x364] sm:$0xf] %v5753_v31  ;;  %1917 = vst [vmem:[#allocation3 + $0x41c] sm:$0xf] %v1848_v2  ;;  %4712 = vmatprep.mubr.bf16.mxu0 %v12304_v7  ;;  %v14329_v5 = vpop.f32.mrf.mxu1 }
 0x1f7   : > { %5722 = vst [vmem:[#allocation3 + $0x384] sm:$0xf] %v5643_v21  ;;  %5786 = vst [vmem:[#allocation3 + $0x388] sm:$0xf] %v5754_v14  ;;  %v10292_v27 = vcombine.low %v3225_v1, %v3230_v28  ;;  %v6107_v15 = vld [vmem:[#allocation2 + $0x2d0] sm:$0xc]  ;;  %v2120_v54 = vsel %vm13708_vm7, %v2118_v61, %v2119_v9 }
 0x1f8   : > { %2188 = vst [vmem:[#allocation3 + $0x3fc] sm:$0xf] %v2117_v22  ;;  %v6108_v46 = vld [vmem:[#allocation2 + $0x2d4] sm:$0xf]  ;;  %v6109_v59 = vld [vmem:[#allocation2 + $0x2d8] sm:$0x3]  ;;  %v14331_v9 = vpop.f32.mrf.mxu1 }
 0x1f9   : > { %v10446_v62 = vrot.slane %v6107_v15, 10  ;;  %v1345_v37 = vld [vmem:[#allocation2 + $0x22c] sm:$0xe]  ;;  %4713 = vmatmul.mubr.bf16.gmra.mxu0 %v10292_v27  ;;  %2189 = vst [vmem:[#allocation3 + $0x420] sm:$0xf] %v2120_v54  ;;  %v6261_v31 = vrot.slane %v6108_v46, 6 }
 0x1fa   : > { %v6264_v14 = vrot.slane %v6109_v59, 6  ;;  %v1346_v21 = vld [vmem:[#allocation2 + $0x230] sm:$0xf]  ;;  %v1347_v1 = vld [vmem:[#allocation2 + $0x234] sm:$0x1]  ;;  %v10100_v45 = vrot.slane %v1345_v37, 9  ;;  %v5990_v59 = vsel %vm13730_vm9, %v10430_v20, %v5989_v55  ;;  %v5993_v37 = vsel %vm13730_vm9, %v5991_v23, %v5992_v38 }
 0x1fb   : > { %v1498_v57 = vrot.slane %v1346_v21, 5  ;;  %v1501_v28 = vrot.slane %v1347_v1, 5  ;;  %v1607_v2 = vld [vmem:[#allocation2 + $0x230] sm:$0xf]  ;;  %v6263_v7 = vrot.slane %v6261_v31, 4 }
 0x1fc   : > { %v1608_v22 = vld [vmem:[#allocation2 + $0x234] sm:$0xf]  ;;  %1639 = vst [vmem:[#allocation3 + $0x3ac] sm:$0xf] %v1607_v2  ;;  %v5493_v61 = vld [vmem:[#allocation2 + $0x198] sm:$0xc]  ;;  %v14339_v2 = vpop.f32.mrf.mxu1 }
 0x1fd   : > { %v1499_v27 = vsel %vm13708_vm7, %v10100_v45, %v1498_v57  ;;  %v1500_v15 = vrot.slane %v1498_v57, 4  ;;  %1640 = vst [vmem:[#allocation3 + $0x3d0] sm:$0xf] %v1608_v22  ;;  %v5494_v46 = vld [vmem:[#allocation2 + $0x19c] sm:$0xf]  ;;  %v10413_v21 = vrot.slane %v5493_v61, 10  ;;  %v6262_v45 = vsel %vm13730_vm9, %v10446_v62, %v6261_v31 }
 0x1fe   : > { %v5495_v54 = vld [vmem:[#allocation2 + $0x1a0] sm:$0x3]  ;;  %1575 = vst [vmem:[#allocation3 + $0x3a8] sm:$0xf] %v1499_v27  ;;  %v5646_v1 = vrot.slane %v5494_v46, 6  ;;  %16849 = vst [vmem:[#allocation40_spill] sm:$0xff] %v14339_v2  ;;  %v6265_v57 = vsel %vm13730_vm9, %v6263_v7, %v6264_v14  ;;  %v14347_v38 = vpop.f32.mrf.mxu1  ;;  %v14350_v46 = vpop.f32.mrf.mxu0 }
 0x1ff   : > { %v3246_v49 = vld [vmem:[#allocation3 + $0x3f8] sm:$0xff]  ;;  %v1502_v22 = vsel %vm13708_vm7, %v1500_v15, %v1501_v28  ;;  %v5649_v55 = vrot.slane %v5495_v54, 6  ;;  %16850 = vst [vmem:[#allocation41_spill] sm:$0xff] %v14347_v38  ;;  %v1690_v27 = vld [vmem:[#allocation2 + $0x260] sm:$0x8]  ;;  %16851 = vst [vmem:[#allocation42_spill] sm:$0xff] %v14350_v46 }
 0x200   : > { %1576 = vst [vmem:[#allocation3 + $0x3cc] sm:$0xf] %v1502_v22  ;;  %v5648_v20 = vrot.slane %v5646_v1, 4  ;;  %v3251_v23 = vld [vmem:[#allocation3 + $0x41c] sm:$0xff]  ;;  %6061 = vst [vmem:[#allocation3 + $0x3f8] sm:$0xf] %v5990_v59  ;;  %v14352_v28 = vpop.f32.mrf.mxu1  ;;  %v11873_v35 = vpop.f32.mrf.mxu0  ;;  %v5647_v59 = vsel %vm13730_vm9, %v10413_v21, %v5646_v1 }
 0x201   : > { %v12310_v61 = vld [vmem:[#allocation3 + $0x3fc] ss:$36 sps:$4 sm:$0xff]   ;;  %6062 = vst [vmem:[#allocation3 + $0x41c] sm:$0xf] %v5993_v37  ;;  %v10312_v62 = vcombine.low %v3246_v49, %v3251_v23  ;;  %v1691_v31 = vld [vmem:[#allocation2 + $0x264] sm:$0xf] }
 0x202   : > { %6333 = vst [vmem:[#allocation3 + $0x3fc] sm:$0xf] %v6262_v45  ;;  %6334 = vst [vmem:[#allocation3 + $0x420] sm:$0xf] %v6265_v57  ;;  %v1692_v14 = vld [vmem:[#allocation2 + $0x268] sm:$0x7]  ;;  %4889 = vmatprep.mubr.bf16.mxu1 %v12310_v61  ;;  %v5650_v49 = vsel %vm13730_vm9, %v5648_v20, %v5649_v55 }
 0x203   : > { %v10118_v7 = vrot.slane %v1690_v27, 11  ;;  %16852 = vst [vmem:[#allocation43_spill] sm:$0xff] %v14352_v28  ;;  %v5755_v15 = vld [vmem:[#allocation2 + $0x1a0] sm:$0xf]  ;;  %v5756_v54 = vld [vmem:[#allocation2 + $0x1a4] sm:$0xf]  ;;  %4890 = vmatmul.mubr.bf16.gmra.mxu1 %v10312_v62  ;;  %v14358_v27 = vpop.f32.mrf.mxu1  ;;  %v969_v28 = vpop.f32.mrf.mxu0 }
 0x204   : > { %v1851_v22 = vrot.slane %v1691_v31, 7  ;;  %v1854_v48 = vrot.slane %v1692_v14, 7  ;;  %v1967_v37 = vld [vmem:[#allocation2 + $0x2f4] sm:$0x1]  ;;  %v10134_v45 = vrot.slane %v1965_v42, 9  ;;  %v2123_v57 = vrot.slane %v1966_v41, 5 }
 0x205   : > { %v5838_v23 = vld [vmem:[#allocation2 + $0x1d4] sm:$0xc]  ;;  %16853 = vst [vmem:[#allocation44_spill] sm:$0xff] %v14358_v27  ;;  %v3235_v61 = vld [vmem:[#allocation3 + $0x3a8] sm:$0xff]  ;;  %v2126_v32 = vrot.slane %v1967_v37, 5  ;;  %v14364_v20 = vpop.f32.mrf.mxu1 }
 0x206   : > { %v1852_v31 = vsel %vm13688_vm3, %v10118_v7, %v1851_v22  ;;  %v1853_v14 = vrot.slane %v1851_v22, 4  ;;  %v5839_v35 = vld [vmem:[#allocation2 + $0x1d8] sm:$0xf]  ;;  %v10431_v62 = vrot.slane %v5838_v23, 10  ;;  %v2124_v21 = vsel %vm13708_vm7, %v10134_v45, %v2123_v57  ;;  %v5840_v55 = vld [vmem:[#allocation2 + $0x1dc] sm:$0x3]  ;;  %v11874_v23 = vpop.f32.mrf.mxu0 }
 0x207   : > { %1918 = vst [vmem:[#allocation3 + $0x440] sm:$0xf] %v1852_v31  ;;  %v2125_v1 = vrot.slane %v2123_v57, 4  ;;  %v5996_v42 = vrot.slane %v5839_v35, 6  ;;  %v6110_v41 = vld [vmem:[#allocation2 + $0x2e8] sm:$0xc]  ;;  %v14370_v35 = vpop.f32.mrf.mxu1 }
 0x208   : > { %16854 = vst [vmem:[#allocation45_spill] sm:$0xff] %v14364_v20  ;;  %v3240_v27 = vld [vmem:[#allocation3 + $0x3cc] sm:$0xff]  ;;  %v1855_v7 = vsel %vm13688_vm3, %v1853_v14, %v1854_v48  ;;  %2190 = vst [vmem:[#allocation3 + $0x444] sm:$0xf] %v2124_v21  ;;  %v5999_v22 = vrot.slane %v5840_v55, 6  ;;  %v10447_v48 = vrot.slane %v6110_v41, 10 }
 0x209   : > { %v12312_v38 = vld [vmem:[#allocation3 + $0x3ac] ss:$36 sps:$4 sm:$0xff]   ;;  %5723 = vst [vmem:[#allocation3 + $0x3a8] sm:$0xf] %v5647_v59  ;;  %5724 = vst [vmem:[#allocation3 + $0x3cc] sm:$0xf] %v5650_v49  ;;  %v10301_v28 = vcombine.low %v3235_v61, %v3240_v27  ;;  %v2127_v45 = vsel %vm13708_vm7, %v2125_v1, %v2126_v32  ;;  %v14372_v59 = vpop.f32.mrf.mxu1 }
 0x20a   : > { %v6111_v37 = vld [vmem:[#allocation2 + $0x2ec] sm:$0xf]  ;;  %5787 = vst [vmem:[#allocation3 + $0x3ac] sm:$0xf] %v5755_v15  ;;  %5788 = vst [vmem:[#allocation3 + $0x3d0] sm:$0xf] %v5756_v54  ;;  %4720 = vmatprep.mubr.bf16.mxu0 %v12312_v38  ;;  %v5997_v38 = vsel %vm13730_vm9, %v10431_v62, %v5996_v42 }
 0x20b   : > { %1919 = vst [vmem:[#allocation3 + $0x464] sm:$0xf] %v1855_v7  ;;  %v5998_v57 = vrot.slane %v5996_v42, 4  ;;  %v6112_v31 = vld [vmem:[#allocation2 + $0x2f0] sm:$0x3]  ;;  %16855 = vst [vmem:[#allocation46_spill] sm:$0xff] %v14370_v35  ;;  %4721 = vmatmul.mubr.bf16.gmra.mxu0 %v10301_v28  ;;  %v11015_v23 = vpop.f32.mrf.mxu1 }
 0x20c   : > { %2191 = vst [vmem:[#allocation3 + $0x468] sm:$0xf] %v2127_v45  ;;  %v6268_v14 = vrot.slane %v6111_v37, 6  ;;  %v6271_v21 = vrot.slane %v6112_v31, 6  ;;  %v1348_v55 = vld [vmem:[#allocation2 + $0x244] sm:$0xe] }
 0x20d   : > { %16856 = vst [vmem:[#allocation47_spill] sm:$0xff] %v14372_v59  ;;  %v1349_v54 = vld [vmem:[#allocation2 + $0x248] sm:$0xf]  ;;  %v1350_v49 = vld [vmem:[#allocation2 + $0x24c] sm:$0x1]  ;;  %v10101_v27 = vrot.slane %v1348_v55, 9  ;;  %v6000_v41 = vsel %vm13730_vm9, %v5998_v57, %v5999_v22  ;;  %v11016_v59 = vpop.f32.mrf.mxu1 }
 0x20e   : > { %v6270_v15 = vrot.slane %v6268_v14, 4  ;;  %v1505_v61 = vrot.slane %v1349_v54, 5  ;;  %v1508_v7 = vrot.slane %v1350_v49, 5  ;;  %v1609_v32 = vld [vmem:[#allocation2 + $0x248] sm:$0xf]  ;;  %v6269_v37 = vsel %vm13730_vm9, %v10447_v48, %v6268_v14 }
 0x20f   : > { %v1610_v1 = vld [vmem:[#allocation2 + $0x24c] sm:$0xf]  ;;  %1641 = vst [vmem:[#allocation3 + $0x3f4] sm:$0xf] %v1609_v32  ;;  %v5496_v28 = vld [vmem:[#allocation2 + $0x1b0] sm:$0xc]  ;;  %v14388_v48 = vadd.f32 %v11016_v59, %v11015_v23 }
 0x210   : > { %1642 = vst [vmem:[#allocation3 + $0x418] sm:$0xf] %v1610_v1  ;;  %v5497_v45 = vld [vmem:[#allocation2 + $0x1b4] sm:$0xf]  ;;  %v5498_v31 = vld [vmem:[#allocation2 + $0x1b8] sm:$0x3]  ;;  %v6272_v54 = vsel %vm13730_vm9, %v6270_v15, %v6271_v21  ;;  %v1506_v49 = vsel %vm13708_vm7, %v10101_v27, %v1505_v61  ;;  %v14392_v15 = vpop.f32.mrf.mxu1 }
 0x211   : > { %v3256_v55 = vld [vmem:[#allocation3 + $0x440] sm:$0xff]  ;;  %v1507_v62 = vrot.slane %v1505_v61, 4  ;;  %v5653_v42 = vrot.slane %v5497_v45, 6  ;;  %1577 = vst [vmem:[#allocation3 + $0x3f0] sm:$0xf] %v1506_v49  ;;  %v10414_v22 = vrot.slane %v5496_v28, 10 }
 0x212   : > { %v5656_v57 = vrot.slane %v5498_v31, 6  ;;  %16857 = vst [vmem:[#allocation48_spill] sm:$0xff] %v14388_v48  ;;  %16858 = vst [vmem:[#allocation49_spill] sm:$0xff] %v14392_v15  ;;  %v14394_v61 = vpop.f32.mrf.mxu1  ;;  %v2497_v59 = vld [vmem:[#allocation2 + $0x214] sm:$0xe] }
 0x213   : > { %v3261_v14 = vld [vmem:[#allocation3 + $0x464] sm:$0xff]  ;;  %v1509_v1 = vsel %vm13708_vm7, %v1507_v62, %v1508_v7  ;;  %v5655_v21 = vrot.slane %v5653_v42, 4  ;;  %6063 = vst [vmem:[#allocation3 + $0x440] sm:$0xf] %v5997_v38  ;;  %16859 = vst [vmem:[#allocation50_spill] sm:$0xff] %v14394_v61  ;;  %v10151_v49 = vrot.slane %v2497_v59, 9  ;;  %v5654_v38 = vsel %vm13730_vm9, %v10414_v22, %v5653_v42 }
 0x214   : > { %v12316_v32 = vld [vmem:[#allocation3 + $0x444] ss:$36 sps:$4 sm:$0xff]   ;;  %6064 = vst [vmem:[#allocation3 + $0x464] sm:$0xf] %v6000_v41  ;;  %v10321_v27 = vcombine.low %v3256_v55, %v3261_v14  ;;  %1578 = vst [vmem:[#allocation3 + $0x414] sm:$0xf] %v1509_v1  ;;  %v11021_v15 = vpop.f32.mrf.mxu1 }
 0x215   : > { %6335 = vst [vmem:[#allocation3 + $0x444] sm:$0xf] %v6269_v37  ;;  %6336 = vst [vmem:[#allocation3 + $0x468] sm:$0xf] %v6272_v54  ;;  %4897 = vmatprep.mubr.bf16.mxu1 %v12316_v32  ;;  %v2498_v23 = vld [vmem:[#allocation2 + $0x218] sm:$0xf]  ;;  %v5657_v14 = vsel %vm13730_vm9, %v5655_v21, %v5656_v57 }
 0x216   : > { %4898 = vmatmul.mubr.bf16.gmra.mxu1 %v10321_v27  ;;  %v2499_v28 = vld [vmem:[#allocation2 + $0x21c] sm:$0x1]  ;;  %v5757_v45 = vld [vmem:[#allocation2 + $0x1b8] sm:$0xf]  ;;  %v2595_v7 = vrot.slane %v2498_v23, 5  ;;  %v11022_v23 = vpop.f32.mrf.mxu1 }
 0x217   : > { %v5758_v31 = vld [vmem:[#allocation2 + $0x1bc] sm:$0xf]  ;;  %v2598_v62 = vrot.slane %v2499_v28, 5  ;;  %v2769_v48 = vld [vmem:[#allocation2 + $0x218] sm:$0xf]  ;;  %v14402_v42 = vadd.f32 %v11022_v23, %v11021_v15 }
 0x218   : > { %v2770_v41 = vld [vmem:[#allocation2 + $0x21c] sm:$0xf]  ;;  %2801 = vst [vmem:[#allocation3 + $0x1c] sm:$0xf] %v2769_v48  ;;  %v6642_v37 = vld [vmem:[#allocation2 + $0x2a0] sm:$0xc]  ;;  %v2596_v32 = vsel %vm13708_vm7, %v10151_v49, %v2595_v7  ;;  %v14408_v21 = vpop.f32.mrf.mxu1 }
 0x219   : > { %v6643_v55 = vld [vmem:[#allocation2 + $0x2a4] sm:$0xf]  ;;  %v3245_v54 = vld [vmem:[#allocation3 + $0x3f0] sm:$0xff]  ;;  %v2597_v1 = vrot.slane %v2595_v7, 4  ;;  %2802 = vst [vmem:[#allocation3 + $0x40] sm:$0xf] %v2770_v41 }
 0x21a   : > { %v6644_v27 = vld [vmem:[#allocation2 + $0x2a8] sm:$0x3]  ;;  %v6740_v59 = vrot.slane %v6643_v55, 6  ;;  %2737 = vst [vmem:[#allocation3 + $0x18] sm:$0xf] %v2596_v32  ;;  %v10464_v28 = vrot.slane %v6642_v37, 10 }
 0x21b   : > { %v6743_v61 = vrot.slane %v6644_v27, 6  ;;  %16860 = vst [vmem:[#allocation51_spill] sm:$0xff] %v14402_v42  ;;  %v3250_v22 = vld [vmem:[#allocation3 + $0x414] sm:$0xff]  ;;  %v2599_v35 = vsel %vm13708_vm7, %v2597_v1, %v2598_v62  ;;  %v14406_v57 = vld [vmem:[#allocation10] ss:$0 sm:$0xff]  ;;  %16861 = vst [vmem:[#allocation52_spill] sm:$0xff] %v14408_v21 }
 0x21c   : > { %v12320_v48 = vld [vmem:[#allocation3 + $0x3f4] ss:$36 sps:$4 sm:$0xff]   ;;  %v6742_v20 = vrot.slane %v6740_v59, 4  ;;  %5725 = vst [vmem:[#allocation3 + $0x3f0] sm:$0xf] %v5654_v38  ;;  %v10310_v49 = vcombine.low %v3245_v54, %v3250_v22  ;;  %v1123_v15 = vadd.f32 %v14208_v13, %v14406_v57  ;;  %v1115_v7 = vadd.f32 %v14406_v57, %v14212_v39 }
 0x21d   : > { %5726 = vst [vmem:[#allocation3 + $0x414] sm:$0xf] %v5657_v14  ;;  %5789 = vst [vmem:[#allocation3 + $0x3f4] sm:$0xf] %v5757_v45  ;;  %v1351_v41 = vld [vmem:[#allocation2 + $0x25c] sm:$0xe]  ;;  %4728 = vmatprep.mubr.bf16.mxu0 %v12320_v48  ;;  %v1126_v45 = vadd.f32 %v14224_v4, %v14406_v57  ;;  %v1118_v54 = vadd.f32 %v14406_v57, %v14226_v33  ;;  %v1139_v14 = vadd.f32 %v14228_v16, %v14406_v57 }
 0x21e   : > { %5790 = vst [vmem:[#allocation3 + $0x418] sm:$0xf] %v5758_v31  ;;  %2738 = vst [vmem:[#allocation3 + $0x3c] sm:$0xf] %v2599_v35  ;;  %v1352_v37 = vld [vmem:[#allocation2 + $0x260] sm:$0xf]  ;;  %v14416_v31 = vpop.f32.mrf.mxu1  ;;  %4729 = vmatmul.mubr.bf16.gmra.mxu0 %v10310_v49  ;;  %v6741_v23 = vsel %vm13730_vm9, %v10464_v28, %v6740_v59  ;;  %v6744_v16 = vsel %vm13730_vm9, %v6742_v20, %v6743_v61  ;;  %v1158_v2 = vadd.f32 %v14264_v51, %v14406_v57 }
 0x21f   : > { %v1353_v62 = vld [vmem:[#allocation2 + $0x264] sm:$0x1]  ;;  %v10102_v55 = vrot.slane %v1351_v41, 9  ;;  %v1512_v32 = vrot.slane %v1352_v37, 5  ;;  %v1611_v27 = vld [vmem:[#allocation2 + $0x260] sm:$0xf] }
 0x220   : > { %v1515_v1 = vrot.slane %v1353_v62, 5  ;;  %16862 = vst [vmem:[#allocation53_spill] sm:$0xff] %v14416_v31  ;;  %v1243_v35 = vmax.f32 %v1123_v15, 0.0  ;;  %v1241_v38 = vmax.f32 %v1115_v7, 0.0  ;;  %v1612_v13 = vld [vmem:[#allocation2 + $0x264] sm:$0xf]  ;;  %v1131_v7 = vadd.f32 %v14406_v57, %v14236_v47  ;;  %v14434_v33 = vpop.f32.mrf.mxu1 }
 0x221   : > { %1643 = vst [vmem:[#allocation3 + $0x43c] sm:$0xf] %v1611_v27  ;;  %v14418_v39 = vld [vmem:[#allocation2 + $0x1c8] sm:$0xc]  ;;  %v1513_v22 = vsel %vm13708_vm7, %v10102_v55, %v1512_v32  ;;  %v1514_v48 = vrot.slane %v1512_v32, 4  ;;  %v3108_v47 = vld [vmem:[#allocation3 + $0x18] sm:$0xff] }
 0x222   : > { %v6914_v4 = vld [vmem:[#allocation2 + $0x2a8] sm:$0xf]  ;;  %1644 = vst [vmem:[#allocation3 + $0x460] sm:$0xf] %v1612_v13  ;;  %v14428_v49 = vld [vmem:[#allocation2 + $0x1cc] sm:$0xf] }
 0x223   : > { %v14430_v15 = vld [vmem:[#allocation2 + $0x1d0] sm:$0x3]  ;;  %v6915_v41 = vld [vmem:[#allocation2 + $0x2ac] sm:$0xf]  ;;  %1275 = vst [vmem:[%s14439_s27 + $0x58] sm:$0xff] %v1243_v35  ;;  %1273 = vst [vmem:[%s14439_s27 + $0x8] sm:$0xff] %v1241_v38  ;;  %v1516_v62 = vsel %vm13708_vm7, %v1514_v48, %v1515_v1  ;;  %v14451_v35 = vpop.f32.mrf.mxu1 }
 0x224   : > { %1579 = vst [vmem:[#allocation3 + $0x438] sm:$0xf] %v1513_v22  ;;  %v10415_v59 = vrot.slane %v14418_v39, 10  ;;  %v5660_v28 = vrot.slane %v14428_v49, 6  ;;  %v5663_v37 = vrot.slane %v14430_v15, 6  ;;  %v1244_v20 = vmax.f32 %v1126_v45, 0.0 }
 0x225   : > { %v1242_v61 = vmax.f32 %v1118_v54, 0.0  ;;  %v2500_v55 = vld [vmem:[#allocation2 + $0x22c] sm:$0xe]  ;;  %v1247_v32 = vmax.f32 %v1139_v14, 0.0  ;;  %v12354_v27 = vld [vmem:[%s16768_s6 + $0x38] sm:$0xff]   ;;  %v12364_v1 = vld [vmem:[%s16768_s6 + $0x70] sm:$0xff]   ;;  %v1142_v15 = vadd.f32 %v14242_v44, %v14406_v57 }
 0x226   : > { %1580 = vst [vmem:[#allocation3 + $0x45c] sm:$0xf] %v1516_v62  ;;  %v5662_v38 = vrot.slane %v5660_v28, 4  ;;  %v2501_v13 = vld [vmem:[#allocation2 + $0x230] sm:$0xf]  ;;  %v10152_v22 = vrot.slane %v2500_v55, 9  ;;  %v14461_v62 = vpop.f32.mrf.mxu1 }
 0x227   : > { %v2502_v39 = vld [vmem:[#allocation2 + $0x234] sm:$0x1]  ;;  %v3113_v45 = vld [vmem:[#allocation3 + $0x3c] sm:$0xff]  ;;  %1276 = vst [vmem:[%s14439_s27 + $0x80] sm:$0xff] %v1244_v20  ;;  %1274 = vst [vmem:[%s14439_s27 + $0x30] sm:$0xff] %v1242_v61  ;;  %v2602_v14 = vrot.slane %v2501_v13, 5  ;;  %v14465_v20 = vpop.f32.mrf.mxu0 }
 0x228   : > { %v12326_v54 = vld [vmem:[#allocation3 + $0x1c] ss:$36 sps:$4 sm:$0xff]   ;;  %v2605_v48 = vrot.slane %v2502_v39, 5  ;;  %1279 = vst [vmem:[%s14439_s27 + $0xf8] sm:$0xff] %v1247_v32  ;;  %v1245_v49 = vmax.f32 %v1131_v7, 0.0  ;;  %16863 = vst [vmem:[#allocation54_spill] sm:$0xff] %v14461_v62  ;;  %v10190_v55 = vcombine.low %v3108_v47, %v3113_v45  ;;  %v5664_v45 = vsel %vm13730_vm9, %v5662_v38, %v5663_v37 }
 0x229   : > { %6882 = vst [vmem:[#allocation3 + $0x18] sm:$0xf] %v6741_v23  ;;  %6883 = vst [vmem:[#allocation3 + $0x3c] sm:$0xf] %v6744_v16  ;;  %v2771_v42 = vld [vmem:[#allocation2 + $0x230] sm:$0xf]  ;;  %5099 = vmatprep.mubr.bf16.mxu1 %v12326_v54  ;;  %v2603_v7 = vsel %vm13708_vm7, %v10152_v22, %v2602_v14  ;;  %v14477_v16 = vpop.f32.mrf.mxu1  ;;  %v14483_v13 = vpop.f32.mrf.mxu0  ;;  %v5661_v22 = vsel %vm13730_vm9, %v10415_v59, %v5660_v28 }
 0x22a   : > { %6946 = vst [vmem:[#allocation3 + $0x1c] sm:$0xf] %v6914_v4  ;;  %6947 = vst [vmem:[#allocation3 + $0x40] sm:$0xf] %v6915_v41  ;;  %v2772_v31 = vld [vmem:[#allocation2 + $0x234] sm:$0xf]  ;;  %5100 = vmatmul.mubr.bf16.vlgmr.msra.gmra.mxu1 %v10190_v55 }
 0x22b   : > { %v14463_v21 = vld [vmem:[#allocation2 + $0x2b8] sm:$0xc]  ;;  %v2604_v61 = vrot.slane %v2602_v14, 4  ;;  %2803 = vst [vmem:[#allocation3 + $0x64] sm:$0xf] %v2771_v42  ;;  %1277 = vst [vmem:[%s14439_s27 + $0xa8] sm:$0xff] %v1245_v49  ;;  %11360 = vmatpush3.bf16.msra.mxu1 %v12354_v27  ;;  %v14494_v55 = vpop.f32.mrf.mxu1 }
 0x22c   : > { %2804 = vst [vmem:[#allocation3 + $0x88] sm:$0xf] %v2772_v31  ;;  %v14469_v44 = vld [vmem:[#allocation2 + $0x2bc] sm:$0xf]  ;;  %v14471_v23 = vld [vmem:[#allocation2 + $0x2c0] sm:$0x3]  ;;  %v1134_v31 = vadd.f32 %v14406_v57, %v14246_v56  ;;  %11361 = vmatprep.subr.bf16.mxu1 %v12364_v1 }
 0x22d   : > { %v12365_v4 = vld [vmem:[%s16768_s6 + $0x30] sm:$0xff]   ;;  %16864 = vst [vmem:[#allocation55_spill] sm:$0xff] %v14477_v16  ;;  %2739 = vst [vmem:[#allocation3 + $0x60] sm:$0xf] %v2603_v7  ;;  %v10465_v32 = vrot.slane %v14463_v21, 10  ;;  %v6747_v42 = vrot.slane %v14469_v44, 6  ;;  %v2606_v54 = vsel %vm13708_vm7, %v2604_v61, %v2605_v48  ;;  %v14497_v48 = vpop.f32.mrf.mxu0 }
 0x22e   : > { %v5759_v41 = vld [vmem:[#allocation2 + $0x1d0] sm:$0xf]  ;;  %v5760_v47 = vld [vmem:[#allocation2 + $0x1d4] sm:$0xf]  ;;  %v3255_v39 = vld [vmem:[#allocation3 + $0x438] sm:$0xff]  ;;  %v1248_v21 = vmax.f32 %v1142_v15, 0.0 }
 0x22f   : > { %v2224_v14 = vld [vmem:[#allocation2 + $0x188] sm:$0x8]  ;;  %v2225_v49 = vld [vmem:[#allocation2 + $0x18c] sm:$0xf]  ;;  %2740 = vst [vmem:[#allocation3 + $0x84] sm:$0xf] %v2606_v54  ;;  %v14505_v54 = vpop.f32.mrf.mxu1  ;;  %v14515_v62 = vpop.f32.mrf.mxu0  ;;  %11362 = vmatpush3.bf16.msra.mxu1 %v12365_v4 }
 0x230   : > { %v12375_v56 = vld [vmem:[%s16768_s6 + $0x68] sm:$0xff]   ;;  %v6749_v7 = vrot.slane %v6747_v42, 4  ;;  %v6750_v59 = vrot.slane %v14471_v23, 6  ;;  %v2226_v28 = vld [vmem:[#allocation2 + $0x190] sm:$0x7]  ;;  %v10135_v37 = vrot.slane %v2224_v14, 11 }
 0x231   : > { %v2322_v38 = vrot.slane %v2225_v49, 7  ;;  %16865 = vst [vmem:[#allocation56_spill] sm:$0xff] %v14497_v48  ;;  %v3260_v61 = vld [vmem:[#allocation3 + $0x45c] sm:$0xff]  ;;  %v2325_v44 = vrot.slane %v2226_v28, 7  ;;  %v14499_v27 = vld [vmem:[#allocation2 + $0x18c] sm:$0xc]  ;;  %v14531_v48 = vpop.f32.mrf.mxu0  ;;  %11363 = vmatprep.subr.bf16.mxu1 %v12375_v56 }
 0x232   : > { %v12328_v15 = vld [vmem:[#allocation3 + $0x43c] ss:$36 sps:$4 sm:$0xff]   ;;  %1280 = vst [vmem:[%s14439_s27 + $0x120] sm:$0xff] %v1248_v21  ;;  %v12376_v16 = vld [vmem:[%s16768_s6 + $0x28] sm:$0xff]   ;;  %5727 = vst [vmem:[#allocation3 + $0x438] sm:$0xf] %v5661_v22  ;;  %v10319_v23 = vcombine.low %v3255_v39, %v3260_v61  ;;  %v1155_v21 = vadd.f32 %v14248_v60, %v14406_v57  ;;  %v14523_v60 = vpop.f32.mrf.mxu1  ;;  %v6748_v61 = vsel %vm13730_vm9, %v10465_v32, %v6747_v42 }
 0x233   : > { %5728 = vst [vmem:[#allocation3 + $0x45c] sm:$0xf] %v5664_v45  ;;  %5791 = vst [vmem:[#allocation3 + $0x43c] sm:$0xf] %v5759_v41  ;;  %v2323_v1 = vsel %vm13688_vm3, %v10135_v37, %v2322_v38  ;;  %v2324_v14 = vrot.slane %v2322_v38, 4  ;;  %v12386_v22 = vld [vmem:[%s16768_s6 + $0x60] sm:$0xff]   ;;  %4736 = vmatprep.mubr.bf16.mxu0 %v12328_v15  ;;  %v6751_v4 = vsel %vm13730_vm9, %v6749_v7, %v6750_v59  ;;  %v14540_v30 = vpop.f32.mrf.mxu0  ;;  %11364 = vmatpush3.bf16.msra.mxu1 %v12376_v16 }
 0x234   : > { %5792 = vst [vmem:[#allocation3 + $0x460] sm:$0xf] %v5760_v47  ;;  %v14509_v49 = vld [vmem:[#allocation2 + $0x190] sm:$0xf]  ;;  %v14511_v28 = vld [vmem:[#allocation2 + $0x194] sm:$0x3]  ;;  %4737 = vmatmul.mubr.bf16.gmra.mxu0 %v10319_v23  ;;  %11365 = vmatprep.subr.bf16.mxu1 %v12386_v22 }
 0x235   : > { %16866 = vst [vmem:[#allocation57_spill] sm:$0xff] %v14515_v62  ;;  %v6916_v41 = vld [vmem:[#allocation2 + $0x2c0] sm:$0xf]  ;;  %v6917_v47 = vld [vmem:[#allocation2 + $0x2c4] sm:$0xf]  ;;  %v10448_v39 = vrot.slane %v14499_v27, 10  ;;  %v2326_v15 = vsel %vm13688_vm3, %v2324_v14, %v2325_v44  ;;  %v1147_v27 = vadd.f32 %v14406_v57, %v14252_v36  ;;  %v14536_v44 = vpop.f32.mrf.mxu1 }
 0x236   : > { %2464 = vst [vmem:[#allocation3 + $0x14] sm:$0xf] %v2323_v1  ;;  %v6467_v45 = vrot.slane %v14509_v49, 6  ;;  %v6470_v37 = vrot.slane %v14511_v28, 6  ;;  %v1246_v38 = vmax.f32 %v1134_v31, 0.0  ;;  %16867 = vst [vmem:[#allocation58_spill] sm:$0xff] %v14523_v60  ;;  %v973_v49 = vlaneseq }
 0x237   : > { %v2503_v62 = vld [vmem:[#allocation2 + $0x244] sm:$0xe]  ;;  %v2504_v1 = vld [vmem:[#allocation2 + $0x248] sm:$0xf]  ;;  %2465 = vst [vmem:[#allocation3 + $0x38] sm:$0xf] %v2326_v15 }
 0x238   : > { %v3118_v28 = vld [vmem:[#allocation3 + $0x60] sm:$0xff]  ;;  %v6469_v31 = vrot.slane %v6467_v45, 4  ;;  %1278 = vst [vmem:[%s14439_s27 + $0xd0] sm:$0xff] %v1246_v38  ;;  %v2505_v23 = vld [vmem:[#allocation2 + $0x24c] sm:$0x1]  ;;  %v10153_v32 = vrot.slane %v2503_v62, 9  ;;  %v14544_v38 = vpop.f32.mrf.mxu1 }
 0x239   : > { %v2609_v42 = vrot.slane %v2504_v1, 5  ;;  %v2612_v14 = vrot.slane %v2505_v23, 5  ;;  %v2773_v60 = vld [vmem:[#allocation2 + $0x248] sm:$0xf]  ;;  %v2774_v46 = vld [vmem:[#allocation2 + $0x24c] sm:$0xf] }
 0x23a   : > { %v1251_v36 = vmax.f32 %v1155_v21, 0.0  ;;  %v3123_v29 = vld [vmem:[#allocation3 + $0x84] sm:$0xff]  ;;  %2805 = vst [vmem:[#allocation3 + $0xac] sm:$0xf] %v2773_v60  ;;  %2806 = vst [vmem:[#allocation3 + $0xd0] sm:$0xf] %v2774_v46  ;;  %v14551_v60 = vpop.f32.mrf.mxu0 }
 0x23b   : > { %v12330_v7 = vld [vmem:[#allocation3 + $0x64] ss:$36 sps:$4 sm:$0xff]   ;;  %v2610_v59 = vsel %vm13708_vm7, %v10153_v32, %v2609_v42  ;;  %v2611_v62 = vrot.slane %v2609_v42, 4  ;;  %v6648_v56 = vld [vmem:[#allocation2 + $0x2d0] sm:$0xc]  ;;  %v10199_v51 = vcombine.low %v3118_v28, %v3123_v29  ;;  %v1249_v1 = vmax.f32 %v1147_v27, 0.0 }
 0x23c   : > { %6884 = vst [vmem:[#allocation3 + $0x60] sm:$0xf] %v6748_v61  ;;  %6885 = vst [vmem:[#allocation3 + $0x84] sm:$0xf] %v6751_v4  ;;  %v6649_v21 = vld [vmem:[#allocation2 + $0x2d4] sm:$0xf]  ;;  %5107 = vmatprep.mubr.bf16.mxu1 %v12330_v7  ;;  %v6468_v27 = vsel %vm13730_vm9, %v10448_v39, %v6467_v45  ;;  %v1150_v32 = vadd.f32 %v14406_v57, %v14266_v17  ;;  %v14565_v42 = vpop.f32.mrf.mxu0 }
 0x23d   : > { %6948 = vst [vmem:[#allocation3 + $0x64] sm:$0xf] %v6916_v41  ;;  %6949 = vst [vmem:[#allocation3 + $0x88] sm:$0xf] %v6917_v47  ;;  %v14546_v15 = vld [vmem:[#allocation2 + $0x2d8] sm:$0x3]  ;;  %v2613_v46 = vsel %vm13708_vm7, %v2611_v62, %v2612_v14  ;;  %v14556_v47 = vpop.f32.mrf.mxu1  ;;  %5108 = vmatmul.mubr.bf16.gmra.mxu1 %v10199_v51  ;;  %v14586_v51 = vadd.f32 %v14483_v13, %v14465_v20 }
 0x23e   : > { %2741 = vst [vmem:[#allocation3 + $0xa8] sm:$0xf] %v2610_v59  ;;  %1283 = vst [vmem:[%s14439_s27 + $0x198] sm:$0xff] %v1251_v36  ;;  %v14549_v23 = vshrl.u32 %v973_v49, 7  ;;  %v10466_v16 = vrot.slane %v6648_v56, 10  ;;  %v6754_v41 = vrot.slane %v6649_v21, 6  ;;  %v6471_v49 = vsel %vm13730_vm9, %v6469_v31, %v6470_v37  ;;  %v14588_v21 = vpop.f32.mrf.mxu0 }
 0x23f   : > { %v6757_v29 = vrot.slane %v14546_v15, 6  ;;  %v3107_v61 = vld [vmem:[#allocation3 + $0x10] sm:$0xff]  ;;  %2742 = vst [vmem:[#allocation3 + $0xcc] sm:$0xf] %v2613_v46  ;;  %1281 = vst [vmem:[%s14439_s27 + $0x148] sm:$0xff] %v1249_v1  ;;  %v1252_v4 = vmax.f32 %v1158_v2, 0.0  ;;  %v14575_v37 = vpop.f32.mrf.mxu1  ;;  %v14582_v56 = vadd.f32 %v14273_v58, %v14406_v57 }
 0x240   : > { %v2227_v22 = vld [vmem:[#allocation2 + $0x1a0] sm:$0x8]  ;;  %v2228_v28 = vld [vmem:[#allocation2 + $0x1a4] sm:$0xf]  ;;  %v6756_v14 = vrot.slane %v6754_v41, 4  ;;  %v14570_v39 = vld [vmem:[%s16767_s5 + $0x230] sm:$0xff]   ;;  %v6755_v1 = vsel %vm13730_vm9, %v10466_v16, %v6754_v41 }
 0x241   : > { %v2229_v36 = vld [vmem:[#allocation2 + $0x1a8] sm:$0x7]  ;;  %v10136_v7 = vrot.slane %v2227_v22, 11  ;;  %v2329_v59 = vrot.slane %v2228_v28, 7  ;;  %v12387_v45 = vld [vmem:[%s16768_s6 + $0x20] sm:$0xff]   ;;  %v3112_v2 = vld [vmem:[#allocation3 + $0x34] sm:$0xff] }
 0x242   : > { %v12332_v31 = vld [vmem:[#allocation3 + $0x14] ss:$36 sps:$4 sm:$0xff]   ;;  %v2332_v17 = vrot.slane %v2229_v36, 7  ;;  %v14577_v62 = vld [vmem:[#allocation2 + $0x1a4] sm:$0xc]  ;;  %1284 = vst [vmem:[%s14439_s27 + $0x1c0] sm:$0xff] %v1252_v4  ;;  %v10188_v15 = vcombine.low %v3107_v61, %v3112_v2  ;;  %11366 = vmatpush3.bf16.msra.mxu1 %v12387_v45  ;;  %v6758_v4 = vsel %vm13730_vm9, %v6756_v14, %v6757_v29 }
 0x243   : > { %6337 = vst [vmem:[#allocation3 + $0x10] sm:$0xf] %v13340_v10  ;;  %6338 = vst [vmem:[#allocation3 + $0x34] sm:$0xf] %v13342_v11  ;;  %v6918_v46 = vld [vmem:[#allocation2 + $0x2d8] sm:$0xf]  ;;  %v2330_v58 = vsel %vm13688_vm3, %v10136_v7, %v2329_v59  ;;  %4938 = vmatprep.mubr.bf16.mxu0 %v12332_v31  ;;  %v14616_v31 = vpop.f32.mrf.mxu1 }
 0x244   : > { %6609 = vst [vmem:[#allocation3 + $0x14] sm:$0xf] %v6468_v27  ;;  %6610 = vst [vmem:[#allocation3 + $0x38] sm:$0xf] %v6471_v49  ;;  %v6919_v22 = vld [vmem:[#allocation2 + $0x2dc] sm:$0xf]  ;;  %v10916_v27 = vpop.f32.mrf.mxu0  ;;  %4939 = vmatmul.mubr.bf16.vlgmr.msra.gmra.mxu0 %v10188_v15 }
 0x245   : > { %v2331_v28 = vrot.slane %v2329_v59, 4  ;;  %v14596_v20 = vld [vmem:[#allocation2 + $0x1a8] sm:$0xf]  ;;  %v14598_v13 = vld [vmem:[#allocation2 + $0x1ac] sm:$0x3]  ;;  %v1250_v16 = vmax.f32 %v1150_v32, 0.0  ;;  %v14614_v32 = vadd.f32 %v14451_v35, %v14434_v33 }
 0x246   : > { %2466 = vst [vmem:[#allocation3 + $0x5c] sm:$0xf] %v2330_v58  ;;  %v6474_v11 = vrot.slane %v14596_v20, 6  ;;  %v2506_v41 = vld [vmem:[#allocation2 + $0x25c] sm:$0xe]  ;;  %v3128_v49 = vld [vmem:[#allocation3 + $0xa8] sm:$0xff]  ;;  %v14626_v33 = vpop.f32.mrf.mxu0  ;;  %v14694_v20 = vadd.f32 %v14556_v47, %v14544_v38  ;;  %v14709_v38 = vadd.f32 %v14406_v57, %v14309_v3 }
 0x247   : > { %v2333_v36 = vsel %vm13688_vm3, %v2331_v28, %v2332_v17  ;;  %v2507_v7 = vld [vmem:[#allocation2 + $0x260] sm:$0xf]  ;;  %v2508_v59 = vld [vmem:[#allocation2 + $0x264] sm:$0x1]  ;;  %v10154_v45 = vrot.slane %v2506_v41, 9  ;;  %v14610_v2 = vld [vmem:[%s16767_s5 + $0x228] sm:$0xff]   ;;  %v1163_v28 = vadd.f32 %v14406_v57, %v14283_v8  ;;  %v14640_v8 = vadd.f32 %v14540_v30, %v14531_v48 }
 0x248   : > { %16868 = vst [vmem:[#allocation59_spill] sm:$0xff] %v14614_v32  ;;  %v12704_v29 = vld [vmem:[%s16767_s5 + $0x238] sm:$0xff]   ;;  %2467 = vst [vmem:[#allocation3 + $0x80] sm:$0xf] %v2333_v36  ;;  %v6476_v14 = vrot.slane %v6474_v11, 4  ;;  %v2616_v17 = vrot.slane %v2507_v7, 5  ;;  %v14632_v36 = vadd.f32 %v14287_v26, %v14406_v57  ;;  %v14652_v30 = vpop.f32.mrf.mxu0 }
 0x249   : > { %11924 = vmatpush3.bf16.msra.mxu0 %v12704_v29  ;;  %1282 = vst [vmem:[%s14439_s27 + $0x170] sm:$0xff] %v1250_v16  ;;  %v2619_v15 = vrot.slane %v2508_v59, 5  ;;  %v2775_v58 = vld [vmem:[#allocation2 + $0x260] sm:$0xf]  ;;  %v3133_v35 = vld [vmem:[#allocation3 + $0xcc] sm:$0xff]  ;;  %v1255_v10 = vmax.f32 %v14582_v56, 0.0  ;;  %v14636_v16 = vadd.f32 %v14406_v57, %v14289_v6  ;;  %v14650_v6 = vadd.f32 %v14291_v40, %v14406_v57 }
 0x24a   : > { %v12335_v41 = vld [vmem:[#allocation3 + $0xac] ss:$36 sps:$4 sm:$0xff]   ;;  %v2776_v61 = vld [vmem:[#allocation2 + $0x264] sm:$0xf]  ;;  %2807 = vst [vmem:[#allocation3 + $0xf4] sm:$0xf] %v2775_v58  ;;  %11925 = vmatprep.subr.bf16.mxu0 %v14570_v39  ;;  %v10208_v56 = vcombine.low %v3128_v49, %v3133_v35  ;;  %v2617_v7 = vsel %vm13708_vm7, %v10154_v45, %v2616_v17  ;;  %v14667_v40 = vadd.f32 %v10916_v27, %v14588_v21 }
 0x24b   : > { %6886 = vst [vmem:[#allocation3 + $0xa8] sm:$0xf] %v6755_v1  ;;  %6887 = vst [vmem:[#allocation3 + $0xcc] sm:$0xf] %v6758_v4  ;;  %v2618_v59 = vrot.slane %v2616_v17, 4  ;;  %5115 = vmatprep.mubr.bf16.mxu1 %v12335_v41  ;;  %v1253_v45 = vmax.f32 %v1163_v28, 0.0 }
 0x24c   : > { %6950 = vst [vmem:[#allocation3 + $0xac] sm:$0xf] %v6918_v46  ;;  %6951 = vst [vmem:[#allocation3 + $0xd0] sm:$0xf] %v6919_v22  ;;  %v14644_v26 = vld [vmem:[#allocation2 + $0x2e8] sm:$0xc]  ;;  %v14660_v46 = vadd.f32 %v14406_v57, %v14303_v34  ;;  %v14664_v22 = vadd.f32 %v14505_v54, %v14494_v55  ;;  %5116 = vmatmul.mubr.bf16.gmra.mxu1 %v10208_v56  ;;  %v10921_v54 = vpop.f32.mrf.mxu0 }
 0x24d   : > { %2808 = vst [vmem:[#allocation3 + $0x118] sm:$0xf] %v2776_v61  ;;  %v14646_v29 = vld [vmem:[#allocation2 + $0x2ec] sm:$0xf]  ;;  %2743 = vst [vmem:[#allocation3 + $0xf0] sm:$0xf] %v2617_v7  ;;  %v11045_v61 = vpop.f32.mrf.mxu1  ;;  %v2620_v49 = vsel %vm13708_vm7, %v2618_v59, %v2619_v15  ;;  %11926 = vmatpush3.bf16.msra.mxu0 %v14570_v39 }
 0x24e   : > { %v14654_v48 = vld [vmem:[#allocation2 + $0x2f0] sm:$0x3]  ;;  %v6761_v1 = vrot.slane %v14646_v29, 6  ;;  %1287 = vst [vmem:[%s14439_s27 + $0x238] sm:$0xff] %v1255_v10  ;;  %16869 = vst [vmem:[#allocation60_spill] sm:$0xff] %v14664_v22  ;;  %v10467_v4 = vrot.slane %v14644_v26, 10  ;;  %11927 = vmatprep.subr.bf16.mxu0 %v14610_v2  ;;  %v10922_v56 = vpop.f32.mrf.mxu0 }
 0x24f   : > { %v6764_v10 = vrot.slane %v14654_v48, 6  ;;  %v2230_v34 = vld [vmem:[#allocation2 + $0x1b8] sm:$0x8]  ;;  %v14677_v55 = vld [vmem:[%s16767_s5 + $0x220] sm:$0xff]   ;;  %v16870_v27 = vrot.slane %v14577_v62, 10  ;;  %v16871_v15 = vrot.slane %v14598_v13, 6 }
 0x250   : > { %v3117_v21 = vld [vmem:[#allocation3 + $0x58] sm:$0xff]  ;;  %2744 = vst [vmem:[#allocation3 + $0x114] sm:$0xf] %v2620_v49  ;;  %v6763_v39 = vrot.slane %v6761_v1, 4  ;;  %v2232_v35 = vld [vmem:[#allocation2 + $0x1c0] sm:$0x7]  ;;  %v14705_v49 = vadd.f32 %v14307_v43, %v14406_v57 }
 0x251   : > { %v6475_v17 = vsel %vm13730_vm9, %v16870_v27, %v6474_v11  ;;  %v6478_v58 = vsel %vm13730_vm9, %v6476_v14, %v16871_v15  ;;  %v2231_v28 = vld [vmem:[#allocation2 + $0x1bc] sm:$0xf]  ;;  %16872 = vst [vmem:[#allocation61_spill] sm:$0xff] %v14694_v20  ;;  %1285 = vst [vmem:[%s14439_s27 + $0x1e8] sm:$0xff] %v1253_v45  ;;  %v10137_v62 = vrot.slane %v2230_v34, 11  ;;  %v2339_v41 = vrot.slane %v2232_v35, 7  ;;  %v11046_v45 = vpop.f32.mrf.mxu1  ;;  %11928 = vmatpush3.bf16.msra.mxu0 %v14610_v2 }
 0x252   : > { %v2336_v11 = vrot.slane %v2231_v28, 7  ;;  %v14697_v13 = vld [vmem:[#allocation2 + $0x1bc] sm:$0xc]  ;;  %v1256_v14 = vmax.f32 %v14632_v36, 0.0  ;;  %v14700_v26 = vld [vmem:[#allocation2 + $0x1c0] sm:$0xf]  ;;  %v14716_v36 = vadd.f32 %v10922_v56, %v10921_v54  ;;  %11929 = vmatprep.subr.bf16.mxu0 %v14677_v55  ;;  %v6762_v2 = vsel %vm13730_vm9, %v10467_v4, %v6761_v1 }
 0x253   : > { %v3122_v7 = vld [vmem:[#allocation3 + $0x7c] sm:$0xff]  ;;  %v10450_v48 = vrot.slane %v14697_v13, 10  ;;  %6339 = vst [vmem:[#allocation3 + $0x58] sm:$0xf] %v13351_v18  ;;  %v6920_v34 = vld [vmem:[#allocation2 + $0x2f0] sm:$0xf]  ;;  %v14727_v18 = vpop.f32.mrf.mxu0 }
 0x254   : > { %v12337_v59 = vld [vmem:[#allocation3 + $0x5c] ss:$36 sps:$4 sm:$0xff]   ;;  %6340 = vst [vmem:[#allocation3 + $0x7c] sm:$0xf] %v13353_v19  ;;  %v10197_v43 = vcombine.low %v3117_v21, %v3122_v7  ;;  %v6921_v27 = vld [vmem:[#allocation2 + $0x2f4] sm:$0xf]  ;;  %v2337_v3 = vsel %vm13688_vm3, %v10137_v62, %v2336_v11 }
 0x255   : > { %v14714_v47 = vld [vmem:[%s16767_s5 + $0x218] sm:$0xff]   ;;  %6611 = vst [vmem:[#allocation3 + $0x5c] sm:$0xf] %v6475_v17  ;;  %6612 = vst [vmem:[#allocation3 + $0x80] sm:$0xf] %v6478_v58  ;;  %v2338_v15 = vrot.slane %v2336_v11, 4  ;;  %4946 = vmatprep.mubr.bf16.mxu0 %v12337_v59  ;;  %v14732_v58 = vadd.f32 %v11046_v45, %v11045_v61  ;;  %v14747_v59 = vpop.f32.mrf.mxu0  ;;  %11930 = vmatpush3.bf16.msra.mxu0 %v14677_v55 }
 0x256   : > { %v14722_v28 = vld [vmem:[#allocation2 + $0x1c4] sm:$0x3]  ;;  %v6481_v54 = vrot.slane %v14700_v26, 6  ;;  %1288 = vst [vmem:[%s14439_s27 + $0x260] sm:$0xff] %v1256_v14  ;;  %2468 = vst [vmem:[#allocation3 + $0xa4] sm:$0xf] %v2337_v3  ;;  %4947 = vmatmul.mubr.bf16.gmra.mxu0 %v10197_v43  ;;  %v6765_v14 = vsel %vm13730_vm9, %v6763_v39, %v6764_v10  ;;  %v14756_v39 = vpop.f32.mrf.mxu1  ;;  %11931 = vmatprep.subr.bf16.mxu0 %v14714_v47 }
 0x257   : > { %v6484_v19 = vrot.slane %v14722_v28, 6  ;;  %v1254_v21 = vmax.f32 %v14636_v16, 0.0  ;;  %v2509_v17 = vld [vmem:[#allocation2 + $0x274] sm:$0xe]  ;;  %16873 = vst [vmem:[#allocation62_spill] sm:$0xff] %v14732_v58  ;;  %v2340_v16 = vsel %vm13688_vm3, %v2338_v15, %v2339_v41  ;;  %v1259_v4 = vmax.f32 %v14650_v6, 0.0  ;;  %v10927_v6 = vpop.f32.mrf.mxu0 }
 0x258   : > { %v12705_v35 = vld [vmem:[%s13335_s17 + $0xd0] sm:$0xff]  ;;  %v6483_v61 = vrot.slane %v6481_v54, 4  ;;  %v2510_v56 = vld [vmem:[#allocation2 + $0x278] sm:$0xf]  ;;  %v2511_v7 = vld [vmem:[#allocation2 + $0x27c] sm:$0x1] }
 0x259   : > { %v14735_v62 = vpack.c.bf16 %v12705_v35, %v12705_v35  ;;  %v3138_v11 = vld [vmem:[#allocation3 + $0xf0] sm:$0xff]  ;;  %2469 = vst [vmem:[#allocation3 + $0xc8] sm:$0xf] %v2340_v16  ;;  %1286 = vst [vmem:[%s14439_s27 + $0x210] sm:$0xff] %v1254_v21  ;;  %v10155_v45 = vrot.slane %v2509_v17, 9  ;;  %v2623_v29 = vrot.slane %v2510_v56, 5  ;;  %v14762_v17 = vadd.f32 %v14315_v50, %v14406_v57  ;;  %11932 = vmatpush3.bf16.msra.mxu0 %v14714_v47 }
 0x25a   : > { %v2626_v43 = vrot.slane %v2511_v7, 5  ;;  %v2777_v1 = vld [vmem:[#allocation2 + $0x278] sm:$0xf]  ;;  %v14754_v10 = vld [vmem:[%s16767_s5 + $0x210] sm:$0xff]   ;;  %v2778_v15 = vld [vmem:[#allocation2 + $0x27c] sm:$0xf] }
 0x25b   : > { %16874 = vst [vmem:[#allocation63_spill] sm:$0xff] %v14735_v62  ;;  %2218 = vst [vmem:[#allocation3 + $0x3b8] sm:$0xf] %v14735_v62  ;;  %v3143_v41 = vld [vmem:[#allocation3 + $0x114] sm:$0xff]  ;;  %v1257_v21 = vmax.f32 %v14660_v46, 0.0  ;;  %v2624_v46 = vsel %vm13708_vm7, %v10155_v45, %v2623_v29  ;;  %v2625_v7 = vrot.slane %v2623_v29, 4  ;;  %11933 = vmatprep.subr.bf16.mxu0 %v14754_v10 }
 0x25c   : > { %v12339_v3 = vld [vmem:[#allocation3 + $0xf4] ss:$36 sps:$4 sm:$0xff]   ;;  %2809 = vst [vmem:[#allocation3 + $0x13c] sm:$0xf] %v2777_v1  ;;  %6888 = vst [vmem:[#allocation3 + $0xf0] sm:$0xf] %v6762_v2  ;;  %v10217_v56 = vcombine.low %v3138_v11, %v3143_v41  ;;  %v10928_v2 = vpop.f32.mrf.mxu0 }
 0x25d   : > { %v12706_v35 = vld [vmem:[%s13335_s17 + $0xd8] sm:$0xff]  ;;  %6889 = vst [vmem:[#allocation3 + $0x114] sm:$0xf] %v6765_v14  ;;  %6952 = vst [vmem:[#allocation3 + $0xf4] sm:$0xf] %v6920_v34  ;;  %v1260_v1 = vmax.f32 %v14705_v49, 0.0  ;;  %5123 = vmatprep.mubr.bf16.mxu1 %v12339_v3  ;;  %11934 = vmatpush3.bf16.msra.mxu0 %v14754_v10 }
 0x25e   : > { %v14766_v16 = vpack.c.bf16 %v12706_v35, %v12706_v35  ;;  %6953 = vst [vmem:[#allocation3 + $0x118] sm:$0xf] %v6921_v27  ;;  %2810 = vst [vmem:[#allocation3 + $0x160] sm:$0xf] %v2778_v15  ;;  %v14770_v50 = vld [vmem:[#allocation2 + $0x300] sm:$0xc]  ;;  %5124 = vmatmul.mubr.bf16.gmra.mxu1 %v10217_v56  ;;  %v14796_v35 = vpop.f32.mrf.mxu1  ;;  %v6482_v56 = vsel %vm13730_vm9, %v10450_v48, %v6481_v54  ;;  %v14816_v28 = vpop.f32.mrf.mxu0 }
 0x25f   : > { %v14772_v55 = vld [vmem:[#allocation2 + $0x304] sm:$0xf]  ;;  %1291 = vst [vmem:[%s14439_s27 + $0x2d8] sm:$0xff] %v1259_v4  ;;  %2745 = vst [vmem:[#allocation3 + $0x138] sm:$0xf] %v2624_v46  ;;  %v10468_v27 = vrot.slane %v14770_v50, 10  ;;  %v2627_v4 = vsel %vm13708_vm7, %v2625_v7, %v2626_v43  ;;  %v6485_v43 = vsel %vm13730_vm9, %v6483_v61, %v6484_v19 }
 0x260   : > { %16875 = vst [vmem:[#allocation64_spill] sm:$0xff] %v14766_v16  ;;  %v14777_v34 = vld [vmem:[#allocation2 + $0x308] sm:$0x3]  ;;  %v6768_v11 = vrot.slane %v14772_v55, 6  ;;  %1289 = vst [vmem:[%s14439_s27 + $0x288] sm:$0xff] %v1257_v21  ;;  %v12707_v14 = vld [vmem:[%s13335_s17 + $0xe0] sm:$0xff]  ;;  %v14794_v21 = vadd.f32 %v10928_v2, %v10927_v6 }
 0x261   : > { %2219 = vst [vmem:[#allocation3 + $0x3dc] sm:$0xf] %v14766_v16  ;;  %v14784_v45 = vpack.c.bf16 %v12707_v14, %v12707_v14  ;;  %v12708_v29 = vld [vmem:[%s13335_s17 + $0xe8] sm:$0xff]  ;;  %v6771_v41 = vrot.slane %v14777_v34, 6  ;;  %v2233_v3 = vld [vmem:[#allocation2 + $0x1d0] sm:$0x8] }
 0x262   : > { %v14787_v49 = vpack.c.bf16 %v12708_v29, %v12708_v29  ;;  %1292 = vst [vmem:[%s14439_s27 + $0x300] sm:$0xff] %v1260_v1  ;;  %v1258_v15 = vmax.f32 %v14709_v38, 0.0  ;;  %v3127_v46 = vld [vmem:[#allocation3 + $0xa0] sm:$0xff]  ;;  %2746 = vst [vmem:[#allocation3 + $0x15c] sm:$0xf] %v2627_v4  ;;  %v6770_v38 = vrot.slane %v6768_v11, 4  ;;  %v1195_v1 = vadd.f32 %v14406_v57, %v14319_v63  ;;  %v11051_v63 = vpop.f32.mrf.mxu1 }
 0x263   : > { %16876 = vst [vmem:[#allocation65_spill] sm:$0xff] %v14784_v45  ;;  %v2234_v6 = vld [vmem:[#allocation2 + $0x1d4] sm:$0xf]  ;;  %v2235_v7 = vld [vmem:[#allocation2 + $0x1d8] sm:$0x7]  ;;  %v10138_v26 = vrot.slane %v2233_v3, 11 }
 0x264   : > { %16877 = vst [vmem:[#allocation66_spill] sm:$0xff] %v14787_v49  ;;  %2220 = vst [vmem:[#allocation3 + $0x400] sm:$0xf] %v14784_v45  ;;  %v2343_v13 = vrot.slane %v2234_v6, 7  ;;  %v2346_v50 = vrot.slane %v2235_v7, 7  ;;  %v1263_v48 = vmax.f32 %v14762_v17, 0.0  ;;  %v1206_v6 = vadd.f32 %v14325_v53, %v14406_v57  ;;  %v11052_v53 = vpop.f32.mrf.mxu1 }
 0x265   : > { %2221 = vst [vmem:[#allocation3 + $0x424] sm:$0xf] %v14787_v49  ;;  %v14811_v55 = vld [vmem:[#allocation2 + $0x1d4] sm:$0xc]  ;;  %1290 = vst [vmem:[%s14439_s27 + $0x2b0] sm:$0xff] %v1258_v15  ;;  %v3132_v54 = vld [vmem:[#allocation3 + $0xc4] sm:$0xff] }
 0x266   : > { %v12341_v19 = vld [vmem:[#allocation3 + $0xa4] ss:$36 sps:$4 sm:$0xff]   ;;  %v14818_v47 = vld [vmem:[#allocation2 + $0x1d8] sm:$0xf]  ;;  %v10451_v61 = vrot.slane %v14811_v55, 10  ;;  %v10206_v17 = vcombine.low %v3127_v46, %v3132_v54  ;;  %v2344_v14 = vsel %vm13688_vm3, %v10138_v26, %v2343_v13  ;;  %v2345_v29 = vrot.slane %v2343_v13, 4 }
 0x267   : > { %6341 = vst [vmem:[#allocation3 + $0xa0] sm:$0xf] %v13365_v24  ;;  %6342 = vst [vmem:[#allocation3 + $0xc4] sm:$0xf] %v13367_v25  ;;  %v6922_v34 = vld [vmem:[#allocation2 + $0x308] sm:$0xf]  ;;  %4954 = vmatprep.mubr.bf16.mxu0 %v12341_v19  ;;  %v6769_v24 = vsel %vm13730_vm9, %v10468_v27, %v6768_v11  ;;  %v6772_v26 = vsel %vm13730_vm9, %v6770_v38, %v6771_v41  ;;  %v14844_v19 = vpop.f32.mrf.mxu0  ;;  %v14848_v38 = vadd.f32 %v11052_v53, %v11051_v63 }
 0x268   : > { %6613 = vst [vmem:[#allocation3 + $0xa4] sm:$0xf] %v6482_v56  ;;  %6614 = vst [vmem:[#allocation3 + $0xc8] sm:$0xf] %v6485_v43  ;;  %v6923_v2 = vld [vmem:[#allocation2 + $0x30c] sm:$0xf]  ;;  %4955 = vmatmul.mubr.bf16.gmra.mxu0 %v10206_v17  ;;  %v2347_v13 = vsel %vm13688_vm3, %v2345_v29, %v2346_v50 }
 0x269   : > { %v14827_v4 = vld [vmem:[#allocation2 + $0x1dc] sm:$0x3]  ;;  %v6488_v3 = vrot.slane %v14818_v47, 6  ;;  %v2512_v15 = vld [vmem:[#allocation2 + $0x28c] sm:$0xe]  ;;  %1295 = vst [vmem:[%s14439_s27 + $0x378] sm:$0xff] %v1263_v48 }
 0x26a   : > { %2470 = vst [vmem:[#allocation3 + $0xec] sm:$0xf] %v2344_v14  ;;  %v6491_v25 = vrot.slane %v14827_v4, 6  ;;  %v2513_v46 = vld [vmem:[#allocation2 + $0x290] sm:$0xf]  ;;  %v10156_v43 = vrot.slane %v2512_v15, 9 }
 0x26b   : > { %v2514_v56 = vld [vmem:[#allocation2 + $0x294] sm:$0x1]  ;;  %v3148_v7 = vld [vmem:[#allocation3 + $0x138] sm:$0xff]  ;;  %v6490_v27 = vrot.slane %v6488_v3, 4  ;;  %v2630_v11 = vrot.slane %v2513_v46, 5  ;;  %v12396_v54 = vld [vmem:[%s16767_s5 + $0x208] sm:$0xff]   ;;  %v1198_v46 = vadd.f32 %v14406_v57, %v14329_v5 }
 0x26c   : > { %v2779_v48 = vld [vmem:[#allocation2 + $0x290] sm:$0xf]  ;;  %2471 = vst [vmem:[#allocation3 + $0x110] sm:$0xf] %v2347_v13  ;;  %v2633_v10 = vrot.slane %v2514_v56, 5  ;;  %v1261_v41 = vmax.f32 %v1195_v1, 0.0  ;;  %11935 = vmatprep.subr.bf16.mxu0 %v12396_v54  ;;  %v1219_v13 = vadd.f32 %v14331_v9, %v14406_v57  ;;  %v6489_v9 = vsel %vm13730_vm9, %v10451_v61, %v6488_v3 }
 0x26d   : > { %v2780_v47 = vld [vmem:[#allocation2 + $0x294] sm:$0xf]  ;;  %2811 = vst [vmem:[#allocation3 + $0x184] sm:$0xf] %v2779_v48  ;;  %v14846_v17 = vld [vmem:[#allocation2 + $0x318] sm:$0xc]  ;;  %v2631_v29 = vsel %vm13708_vm7, %v10156_v43, %v2630_v11  ;;  %11936 = vmatpush3.bf16.msra.mxu0 %v12396_v54 }
 0x26e   : > { %16878 = vst [vmem:[#allocation67_spill] sm:$0xff] %v14848_v38  ;;  %v3153_v50 = vld [vmem:[#allocation3 + $0x15c] sm:$0xff]  ;;  %v2632_v4 = vrot.slane %v2630_v11, 4  ;;  %2812 = vst [vmem:[#allocation3 + $0x1a8] sm:$0xf] %v2780_v47  ;;  %v14864_v11 = vpop.f32.mrf.mxu1  ;;  %v6492_v47 = vsel %vm13730_vm9, %v6490_v27, %v6491_v25  ;;  %v1267_v3 = vmax.f32 %v1219_v13, 0.0 }
 0x26f   : > { %v12344_v14 = vld [vmem:[#allocation3 + $0x13c] ss:$36 sps:$4 sm:$0xff]   ;;  %6890 = vst [vmem:[#allocation3 + $0x138] sm:$0xf] %v6769_v24  ;;  %6891 = vst [vmem:[#allocation3 + $0x15c] sm:$0xf] %v6772_v26  ;;  %v10226_v1 = vcombine.low %v3148_v7, %v3153_v50  ;;  %v10933_v26 = vpop.f32.mrf.mxu0 }
 0x270   : > { %v14852_v15 = vld [vmem:[#allocation2 + $0x31c] sm:$0xf]  ;;  %6954 = vst [vmem:[#allocation3 + $0x13c] sm:$0xf] %v6922_v34  ;;  %6955 = vst [vmem:[#allocation3 + $0x160] sm:$0xf] %v6923_v2  ;;  %5131 = vmatprep.mubr.bf16.mxu1 %v12344_v14  ;;  %v2634_v5 = vsel %vm13708_vm7, %v2632_v4, %v2633_v10 }
 0x271   : > { %2747 = vst [vmem:[#allocation3 + $0x180] sm:$0xf] %v2631_v29  ;;  %v6659_v63 = vld [vmem:[#allocation2 + $0x320] sm:$0x3]  ;;  %v6775_v56 = vrot.slane %v14852_v15, 6  ;;  %1293 = vst [vmem:[%s14439_s27 + $0x328] sm:$0xff] %v1261_v41  ;;  %5132 = vmatmul.mubr.bf16.gmra.mxu1 %v10226_v1  ;;  %v10934_v55 = vpop.f32.mrf.mxu0 }
 0x272   : > { %v10469_v24 = vrot.slane %v14846_v17, 10  ;;  %v6778_v34 = vrot.slane %v6659_v63, 6  ;;  %v2236_v2 = vld [vmem:[#allocation2 + $0x1e8] sm:$0x8]  ;;  %v1264_v7 = vmax.f32 %v1206_v6, 0.0  ;;  %v1262_v50 = vmax.f32 %v1198_v46, 0.0 }
 0x273   : > { %2748 = vst [vmem:[#allocation3 + $0x1a4] sm:$0xf] %v2634_v5  ;;  %v6777_v57 = vrot.slane %v6775_v56, 4  ;;  %v2237_v48 = vld [vmem:[#allocation2 + $0x1ec] sm:$0xf]  ;;  %v10139_v53 = vrot.slane %v2236_v2, 11  ;;  %v14878_v4 = vadd.f32 %v10934_v55, %v10933_v26 }
 0x274   : > { %v2238_v54 = vld [vmem:[#allocation2 + $0x1f0] sm:$0x7]  ;;  %v3137_v10 = vld [vmem:[#allocation3 + $0xe8] sm:$0xff]  ;;  %v2350_v17 = vrot.slane %v2237_v48, 7  ;;  %1296 = vst [vmem:[%s14439_s27 + $0x3a0] sm:$0xff] %v1264_v7  ;;  %1294 = vst [vmem:[%s14439_s27 + $0x350] sm:$0xff] %v1262_v50  ;;  %v14884_v7 = vpop.f32.mrf.mxu1  ;;  %v6776_v50 = vsel %vm13730_vm9, %v10469_v24, %v6775_v56 }
 0x275   : > { %v2353_v6 = vrot.slane %v2238_v54, 7  ;;  %v14872_v41 = vld [vmem:[#allocation2 + $0x1ec] sm:$0xc]  ;;  %v6382_v14 = vld [vmem:[#allocation2 + $0x1f0] sm:$0xf]  ;;  %1299 = vst [vmem:[%s14439_s27 + $0x418] sm:$0xff] %v1267_v3  ;;  %v6779_v55 = vsel %vm13730_vm9, %v6777_v57, %v6778_v34 }
 0x276   : > { %v14875_v29 = vld [vmem:[#allocation2 + $0x1f4] sm:$0x3]  ;;  %v10452_v61 = vrot.slane %v14872_v41, 10  ;;  %v3142_v15 = vld [vmem:[#allocation3 + $0x10c] sm:$0xff]  ;;  %v6924_v25 = vld [vmem:[#allocation2 + $0x320] sm:$0xf]  ;;  %v2351_v63 = vsel %vm13688_vm3, %v10139_v53, %v2350_v17  ;;  %v11057_v34 = vpop.f32.mrf.mxu1 }
 0x277   : > { %v12346_v1 = vld [vmem:[#allocation3 + $0xec] ss:$36 sps:$4 sm:$0xff]   ;;  %v6925_v27 = vld [vmem:[#allocation2 + $0x324] sm:$0xf]  ;;  %v2352_v5 = vrot.slane %v2350_v17, 4  ;;  %v6495_v2 = vrot.slane %v6382_v14, 6  ;;  %v10215_v26 = vcombine.low %v3137_v10, %v3142_v15  ;;  %v14900_v15 = vpop.f32.mrf.mxu0 }
 0x278   : > { %v6498_v46 = vrot.slane %v14875_v29, 6  ;;  %v16879_v48 = vld [vmem:[#allocation18_spill] sm:$0xff]  ;;  %v16880_v13 = vld [vmem:[#allocation19_spill] sm:$0xff]  ;;  %6615 = vst [vmem:[#allocation3 + $0xec] sm:$0xf] %v6489_v9  ;;  %v16881_v41 = vld [vmem:[#allocation40_spill] sm:$0xff]  ;;  %4962 = vmatprep.mubr.bf16.mxu0 %v12346_v1 }
 0x279   : > { %6343 = vst [vmem:[#allocation3 + $0xe8] sm:$0xf] %v16879_v48  ;;  %6344 = vst [vmem:[#allocation3 + $0x10c] sm:$0xf] %v16880_v13  ;;  %v14889_v54 = vld [vmem:[#allocation10] ss:$0 sm:$0xff]  ;;  %v2354_v9 = vsel %vm13688_vm3, %v2352_v5, %v2353_v6  ;;  %4963 = vmatmul.mubr.bf16.gmra.mxu0 %v10215_v26 }
 0x27a   : > { %6616 = vst [vmem:[#allocation3 + $0x110] sm:$0xf] %v6492_v47  ;;  %2472 = vst [vmem:[#allocation3 + $0x134] sm:$0xf] %v2351_v63  ;;  %v1211_v53 = vadd.f32 %v14889_v54, %v16881_v41  ;;  %v3158_v17 = vld [vmem:[#allocation3 + $0x180] sm:$0xff]  ;;  %v6497_v47 = vrot.slane %v6495_v2, 4 }
 0x27b   : > { %v883_v10 = vld [vmem:[#allocation7] sm:$0x1]  ;;  %2473 = vst [vmem:[#allocation3 + $0x158] sm:$0xf] %v2354_v9  ;;  %v16882_v14 = vld [vmem:[#allocation42_spill] sm:$0xff]  ;;  %v16884_v43 = vld [vmem:[#allocation43_spill] sm:$0xff] }
 0x27c   : > { %v967_v29 = vadd.f32 %v16882_v14, %v883_v10  ;;  %v2515_v3 = vld [vmem:[#allocation2 + $0x2a4] sm:$0xe]  ;;  %v2516_v48 = vld [vmem:[#allocation2 + $0x2a8] sm:$0xf]  ;;  %6892 = vst [vmem:[#allocation3 + $0x180] sm:$0xf] %v6776_v50 }
 0x27d   : > { %v3163_v1 = vld [vmem:[#allocation3 + $0x1a4] sm:$0xff]  ;;  %v10157_v13 = vrot.slane %v2515_v3, 9  ;;  %v2517_v5 = vld [vmem:[#allocation2 + $0x2ac] sm:$0x1]  ;;  %v2637_v26 = vrot.slane %v2516_v48, 5  ;;  %v1265_v3 = vmax.f32 %v1211_v53, 0.0 }
 0x27e   : > { %v12348_v63 = vld [vmem:[#allocation3 + $0x184] ss:$36 sps:$4 sm:$0xff]   ;;  %6893 = vst [vmem:[#allocation3 + $0x1a4] sm:$0xf] %v6779_v55  ;;  %v10235_v57 = vcombine.low %v3158_v17, %v3163_v1  ;;  %v972_v6 = vmax.f32 %v967_v29, 0.0  ;;  %v2640_v9 = vrot.slane %v2517_v5, 5  ;;  %v6499_v29 = vsel %vm13730_vm9, %v6497_v47, %v6498_v46 }
 0x27f   : > { %v16883_v56 = vld [vmem:[#allocation41_spill] sm:$0xff]  ;;  %6956 = vst [vmem:[#allocation3 + $0x184] sm:$0xf] %v6924_v25  ;;  %6957 = vst [vmem:[#allocation3 + $0x1a8] sm:$0xf] %v6925_v27  ;;  %5139 = vmatprep.mubr.bf16.mxu1 %v12348_v63  ;;  %v6496_v25 = vsel %vm13730_vm9, %v10452_v61, %v6495_v2  ;;  %v16885_v27 = vsub.s32 0, %v14549_v23  ;;  %v2638_v50 = vsel %vm13708_vm7, %v10157_v13, %v2637_v26  ;;  %v14922_v61 = vpop.f32.mrf.mxu0  ;;  %v11058_v23 = vpop.f32.mrf.mxu1 }
 0x280   : > { %v14904_v24 = vadd.f32 %v14889_v54, %v16883_v56  ;;  %v2781_v41 = vld [vmem:[#allocation2 + $0x2a8] sm:$0xf]  ;;  %v2782_v10 = vld [vmem:[#allocation2 + $0x2ac] sm:$0xf]  ;;  %v14906_v14 = vld [vmem:[#allocation2 + $0x330] sm:$0xc]  ;;  %v14910_v56 = vadd.f32 %v14889_v54, %v16884_v43  ;;  %5140 = vmatmul.mubr.bf16.gmra.mxu1 %v10235_v57  ;;  %v14931_v48 = vadd.f32 %v11058_v23, %v11057_v34 }
 0x281   : > { %2813 = vst [vmem:[#allocation3 + $0x1cc] sm:$0xf] %v2781_v41  ;;  %v976_v17 = vrot.slane %v972_v6, %v16885_v27  ;;  %v2639_v55 = vrot.slane %v2637_v26, 4  ;;  %2814 = vst [vmem:[#allocation3 + $0x1f0] sm:$0xf] %v2782_v10  ;;  %v14924_v2 = vld [vmem:[#allocation3 + $0x130] sm:$0xff]  ;;  %v10939_v23 = vpop.f32.mrf.mxu0 }
 0x282   : > { %v14918_v53 = vld [vmem:[#allocation2 + $0x334] sm:$0xf]  ;;  %v14920_v43 = vld [vmem:[#allocation2 + $0x338] sm:$0x3]  ;;  %2749 = vst [vmem:[#allocation3 + $0x1c8] sm:$0xf] %v2638_v50 }
 0x283   : > { %v16799_v1 = vrot.slane %v14918_v53, 6  ;;  %1297 = vst [vmem:[%s14439_s27 + $0x3c8] sm:$0xff] %v1265_v3  ;;  %v1268_v63 = vmax.f32 %v14904_v24, 0.0  ;;  %16886 = vst [vmem:[#allocation18_spill] sm:$0xff] %v14931_v48  ;;  %v2641_v46 = vsel %vm13708_vm7, %v2639_v55, %v2640_v9  ;;  %v10470_v47 = vrot.slane %v14906_v14, 10  ;;  %v3152_v57 = vld [vmem:[#allocation3 + $0x154] sm:$0xff] }
 0x284   : > { %977 = vst [vmem:[%s14439_s27] sm:$0xff] %v976_v17  ;;  %978 = vst [vmem:[%s14439_s27 + $0x28] sm:$0xff] %v976_v17  ;;  %v6785_v13 = vrot.slane %v14920_v43, 6  ;;  %v2239_v24 = vld [vmem:[#allocation2 + $0x200] sm:$0x8]  ;;  %v2240_v34 = vld [vmem:[#allocation2 + $0x204] sm:$0xf]  ;;  %v10224_v14 = vcombine.low %v14924_v2, %v3152_v57 }
 0x285   : > { %979 = vst [vmem:[%s14439_s27 + $0x50] sm:$0xff] %v976_v17  ;;  %980 = vst [vmem:[%s14439_s27 + $0x78] sm:$0xff] %v976_v17  ;;  %v12350_v6 = vld [vmem:[#allocation3 + $0x134] ss:$36 sps:$4 sm:$0xff]   ;;  %v6784_v5 = vrot.slane %v16799_v1, 4  ;;  %v16889_v9 = vld [vmem:[#allocation21_spill] sm:$0xff]  ;;  %v15001_v1 = vpop.f32.mrf.mxu1 }
 0x286   : > { %981 = vst [vmem:[%s14439_s27 + $0xa0] sm:$0xff] %v976_v17  ;;  %982 = vst [vmem:[%s14439_s27 + $0xc8] sm:$0xff] %v976_v17  ;;  %v2241_v26 = vld [vmem:[#allocation2 + $0x208] sm:$0x7]  ;;  %v16887_v41 = vld [vmem:[#allocation44_spill] sm:$0xff]  ;;  %v10140_v27 = vrot.slane %v2239_v24, 11  ;;  %4970 = vmatprep.mubr.bf16.mxu0 %v12350_v6 }
 0x287   : > { %983 = vst [vmem:[%s14439_s27 + $0xf0] sm:$0xff] %v976_v17  ;;  %984 = vst [vmem:[%s14439_s27 + $0x118] sm:$0xff] %v976_v17  ;;  %v1235_v10 = vadd.f32 %v14889_v54, %v16887_v41  ;;  %v16888_v3 = vld [vmem:[#allocation20_spill] sm:$0xff]  ;;  %v2360_v50 = vrot.slane %v2241_v26, 7  ;;  %v14977_v55 = vld [vmem:[#allocation2 + $0x204] sm:$0xc]  ;;  %4971 = vmatmul.mubr.bf16.gmra.mxu0 %v10224_v14  ;;  %v6786_v16 = vsel %vm13730_vm9, %v6784_v5, %v6785_v13 }
 0x288   : > { %985 = vst [vmem:[%s14439_s27 + $0x140] sm:$0xff] %v976_v17  ;;  %986 = vst [vmem:[%s14439_s27 + $0x168] sm:$0xff] %v976_v17  ;;  %v12397_v43 = vld [vmem:[%s16768_s6 + $0x58] sm:$0xff]   ;;  %v16890_v2 = vld [vmem:[#allocation45_spill] sm:$0xff]  ;;  %v16892_v14 = vrot.slane %v14918_v53, 6  ;;  %s12944_s17 = smov [#allocation13]  }
 0x289   : > { %987 = vst [vmem:[%s14439_s27 + $0x190] sm:$0xff] %v976_v17  ;;  %988 = vst [vmem:[%s14439_s27 + $0x1b8] sm:$0xff] %v976_v17  ;;  %v1227_v24 = vadd.f32 %v14889_v54, %v16890_v2  ;;  %v6926_v26 = vld [vmem:[#allocation2 + $0x338] sm:$0xf]  ;;  %v6927_v41 = vld [vmem:[#allocation2 + $0x33c] sm:$0xf]  ;;  %11367 = vmatprep.subr.bf16.mxu1 %v12397_v43 }
 0x28a   : > { %989 = vst [vmem:[%s14439_s27 + $0x1e0] sm:$0xff] %v976_v17  ;;  %990 = vst [vmem:[%s14439_s27 + $0x208] sm:$0xff] %v976_v17  ;;  %v12398_v2 = vld [vmem:[%s16768_s6 + $0x18] sm:$0xff]   ;;  %v6783_v49 = vsel %vm13730_vm9, %v10470_v47, %v16892_v14  ;;  %v3168_v45 = vld [vmem:[#allocation3 + $0x1c8] sm:$0xff]  ;;  %s12862_s2 = sshll.u32 %s12944_s17, 4  ;;  %s12863_s2 = int_to_ptr.vmem [resolvable:$false] %s12862_s2 }
 0x28b   : > { %991 = vst [vmem:[%s14439_s27 + $0x230] sm:$0xff] %v976_v17  ;;  %992 = vst [vmem:[%s14439_s27 + $0x258] sm:$0xff] %v976_v17  ;;  %v2783_v38 = vld [vmem:[#allocation2 + $0x2c0] sm:$0xf]  ;;  %11368 = vmatpush3.bf16.msra.mxu1 %v12398_v2  ;;  %v12403_v47 = vld [vmem:[%s16768_s6 + $0x50] sm:$0xff]   ;;  %s12864_s21 = scalar_lea.vmem %s12863_s2, 40960  ;;  %p12865_p10 = scmp.lt.s32.totalorder %s16716_s28, %s12863_s2 }
 0x28c   : > { %993 = vst [vmem:[%s14439_s27 + $0x280] sm:$0xff] %v976_v17  ;;  %994 = vst [vmem:[%s14439_s27 + $0x2a8] sm:$0xff] %v976_v17  ;;  %v12355_v5 = vld [vmem:[#allocation3 + $0x1cc] ss:$36 sps:$4 sm:$0xff]   ;;  %11369 = vmatprep.subr.bf16.mxu1 %v12403_v47  ;;  %v2788_v32 = vld [vmem:[#allocation2 + $0x2f4] sm:$0xf]  ;;  %p12866_p8 = scmp.lt.s32.totalorder %s12864_s21, %s12858_s23 }
 0x28d   : > { %995 = vst [vmem:[%s14439_s27 + $0x2d0] sm:$0xff] %v976_v17  ;;  %996 = vst [vmem:[%s14439_s27 + $0x2f8] sm:$0xff] %v976_v17  ;;  %v16894_v2 = vld [vmem:[#allocation47_spill] sm:$0xff]  ;;  %5147 = vmatprep.mubr.bf16.mxu1 %v12355_v5  ;;  %v16940_v52 = vld [vmem:[#allocation64_spill] sm:$0xff] }
 0x28e   : > { %997 = vst [vmem:[%s14439_s27 + $0x320] sm:$0xff] %v976_v17  ;;  %998 = vst [vmem:[%s14439_s27 + $0x348] sm:$0xff] %v976_v17  ;;  %v2787_v22 = vld [vmem:[#allocation2 + $0x2f0] sm:$0xf]  ;;  %p12867_p11 = por %p12866_p8, %p12865_p10 }
 0x28f   : > { %999 = vst [vmem:[%s14439_s27 + $0x370] sm:$0xff] %v976_v17  ;;  %1000 = vst [vmem:[%s14439_s27 + $0x398] sm:$0xff] %v976_v17 }
 0x290   : > { %1001 = vst [vmem:[%s14439_s27 + $0x3c0] sm:$0xff] %v976_v17  ;;  %1002 = vst [vmem:[%s14439_s27 + $0x3e8] sm:$0xff] %v976_v17  ;;  %p12868_p13 = pnand %p12867_p11, %p12861_p6 }
 0x291   : > { %1003 = vst [vmem:[%s14439_s27 + $0x410] sm:$0xff] %v976_v17  ;;  %1004 = vst [vmem:[%s14439_s27 + $0x438] sm:$0xff] %v976_v17 }
 0x292   : > { %1005 = vst [vmem:[%s14439_s27 + $0x460] sm:$0xff] %v976_v17  ;;  %1006 = vst [vmem:[%s14439_s27 + $0x488] sm:$0xff] %v976_v17 }
 0x293   : > { %1007 = vst [vmem:[%s14439_s27 + $0x4b0] sm:$0xff] %v976_v17  ;;  %1008 = vst [vmem:[%s14439_s27 + $0x4d8] sm:$0xff] %v976_v17  ;;  %v2357_v17 = vrot.slane %v2240_v34, 7  ;;  %v16891_v34 = vld [vmem:[#allocation46_spill] sm:$0xff] }
 0x294   : > { %2750 = vst [vmem:[#allocation3 + $0x1ec] sm:$0xf] %v2641_v46  ;;  %1300 = vst [vmem:[%s14439_s27 + $0x440] sm:$0xff] %v1268_v63  ;;  %v14982_v63 = vld [vmem:[#allocation2 + $0x208] sm:$0xf]  ;;  %v14992_v57 = vadd.f32 %v14889_v54, %v16891_v34  ;;  %v10940_v34 = vpop.f32.mrf.mxu0 }
 0x295   : > { %6345 = vst [vmem:[#allocation3 + $0x130] sm:$0xf] %v16888_v3  ;;  %6346 = vst [vmem:[#allocation3 + $0x154] sm:$0xf] %v16889_v9  ;;  %v14984_v46 = vld [vmem:[#allocation2 + $0x20c] sm:$0x3]  ;;  %v2358_v6 = vsel %vm13688_vm3, %v10140_v27, %v2357_v17  ;;  %v15008_v43 = vadd.f32 %v10940_v34, %v10939_v23  ;;  %v1230_v34 = vadd.f32 %v14889_v54, %v16894_v2 }
 0x296   : > { %6617 = vst [vmem:[#allocation3 + $0x134] sm:$0xf] %v6496_v25  ;;  %6618 = vst [vmem:[#allocation3 + $0x158] sm:$0xf] %v6499_v29  ;;  %v1266_v29 = vmax.f32 %v14910_v56, 0.0  ;;  %v2359_v3 = vrot.slane %v2357_v17, 4 }
 0x297   : > { %v6502_v9 = vrot.slane %v14982_v63, 6  ;;  %v2518_v56 = vld [vmem:[#allocation2 + $0x2bc] sm:$0xe]  ;;  %2474 = vst [vmem:[#allocation3 + $0x17c] sm:$0xf] %v2358_v6  ;;  %v1271_v25 = vmax.f32 %v1235_v10, 0.0 }
 0x298   : > { %1298 = vst [vmem:[%s14439_s27 + $0x3f0] sm:$0xff] %v1266_v29  ;;  %v2519_v27 = vld [vmem:[#allocation2 + $0x2c0] sm:$0xf]  ;;  %v2520_v17 = vld [vmem:[#allocation2 + $0x2c4] sm:$0x1]  ;;  %v10158_v63 = vrot.slane %v2518_v56, 9  ;;  %v2361_v62 = vsel %vm13688_vm3, %v2359_v3, %v2360_v50 }
 0x299   : > { %16893 = vst [vmem:[#allocation19_spill] sm:$0xff] %v15008_v43  ;;  %v6504_v53 = vrot.slane %v6502_v9, 4  ;;  %v2644_v48 = vrot.slane %v2519_v27, 5  ;;  %2475 = vst [vmem:[#allocation3 + $0x1a0] sm:$0xf] %v2361_v62  ;;  %v2647_v29 = vrot.slane %v2520_v17, 5  ;;  %v15024_v62 = vpop.f32.mrf.mxu1 }
 0x29a   : > { %v2784_v10 = vld [vmem:[#allocation2 + $0x2c4] sm:$0xf]  ;;  %2815 = vst [vmem:[#allocation3 + $0x214] sm:$0xf] %v2783_v38  ;;  %v15017_v23 = vld [vmem:[#allocation2 + $0x348] sm:$0xc] }
 0x29b   : > { %1303 = vst [vmem:[%s14439_s27 + $0x4b8] sm:$0xff] %v1271_v25  ;;  %v1269_v6 = vmax.f32 %v1227_v24, 0.0  ;;  %v3173_v13 = vld [vmem:[#allocation3 + $0x1ec] sm:$0xff]  ;;  %v2645_v50 = vsel %vm13708_vm7, %v10158_v63, %v2644_v48  ;;  %v2646_v3 = vrot.slane %v2644_v48, 4  ;;  %2816 = vst [vmem:[#allocation3 + $0x238] sm:$0xf] %v2784_v10  ;;  %v11063_v5 = vpop.f32.mrf.mxu1 }
 0x29c   : > { %v6664_v56 = vld [vmem:[#allocation2 + $0x34c] sm:$0xf]  ;;  %6894 = vst [vmem:[#allocation3 + $0x1c8] sm:$0xf] %v6783_v49  ;;  %6895 = vst [vmem:[#allocation3 + $0x1ec] sm:$0xf] %v6786_v16  ;;  %v10244_v38 = vcombine.low %v3168_v45, %v3173_v13  ;;  %v15031_v49 = vpop.f32.mrf.mxu0 }
 0x29d   : > { %6958 = vst [vmem:[#allocation3 + $0x1cc] sm:$0xf] %v6926_v26  ;;  %6959 = vst [vmem:[#allocation3 + $0x1f0] sm:$0xf] %v6927_v41  ;;  %v6665_v25 = vld [vmem:[#allocation2 + $0x350] sm:$0x3]  ;;  %v2648_v48 = vsel %vm13708_vm7, %v2646_v3, %v2647_v29 }
 0x29e   : > { %2751 = vst [vmem:[#allocation3 + $0x210] sm:$0xf] %v2645_v50  ;;  %v6789_v24 = vrot.slane %v6664_v56, 6  ;;  %1301 = vst [vmem:[%s14439_s27 + $0x468] sm:$0xff] %v1269_v6  ;;  %v10471_v14 = vrot.slane %v15017_v23, 10  ;;  %v6792_v27 = vrot.slane %v6665_v25, 6  ;;  %5148 = vmatmul.mubr.bf16.gmra.mxu1 %v10244_v38 }
 0x29f   : > { %v2242_v54 = vld [vmem:[#allocation2 + $0x218] sm:$0x8]  ;;  %v1272_v17 = vmax.f32 %v14992_v57, 0.0  ;;  %v16895_v16 = vrot.slane %v14977_v55, 10  ;;  %2752 = vst [vmem:[#allocation3 + $0x234] sm:$0xf] %v2648_v48 }
 0x2a0   : > { %v6791_v26 = vrot.slane %v6789_v24, 4  ;;  %v2243_v41 = vld [vmem:[#allocation2 + $0x21c] sm:$0xf]  ;;  %v2244_v63 = vld [vmem:[#allocation2 + $0x220] sm:$0x7]  ;;  %v10141_v47 = vrot.slane %v2242_v54, 11 }
 0x2a1   : > { %v6503_v45 = vsel %vm13730_vm9, %v16895_v16, %v6502_v9  ;;  %v3157_v29 = vld [vmem:[#allocation3 + $0x178] sm:$0xff]  ;;  %v16896_v10 = vrot.slane %v14984_v46, 6  ;;  %v2364_v57 = vrot.slane %v2243_v41, 7  ;;  %v2367_v6 = vrot.slane %v2244_v63, 7  ;;  %1304 = vst [vmem:[%s14439_s27 + $0x4e0] sm:$0xff] %v1272_v17  ;;  %v12404_v56 = vld [vmem:[%s16768_s6 + $0x10] sm:$0xff]   ;;  %v15051_v17 = vpop.f32.mrf.mxu0  ;;  %v11064_v16 = vpop.f32.mrf.mxu1 }
 0x2a2   : > { %v6387_v13 = vld [vmem:[#allocation2 + $0x21c] sm:$0xc]  ;;  %v1270_v55 = vmax.f32 %v1230_v34, 0.0  ;;  %v6388_v50 = vld [vmem:[#allocation2 + $0x220] sm:$0xf]  ;;  %v16897_v41 = vld [vmem:[#allocation22_spill] sm:$0xff]  ;;  %11370 = vmatpush3.bf16.msra.mxu1 %v12404_v56 }
 0x2a3   : > { %v6506_v23 = vsel %vm13730_vm9, %v6504_v53, %v16896_v10  ;;  %v15042_v9 = vld [vmem:[#allocation2 + $0x224] sm:$0x3]  ;;  %v10454_v3 = vrot.slane %v6387_v13, 10  ;;  %v3162_v2 = vld [vmem:[#allocation3 + $0x19c] sm:$0xff]  ;;  %v6928_v38 = vld [vmem:[#allocation2 + $0x350] sm:$0xf]  ;;  %v2365_v53 = vsel %vm13688_vm3, %v10141_v47, %v2364_v57  ;;  %v15055_v13 = vadd.f32 %v11064_v16, %v11063_v5 }
 0x2a4   : > { %v12357_v46 = vld [vmem:[#allocation3 + $0x17c] ss:$36 sps:$4 sm:$0xff]   ;;  %v6929_v25 = vld [vmem:[#allocation2 + $0x354] sm:$0xf]  ;;  %v2366_v48 = vrot.slane %v2364_v57, 4  ;;  %v6509_v54 = vrot.slane %v6388_v50, 6  ;;  %v10233_v10 = vcombine.low %v3157_v29, %v3162_v2  ;;  %v6790_v57 = vsel %vm13730_vm9, %v10471_v14, %v6789_v24 }
 0x2a5   : > { %v6512_v34 = vrot.slane %v15042_v9, 6  ;;  %1302 = vst [vmem:[%s14439_s27 + $0x490] sm:$0xff] %v1270_v55  ;;  %6347 = vst [vmem:[#allocation3 + $0x178] sm:$0xf] %v16897_v41  ;;  %v16898_v63 = vld [vmem:[#allocation23_spill] sm:$0xff]  ;;  %4978 = vmatprep.mubr.bf16.mxu0 %v12357_v46  ;;  %v6793_v55 = vsel %vm13730_vm9, %v6791_v26, %v6792_v27  ;;  %v10945_v46 = vpop.f32.mrf.mxu0 }
 0x2a6   : > { %6348 = vst [vmem:[#allocation3 + $0x19c] sm:$0xf] %v16898_v63  ;;  %6619 = vst [vmem:[#allocation3 + $0x17c] sm:$0xf] %v6503_v45  ;;  %v3178_v47 = vld [vmem:[#allocation3 + $0x210] sm:$0xff]  ;;  %v2368_v50 = vsel %vm13688_vm3, %v2366_v48, %v2367_v6  ;;  %v6511_v9 = vrot.slane %v6509_v54, 4  ;;  %4979 = vmatmul.mubr.bf16.gmra.mxu0 %v10233_v10 }
 0x2a7   : > { %6620 = vst [vmem:[#allocation3 + $0x1a0] sm:$0xf] %v6506_v23  ;;  %2476 = vst [vmem:[#allocation3 + $0x1c4] sm:$0xf] %v2365_v53  ;;  %v2521_v45 = vld [vmem:[#allocation2 + $0x2d4] sm:$0xe]  ;;  %v15063_v53 = vpop.f32.mrf.mxu1  ;;  %v10946_v63 = vpop.f32.mrf.mxu0 }
 0x2a8   : > { %16899 = vst [vmem:[#allocation40_spill] sm:$0xff] %v15055_v13  ;;  %2477 = vst [vmem:[#allocation3 + $0x1e8] sm:$0xf] %v2368_v50  ;;  %v2522_v29 = vld [vmem:[#allocation2 + $0x2d8] sm:$0xf]  ;;  %v10159_v2 = vrot.slane %v2521_v45, 9  ;;  %v6513_v50 = vsel %vm13730_vm9, %v6511_v9, %v6512_v34 }
 0x2a9   : > { %v3183_v23 = vld [vmem:[#allocation3 + $0x234] sm:$0xff]  ;;  %v2523_v5 = vld [vmem:[#allocation2 + $0x2dc] sm:$0x1]  ;;  %6896 = vst [vmem:[#allocation3 + $0x210] sm:$0xf] %v6790_v57  ;;  %v2651_v14 = vrot.slane %v2522_v29, 5 }
 0x2aa   : > { %v12359_v56 = vld [vmem:[#allocation3 + $0x214] ss:$36 sps:$4 sm:$0xff]   ;;  %6897 = vst [vmem:[#allocation3 + $0x234] sm:$0xf] %v6793_v55  ;;  %v10253_v24 = vcombine.low %v3178_v47, %v3183_v23  ;;  %v2654_v27 = vrot.slane %v2523_v5, 5  ;;  %v12407_v57 = vld [vmem:[%s16768_s6 + $0x48] sm:$0xff]   ;;  %v15085_v23 = vpop.f32.mrf.mxu1 }
 0x2ab   : > { %6960 = vst [vmem:[#allocation3 + $0x214] sm:$0xf] %v6928_v38  ;;  %6961 = vst [vmem:[#allocation3 + $0x238] sm:$0xf] %v6929_v25  ;;  %v2785_v26 = vld [vmem:[#allocation2 + $0x2d8] sm:$0xf]  ;;  %5155 = vmatprep.mubr.bf16.mxu1 %v12359_v56  ;;  %v6510_v38 = vsel %vm13730_vm9, %v10454_v3, %v6509_v54  ;;  %v2652_v25 = vsel %vm13708_vm7, %v10159_v2, %v2651_v14  ;;  %v15083_v54 = vadd.f32 %v10946_v63, %v10945_v46 }
 0x2ac   : > { %v2786_v6 = vld [vmem:[#allocation2 + $0x2dc] sm:$0xf]  ;;  %2817 = vst [vmem:[#allocation3 + $0x25c] sm:$0xf] %v2785_v26  ;;  %v15065_v48 = vld [vmem:[#allocation2 + $0x360] sm:$0xc]  ;;  %5156 = vmatmul.mubr.bf16.gmra.mxu1 %v10253_v24  ;;  %11371 = vmatprep.subr.bf16.mxu1 %v12407_v57 }
 0x2ad   : > { %2818 = vst [vmem:[#allocation3 + $0x280] sm:$0xf] %v2786_v6  ;;  %v15067_v16 = vld [vmem:[#allocation2 + $0x364] sm:$0xf]  ;;  %v15069_v41 = vld [vmem:[#allocation2 + $0x368] sm:$0x3] }
 0x2ae   : > { %v2653_v10 = vrot.slane %v2651_v14, 4  ;;  %v6796_v47 = vrot.slane %v15067_v16, 6  ;;  %v3167_v55 = vld [vmem:[#allocation3 + $0x1c0] sm:$0xff]  ;;  %2753 = vst [vmem:[#allocation3 + $0x258] sm:$0xf] %v2652_v25  ;;  %v10472_v45 = vrot.slane %v15065_v48, 10 }
 0x2af   : > { %v6799_v29 = vrot.slane %v15069_v41, 6  ;;  %v2245_v3 = vld [vmem:[#allocation2 + $0x230] sm:$0x8]  ;;  %16900 = vst [vmem:[#allocation42_spill] sm:$0xff] %v15083_v54  ;;  %v2246_v2 = vld [vmem:[#allocation2 + $0x234] sm:$0xf] }
 0x2b0   : > { %v2655_v56 = vsel %vm13708_vm7, %v2653_v10, %v2654_v27  ;;  %v6798_v5 = vrot.slane %v6796_v47, 4  ;;  %v2247_v24 = vld [vmem:[#allocation2 + $0x238] sm:$0x7]  ;;  %v10142_v14 = vrot.slane %v2245_v3, 11  ;;  %v3172_v26 = vld [vmem:[#allocation3 + $0x1e4] sm:$0xff]  ;;  %v2371_v9 = vrot.slane %v2246_v2, 7  ;;  %v15100_v10 = vpop.f32.mrf.mxu0 }
 0x2b1   : > { %v12361_v34 = vld [vmem:[#allocation3 + $0x1c4] ss:$36 sps:$4 sm:$0xff]   ;;  %2754 = vst [vmem:[#allocation3 + $0x27c] sm:$0xf] %v2655_v56  ;;  %v2374_v6 = vrot.slane %v2247_v24, 7  ;;  %v16901_v48 = vld [vmem:[#allocation24_spill] sm:$0xff]  ;;  %v10242_v27 = vcombine.low %v3167_v55, %v3172_v26  ;;  %v11069_v55 = vpop.f32.mrf.mxu1 }
 0x2b2   : > { %v12408_v46 = vld [vmem:[%s16768_s6 + $0x8] sm:$0xff]   ;;  %6349 = vst [vmem:[#allocation3 + $0x1c0] sm:$0xf] %v16901_v48  ;;  %v16902_v16 = vld [vmem:[#allocation25_spill] sm:$0xff]  ;;  %6621 = vst [vmem:[#allocation3 + $0x1c4] sm:$0xf] %v6510_v38  ;;  %4986 = vmatprep.mubr.bf16.mxu0 %v12361_v34  ;;  %v2372_v57 = vsel %vm13688_vm3, %v10142_v14, %v2371_v9 }
 0x2b3   : > { %6350 = vst [vmem:[#allocation3 + $0x1e4] sm:$0xf] %v16902_v16  ;;  %6622 = vst [vmem:[#allocation3 + $0x1e8] sm:$0xf] %v6513_v50  ;;  %v15094_v41 = vld [vmem:[#allocation2 + $0x234] sm:$0xc]  ;;  %11372 = vmatpush3.bf16.msra.mxu1 %v12408_v46  ;;  %4987 = vmatmul.mubr.bf16.gmra.mxu0 %v10242_v27 }
 0x2b4   : > { %v15096_v63 = vld [vmem:[#allocation2 + $0x238] sm:$0xf]  ;;  %v15098_v25 = vld [vmem:[#allocation2 + $0x23c] sm:$0x3]  ;;  %v2373_v3 = vrot.slane %v2371_v9, 4  ;;  %v12411_v38 = vld [vmem:[%s16767_s5 + $0x200] sm:$0xff]  }
 0x2b5   : > { %v2524_v2 = vld [vmem:[#allocation2 + $0x2ec] sm:$0xe]  ;;  %v6930_v50 = vld [vmem:[#allocation2 + $0x368] sm:$0xf]  ;;  %2478 = vst [vmem:[#allocation3 + $0x20c] sm:$0xf] %v2372_v57  ;;  %11937 = vmatprep.subr.bf16.mxu0 %v12411_v38 }
 0x2b6   : > { %v6931_v24 = vld [vmem:[#allocation2 + $0x36c] sm:$0xf]  ;;  %v16903_v26 = vld [vmem:[#allocation49_spill] sm:$0xff]  ;;  %v2525_v16 = vld [vmem:[#allocation2 + $0x2f0] sm:$0xf]  ;;  %v10160_v9 = vrot.slane %v2524_v2, 9  ;;  %v2375_v46 = vsel %vm13688_vm3, %v2373_v3, %v2374_v6  ;;  %v6797_v2 = vsel %vm13730_vm9, %v10472_v45, %v6796_v47  ;;  %11938 = vmatpush3.bf16.msra.mxu0 %v12411_v38 }
 0x2b7   : > { %v16904_v48 = vld [vmem:[#allocation50_spill] sm:$0xff]  ;;  %v2526_v14 = vld [vmem:[#allocation2 + $0x2f4] sm:$0x1]  ;;  %v16905_v13 = vld [vmem:[#allocation52_spill] sm:$0xff]  ;;  %v10455_v20 = vrot.slane %v15094_v41, 10  ;;  %v2658_v27 = vrot.slane %v2525_v16, 5 }
 0x2b8   : > { %v15110_v34 = vadd.f32 %v16904_v48, %v16903_v26  ;;  %v16906_v56 = vld [vmem:[#allocation53_spill] sm:$0xff]  ;;  %v16907_v57 = vld [vmem:[#allocation56_spill] sm:$0xff]  ;;  %v11070_v26 = vpop.f32.mrf.mxu1  ;;  %2479 = vst [vmem:[#allocation3 + $0x230] sm:$0xf] %v2375_v46  ;;  %v2661_v6 = vrot.slane %v2526_v14, 5  ;;  %v16910_v16 = vrot.slane %v15096_v63, 6 }
 0x2b9   : > { %v15114_v58 = vadd.f32 %v16906_v56, %v16905_v13  ;;  %v16908_v54 = vld [vmem:[#allocation57_spill] sm:$0xff]  ;;  %v3188_v48 = vld [vmem:[#allocation3 + $0x258] sm:$0xff]  ;;  %v6800_v13 = vsel %vm13730_vm9, %v6798_v5, %v6799_v29  ;;  %2819 = vst [vmem:[#allocation3 + $0x2a4] sm:$0xf] %v2787_v22  ;;  %2820 = vst [vmem:[#allocation3 + $0x2c8] sm:$0xf] %v2788_v32  ;;  %v15133_v56 = vadd.f32 %v11070_v26, %v11069_v55 }
 0x2ba   : > { %v15121_v43 = vadd.f32 %v16908_v54, %v16907_v57  ;;  %v15127_v41 = vld [vmem:[#allocation2 + $0x378] sm:$0xc]  ;;  %v15129_v3 = vld [vmem:[#allocation2 + $0x37c] sm:$0xf]  ;;  %v15131_v54 = vpop.f32.mrf.mxu0  ;;  %v6518_v57 = vrot.slane %v16910_v16, 4  ;;  %v6519_v47 = vrot.slane %v15098_v25, 6  ;;  %v2659_v45 = vsel %vm13708_vm7, %v10160_v9, %v2658_v27 }
 0x2bb   : > { %16909 = vst [vmem:[#allocation41_spill] sm:$0xff] %v15133_v56  ;;  %v2660_v29 = vrot.slane %v2658_v27, 4  ;;  %v15140_v22 = vld [vmem:[#allocation2 + $0x380] sm:$0x3]  ;;  %2755 = vst [vmem:[#allocation3 + $0x2a0] sm:$0xf] %v2659_v45  ;;  %v15149_v26 = vadd.f32 %v14565_v42, %v14551_v60 }
 0x2bc   : > { %v3193_v32 = vld [vmem:[#allocation3 + $0x27c] sm:$0xff]  ;;  %v6803_v38 = vrot.slane %v15129_v3, 6  ;;  %v16911_v14 = vld [vmem:[#allocation54_spill] sm:$0xff]  ;;  %v16912_v46 = vld [vmem:[#allocation55_spill] sm:$0xff]  ;;  %6898 = vst [vmem:[#allocation3 + $0x258] sm:$0xf] %v6797_v2 }
 0x2bd   : > { %v12366_v5 = vld [vmem:[#allocation3 + $0x25c] ss:$36 sps:$4 sm:$0xff]   ;;  %v15145_v55 = vadd.f32 %v16912_v46, %v16911_v14  ;;  %v16913_v25 = vld [vmem:[#allocation58_spill] sm:$0xff]  ;;  %6899 = vst [vmem:[#allocation3 + $0x27c] sm:$0xf] %v6800_v13  ;;  %v10262_v27 = vcombine.low %v3188_v48, %v3193_v32  ;;  %v2662_v3 = vsel %vm13708_vm7, %v2660_v29, %v2661_v6  ;;  %v10473_v45 = vrot.slane %v15127_v41, 10  ;;  %v10951_v48 = vpop.f32.mrf.mxu0 }
 0x2be   : > { %v15153_v16 = vadd.f32 %v14536_v44, %v16913_v25  ;;  %v12412_v9 = vld [vmem:[%s16768_s6 + $0x40] sm:$0xff]   ;;  %6962 = vst [vmem:[#allocation3 + $0x25c] sm:$0xf] %v6930_v50  ;;  %6963 = vst [vmem:[#allocation3 + $0x280] sm:$0xf] %v6931_v24  ;;  %v6806_v60 = vrot.slane %v15140_v22, 6  ;;  %5163 = vmatprep.mubr.bf16.mxu1 %v12366_v5  ;;  %v15164_v50 = vadd.f32 %v14652_v30, %v14626_v33 }
 0x2bf   : > { %v2248_v42 = vld [vmem:[#allocation2 + $0x248] sm:$0x8]  ;;  %v2249_v14 = vld [vmem:[#allocation2 + $0x24c] sm:$0xf]  ;;  %2756 = vst [vmem:[#allocation3 + $0x2c4] sm:$0xf] %v2662_v3  ;;  %11373 = vmatprep.subr.bf16.mxu1 %v12412_v9  ;;  %5164 = vmatmul.mubr.bf16.gmra.mxu1 %v10262_v27  ;;  %v6520_v41 = vsel %vm13730_vm9, %v6518_v57, %v6519_v47  ;;  %v15177_v30 = vadd.f32 %v14616_v31, %v14575_v37  ;;  %v10952_v57 = vpop.f32.mrf.mxu0 }
 0x2c0   : > { %v6805_v44 = vrot.slane %v6803_v38, 4  ;;  %v2250_v46 = vld [vmem:[#allocation2 + $0x250] sm:$0x7]  ;;  %v10143_v25 = vrot.slane %v2248_v42, 11  ;;  %v2378_v56 = vrot.slane %v2249_v14, 7  ;;  %v12413_v24 = vld [vmem:[%s16768_s6] sm:$0xff]  }
 0x2c1   : > { %v3177_v2 = vld [vmem:[#allocation3 + $0x208] sm:$0xff]  ;;  %v16914_v13 = vrot.slane %v15096_v63, 6  ;;  %v2381_v29 = vrot.slane %v2250_v46, 7  ;;  %v6394_v33 = vld [vmem:[#allocation2 + $0x250] sm:$0xf]  ;;  %v15183_v63 = vadd.f32 %v14796_v35, %v14756_v39  ;;  %11374 = vmatpush3.bf16.msra.mxu1 %v12413_v24  ;;  %v15187_v46 = vadd.f32 %v14747_v59, %v14727_v18 }
 0x2c2   : > { %v6393_v22 = vld [vmem:[#allocation2 + $0x24c] sm:$0xc]  ;;  %v2379_v32 = vsel %vm13688_vm3, %v10143_v25, %v2378_v56  ;;  %v2380_v5 = vrot.slane %v2378_v56, 4  ;;  %v6395_v9 = vld [vmem:[#allocation2 + $0x254] sm:$0x3]  ;;  %v6523_v37 = vrot.slane %v6394_v33, 6  ;;  %v15192_v39 = vadd.f32 %v10952_v57, %v10951_v48 }
 0x2c3   : > { %v6517_v6 = vsel %vm13730_vm9, %v10455_v20, %v16914_v13  ;;  %v10456_v27 = vrot.slane %v6393_v22, 10  ;;  %v11072_v20 = vpop.f32.mrf.mxu1  ;;  %v3182_v47 = vld [vmem:[#allocation3 + $0x22c] sm:$0xff]  ;;  %v6932_v42 = vld [vmem:[#allocation2 + $0x380] sm:$0xf]  ;;  %v6933_v14 = vld [vmem:[#allocation2 + $0x384] sm:$0xf]  ;;  %v15200_v18 = vadd.f32 %v14844_v19, %v14816_v28  ;;  %v15204_v59 = vadd.f32 %v14884_v7, %v14864_v11 }
 0x2c4   : > { %v12368_v3 = vld [vmem:[#allocation3 + $0x20c] ss:$36 sps:$4 sm:$0xff]   ;;  %2480 = vst [vmem:[#allocation3 + $0x254] sm:$0xf] %v2379_v32  ;;  %v6526_v31 = vrot.slane %v6395_v9, 6  ;;  %v12424_v56 = vld [vmem:[%s16768_s6 + $0xf8] sm:$0xff]   ;;  %v10251_v24 = vcombine.low %v3177_v2, %v3182_v47  ;;  %v2382_v13 = vsel %vm13688_vm3, %v2380_v5, %v2381_v29  ;;  %v6804_v22 = vsel %vm13730_vm9, %v10473_v45, %v6803_v38  ;;  %v15242_v5 = vpop.f32.mrf.mxu0 }
 0x2c5   : > { %v16915_v35 = vld [vmem:[#allocation26_spill] sm:$0xff]  ;;  %v16916_v25 = vld [vmem:[#allocation27_spill] sm:$0xff]  ;;  %6623 = vst [vmem:[#allocation3 + $0x20c] sm:$0xf] %v6517_v6  ;;  %6624 = vst [vmem:[#allocation3 + $0x230] sm:$0xf] %v6520_v41  ;;  %4994 = vmatprep.mubr.bf16.mxu0 %v12368_v3  ;;  %v6807_v6 = vsel %vm13730_vm9, %v6805_v44, %v6806_v60  ;;  %v15212_v41 = vadd.f32 %v14922_v61, %v14900_v15  ;;  %11471 = vmatprep.subr.bf16.mxu0 %v12424_v56  ;;  %v11073_v61 = vpop.f32.mrf.mxu1 }
 0x2c6   : > { %6351 = vst [vmem:[#allocation3 + $0x208] sm:$0xf] %v16915_v35  ;;  %6352 = vst [vmem:[#allocation3 + $0x22c] sm:$0xf] %v16916_v25  ;;  %v3198_v48 = vld [vmem:[#allocation3 + $0x2a0] sm:$0xff]  ;;  %v6525_v2 = vrot.slane %v6523_v37, 4  ;;  %4995 = vmatmul.mubr.bf16.gmra.mxu0 %v10251_v24  ;;  %v15218_v7 = vadd.f32 %v15024_v62, %v15001_v1  ;;  %v15222_v38 = vadd.f32 %v15051_v17, %v15031_v49 }
 0x2c7   : > { %2481 = vst [vmem:[#allocation3 + $0x278] sm:$0xf] %v2382_v13  ;;  %v15214_v28 = vld [vmem:[#allocation12] ss:$0 sm:$0xff]  ;;  %v2527_v19 = vld [vmem:[#allocation2 + $0x304] sm:$0xe]  ;;  %v15226_v45 = vadd.f32 %v15085_v23, %v15063_v53  ;;  %v15230_v15 = vadd.f32 %v15131_v54, %v15100_v10  ;;  %v6524_v29 = vsel %vm13730_vm9, %v10456_v27, %v6523_v37  ;;  %v15236_v17 = vadd.f32 %v11073_v61, %v11072_v20  ;;  %v15262_v56 = vpop.f32.mrf.mxu1 }
 0x2c8   : > { %v2528_v11 = vld [vmem:[#allocation2 + $0x308] sm:$0xf]  ;;  %v6527_v1 = vsel %vm13730_vm9, %v6525_v2, %v6526_v31  ;;  %v2529_v62 = vld [vmem:[#allocation2 + $0x30c] sm:$0x1]  ;;  %v10161_v49 = vrot.slane %v2527_v19, 9  ;;  %v15240_v23 = vadd.f32 %v14586_v51, %v15214_v28  ;;  %v15246_v57 = vadd.f32 %v15121_v43, %v15214_v28 }
 0x2c9   : > { %v3203_v60 = vld [vmem:[#allocation3 + $0x2c4] sm:$0xff]  ;;  %6900 = vst [vmem:[#allocation3 + $0x2a0] sm:$0xf] %v6804_v22  ;;  %v2665_v10 = vrot.slane %v2528_v11, 5  ;;  %v2668_v54 = vrot.slane %v2529_v62, 5  ;;  %v15250_v51 = vadd.f32 %v14640_v8, %v15214_v28  ;;  %v15254_v47 = vadd.f32 %v15149_v26, %v15214_v28  ;;  %v11076_v19 = vpop.f32.mrf.mxu1  ;;  %v16917_v11 = vld [vmem:[#allocation28_spill] sm:$0xff] }
 0x2ca   : > { %v12370_v44 = vld [vmem:[#allocation3 + $0x2a4] ss:$36 sps:$4 sm:$0xff]   ;;  %6901 = vst [vmem:[#allocation3 + $0x2c4] sm:$0xf] %v6807_v6  ;;  %v10271_v53 = vcombine.low %v3198_v48, %v3203_v60  ;;  %v2790_v32 = vld [vmem:[#allocation2 + $0x30c] sm:$0xf]  ;;  %v15258_v3 = vadd.f32 %v14667_v40, %v15214_v28  ;;  %v15266_v26 = vadd.f32 %v15164_v50, %v15214_v28  ;;  %v15270_v40 = vadd.f32 %v14716_v36, %v15214_v28  ;;  %v10955_v36 = vpop.f32.mrf.mxu0 }
 0x2cb   : > { %6964 = vst [vmem:[#allocation3 + $0x2a4] sm:$0xf] %v6932_v42  ;;  %6965 = vst [vmem:[#allocation3 + $0x2c8] sm:$0xf] %v6933_v14  ;;  %v2789_v33 = vld [vmem:[#allocation2 + $0x308] sm:$0xf]  ;;  %5171 = vmatprep.mubr.bf16.mxu1 %v12370_v44  ;;  %v2666_v14 = vsel %vm13708_vm7, %v10161_v49, %v2665_v10  ;;  %v15274_v25 = vadd.f32 %v15187_v46, %v15214_v28  ;;  %v15280_v2 = vadd.f32 %v14794_v21, %v15214_v28 }
 0x2cc   : > { %2821 = vst [vmem:[#allocation3 + $0x2ec] sm:$0xf] %v2789_v33  ;;  %2822 = vst [vmem:[#allocation3 + $0x310] sm:$0xf] %v2790_v32  ;;  %v6672_v9 = vld [vmem:[#allocation2 + $0x390] sm:$0xc]  ;;  %5172 = vmatmul.mubr.bf16.gmra.mxu1 %v10271_v53  ;;  %v15284_v50 = vadd.f32 %v15200_v18, %v15214_v28 }
 0x2cd   : > { %v6673_v27 = vld [vmem:[#allocation2 + $0x394] sm:$0xf]  ;;  %v6674_v20 = vld [vmem:[#allocation2 + $0x398] sm:$0x3]  ;;  %v2667_v37 = vrot.slane %v2665_v10, 4  ;;  %v10474_v43 = vrot.slane %v6672_v9, 10 }
 0x2ce   : > { %v3187_v42 = vld [vmem:[#allocation3 + $0x250] sm:$0xff]  ;;  %v6810_v31 = vrot.slane %v6673_v27, 6  ;;  %2757 = vst [vmem:[#allocation3 + $0x2e8] sm:$0xf] %v2666_v14  ;;  %v6813_v8 = vrot.slane %v6674_v20, 6  ;;  %v16918_v46 = vld [vmem:[#allocation29_spill] sm:$0xff] }
 0x2cf   : > { %v2251_v35 = vld [vmem:[#allocation2 + $0x260] sm:$0x8]  ;;  %v3192_v24 = vld [vmem:[#allocation3 + $0x274] sm:$0xff]  ;;  %v2669_v48 = vsel %vm13708_vm7, %v2667_v37, %v2668_v54  ;;  %v2252_v6 = vld [vmem:[#allocation2 + $0x264] sm:$0xf] }
 0x2d0   : > { %v12372_v13 = vld [vmem:[#allocation3 + $0x254] ss:$36 sps:$4 sm:$0xff]   ;;  %v6812_v22 = vrot.slane %v6810_v31, 4  ;;  %6353 = vst [vmem:[#allocation3 + $0x250] sm:$0xf] %v16917_v11  ;;  %v10260_v61 = vcombine.low %v3187_v42, %v3192_v24  ;;  %v6811_v60 = vsel %vm13730_vm9, %v10474_v43, %v6810_v31  ;;  %v10144_v21 = vrot.slane %v2251_v35, 11  ;;  %v10957_v24 = vpop.f32.mrf.mxu0 }
 0x2d1   : > { %6354 = vst [vmem:[#allocation3 + $0x274] sm:$0xf] %v16918_v46  ;;  %6625 = vst [vmem:[#allocation3 + $0x254] sm:$0xf] %v6524_v29  ;;  %v2253_v44 = vld [vmem:[#allocation2 + $0x268] sm:$0x7]  ;;  %5002 = vmatprep.mubr.bf16.mxu0 %v12372_v13  ;;  %v15294_v29 = vadd.f32 %v14878_v4, %v15214_v28  ;;  %v15310_v13 = vpop.f32.mrf.mxu1 }
 0x2d2   : > { %6626 = vst [vmem:[#allocation3 + $0x278] sm:$0xf] %v6527_v1  ;;  %2758 = vst [vmem:[#allocation3 + $0x30c] sm:$0xf] %v2669_v48  ;;  %v2385_v62 = vrot.slane %v2252_v6, 7  ;;  %v6814_v18 = vsel %vm13730_vm9, %v6812_v22, %v6813_v8  ;;  %v2388_v53 = vrot.slane %v2253_v44, 7  ;;  %v15298_v1 = vadd.f32 %v15212_v41, %v15214_v28  ;;  %5003 = vmatmul.mubr.bf16.gmra.mxu0 %v10260_v61 }
 0x2d3   : > { %v6396_v49 = vld [vmem:[#allocation2 + $0x264] sm:$0xc]  ;;  %v6397_v10 = vld [vmem:[#allocation2 + $0x268] sm:$0xf]  ;;  %v6398_v54 = vld [vmem:[#allocation2 + $0x26c] sm:$0x3]  ;;  %v15308_v41 = vadd.f32 %v15222_v38, %v15214_v28 }
 0x2d4   : > { %v2386_v33 = vsel %vm13688_vm3, %v10144_v21, %v2385_v62  ;;  %v2387_v32 = vrot.slane %v2385_v62, 4  ;;  %v10457_v9 = vrot.slane %v6396_v49, 10  ;;  %v6530_v27 = vrot.slane %v6397_v10, 6  ;;  %v2530_v20 = vld [vmem:[#allocation2 + $0x31c] sm:$0xe]  ;;  %v16919_v8 = vld [vmem:[#allocation19_spill] sm:$0xff] }
 0x2d5   : > { %v6934_v42 = vld [vmem:[#allocation2 + $0x398] sm:$0xf]  ;;  %v6935_v14 = vld [vmem:[#allocation2 + $0x39c] sm:$0xf]  ;;  %2482 = vst [vmem:[#allocation3 + $0x29c] sm:$0xf] %v2386_v33  ;;  %v15304_v35 = vadd.f32 %v16919_v8, %v15214_v28  ;;  %v15320_v10 = vadd.f32 %v15230_v15, %v15214_v28  ;;  %v10958_v33 = vpop.f32.mrf.mxu0 }
 0x2d6   : > { %v6533_v37 = vrot.slane %v6398_v54, 6  ;;  %v2531_v43 = vld [vmem:[#allocation2 + $0x320] sm:$0xf]  ;;  %v2532_v31 = vld [vmem:[#allocation2 + $0x324] sm:$0x1]  ;;  %v10162_v4 = vrot.slane %v2530_v20, 9  ;;  %v2389_v48 = vsel %vm13688_vm3, %v2387_v32, %v2388_v53  ;;  %v10956_v53 = vadd.f32 %v10955_v36, %v15242_v5  ;;  %v15334_v36 = vpop.f32.mrf.mxu1 }
 0x2d7   : > { %v6532_v22 = vrot.slane %v6530_v27, 4  ;;  %v2672_v6 = vrot.slane %v2531_v43, 5  ;;  %v2791_v11 = vld [vmem:[#allocation2 + $0x320] sm:$0xf]  ;;  %v2792_v46 = vld [vmem:[#allocation2 + $0x324] sm:$0xf]  ;;  %v15324_v54 = vadd.f32 %v11076_v19, %v15262_v56  ;;  %v6531_v32 = vsel %vm13730_vm9, %v10457_v9, %v6530_v27  ;;  %v10960_v19 = vpop.f32.mrf.mxu0 }
 0x2d8   : > { %v16920_v61 = vld [vmem:[#allocation42_spill] sm:$0xff]  ;;  %2483 = vst [vmem:[#allocation3 + $0x2c0] sm:$0xf] %v2389_v48  ;;  %v2675_v62 = vrot.slane %v2532_v31, 5  ;;  %2823 = vst [vmem:[#allocation3 + $0x334] sm:$0xf] %v2791_v11  ;;  %v15332_v5 = vadd.f32 %v15192_v39, %v15214_v28  ;;  %v10959_v56 = vadd.f32 %v10958_v33, %v10957_v24 }
 0x2d9   : > { %v15316_v44 = vadd.f32 %v16920_v61, %v15214_v28  ;;  %v3208_v21 = vld [vmem:[#allocation3 + $0x2e8] sm:$0xff]  ;;  %2824 = vst [vmem:[#allocation3 + $0x358] sm:$0xf] %v2792_v46  ;;  %v2673_v20 = vsel %vm13708_vm7, %v10162_v4, %v2672_v6  ;;  %v2674_v43 = vrot.slane %v2672_v6, 4  ;;  %v6677_v31 = vld [vmem:[#allocation2 + $0x3b0] sm:$0x3]  ;;  %v6534_v27 = vsel %vm13730_vm9, %v6532_v22, %v6533_v37 }
 0x2da   : > { %v6675_v38 = vld [vmem:[#allocation2 + $0x3a8] sm:$0xc]  ;;  %v6676_v49 = vld [vmem:[#allocation2 + $0x3ac] sm:$0xf]  ;;  %2759 = vst [vmem:[#allocation3 + $0x330] sm:$0xf] %v2673_v20  ;;  %v15351_v20 = vadd.f32 %v15110_v34, %v15246_v57 }
 0x2db   : > { %v10475_v8 = vrot.slane %v6675_v38, 10  ;;  %v3213_v48 = vld [vmem:[#allocation3 + $0x30c] sm:$0xff]  ;;  %v6817_v15 = vrot.slane %v6676_v49, 6  ;;  %v6820_v46 = vrot.slane %v6677_v31, 6  ;;  %6902 = vst [vmem:[#allocation3 + $0x2e8] sm:$0xf] %v6811_v60  ;;  %v2676_v4 = vsel %vm13708_vm7, %v2674_v43, %v2675_v62 }
 0x2dc   : > { %v12377_v11 = vld [vmem:[#allocation3 + $0x2ec] ss:$36 sps:$4 sm:$0xff]   ;;  %6903 = vst [vmem:[#allocation3 + $0x30c] sm:$0xf] %v6814_v18  ;;  %v10280_v9 = vcombine.low %v3208_v21, %v3213_v48  ;;  %v2254_v6 = vld [vmem:[#allocation2 + $0x278] sm:$0x8]  ;;  %v10961_v21 = vpop.f32.mrf.mxu0 }
 0x2dd   : > { %6966 = vst [vmem:[#allocation3 + $0x2ec] sm:$0xf] %v6934_v42  ;;  %6967 = vst [vmem:[#allocation3 + $0x310] sm:$0xf] %v6935_v14  ;;  %v2255_v61 = vld [vmem:[#allocation2 + $0x27c] sm:$0xf]  ;;  %5179 = vmatprep.mubr.bf16.mxu1 %v12377_v11  ;;  %v15345_v14 = vadd.f32 %v10956_v53, %v15214_v28  ;;  %v6818_v22 = vsel %vm13730_vm9, %v10475_v8, %v6817_v15  ;;  %v15358_v11 = vadd.f32 %v10959_v56, %v15214_v28  ;;  %v11081_v8 = vpop.f32.mrf.mxu1 }
 0x2de   : > { %v16921_v39 = vld [vmem:[#allocation48_spill] sm:$0xff]  ;;  %2760 = vst [vmem:[#allocation3 + $0x354] sm:$0xf] %v2676_v4  ;;  %v6819_v24 = vrot.slane %v6817_v15, 4  ;;  %v2256_v60 = vld [vmem:[#allocation2 + $0x280] sm:$0x7]  ;;  %5180 = vmatmul.mubr.bf16.gmra.mxu1 %v10280_v9 }
 0x2df   : > { %v15342_v38 = vadd.f32 %v16921_v39, %v15240_v23  ;;  %v10145_v18 = vrot.slane %v2254_v6, 11  ;;  %v2392_v42 = vrot.slane %v2255_v61, 7  ;;  %v3197_v37 = vld [vmem:[#allocation3 + $0x298] sm:$0xff]  ;;  %v2395_v62 = vrot.slane %v2256_v60, 7  ;;  %v6400_v33 = vld [vmem:[#allocation2 + $0x280] sm:$0xf] }
 0x2e0   : > { %v6399_v49 = vld [vmem:[#allocation2 + $0x27c] sm:$0xc]  ;;  %v10962_v23 = vadd.f32 %v10961_v21, %v10960_v19  ;;  %v6821_v43 = vsel %vm13730_vm9, %v6819_v24, %v6820_v46  ;;  %v6401_v48 = vld [vmem:[#allocation2 + $0x284] sm:$0x3]  ;;  %v6936_v4 = vld [vmem:[#allocation2 + $0x3b0] sm:$0xf] }
 0x2e1   : > { %v2393_v53 = vsel %vm13688_vm3, %v10145_v18, %v2392_v42  ;;  %v2394_v31 = vrot.slane %v2392_v42, 4  ;;  %v3202_v15 = vld [vmem:[#allocation3 + $0x2bc] sm:$0xff]  ;;  %v6937_v19 = vld [vmem:[#allocation2 + $0x3b4] sm:$0xf]  ;;  %v10458_v6 = vrot.slane %v6399_v49, 10  ;;  %v6537_v34 = vrot.slane %v6400_v33, 6  ;;  %v11082_v18 = vpop.f32.mrf.mxu1 }
 0x2e2   : > { %v12379_v9 = vld [vmem:[#allocation3 + $0x29c] ss:$36 sps:$4 sm:$0xff]   ;;  %2484 = vst [vmem:[#allocation3 + $0x2e4] sm:$0xf] %v2393_v53  ;;  %v6540_v57 = vrot.slane %v6401_v48, 6  ;;  %v16922_v61 = vld [vmem:[#allocation51_spill] sm:$0xff]  ;;  %v10269_v56 = vcombine.low %v3197_v37, %v3202_v15  ;;  %v15370_v42 = vadd.f32 %v15114_v58, %v15254_v47  ;;  %v15383_v37 = vadd.f32 %v15145_v55, %v15266_v26 }
 0x2e3   : > { %v15362_v46 = vadd.f32 %v16922_v61, %v15250_v51  ;;  %v16923_v39 = vld [vmem:[#allocation30_spill] sm:$0xff]  ;;  %v16924_v24 = vld [vmem:[#allocation31_spill] sm:$0xff]  ;;  %6627 = vst [vmem:[#allocation3 + $0x29c] sm:$0xf] %v6531_v32  ;;  %6628 = vst [vmem:[#allocation3 + $0x2c0] sm:$0xf] %v6534_v27  ;;  %v2396_v60 = vsel %vm13688_vm3, %v2394_v31, %v2395_v62  ;;  %5010 = vmatprep.mubr.bf16.mxu0 %v12379_v9  ;;  %v15377_v32 = vadd.f32 %v10962_v23, %v15214_v28 }
 0x2e4   : > { %6355 = vst [vmem:[#allocation3 + $0x298] sm:$0xf] %v16923_v39  ;;  %6356 = vst [vmem:[#allocation3 + $0x2bc] sm:$0xf] %v16924_v24  ;;  %v16925_v21 = vld [vmem:[#allocation59_spill] sm:$0xff]  ;;  %v6539_v33 = vrot.slane %v6537_v34, 4  ;;  %v15379_v27 = vadd.f32 %v11082_v18, %v11081_v8  ;;  %5011 = vmatmul.mubr.bf16.gmra.mxu0 %v10269_v56  ;;  %v15391_v31 = vadd.f32 %v15153_v16, %v15274_v25 }
 0x2e5   : > { %v15374_v49 = vadd.f32 %v16925_v21, %v15258_v3  ;;  %v3218_v51 = vld [vmem:[#allocation3 + $0x330] sm:$0xff]  ;;  %2485 = vst [vmem:[#allocation3 + $0x308] sm:$0xf] %v2396_v60  ;;  %v2534_v47 = vld [vmem:[#allocation2 + $0x338] sm:$0xf]  ;;  %v16927_v23 = vld [vmem:[#allocation61_spill] sm:$0xff]  ;;  %v15399_v55 = vadd.f32 %v15177_v30, %v15284_v50  ;;  %v6538_v15 = vsel %vm13730_vm9, %v10458_v6, %v6537_v34  ;;  %v15409_v50 = vadd.f32 %v15183_v63, %v15298_v1  ;;  %v10963_v60 = vpop.f32.mrf.mxu0 }
 0x2e6   : > { %v2533_v58 = vld [vmem:[#allocation2 + $0x334] sm:$0xe]  ;;  %v2535_v62 = vld [vmem:[#allocation2 + $0x33c] sm:$0x1]  ;;  %v15395_v48 = vadd.f32 %v16927_v23, %v15280_v2  ;;  %6904 = vst [vmem:[#allocation3 + $0x330] sm:$0xf] %v6818_v22  ;;  %v6541_v22 = vsel %vm13730_vm9, %v6539_v33, %v6540_v57  ;;  %v15421_v18 = vadd.f32 %v15204_v59, %v15308_v41  ;;  %v15441_v41 = vadd.f32 %v15226_v45, %v15345_v14 }
 0x2e7   : > { %v16926_v3 = vld [vmem:[#allocation60_spill] sm:$0xff]  ;;  %v10163_v9 = vrot.slane %v2533_v58, 9  ;;  %v2682_v61 = vrot.slane %v2535_v62, 5  ;;  %v6678_v39 = vld [vmem:[#allocation2 + $0x3c0] sm:$0xc]  ;;  %v16928_v24 = vld [vmem:[#allocation62_spill] sm:$0xff]  ;;  %v10964_v62 = vpop.f32.mrf.mxu0 }
 0x2e8   : > { %v15387_v53 = vadd.f32 %v16926_v3, %v15270_v40  ;;  %v3223_v26 = vld [vmem:[#allocation3 + $0x354] sm:$0xff]  ;;  %v2679_v40 = vrot.slane %v2534_v47, 5  ;;  %v2794_v2 = vld [vmem:[#allocation2 + $0x33c] sm:$0xf]  ;;  %v15405_v30 = vadd.f32 %v16928_v24, %v15294_v29  ;;  %v6679_v29 = vld [vmem:[#allocation2 + $0x3c4] sm:$0xf]  ;;  %v15429_v47 = vpop.f32.mrf.mxu1  ;;  %v15433_v3 = vadd.f32 %v15218_v7, %v15320_v10 }
 0x2e9   : > { %v12381_v8 = vld [vmem:[#allocation3 + $0x334] ss:$36 sps:$4 sm:$0xff]   ;;  %6905 = vst [vmem:[#allocation3 + $0x354] sm:$0xf] %v6821_v43  ;;  %v10289_v16 = vcombine.low %v3218_v51, %v3223_v26  ;;  %2826 = vst [vmem:[#allocation3 + $0x3a0] sm:$0xf] %v2794_v2 }
 0x2ea   : > { %6968 = vst [vmem:[#allocation3 + $0x334] sm:$0xf] %v6936_v4  ;;  %6969 = vst [vmem:[#allocation3 + $0x358] sm:$0xf] %v6937_v19  ;;  %v2793_v25 = vld [vmem:[#allocation2 + $0x338] sm:$0xf]  ;;  %5187 = vmatprep.mubr.bf16.mxu1 %v12381_v8  ;;  %v2680_v43 = vsel %vm13708_vm7, %v10163_v9, %v2679_v40 }
 0x2eb   : > { %v16929_v6 = vld [vmem:[#allocation67_spill] sm:$0xff]  ;;  %v2681_v4 = vrot.slane %v2679_v40, 4  ;;  %2825 = vst [vmem:[#allocation3 + $0x37c] sm:$0xf] %v2793_v25  ;;  %v6680_v19 = vld [vmem:[#allocation2 + $0x3c8] sm:$0x3]  ;;  %5188 = vmatmul.mubr.bf16.gmra.mxu1 %v10289_v16  ;;  %v10965_v40 = vadd.f32 %v10964_v62, %v10963_v60 }
 0x2ec   : > { %v15413_v34 = vadd.f32 %v16929_v6, %v15304_v35  ;;  %v10476_v56 = vrot.slane %v6678_v39, 10  ;;  %v3207_v63 = vld [vmem:[#allocation3 + $0x2e0] sm:$0xff]  ;;  %2761 = vst [vmem:[#allocation3 + $0x378] sm:$0xf] %v2680_v43  ;;  %v6824_v1 = vrot.slane %v6679_v29, 6  ;;  %v6827_v35 = vrot.slane %v6680_v19, 6  ;;  %v10966_v39 = vpop.f32.mrf.mxu0 }
 0x2ed   : > { %v16930_v57 = vld [vmem:[#allocation18_spill] sm:$0xff]  ;;  %v2683_v51 = vsel %vm13708_vm7, %v2681_v4, %v2682_v61  ;;  %v2257_v33 = vld [vmem:[#allocation2 + $0x290] sm:$0x8]  ;;  %v2258_v58 = vld [vmem:[#allocation2 + $0x294] sm:$0xf]  ;;  %v4699_v43 = vadd.f32 %v10965_v40, %v15214_v28 }
 0x2ee   : > { %v15425_v21 = vadd.f32 %v16930_v57, %v15316_v44  ;;  %v16931_v23 = vld [vmem:[#allocation40_spill] sm:$0xff]  ;;  %v3212_v44 = vld [vmem:[#allocation3 + $0x304] sm:$0xff]  ;;  %2762 = vst [vmem:[#allocation3 + $0x39c] sm:$0xf] %v2683_v51  ;;  %v6826_v8 = vrot.slane %v6824_v1, 4  ;;  %v10146_v25 = vrot.slane %v2257_v33, 11  ;;  %v6825_v4 = vsel %vm13730_vm9, %v10476_v56, %v6824_v1  ;;  %v15467_v57 = vpop.f32.mrf.mxu1  ;;  %v10967_v51 = vpop.f32.mrf.mxu0 }
 0x2ef   : > { %v15437_v59 = vadd.f32 %v16931_v23, %v15332_v5  ;;  %v12383_v26 = vld [vmem:[#allocation3 + $0x2e4] ss:$36 sps:$4 sm:$0xff]   ;;  %v2259_v9 = vld [vmem:[#allocation2 + $0x298] sm:$0x7]  ;;  %v10278_v5 = vcombine.low %v3207_v63, %v3212_v44  ;;  %v2399_v45 = vrot.slane %v2258_v58, 7  ;;  %v10968_v62 = vadd.f32 %v10967_v51, %v10966_v39 }
 0x2f0   : > { %v16932_v61 = vld [vmem:[#allocation41_spill] sm:$0xff]  ;;  %v16933_v7 = vld [vmem:[#allocation32_spill] sm:$0xff]  ;;  %6629 = vst [vmem:[#allocation3 + $0x2e4] sm:$0xf] %v6538_v15  ;;  %6630 = vst [vmem:[#allocation3 + $0x308] sm:$0xf] %v6541_v22  ;;  %5018 = vmatprep.mubr.bf16.mxu0 %v12383_v26  ;;  %v15461_v22 = vadd.f32 %v15236_v17, %v15377_v32  ;;  %v6828_v33 = vsel %vm13730_vm9, %v6826_v8, %v6827_v35  ;;  %v15472_v56 = vadd.f32 %v15324_v54, %v4699_v43 }
 0x2f1   : > { %v15445_v16 = vadd.f32 %v16932_v61, %v15358_v11  ;;  %6357 = vst [vmem:[#allocation3 + $0x2e0] sm:$0xf] %v16933_v7  ;;  %v16934_v10 = vld [vmem:[#allocation33_spill] sm:$0xff]  ;;  %v2402_v14 = vrot.slane %v2259_v9, 7  ;;  %v15449_v2 = vld [vmem:[#allocation2 + $0x294] sm:$0xc]  ;;  %v11080_v11 = vadd.f32 %v15334_v36, %v15310_v13  ;;  %5019 = vmatmul.mubr.bf16.gmra.mxu0 %v10278_v5  ;;  %v2400_v60 = vsel %vm13688_vm3, %v10146_v25, %v2399_v45 }
 0x2f2   : > { %6358 = vst [vmem:[#allocation3 + $0x304] sm:$0xf] %v16934_v10  ;;  %v6403_v24 = vld [vmem:[#allocation2 + $0x298] sm:$0xf]  ;;  %v15451_v6 = vld [vmem:[#allocation2 + $0x29c] sm:$0x3]  ;;  %v4702_v10 = vadd.f32 %v10968_v62, %v15214_v28 }
 0x2f3   : > { %v12453_v15 = vld [vmem:[%s16768_s6 + $0x178] sm:$0xff]   ;;  %v6938_v29 = vld [vmem:[#allocation2 + $0x3c8] sm:$0xf]  ;;  %v6939_v19 = vld [vmem:[#allocation2 + $0x3cc] sm:$0xf]  ;;  %v2401_v13 = vrot.slane %v2399_v45, 4 }
 0x2f4   : > { %v6544_v36 = vrot.slane %v6403_v24, 6  ;;  %v2536_v63 = vld [vmem:[#allocation2 + $0x34c] sm:$0xe]  ;;  %2486 = vst [vmem:[#allocation3 + $0x32c] sm:$0xf] %v2400_v60  ;;  %11583 = vmatprep.subr.bf16.mxu1 %v12453_v15  ;;  %v3228_v1 = vld [vmem:[#allocation3 + $0x378] sm:$0xff]  ;;  %v15481_v43 = vadd.f32 %v11080_v11, %v4702_v10 }
 0x2f5   : > { %v2537_v17 = vld [vmem:[#allocation2 + $0x350] sm:$0xf]  ;;  %v2538_v32 = vld [vmem:[#allocation2 + $0x354] sm:$0x1]  ;;  %v10164_v58 = vrot.slane %v2536_v63, 9  ;;  %v2403_v23 = vsel %vm13688_vm3, %v2401_v13, %v2402_v14  ;;  %v10459_v44 = vrot.slane %v15449_v2, 10  ;;  %v11087_v2 = vpop.f32.mrf.mxu1 }
 0x2f6   : > { %v6547_v26 = vrot.slane %v15451_v6, 6  ;;  %v2686_v9 = vrot.slane %v2537_v17, 5  ;;  %v2795_v40 = vld [vmem:[#allocation2 + $0x350] sm:$0xf]  ;;  %2487 = vst [vmem:[#allocation3 + $0x350] sm:$0xf] %v2403_v23 }
 0x2f7   : > { %v6546_v35 = vrot.slane %v6544_v36, 4  ;;  %v2689_v8 = vrot.slane %v2538_v32, 5  ;;  %v2796_v61 = vld [vmem:[#allocation2 + $0x354] sm:$0xf]  ;;  %2827 = vst [vmem:[#allocation3 + $0x3c4] sm:$0xf] %v2795_v40  ;;  %v11088_v63 = vpop.f32.mrf.mxu1 }
 0x2f8   : > { %v6681_v7 = vld [vmem:[#allocation2 + $0x3d8] sm:$0xc]  ;;  %v3233_v54 = vld [vmem:[#allocation3 + $0x39c] sm:$0xff]  ;;  %v2687_v25 = vsel %vm13708_vm7, %v10164_v58, %v2686_v9  ;;  %v2688_v45 = vrot.slane %v2686_v9, 4  ;;  %2828 = vst [vmem:[#allocation3 + $0x3e8] sm:$0xf] %v2796_v61  ;;  %v15487_v17 = vadd.f32 %v11088_v63, %v11087_v2 }
 0x2f9   : > { %v12388_v5 = vld [vmem:[#allocation3 + $0x37c] ss:$36 sps:$4 sm:$0xff]   ;;  %6906 = vst [vmem:[#allocation3 + $0x378] sm:$0xf] %v6825_v4  ;;  %6907 = vst [vmem:[#allocation3 + $0x39c] sm:$0xf] %v6828_v33  ;;  %v10298_v39 = vcombine.low %v3228_v1, %v3233_v54  ;;  %v6545_v4 = vsel %vm13730_vm9, %v10459_v44, %v6544_v36  ;;  %v6548_v32 = vsel %vm13730_vm9, %v6546_v35, %v6547_v26 }
 0x2fa   : > { %v6682_v14 = vld [vmem:[#allocation2 + $0x3dc] sm:$0xf]  ;;  %6970 = vst [vmem:[#allocation3 + $0x37c] sm:$0xf] %v6938_v29  ;;  %6971 = vst [vmem:[#allocation3 + $0x3a0] sm:$0xf] %v6939_v19  ;;  %5195 = vmatprep.mubr.bf16.mxu1 %v12388_v5  ;;  %v2690_v15 = vsel %vm13708_vm7, %v2688_v45, %v2689_v8  ;;  %v10969_v45 = vpop.f32.mrf.mxu0 }
 0x2fb   : > { %2763 = vst [vmem:[#allocation3 + $0x3c0] sm:$0xf] %v2687_v25  ;;  %v6683_v24 = vld [vmem:[#allocation2 + $0x3e0] sm:$0x3]  ;;  %v6831_v6 = vrot.slane %v6682_v14, 6  ;;  %v10477_v60 = vrot.slane %v6681_v7, 10  ;;  %5196 = vmatmul.mubr.bf16.gmra.mxu1 %v10298_v39  ;;  %v15493_v14 = vpop.f32.mrf.mxu1 }
 0x2fc   : > { %v2260_v13 = vld [vmem:[#allocation2 + $0x2a8] sm:$0x8]  ;;  %2764 = vst [vmem:[#allocation3 + $0x3e4] sm:$0xf] %v2690_v15  ;;  %v6834_v29 = vrot.slane %v6683_v24, 6  ;;  %v16936_v35 = vld [vmem:[#allocation35_spill] sm:$0xff] }
 0x2fd   : > { %v2261_v19 = vld [vmem:[#allocation2 + $0x2ac] sm:$0xf]  ;;  %v2262_v51 = vld [vmem:[#allocation2 + $0x2b0] sm:$0x7]  ;;  %v10147_v33 = vrot.slane %v2260_v13, 11  ;;  %v6833_v58 = vrot.slane %v6831_v6, 4  ;;  %v6832_v24 = vsel %vm13730_vm9, %v10477_v60, %v6831_v6 }
 0x2fe   : > { %v3217_v11 = vld [vmem:[#allocation3 + $0x328] sm:$0xff]  ;;  %v2406_v62 = vrot.slane %v2261_v19, 7  ;;  %v2409_v1 = vrot.slane %v2262_v51, 7  ;;  %v6406_v9 = vld [vmem:[#allocation2 + $0x2b0] sm:$0xf]  ;;  %v10970_v19 = vpop.f32.mrf.mxu0 }
 0x2ff   : > { %v6405_v23 = vld [vmem:[#allocation2 + $0x2ac] sm:$0xc]  ;;  %v6407_v40 = vld [vmem:[#allocation2 + $0x2b4] sm:$0x3]  ;;  %v6940_v44 = vld [vmem:[#allocation2 + $0x3e0] sm:$0xf]  ;;  %v6835_v15 = vsel %vm13730_vm9, %v6833_v58, %v6834_v29 }
 0x300   : > { %v10460_v8 = vrot.slane %v6405_v23, 10  ;;  %v3222_v61 = vld [vmem:[#allocation3 + $0x34c] sm:$0xff]  ;;  %v6941_v7 = vld [vmem:[#allocation2 + $0x3e4] sm:$0xf]  ;;  %v2407_v10 = vsel %vm13688_vm3, %v10147_v33, %v2406_v62  ;;  %v2408_v54 = vrot.slane %v2406_v62, 4  ;;  %v6551_v5 = vrot.slane %v6406_v9, 6  ;;  %v15503_v9 = vpop.f32.mrf.mxu1  ;;  %v10972_v6 = vpop.f32.mrf.mxu0 }
 0x301   : > { %v12390_v36 = vld [vmem:[#allocation3 + $0x32c] ss:$36 sps:$4 sm:$0xff]   ;;  %v6554_v25 = vrot.slane %v6407_v40, 6  ;;  %6360 = vst [vmem:[#allocation3 + $0x34c] sm:$0xf] %v16936_v35  ;;  %v10287_v2 = vcombine.low %v3217_v11, %v3222_v61  ;;  %v10971_v33 = vadd.f32 %v10970_v19, %v10969_v45 }
 0x302   : > { %v16935_v26 = vld [vmem:[#allocation34_spill] sm:$0xff]  ;;  %6631 = vst [vmem:[#allocation3 + $0x32c] sm:$0xf] %v6545_v4  ;;  %6632 = vst [vmem:[#allocation3 + $0x350] sm:$0xf] %v6548_v32  ;;  %5026 = vmatprep.mubr.bf16.mxu0 %v12390_v36  ;;  %v3238_v39 = vld [vmem:[#allocation3 + $0x3c0] sm:$0xff]  ;;  %v2410_v13 = vsel %vm13688_vm3, %v2408_v54, %v2409_v1  ;;  %v10973_v45 = vpop.f32.mrf.mxu0 }
 0x303   : > { %6359 = vst [vmem:[#allocation3 + $0x328] sm:$0xf] %v16935_v26  ;;  %2488 = vst [vmem:[#allocation3 + $0x374] sm:$0xf] %v2407_v10  ;;  %v6553_v63 = vrot.slane %v6551_v5, 4  ;;  %5027 = vmatmul.mubr.bf16.gmra.mxu0 %v10287_v2  ;;  %v3243_v11 = vld [vmem:[#allocation3 + $0x3e4] sm:$0xff]  ;;  %v4707_v61 = vadd.f32 %v10971_v33, %v15214_v28  ;;  %v6552_v26 = vsel %vm13730_vm9, %v10460_v8, %v6551_v5 }
 0x304   : > { %2489 = vst [vmem:[#allocation3 + $0x398] sm:$0xf] %v2410_v13  ;;  %v2539_v51 = vld [vmem:[#allocation2 + $0x364] sm:$0xe]  ;;  %v2540_v4 = vld [vmem:[#allocation2 + $0x368] sm:$0xf]  ;;  %v10307_v60 = vcombine.low %v3238_v39, %v3243_v11  ;;  %v11093_v13 = vpop.f32.mrf.mxu1  ;;  %v10974_v19 = vadd.f32 %v10973_v45, %v10972_v6 }
 0x305   : > { %v12392_v32 = vld [vmem:[#allocation3 + $0x3c4] ss:$36 sps:$4 sm:$0xff]   ;;  %v2541_v62 = vld [vmem:[#allocation2 + $0x36c] sm:$0x1]  ;;  %v10165_v23 = vrot.slane %v2539_v51, 9  ;;  %v2693_v29 = vrot.slane %v2540_v4, 5  ;;  %v6555_v39 = vsel %vm13730_vm9, %v6553_v63, %v6554_v25  ;;  %v15513_v51 = vadd.f32 %v15379_v27, %v4707_v61 }
 0x306   : > { %6908 = vst [vmem:[#allocation3 + $0x3c0] sm:$0xf] %v6832_v24  ;;  %6909 = vst [vmem:[#allocation3 + $0x3e4] sm:$0xf] %v6835_v15  ;;  %v2696_v58 = vrot.slane %v2541_v62, 5  ;;  %5203 = vmatprep.mubr.bf16.mxu1 %v12392_v32  ;;  %v11086_v32 = vadd.f32 %v15467_v57, %v15429_v47  ;;  %v4710_v6 = vadd.f32 %v10974_v19, %v15214_v28  ;;  %v11094_v27 = vpop.f32.mrf.mxu1 }
 0x307   : > { %6972 = vst [vmem:[#allocation3 + $0x3c4] sm:$0xf] %v6940_v44  ;;  %6973 = vst [vmem:[#allocation3 + $0x3e8] sm:$0xf] %v6941_v7  ;;  %v2797_v1 = vld [vmem:[#allocation2 + $0x368] sm:$0xf]  ;;  %5204 = vmatmul.mubr.bf16.gmra.mxu1 %v10307_v60  ;;  %v2694_v44 = vsel %vm13708_vm7, %v10165_v23, %v2693_v29  ;;  %v15522_v47 = vadd.f32 %v11094_v27, %v11093_v13 }
 0x308   : > { %v2798_v40 = vld [vmem:[#allocation2 + $0x36c] sm:$0xf]  ;;  %2829 = vst [vmem:[#allocation3 + $0x40c] sm:$0xf] %v2797_v1  ;;  %v6684_v36 = vld [vmem:[#allocation2 + $0x3f0] sm:$0xc] }
 0x309   : > { %2830 = vst [vmem:[#allocation3 + $0x430] sm:$0xf] %v2798_v40  ;;  %v6685_v10 = vld [vmem:[#allocation2 + $0x3f4] sm:$0xf]  ;;  %v6686_v54 = vld [vmem:[#allocation2 + $0x3f8] sm:$0x3] }
 0x30a   : > { %v2695_v7 = vrot.slane %v2693_v29, 4  ;;  %v6838_v35 = vrot.slane %v6685_v10, 6  ;;  %v3227_v2 = vld [vmem:[#allocation3 + $0x370] sm:$0xff]  ;;  %2765 = vst [vmem:[#allocation3 + $0x408] sm:$0xf] %v2694_v44  ;;  %v10478_v24 = vrot.slane %v6684_v36, 10 }
 0x30b   : > { %v2263_v15 = vld [vmem:[#allocation2 + $0x2c0] sm:$0x8]  ;;  %v6841_v5 = vrot.slane %v6686_v54, 6  ;;  %v2264_v4 = vld [vmem:[#allocation2 + $0x2c4] sm:$0xf]  ;;  %v3232_v62 = vld [vmem:[#allocation3 + $0x394] sm:$0xff] }
 0x30c   : > { %v2697_v8 = vsel %vm13708_vm7, %v2695_v7, %v2696_v58  ;;  %v2265_v33 = vld [vmem:[#allocation2 + $0x2c8] sm:$0x7]  ;;  %v10148_v11 = vrot.slane %v2263_v15, 11  ;;  %v12394_v25 = vld [vmem:[#allocation3 + $0x374] ss:$36 sps:$4 sm:$0xff]   ;;  %v6840_v63 = vrot.slane %v6838_v35, 4  ;;  %v10296_v58 = vcombine.low %v3227_v2, %v3232_v62 }
 0x30d   : > { %2766 = vst [vmem:[#allocation3 + $0x42c] sm:$0xf] %v2697_v8  ;;  %v2413_v23 = vrot.slane %v2264_v4, 7  ;;  %v2416_v60 = vrot.slane %v2265_v33, 7  ;;  %v16937_v29 = vld [vmem:[#allocation36_spill] sm:$0xff]  ;;  %v16938_v1 = vld [vmem:[#allocation37_spill] sm:$0xff]  ;;  %5034 = vmatprep.mubr.bf16.mxu0 %v12394_v25  ;;  %v6839_v8 = vsel %vm13730_vm9, %v10478_v24, %v6838_v35  ;;  %v10975_v25 = vpop.f32.mrf.mxu0 }
 0x30e   : > { %6361 = vst [vmem:[#allocation3 + $0x370] sm:$0xf] %v16937_v29  ;;  %6362 = vst [vmem:[#allocation3 + $0x394] sm:$0xf] %v16938_v1  ;;  %v6408_v40 = vld [vmem:[#allocation2 + $0x2c4] sm:$0xc]  ;;  %5035 = vmatmul.mubr.bf16.gmra.mxu0 %v10296_v58  ;;  %v6842_v4 = vsel %vm13730_vm9, %v6840_v63, %v6841_v5  ;;  %v15534_v58 = vpop.f32.mrf.mxu1 }
 0x30f   : > { %6633 = vst [vmem:[#allocation3 + $0x374] sm:$0xf] %v6552_v26  ;;  %6634 = vst [vmem:[#allocation3 + $0x398] sm:$0xf] %v6555_v39  ;;  %v6409_v61 = vld [vmem:[#allocation2 + $0x2c8] sm:$0xf]  ;;  %v2414_v57 = vsel %vm13688_vm3, %v10148_v11, %v2413_v23  ;;  %v15526_v26 = vadd.f32 %v11086_v32, %v4710_v6  ;;  %v10976_v35 = vpop.f32.mrf.mxu0 }
 0x310   : > { %v6410_v36 = vld [vmem:[#allocation2 + $0x2cc] sm:$0x3]  ;;  %v2415_v10 = vrot.slane %v2413_v23, 4  ;;  %v10461_v54 = vrot.slane %v6408_v40, 10  ;;  %v6558_v45 = vrot.slane %v6409_v61, 6 }
 0x311   : > { %v6942_v44 = vld [vmem:[#allocation2 + $0x3f8] sm:$0xf]  ;;  %v6943_v7 = vld [vmem:[#allocation2 + $0x3fc] sm:$0xf]  ;;  %2490 = vst [vmem:[#allocation3 + $0x3bc] sm:$0xf] %v2414_v57  ;;  %v10977_v57 = vadd.f32 %v10976_v35, %v10975_v25 }
 0x312   : > { %v6561_v15 = vrot.slane %v6410_v36, 6  ;;  %v2417_v2 = vsel %vm13688_vm3, %v2415_v10, %v2416_v60  ;;  %v6560_v39 = vrot.slane %v6558_v45, 4  ;;  %v2542_v13 = vld [vmem:[#allocation2 + $0x37c] sm:$0xe]  ;;  %v3248_v19 = vld [vmem:[#allocation3 + $0x408] sm:$0xff]  ;;  %v10978_v10 = vpop.f32.mrf.mxu0 }
 0x313   : > { %2491 = vst [vmem:[#allocation3 + $0x3e0] sm:$0xf] %v2417_v2  ;;  %v2543_v33 = vld [vmem:[#allocation2 + $0x380] sm:$0xf]  ;;  %v2544_v11 = vld [vmem:[#allocation2 + $0x384] sm:$0x1] }
 0x314   : > { %v10166_v62 = vrot.slane %v2542_v13, 9  ;;  %v2700_v23 = vrot.slane %v2543_v33, 5  ;;  %v2703_v32 = vrot.slane %v2544_v11, 5  ;;  %v2799_v6 = vld [vmem:[#allocation2 + $0x380] sm:$0xf]  ;;  %v3253_v29 = vld [vmem:[#allocation3 + $0x42c] sm:$0xff]  ;;  %v6559_v13 = vsel %vm13730_vm9, %v10461_v54, %v6558_v45  ;;  %v15545_v33 = vpop.f32.mrf.mxu1  ;;  %v10979_v11 = vpop.f32.mrf.mxu0 }
 0x315   : > { %v2800_v27 = vld [vmem:[#allocation2 + $0x384] sm:$0xf]  ;;  %v12399_v60 = vld [vmem:[#allocation3 + $0x40c] ss:$36 sps:$4 sm:$0xff]   ;;  %2831 = vst [vmem:[#allocation3 + $0x454] sm:$0xf] %v2799_v6  ;;  %v10316_v24 = vcombine.low %v3248_v19, %v3253_v29  ;;  %v11092_v54 = vadd.f32 %v15503_v9, %v15493_v14  ;;  %v10980_v45 = vadd.f32 %v10979_v11, %v10978_v10 }
 0x316   : > { %2832 = vst [vmem:[#allocation3 + $0x478] sm:$0xf] %v2800_v27  ;;  %v6687_v1 = vld [vmem:[#allocation2 + $0x408] sm:$0xc]  ;;  %6910 = vst [vmem:[#allocation3 + $0x408] sm:$0xf] %v6839_v8  ;;  %v2701_v5 = vsel %vm13708_vm7, %v10166_v62, %v2700_v23  ;;  %5211 = vmatprep.mubr.bf16.mxu1 %v12399_v60 }
 0x317   : > { %6911 = vst [vmem:[#allocation3 + $0x42c] sm:$0xf] %v6842_v4  ;;  %6974 = vst [vmem:[#allocation3 + $0x40c] sm:$0xf] %v6942_v44  ;;  %v2702_v63 = vrot.slane %v2700_v23, 4  ;;  %5212 = vmatmul.mubr.bf16.gmra.mxu1 %v10316_v24  ;;  %v6562_v44 = vsel %vm13730_vm9, %v6560_v39, %v6561_v15  ;;  %v10479_v19 = vrot.slane %v6687_v1, 10  ;;  %v4715_v4 = vadd.f32 %v10977_v57, %v15214_v28  ;;  %v11099_v57 = vpop.f32.mrf.mxu1 }
 0x318   : > { %6975 = vst [vmem:[#allocation3 + $0x430] sm:$0xf] %v6943_v7  ;;  %v6688_v40 = vld [vmem:[#allocation2 + $0x40c] sm:$0xf]  ;;  %v6689_v61 = vld [vmem:[#allocation2 + $0x410] sm:$0x3] }
 0x319   : > { %2767 = vst [vmem:[#allocation3 + $0x450] sm:$0xf] %v2701_v5  ;;  %v6845_v36 = vrot.slane %v6688_v40, 6  ;;  %v3237_v2 = vld [vmem:[#allocation3 + $0x3b8] sm:$0xff]  ;;  %v2704_v7 = vsel %vm13708_vm7, %v2702_v63, %v2703_v32  ;;  %v6848_v8 = vrot.slane %v6689_v61, 6  ;;  %v16939_v15 = vld [vmem:[#allocation63_spill] sm:$0xff]  ;;  %v15552_v29 = vadd.f32 %v15487_v17, %v4715_v4  ;;  %v11100_v4 = vpop.f32.mrf.mxu1 }
 0x31a   : > { %2768 = vst [vmem:[#allocation3 + $0x474] sm:$0xf] %v2704_v7  ;;  %v3242_v62 = vld [vmem:[#allocation3 + $0x3dc] sm:$0xff]  ;;  %v2266_v6 = vld [vmem:[#allocation2 + $0x2d8] sm:$0x8] }
 0x31b   : > { %v12401_v25 = vld [vmem:[#allocation3 + $0x3bc] ss:$36 sps:$4 sm:$0xff]   ;;  %v6847_v23 = vrot.slane %v6845_v36, 4  ;;  %6363 = vst [vmem:[#allocation3 + $0x3b8] sm:$0xf] %v16939_v15  ;;  %v10305_v39 = vcombine.low %v3237_v2, %v3242_v62  ;;  %v10149_v27 = vrot.slane %v2266_v6, 11  ;;  %v6846_v63 = vsel %vm13730_vm9, %v10479_v19, %v6845_v36 }
 0x31c   : > { %6364 = vst [vmem:[#allocation3 + $0x3dc] sm:$0xf] %v16940_v52  ;;  %6635 = vst [vmem:[#allocation3 + $0x3bc] sm:$0xf] %v6559_v13  ;;  %v2267_v32 = vld [vmem:[#allocation2 + $0x2dc] sm:$0xf]  ;;  %5042 = vmatprep.mubr.bf16.mxu0 %v12401_v25  ;;  %v15567_v25 = vadd.f32 %v11100_v4, %v11099_v57 }
 0x31d   : > { %6636 = vst [vmem:[#allocation3 + $0x3e0] sm:$0xf] %v6562_v44  ;;  %v2268_v28 = vld [vmem:[#allocation2 + $0x2e0] sm:$0x7]  ;;  %v6944_v60 = vld [vmem:[#allocation2 + $0x410] sm:$0xf]  ;;  %5043 = vmatmul.mubr.bf16.gmra.mxu0 %v10305_v39  ;;  %v6849_v17 = vsel %vm13730_vm9, %v6847_v23, %v6848_v8 }
 0x31e   : > { %v6945_v1 = vld [vmem:[#allocation2 + $0x414] sm:$0xf]  ;;  %v2420_v35 = vrot.slane %v2267_v32, 7  ;;  %v2423_v24 = vrot.slane %v2268_v28, 7  ;;  %v6412_v14 = vld [vmem:[#allocation2 + $0x2e0] sm:$0xf] }
 0x31f   : > { %v15554_v9 = vld [vmem:[#allocation12] ss:$0 sm:$0xff]  ;;  %v6411_v40 = vld [vmem:[#allocation2 + $0x2dc] sm:$0xc]  ;;  %v6565_v61 = vrot.slane %v6412_v14, 6 }
 0x320   : > { %v4718_v5 = vadd.f32 %v15554_v9, %v10980_v45  ;;  %v3258_v10 = vld [vmem:[#allocation3 + $0x450] sm:$0xff]  ;;  %v2421_v2 = vsel %vm13688_vm3, %v10149_v27, %v2420_v35  ;;  %v2422_v13 = vrot.slane %v2420_v35, 4  ;;  %v6413_v44 = vld [vmem:[#allocation2 + $0x2e4] sm:$0x3]  ;;  %v10462_v19 = vrot.slane %v6411_v40, 10  ;;  %v10981_v35 = vpop.f32.mrf.mxu0 }
 0x321   : > { %2492 = vst [vmem:[#allocation3 + $0x404] sm:$0xf] %v2421_v2  ;;  %v3263_v11 = vld [vmem:[#allocation3 + $0x474] sm:$0xff]  ;;  %6912 = vst [vmem:[#allocation3 + $0x450] sm:$0xf] %v6846_v63  ;;  %v6567_v23 = vrot.slane %v6565_v61, 4 }
 0x322   : > { %v15563_v7 = vadd.f32 %v11092_v54, %v4718_v5  ;;  %v12405_v62 = vld [vmem:[#allocation3 + $0x454] ss:$36 sps:$4 sm:$0xff]   ;;  %v2424_v36 = vsel %vm13688_vm3, %v2422_v13, %v2423_v24  ;;  %6913 = vst [vmem:[#allocation3 + $0x474] sm:$0xf] %v6849_v17  ;;  %v10325_v8 = vcombine.low %v3258_v10, %v3263_v11  ;;  %v6568_v6 = vrot.slane %v6413_v44, 6  ;;  %v10982_v57 = vpop.f32.mrf.mxu0 }
 0x323   : > { %6976 = vst [vmem:[#allocation3 + $0x454] sm:$0xf] %v6944_v60  ;;  %6977 = vst [vmem:[#allocation3 + $0x478] sm:$0xf] %v6945_v1  ;;  %v12416_v54 = vld [vmem:[#allocation3 + $0x4] ss:$36 sps:$4 sm:$0xff]   ;;  %5219 = vmatprep.mubr.bf16.mxu1 %v12405_v62  ;;  %v15575_v1 = vpop.f32.mrf.mxu1  ;;  %v6566_v17 = vsel %vm13730_vm9, %v10462_v19, %v6565_v61  ;;  %v10983_v62 = vadd.f32 %v10982_v57, %v10981_v35 }
 0x324   : > { %16941 = vst [vmem:[#allocation43_spill] sm:$0xff] %v15563_v7  ;;  %2493 = vst [vmem:[#allocation3 + $0x428] sm:$0xf] %v2424_v36  ;;  %v2269_v45 = vld [vmem:[#allocation2 + $0x2f0] sm:$0x8]  ;;  %5220 = vmatmul.mubr.bf16.gmra.mxu1 %v10325_v8  ;;  %v6569_v2 = vsel %vm13730_vm9, %v6567_v23, %v6568_v6  ;;  %v12455_v11 = vld [vmem:[%s16768_s6 + $0x138] sm:$0xff]  }
 0x325   : > { %v2270_v15 = vld [vmem:[#allocation2 + $0x2f4] sm:$0xf]  ;;  %v2271_v52 = vld [vmem:[#allocation2 + $0x2f8] sm:$0x7]  ;;  %v10150_v39 = vrot.slane %v2269_v45, 11  ;;  %8762 = vmatprep.mubr.bf16.mxu1 %v12416_v54  ;;  %v10984_v45 = vpop.f32.mrf.mxu0  ;;  %v15595_v35 = vpop.f32.mrf.mxu1 }
 0x326   : > { %v2427_v32 = vrot.slane %v2270_v15, 7  ;;  %v2430_v28 = vrot.slane %v2271_v52, 7  ;;  %v15569_v27 = vld [vmem:[#allocation2 + $0x2f4] sm:$0xc]  ;;  %v15571_v24 = vld [vmem:[#allocation2 + $0x2f8] sm:$0xf] }
 0x327   : > { %v15573_v60 = vld [vmem:[#allocation2 + $0x2fc] sm:$0x3]  ;;  %v12414_v14 = vld [vmem:[#allocation3] ss:$36 sps:$4 sm:$0xff]   ;;  %v6572_v40 = vrot.slane %v15571_v24, 6  ;;  %v10463_v13 = vrot.slane %v15569_v27, 10  ;;  %v4723_v27 = vadd.f32 %v15554_v9, %v10983_v62 }
 0x328   : > { %v2428_v5 = vsel %vm13688_vm3, %v10150_v39, %v2427_v32  ;;  %v2429_v63 = vrot.slane %v2427_v32, 4  ;;  %v3247_v10 = vld [vmem:[#allocation3 + $0x400] sm:$0xff]  ;;  %v12421_v44 = vld [vmem:[#allocation3 + $0x4c] ss:$36 sps:$4 sm:$0xff]   ;;  %v2833_v4 = vld [vmem:[#allocation2 + $0x218] sm:$0x8] }
 0x329   : > { %2494 = vst [vmem:[#allocation3 + $0x44c] sm:$0xf] %v2428_v5  ;;  %v6575_v8 = vrot.slane %v15573_v60, 6  ;;  %v2834_v54 = vld [vmem:[#allocation2 + $0x21c] sm:$0xf]  ;;  %v10167_v19 = vrot.slane %v2833_v4, 11  ;;  %v10985_v4 = vpop.f32.mrf.mxu0 }
 0x32a   : > { %v2431_v36 = vsel %vm13688_vm3, %v2429_v63, %v2430_v28  ;;  %v2835_v61 = vld [vmem:[#allocation2 + $0x220] sm:$0x7]  ;;  %v12469_v23 = vld [vmem:[%s16768_s6 + $0x170] sm:$0xff]   ;;  %v6574_v52 = vrot.slane %v6572_v40, 4  ;;  %v2931_v39 = vrot.slane %v2834_v54, 7  ;;  %v16943_v24 = vld [vmem:[#allocation66_spill] sm:$0xff] }
 0x32b   : > { %v3252_v6 = vld [vmem:[#allocation3 + $0x424] sm:$0xff]  ;;  %2495 = vst [vmem:[#allocation3 + $0x470] sm:$0xf] %v2431_v36  ;;  %v2934_v32 = vrot.slane %v2835_v61, 7  ;;  %v15599_v5 = vld [vmem:[#allocation2 + $0x2ac] sm:$0xc] }
 0x32c   : > { %v12409_v15 = vld [vmem:[#allocation3 + $0x404] ss:$36 sps:$4 sm:$0xff]   ;;  %6366 = vst [vmem:[#allocation3 + $0x424] sm:$0xf] %v16943_v24  ;;  %v10314_v60 = vcombine.low %v3247_v10, %v3252_v6  ;;  %v6979_v63 = vld [vmem:[#allocation2 + $0x2b0] sm:$0xf]  ;;  %v2932_v36 = vsel %vm13688_vm3, %v10167_v19, %v2931_v39  ;;  %8763 = vmatmul.mubr.bf16.vlgmr.msra.gmra.mxu1 %v12414_v14  ;;  %v10986_v24 = vadd.f32 %v10985_v4, %v10984_v45  ;;  %v11105_v14 = vpop.f32.mrf.mxu1 }
 0x32d   : > { %v16942_v28 = vld [vmem:[#allocation65_spill] sm:$0xff]  ;;  %6637 = vst [vmem:[#allocation3 + $0x404] sm:$0xf] %v6566_v17  ;;  %6638 = vst [vmem:[#allocation3 + $0x428] sm:$0xf] %v6569_v2  ;;  %5050 = vmatprep.mubr.bf16.mxu0 %v12409_v15  ;;  %v2933_v54 = vrot.slane %v2931_v39, 4  ;;  %v15610_v19 = vadd.f32 %v15522_v47, %v4723_v27  ;;  %8770 = vmatprep.mubr.bf16.mxu1 %v12421_v44  ;;  %v6573_v47 = vsel %vm13730_vm9, %v10463_v13, %v6572_v40 }
 0x32e   : > { %6365 = vst [vmem:[#allocation3 + $0x400] sm:$0xf] %v16942_v28  ;;  %v6980_v57 = vld [vmem:[#allocation2 + $0x2b4] sm:$0x3]  ;;  %v7076_v62 = vrot.slane %v6979_v63, 6  ;;  %v11098_v28 = vadd.f32 %v15545_v33, %v15534_v58  ;;  %5051 = vmatmul.mubr.bf16.gmra.mxu0 %v10314_v60  ;;  %v10480_v10 = vrot.slane %v15599_v5, 10  ;;  %11584 = vmatpush3.bf16.msra.mxu1 %v12455_v11  ;;  %v6576_v44 = vsel %vm13730_vm9, %v6574_v52, %v6575_v8 }
 0x32f   : > { %v2836_v61 = vld [vmem:[#allocation2 + $0x230] sm:$0x8]  ;;  %3073 = vst [vmem:[#allocation3 + $0x20] sm:$0xf] %v2932_v36  ;;  %v2837_v2 = vld [vmem:[#allocation2 + $0x234] sm:$0xf]  ;;  %v2935_v58 = vsel %vm13688_vm3, %v2933_v54, %v2934_v32  ;;  %v4726_v4 = vadd.f32 %v15554_v9, %v10986_v24  ;;  %11585 = vmatprep.subr.bf16.mxu1 %v12469_v23 }
 0x330   : > { %v12471_v17 = vld [vmem:[%s16768_s6 + $0x130] sm:$0xff]   ;;  %v2838_v6 = vld [vmem:[#allocation2 + $0x238] sm:$0x7]  ;;  %v10168_v15 = vrot.slane %v2836_v61, 11  ;;  %v7078_v33 = vrot.slane %v7076_v62, 4  ;;  %v7079_v39 = vrot.slane %v6980_v57, 6  ;;  %v11106_v61 = vpop.f32.mrf.mxu1 }
 0x331   : > { %v2938_v63 = vrot.slane %v2837_v2, 7  ;;  %v15614_v7 = vld [vmem:[#allocation2 + $0x2c8] sm:$0xf]  ;;  %3074 = vst [vmem:[#allocation3 + $0x44] sm:$0xf] %v2935_v58  ;;  %v2941_v32 = vrot.slane %v2838_v6, 7  ;;  %v15630_v52 = vadd.f32 %v11106_v61, %v11105_v14  ;;  %v15635_v2 = vadd.f32 %v11098_v28, %v4726_v4 }
 0x332   : > { %v12485_v60 = vld [vmem:[%s16768_s6 + $0x168] sm:$0xff]   ;;  %v6981_v27 = vld [vmem:[#allocation2 + $0x2c4] sm:$0xc]  ;;  %v7083_v54 = vrot.slane %v15614_v7, 6  ;;  %v12428_v14 = vld [vmem:[#allocation3 + $0x94] ss:$36 sps:$4 sm:$0xff]   ;;  %11586 = vmatpush3.bf16.msra.mxu1 %v12471_v17  ;;  %v7080_v28 = vsel %vm13730_vm9, %v7078_v33, %v7079_v39  ;;  %v10987_v39 = vpop.f32.mrf.mxu0 }
 0x333   : > { %v3257_v5 = vld [vmem:[#allocation3 + $0x448] sm:$0xff]  ;;  %v2939_v11 = vsel %vm13688_vm3, %v10168_v15, %v2938_v63  ;;  %v2940_v36 = vrot.slane %v2938_v63, 4  ;;  %v12501_v23 = vld [vmem:[%s16768_s6 + $0x160] sm:$0xff]   ;;  %v16945_v15 = vld [vmem:[#allocation39_spill] sm:$0xff]  ;;  %v10481_v58 = vrot.slane %v6981_v27, 10  ;;  %11587 = vmatprep.subr.bf16.mxu1 %v12485_v60  ;;  %v15653_v60 = vpop.f32.mrf.mxu1 }
 0x334   : > { %v12419_v45 = vld [vmem:[#allocation3 + $0x48] ss:$36 sps:$4 sm:$0xff]   ;;  %3075 = vst [vmem:[#allocation3 + $0x68] sm:$0xf] %v2939_v11  ;;  %v7077_v11 = vsel %vm13730_vm9, %v10480_v10, %v7076_v62  ;;  %v15645_v27 = vld [vmem:[#allocation2 + $0x2dc] sm:$0xc] }
 0x335   : > { %v6983_v57 = vld [vmem:[#allocation2 + $0x2cc] sm:$0x3]  ;;  %v2942_v24 = vsel %vm13688_vm3, %v2940_v36, %v2941_v32  ;;  %v2839_v4 = vld [vmem:[#allocation2 + $0x248] sm:$0x8]  ;;  %8771 = vmatmul.mubr.bf16.gmra.mxu1 %v12419_v45  ;;  %v15647_v17 = vld [vmem:[#allocation2 + $0x2e0] sm:$0xf]  ;;  %v7084_v36 = vsel %vm13730_vm9, %v10481_v58, %v7083_v54 }
 0x336   : > { %v12487_v40 = vld [vmem:[%s16768_s6 + $0x128] sm:$0xff]   ;;  %v7086_v63 = vrot.slane %v6983_v57, 6  ;;  %3076 = vst [vmem:[#allocation3 + $0x8c] sm:$0xf] %v2942_v24  ;;  %v15649_v57 = vld [vmem:[#allocation2 + $0x2e4] sm:$0x3]  ;;  %8778 = vmatprep.mubr.bf16.mxu1 %v12428_v14 }
 0x337   : > { %v3262_v13 = vld [vmem:[#allocation3 + $0x46c] sm:$0xff]  ;;  %11588 = vmatpush3.bf16.msra.mxu1 %v12487_v40  ;;  %v12503_v45 = vld [vmem:[%s16768_s6 + $0x120] sm:$0xff]   ;;  %v12425_v14 = vld [vmem:[%s16768_s6 + $0xb8] sm:$0xff]  }
 0x338   : > { %v12417_v8 = vld [vmem:[#allocation3 + $0x44c] ss:$36 sps:$4 sm:$0xff]   ;;  %6368 = vst [vmem:[#allocation3 + $0x46c] sm:$0xf] %v16945_v15  ;;  %v10323_v7 = vcombine.low %v3257_v5, %v3262_v13  ;;  %v7085_v5 = vrot.slane %v7083_v54, 4  ;;  %v7090_v15 = vrot.slane %v15647_v17, 6  ;;  %11589 = vmatprep.subr.bf16.mxu1 %v12501_v23 }
 0x339   : > { %v16944_v6 = vld [vmem:[#allocation38_spill] sm:$0xff]  ;;  %6639 = vst [vmem:[#allocation3 + $0x44c] sm:$0xf] %v6573_v47  ;;  %6640 = vst [vmem:[#allocation3 + $0x470] sm:$0xf] %v6576_v44  ;;  %5058 = vmatprep.mubr.bf16.mxu0 %v12417_v8  ;;  %v10169_v44 = vrot.slane %v2839_v4, 11  ;;  %v10988_v4 = vpop.f32.mrf.mxu0 }
 0x33a   : > { %6367 = vst [vmem:[#allocation3 + $0x448] sm:$0xf] %v16944_v6  ;;  %v2840_v61 = vld [vmem:[#allocation2 + $0x24c] sm:$0xf]  ;;  %v2841_v47 = vld [vmem:[#allocation2 + $0x250] sm:$0x7]  ;;  %5059 = vmatmul.mubr.bf16.gmra.mxu0 %v10323_v7  ;;  %v7087_v40 = vsel %vm13730_vm9, %v7085_v5, %v7086_v63  ;;  %v10989_v5 = vadd.f32 %v10988_v4, %v10987_v39 }
 0x33b   : > { %v2945_v13 = vrot.slane %v2840_v61, 7  ;;  %v2948_v32 = vrot.slane %v2841_v47, 7  ;;  %v12422_v62 = vld [vmem:[#allocation3 + $0x20] ss:$36 sps:$4 sm:$0xff]   ;;  %v12426_v8 = vld [vmem:[#allocation3 + $0x90] ss:$36 sps:$4 sm:$0xff]   ;;  %11590 = vmatpush3.bf16.msra.mxu1 %v12503_v45 }
 0x33c   : > { %7218 = vst [vmem:[#allocation3 + $0x20] sm:$0xf] %v7077_v11  ;;  %7219 = vst [vmem:[#allocation3 + $0x44] sm:$0xf] %v7080_v28  ;;  %v10482_v6 = vrot.slane %v15645_v27, 10  ;;  %11939 = vmatprep.mubr.bf16.mxu0 %v12422_v62  ;;  %v7093_v61 = vrot.slane %v15649_v57, 6  ;;  %v15675_v62 = vpop.f32.mrf.mxu1 }
 0x33d   : > { %v2946_v10 = vsel %vm13688_vm3, %v10169_v44, %v2945_v13  ;;  %v2947_v33 = vrot.slane %v2945_v13, 4  ;;  %v2842_v7 = vld [vmem:[#allocation2 + $0x260] sm:$0x8]  ;;  %v2843_v24 = vld [vmem:[#allocation2 + $0x264] sm:$0xf]  ;;  %v12431_v63 = vld [vmem:[%s16768_s6 + $0xf0] sm:$0xff]   ;;  %8779 = vmatmul.mubr.bf16.gmra.mxu1 %v12426_v8 }
 0x33e   : > { %3077 = vst [vmem:[#allocation3 + $0xb0] sm:$0xf] %v2946_v10  ;;  %v2844_v58 = vld [vmem:[#allocation2 + $0x268] sm:$0x7]  ;;  %v10170_v11 = vrot.slane %v2842_v7, 11  ;;  %v2952_v28 = vrot.slane %v2843_v24, 7  ;;  %v10990_v10 = vpop.f32.mrf.mxu0  ;;  %v4731_v7 = vadd.f32 %v15554_v9, %v10989_v5 }
 0x33f   : > { %v2949_v54 = vsel %vm13688_vm3, %v2947_v33, %v2948_v32  ;;  %v2955_v47 = vrot.slane %v2844_v58, 7  ;;  %v6987_v23 = vld [vmem:[#allocation2 + $0x2f4] sm:$0xc]  ;;  %v6988_v44 = vld [vmem:[#allocation2 + $0x2f8] sm:$0xf]  ;;  %v7092_v27 = vrot.slane %v7090_v15, 4  ;;  %v11104_v58 = vadd.f32 %v15595_v35, %v15575_v1 }
 0x340   : > { %3078 = vst [vmem:[#allocation3 + $0xd4] sm:$0xf] %v2949_v54  ;;  %v12423_v13 = vld [vmem:[#allocation3 + $0x68] ss:$36 sps:$4 sm:$0xff]   ;;  %v2953_v32 = vsel %vm13688_vm3, %v10170_v11, %v2952_v28  ;;  %v2954_v17 = vrot.slane %v2952_v28, 4  ;;  %v7097_v33 = vrot.slane %v6988_v44, 6  ;;  %v10991_v11 = vpop.f32.mrf.mxu0  ;;  %v7091_v1 = vsel %vm13730_vm9, %v10482_v6, %v7090_v15  ;;  %v11239_v44 = vpop.f32.mrf.mxu1 }
 0x341   : > { %7220 = vst [vmem:[#allocation3 + $0x68] sm:$0xf] %v7084_v36  ;;  %7221 = vst [vmem:[#allocation3 + $0x8c] sm:$0xf] %v7087_v40  ;;  %v6989_v57 = vld [vmem:[#allocation2 + $0x2fc] sm:$0x3]  ;;  %v10992_v28 = vadd.f32 %v10991_v11, %v10990_v10  ;;  %v7094_v35 = vsel %vm13730_vm9, %v7092_v27, %v7093_v61 }
 0x342   : > { %3079 = vst [vmem:[#allocation3 + $0xf8] sm:$0xf] %v2953_v32  ;;  %v12517_v39 = vld [vmem:[%s16768_s6 + $0x158] sm:$0xff]   ;;  %v2956_v24 = vsel %vm13688_vm3, %v2954_v17, %v2955_v47  ;;  %v10483_v54 = vrot.slane %v6987_v23, 10  ;;  %11940 = vmatmul.mubr.bf16.vlgmr.msra.gmra.mxu0 %v12423_v13  ;;  %v7099_v45 = vrot.slane %v7097_v33, 4  ;;  %v7100_v36 = vrot.slane %v6989_v57, 6  ;;  %v11240_v27 = vpop.f32.mrf.mxu1 }
 0x343   : > { %3080 = vst [vmem:[#allocation3 + $0x11c] sm:$0xf] %v2956_v24  ;;  %v12432_v40 = vld [vmem:[%s16768_s6 + $0xb0] sm:$0xff]   ;;  %v12519_v4 = vld [vmem:[%s16768_s6 + $0x118] sm:$0xff]   ;;  %v15692_v47 = vadd.f32 %v15567_v25, %v4731_v7  ;;  %11472 = vmatpush3.bf16.msra.mxu0 %v12425_v14  ;;  %11591 = vmatprep.subr.bf16.mxu1 %v12517_v39  ;;  %v2847_v32 = vld [vmem:[#allocation2 + $0x280] sm:$0x7]  ;;  %v4734_v14 = vadd.f32 %v15554_v9, %v10992_v28 }
 0x344   : > { %v12435_v8 = vld [vmem:[#allocation3 + $0xdc] ss:$36 sps:$4 sm:$0xff]   ;;  %v2845_v23 = vld [vmem:[#allocation2 + $0x278] sm:$0x8]  ;;  %11473 = vmatprep.subr.bf16.mxu0 %v12431_v63  ;;  %v12438_v25 = vld [vmem:[%s16768_s6 + $0xe8] sm:$0xff]   ;;  %11592 = vmatpush3.bf16.msra.mxu1 %v12519_v4  ;;  %v2962_v61 = vrot.slane %v2847_v32, 7  ;;  %v7098_v63 = vsel %vm13730_vm9, %v10483_v54, %v7097_v33  ;;  %v15713_v24 = vadd.f32 %v11240_v27, %v11239_v44  ;;  %v7101_v28 = vsel %vm13730_vm9, %v7099_v45, %v7100_v36 }
 0x345   : > { %16946 = vst [vmem:[#allocation44_spill] sm:$0xff] %v15692_v47  ;;  %v12433_v5 = vld [vmem:[#allocation3 + $0xd8] ss:$36 sps:$4 sm:$0xff]   ;;  %v10171_v17 = vrot.slane %v2845_v23, 11  ;;  %8786 = vmatprep.mubr.bf16.mxu1 %v12435_v8  ;;  %v15704_v10 = vld [vmem:[#allocation2 + $0x30c] sm:$0xc]  ;;  %v15715_v11 = vadd.f32 %v11104_v58, %v4734_v14 }
 0x346   : > { %v2846_v13 = vld [vmem:[#allocation2 + $0x27c] sm:$0xf]  ;;  %v15706_v57 = vld [vmem:[#allocation2 + $0x310] sm:$0xf]  ;;  %v15708_v7 = vld [vmem:[#allocation2 + $0x314] sm:$0x3]  ;;  %8787 = vmatmul.mubr.bf16.gmra.mxu1 %v12433_v5 }
 0x347   : > { %v12429_v6 = vld [vmem:[#allocation3 + $0xb0] ss:$36 sps:$4 sm:$0xff]   ;;  %v2959_v15 = vrot.slane %v2846_v13, 7  ;;  %v12439_v39 = vld [vmem:[%s16768_s6 + $0xa8] sm:$0xff]   ;;  %16947 = vst [vmem:[#allocation20_spill] sm:$0xff] %v15715_v11  ;;  %11474 = vmatpush3.bf16.msra.mxu0 %v12432_v40  ;;  %v7104_v4 = vrot.slane %v15706_v57, 6 }
 0x348   : > { %7222 = vst [vmem:[#allocation3 + $0xb0] sm:$0xf] %v7091_v1  ;;  %7223 = vst [vmem:[#allocation3 + $0xd4] sm:$0xf] %v7094_v35  ;;  %11943 = vmatprep.mubr.bf16.mxu0 %v12429_v6  ;;  %v12445_v1 = vld [vmem:[%s16768_s6 + $0xe0] sm:$0xff]   ;;  %v15725_v35 = vpop.f32.mrf.mxu1  ;;  %v12527_v58 = vld [vmem:[%s16768_s6 + $0x150] sm:$0xff]   ;;  %11475 = vmatprep.subr.bf16.mxu0 %v12438_v25 }
 0x349   : > { %v2960_v33 = vsel %vm13688_vm3, %v10171_v17, %v2959_v15  ;;  %v2961_v54 = vrot.slane %v2959_v15, 4  ;;  %v10484_v45 = vrot.slane %v15704_v10, 10  ;;  %v2848_v36 = vld [vmem:[#allocation2 + $0x290] sm:$0x8]  ;;  %v2849_v40 = vld [vmem:[#allocation2 + $0x294] sm:$0xf]  ;;  %v10993_v17 = vpop.f32.mrf.mxu0  ;;  %11593 = vmatprep.subr.bf16.mxu1 %v12527_v58 }
 0x34a   : > { %3081 = vst [vmem:[#allocation3 + $0x140] sm:$0xf] %v2960_v33  ;;  %v12528_v8 = vld [vmem:[%s16768_s6 + $0x110] sm:$0xff]   ;;  %v12430_v23 = vld [vmem:[#allocation3 + $0xf8] ss:$36 sps:$4 sm:$0xff]   ;;  %v7107_v13 = vrot.slane %v15708_v7, 6 }
 0x34b   : > { %v2963_v44 = vsel %vm13688_vm3, %v2961_v54, %v2962_v61  ;;  %v10172_v32 = vrot.slane %v2848_v36, 11  ;;  %7224 = vst [vmem:[#allocation3 + $0xf8] sm:$0xf] %v7098_v63  ;;  %7225 = vst [vmem:[#allocation3 + $0x11c] sm:$0xf] %v7101_v28  ;;  %v2966_v6 = vrot.slane %v2849_v40, 7  ;;  %11944 = vmatmul.mubr.bf16.gmra.mxu0 %v12430_v23  ;;  %v10994_v7 = vpop.f32.mrf.mxu0  ;;  %v15748_v28 = vpop.f32.mrf.mxu1  ;;  %11594 = vmatpush3.bf16.msra.mxu1 %v12528_v8 }
 0x34c   : > { %3082 = vst [vmem:[#allocation3 + $0x164] sm:$0xf] %v2963_v44  ;;  %v2850_v14 = vld [vmem:[#allocation2 + $0x298] sm:$0x7]  ;;  %v15737_v25 = vld [vmem:[#allocation2 + $0x324] sm:$0xc]  ;;  %11476 = vmatpush3.bf16.msra.mxu0 %v12439_v39  ;;  %v10995_v23 = vadd.f32 %v10994_v7, %v10993_v17 }
 0x34d   : > { %v12446_v15 = vld [vmem:[%s16768_s6 + $0xa0] sm:$0xff]   ;;  %v12532_v61 = vld [vmem:[%s16768_s6 + $0x148] sm:$0xff]   ;;  %v7106_v27 = vrot.slane %v7104_v4, 4  ;;  %v2969_v10 = vrot.slane %v2850_v14, 7  ;;  %v12452_v5 = vld [vmem:[%s16768_s6 + $0xd8] sm:$0xff]   ;;  %v2967_v33 = vsel %vm13688_vm3, %v10172_v32, %v2966_v6  ;;  %v2968_v54 = vrot.slane %v2966_v6, 4  ;;  %11477 = vmatprep.subr.bf16.mxu0 %v12445_v1  ;;  %v10996_v44 = vpop.f32.mrf.mxu0 }
 0x34e   : > { %v6994_v57 = vld [vmem:[#allocation2 + $0x328] sm:$0xf]  ;;  %v6995_v63 = vld [vmem:[#allocation2 + $0x32c] sm:$0x3]  ;;  %v10485_v58 = vrot.slane %v15737_v25, 10  ;;  %11595 = vmatprep.subr.bf16.mxu1 %v12532_v61  ;;  %v12454_v39 = vld [vmem:[%s16768_s6 + $0x98] sm:$0xff]   ;;  %v7105_v25 = vsel %vm13730_vm9, %v10484_v45, %v7104_v4  ;;  %v11110_v4 = vadd.f32 %v15675_v62, %v15653_v60 }
 0x34f   : > { %v7111_v36 = vrot.slane %v6994_v57, 6  ;;  %v12533_v40 = vld [vmem:[%s16768_s6 + $0x108] sm:$0xff]   ;;  %3083 = vst [vmem:[#allocation3 + $0x188] sm:$0xf] %v2967_v33  ;;  %v2970_v8 = vsel %vm13688_vm3, %v2968_v54, %v2969_v10  ;;  %v7114_v11 = vrot.slane %v6995_v63, 6  ;;  %v7108_v61 = vsel %vm13730_vm9, %v7106_v27, %v7107_v13  ;;  %v11245_v10 = vpop.f32.mrf.mxu1  ;;  %v10997_v7 = vpop.f32.mrf.mxu0 }
 0x350   : > { %v12440_v32 = vld [vmem:[#allocation3 + $0x120] ss:$36 sps:$4 sm:$0xff]   ;;  %3084 = vst [vmem:[#allocation3 + $0x1ac] sm:$0xf] %v2970_v8  ;;  %v2851_v1 = vld [vmem:[#allocation2 + $0x2a8] sm:$0x8]  ;;  %v4739_v57 = vadd.f32 %v15554_v9, %v10995_v23  ;;  %11596 = vmatpush3.bf16.msra.mxu1 %v12533_v40  ;;  %11478 = vmatpush3.bf16.msra.mxu0 %v12446_v15  ;;  %v10998_v45 = vadd.f32 %v10997_v7, %v10996_v44 }
 0x351   : > { %v7113_v14 = vrot.slane %v7111_v36, 4  ;;  %v12442_v6 = vld [vmem:[#allocation3 + $0x124] ss:$36 sps:$4 sm:$0xff]   ;;  %v2852_v17 = vld [vmem:[#allocation2 + $0x2ac] sm:$0xf]  ;;  %v10173_v33 = vrot.slane %v2851_v1, 11  ;;  %11479 = vmatprep.subr.bf16.mxu0 %v12452_v5  ;;  %v11246_v8 = vpop.f32.mrf.mxu1 }
 0x352   : > { %8794 = vmatprep.mubr.bf16.mxu1 %v12442_v6  ;;  %v2853_v63 = vld [vmem:[#allocation2 + $0x2b0] sm:$0x7]  ;;  %v2973_v54 = vrot.slane %v2852_v17, 7  ;;  %v15766_v47 = vld [vmem:[#allocation2 + $0x33c] sm:$0xc]  ;;  %v15774_v40 = vadd.f32 %v15630_v52, %v4739_v57  ;;  %v4742_v44 = vadd.f32 %v15554_v9, %v10998_v45  ;;  %v15779_v5 = vadd.f32 %v11246_v8, %v11245_v10  ;;  %v12538_v1 = vld [vmem:[%s16768_s6 + $0x140] sm:$0xff]  }
 0x353   : > { %v12436_v13 = vld [vmem:[#allocation3 + $0x140] ss:$36 sps:$4 sm:$0xff]   ;;  %v2976_v27 = vrot.slane %v2853_v63, 7  ;;  %v12461_v23 = vld [vmem:[%s16768_s6 + $0xd0] sm:$0xff]   ;;  %8795 = vmatmul.mubr.bf16.gmra.mxu1 %v12440_v32  ;;  %v7112_v52 = vsel %vm13730_vm9, %v10485_v58, %v7111_v36  ;;  %v7115_v32 = vsel %vm13730_vm9, %v7113_v14, %v7114_v11  ;;  %v15792_v10 = vpop.f32.mrf.mxu1  ;;  %v2856_v63 = vld [vmem:[#allocation2 + $0x2c8] sm:$0x7]  ;;  %v11127_v11 = vpop.f32.mrf.mxu0  ;;  %11597 = vmatprep.subr.bf16.mxu1 %v12538_v1 }
 0x354   : > { %7226 = vst [vmem:[#allocation3 + $0x140] sm:$0xf] %v7105_v25  ;;  %7227 = vst [vmem:[#allocation3 + $0x164] sm:$0xf] %v7108_v61  ;;  %v2974_v15 = vsel %vm13688_vm3, %v10173_v33, %v2973_v54  ;;  %v2975_v6 = vrot.slane %v2973_v54, 4  ;;  %11947 = vmatprep.mubr.bf16.mxu0 %v12436_v13  ;;  %v10486_v25 = vrot.slane %v15766_v47, 10  ;;  %11480 = vmatpush3.bf16.msra.mxu0 %v12454_v39 }
 0x355   : > { %v6997_v60 = vld [vmem:[#allocation2 + $0x340] sm:$0xf]  ;;  %v6998_v62 = vld [vmem:[#allocation2 + $0x344] sm:$0x3]  ;;  %3085 = vst [vmem:[#allocation3 + $0x1d0] sm:$0xf] %v2974_v15  ;;  %v15799_v14 = vadd.f32 %v11110_v4, %v4742_v44  ;;  %11481 = vmatprep.subr.bf16.mxu0 %v12461_v23  ;;  %v15801_v8 = vpop.f32.mrf.mxu1 }
 0x356   : > { %v7118_v61 = vrot.slane %v6997_v60, 6  ;;  %v2854_v17 = vld [vmem:[#allocation2 + $0x2c0] sm:$0x8]  ;;  %v2855_v57 = vld [vmem:[#allocation2 + $0x2c4] sm:$0xf]  ;;  %v12462_v9 = vld [vmem:[%s16768_s6 + $0x90] sm:$0xff]   ;;  %v2977_v7 = vsel %vm13688_vm3, %v2975_v6, %v2976_v27  ;;  %v11128_v60 = vpop.f32.mrf.mxu0 }
 0x357   : > { %v10174_v58 = vrot.slane %v2854_v17, 11  ;;  %v2980_v36 = vrot.slane %v2855_v57, 7  ;;  %v12468_v47 = vld [vmem:[%s16768_s6 + $0xc8] sm:$0xff]   ;;  %16948 = vst [vmem:[#allocation21_spill] sm:$0xff] %v15799_v14  ;;  %3086 = vst [vmem:[#allocation3 + $0x1f4] sm:$0xf] %v2977_v7  ;;  %v11129_v23 = vadd.f32 %v11128_v60, %v11127_v11  ;;  %v11251_v11 = vpop.f32.mrf.mxu1 }
 0x358   : > { %v7121_v33 = vrot.slane %v6998_v62, 6  ;;  %v2983_v54 = vrot.slane %v2856_v63, 7  ;;  %v6999_v45 = vld [vmem:[#allocation2 + $0x354] sm:$0xc]  ;;  %v7000_v13 = vld [vmem:[#allocation2 + $0x358] sm:$0xf]  ;;  %11482 = vmatpush3.bf16.msra.mxu0 %v12462_v9 }
 0x359   : > { %v12437_v27 = vld [vmem:[#allocation3 + $0x188] ss:$36 sps:$4 sm:$0xff]   ;;  %v7120_v15 = vrot.slane %v7118_v61, 4  ;;  %v2981_v39 = vsel %vm13688_vm3, %v10174_v58, %v2980_v36  ;;  %v2982_v6 = vrot.slane %v2980_v36, 4  ;;  %v7001_v4 = vld [vmem:[#allocation2 + $0x35c] sm:$0x3]  ;;  %v4941_v36 = vadd.f32 %v11129_v23, %v15342_v38  ;;  %11483 = vmatprep.subr.bf16.mxu0 %v12468_v47 }
 0x35a   : > { %7228 = vst [vmem:[#allocation3 + $0x188] sm:$0xf] %v7112_v52  ;;  %7229 = vst [vmem:[#allocation3 + $0x1ac] sm:$0xf] %v7115_v32  ;;  %v10487_v44 = vrot.slane %v6999_v45, 10  ;;  %v7125_v1 = vrot.slane %v7000_v13, 6  ;;  %11948 = vmatmul.mubr.bf16.gmra.mxu0 %v12437_v27  ;;  %v11130_v52 = vpop.f32.mrf.mxu0  ;;  %v11244_v38 = vadd.f32 %v15748_v28, %v15725_v35 }
 0x35b   : > { %3087 = vst [vmem:[#allocation3 + $0x218] sm:$0xf] %v2981_v39  ;;  %v12470_v62 = vld [vmem:[%s16768_s6 + $0x88] sm:$0xff]   ;;  %v2984_v17 = vsel %vm13688_vm3, %v2982_v6, %v2983_v54  ;;  %v7128_v57 = vrot.slane %v7001_v4, 6  ;;  %v12477_v7 = vld [vmem:[%s16768_s6 + $0xc0] sm:$0xff]   ;;  %v7119_v54 = vsel %vm13730_vm9, %v10486_v25, %v7118_v61  ;;  %v7122_v45 = vsel %vm13730_vm9, %v7120_v15, %v7121_v33  ;;  %v11252_v25 = vpop.f32.mrf.mxu1 }
 0x35c   : > { %v12540_v32 = vld [vmem:[%s16768_s6 + $0x100] sm:$0xff]   ;;  %3088 = vst [vmem:[#allocation3 + $0x23c] sm:$0xf] %v2984_v17  ;;  %v7127_v63 = vrot.slane %v7125_v1, 4  ;;  %v12447_v58 = vld [vmem:[#allocation3 + $0x168] ss:$36 sps:$4 sm:$0xff]   ;;  %v11131_v39 = vpop.f32.mrf.mxu0  ;;  %v15827_v61 = vadd.f32 %v15713_v24, %v4941_v36  ;;  %v15829_v17 = vadd.f32 %v11252_v25, %v11251_v11  ;;  %11484 = vmatpush3.bf16.msra.mxu0 %v12470_v62 }
 0x35d   : > { %v12449_v13 = vld [vmem:[#allocation3 + $0x16c] ss:$36 sps:$4 sm:$0xff]   ;;  %v2857_v27 = vld [vmem:[#allocation2 + $0x2d8] sm:$0x8]  ;;  %11598 = vmatpush3.bf16.msra.mxu1 %v12540_v32  ;;  %v2858_v6 = vld [vmem:[#allocation2 + $0x2dc] sm:$0xf]  ;;  %v11132_v23 = vadd.f32 %v11131_v39, %v11130_v52  ;;  %v7126_v32 = vsel %vm13730_vm9, %v10487_v44, %v7125_v1  ;;  %v15834_v24 = vpop.f32.mrf.mxu1  ;;  %11485 = vmatprep.subr.bf16.mxu0 %v12477_v7 }
 0x35e   : > { %v2859_v60 = vld [vmem:[#allocation2 + $0x2e0] sm:$0x7]  ;;  %v10175_v4 = vrot.slane %v2857_v27, 11  ;;  %v12443_v33 = vld [vmem:[#allocation3 + $0x1d0] ss:$36 sps:$4 sm:$0xff]   ;;  %8802 = vmatprep.mubr.bf16.mxu1 %v12449_v13  ;;  %v2987_v47 = vrot.slane %v2858_v6, 7  ;;  %v7129_v52 = vsel %vm13730_vm9, %v7127_v63, %v7128_v57 }
 0x35f   : > { %v12478_v9 = vld [vmem:[%s16768_s6 + $0x80] sm:$0xff]   ;;  %v2990_v15 = vrot.slane %v2859_v60, 7  ;;  %7230 = vst [vmem:[#allocation3 + $0x1d0] sm:$0xf] %v7119_v54  ;;  %7231 = vst [vmem:[#allocation3 + $0x1f4] sm:$0xf] %v7122_v45  ;;  %8803 = vmatmul.mubr.bf16.gmra.mxu1 %v12447_v58  ;;  %v4944_v28 = vadd.f32 %v11132_v23, %v15351_v20  ;;  %11951 = vmatprep.mubr.bf16.mxu0 %v12443_v33  ;;  %v11133_v45 = vpop.f32.mrf.mxu0 }
 0x360   : > { %v7002_v27 = vld [vmem:[#allocation2 + $0x36c] sm:$0xc]  ;;  %v7003_v14 = vld [vmem:[#allocation2 + $0x370] sm:$0xf]  ;;  %v7004_v35 = vld [vmem:[#allocation2 + $0x374] sm:$0x3]  ;;  %v2988_v36 = vsel %vm13688_vm3, %v10175_v4, %v2987_v47  ;;  %11486 = vmatpush3.bf16.msra.mxu0 %v12478_v9 }
 0x361   : > { %v2989_v11 = vrot.slane %v2987_v47, 4  ;;  %v7132_v54 = vrot.slane %v7003_v14, 6  ;;  %v12486_v44 = vld [vmem:[%s16768_s6 + $0x1f8] sm:$0xff]   ;;  %3089 = vst [vmem:[#allocation3 + $0x260] sm:$0xf] %v2988_v36  ;;  %v10488_v1 = vrot.slane %v7002_v27, 10  ;;  %v15843_v13 = vadd.f32 %v11244_v38, %v4944_v28  ;;  %v15847_v14 = vpop.f32.mrf.mxu1  ;;  %v11134_v23 = vpop.f32.mrf.mxu0 }
 0x362   : > { %v7135_v62 = vrot.slane %v7004_v35, 6  ;;  %v2860_v20 = vld [vmem:[#allocation2 + $0x2f0] sm:$0x8]  ;;  %v2861_v58 = vld [vmem:[#allocation2 + $0x2f4] sm:$0xf]  ;;  %11695 = vmatprep.subr.bf16.mxu0 %v12486_v44  ;;  %v11135_v27 = vadd.f32 %v11134_v23, %v11133_v45 }
 0x363   : > { %v12444_v39 = vld [vmem:[#allocation3 + $0x218] ss:$36 sps:$4 sm:$0xff]   ;;  %v2991_v57 = vsel %vm13688_vm3, %v2989_v11, %v2990_v15  ;;  %v7134_v63 = vrot.slane %v7132_v54, 4  ;;  %v10176_v6 = vrot.slane %v2860_v20, 11  ;;  %v2994_v60 = vrot.slane %v2861_v58, 7  ;;  %v11257_v11 = vpop.f32.mrf.mxu1 }
 0x364   : > { %7232 = vst [vmem:[#allocation3 + $0x218] sm:$0xf] %v7126_v32  ;;  %7233 = vst [vmem:[#allocation3 + $0x23c] sm:$0xf] %v7129_v52  ;;  %v2862_v7 = vld [vmem:[#allocation2 + $0x2f8] sm:$0x7]  ;;  %11952 = vmatmul.mubr.bf16.gmra.mxu0 %v12444_v39  ;;  %v11136_v52 = vpop.f32.mrf.mxu0  ;;  %v4949_v36 = vadd.f32 %v11135_v27, %v15362_v46  ;;  %v11250_v58 = vadd.f32 %v15801_v8, %v15792_v10  ;;  %v7133_v45 = vsel %vm13730_vm9, %v10488_v1, %v7132_v54 }
 0x365   : > { %3090 = vst [vmem:[#allocation3 + $0x284] sm:$0xf] %v2991_v57  ;;  %v7005_v4 = vld [vmem:[#allocation2 + $0x384] sm:$0xc]  ;;  %v2997_v25 = vrot.slane %v2862_v7, 7  ;;  %v2995_v15 = vsel %vm13688_vm3, %v10176_v6, %v2994_v60  ;;  %v2996_v35 = vrot.slane %v2994_v60, 4  ;;  %v7136_v39 = vsel %vm13730_vm9, %v7134_v63, %v7135_v62  ;;  %v11258_v6 = vpop.f32.mrf.mxu1 }
 0x366   : > { %v7006_v38 = vld [vmem:[#allocation2 + $0x388] sm:$0xf]  ;;  %v7007_v33 = vld [vmem:[#allocation2 + $0x38c] sm:$0x3]  ;;  %v10489_v47 = vrot.slane %v7005_v4, 10  ;;  %v11137_v44 = vpop.f32.mrf.mxu0  ;;  %v15861_v46 = vadd.f32 %v15779_v5, %v4949_v36  ;;  %v15863_v23 = vadd.f32 %v11258_v6, %v11257_v11 }
 0x367   : > { %v7139_v28 = vrot.slane %v7006_v38, 6  ;;  %v7142_v32 = vrot.slane %v7007_v33, 6  ;;  %3091 = vst [vmem:[#allocation3 + $0x2a8] sm:$0xf] %v2995_v15  ;;  %v2998_v9 = vsel %vm13688_vm3, %v2996_v35, %v2997_v25  ;;  %v11138_v57 = vadd.f32 %v11137_v44, %v11136_v52  ;;  %v12456_v7 = vld [vmem:[#allocation3 + $0x1b0] ss:$36 sps:$4 sm:$0xff]   ;;  %v15866_v38 = vpop.f32.mrf.mxu1 }
 0x368   : > { %3092 = vst [vmem:[#allocation3 + $0x2cc] sm:$0xf] %v2998_v9  ;;  %v12458_v60 = vld [vmem:[#allocation3 + $0x1b4] ss:$36 sps:$4 sm:$0xff]   ;;  %v2863_v4 = vld [vmem:[#allocation2 + $0x308] sm:$0x8]  ;;  %v11139_v35 = vpop.f32.mrf.mxu0 }
 0x369   : > { %v7141_v20 = vrot.slane %v7139_v28, 4  ;;  %v2864_v10 = vld [vmem:[#allocation2 + $0x30c] sm:$0xf]  ;;  %v4952_v8 = vadd.f32 %v11138_v57, %v15370_v42  ;;  %8810 = vmatprep.mubr.bf16.mxu1 %v12458_v60  ;;  %v2865_v54 = vld [vmem:[#allocation2 + $0x310] sm:$0x7]  ;;  %v10177_v1 = vrot.slane %v2863_v4, 11  ;;  %v7140_v5 = vsel %vm13730_vm9, %v10489_v47, %v7139_v28  ;;  %v15876_v44 = vpop.f32.mrf.mxu1 }
 0x36a   : > { %v3001_v62 = vrot.slane %v2864_v10, 7  ;;  %v7008_v63 = vld [vmem:[#allocation2 + $0x39c] sm:$0xc]  ;;  %8811 = vmatmul.mubr.bf16.gmra.mxu1 %v12456_v7  ;;  %v3004_v33 = vrot.slane %v2865_v54, 7  ;;  %v7009_v27 = vld [vmem:[#allocation2 + $0x3a0] sm:$0xf] }
 0x36b   : > { %v7010_v15 = vld [vmem:[#allocation2 + $0x3a4] sm:$0x3]  ;;  %v15870_v52 = vadd.f32 %v11250_v58, %v4952_v8  ;;  %v7143_v42 = vsel %vm13730_vm9, %v7141_v20, %v7142_v32  ;;  %v7146_v9 = vrot.slane %v7009_v27, 6  ;;  %v2868_v28 = vld [vmem:[#allocation2 + $0x328] sm:$0x7]  ;;  %v10490_v6 = vrot.slane %v7008_v63, 10 }
 0x36c   : > { %v12450_v25 = vld [vmem:[#allocation3 + $0x260] ss:$36 sps:$4 sm:$0xff]   ;;  %v3002_v36 = vsel %vm13688_vm3, %v10177_v1, %v3001_v62  ;;  %v3003_v11 = vrot.slane %v3001_v62, 4  ;;  %v3011_v20 = vrot.slane %v2868_v28, 7  ;;  %v7011_v60 = vld [vmem:[#allocation2 + $0x3b4] sm:$0xc]  ;;  %v11263_v62 = vpop.f32.mrf.mxu1 }
 0x36d   : > { %7234 = vst [vmem:[#allocation3 + $0x260] sm:$0xf] %v7133_v45  ;;  %7235 = vst [vmem:[#allocation3 + $0x284] sm:$0xf] %v7136_v39  ;;  %11955 = vmatprep.mubr.bf16.mxu0 %v12450_v25  ;;  %v2866_v45 = vld [vmem:[#allocation2 + $0x320] sm:$0x8]  ;;  %v11140_v39 = vpop.f32.mrf.mxu0 }
 0x36e   : > { %3093 = vst [vmem:[#allocation3 + $0x2f0] sm:$0xf] %v3002_v36  ;;  %v2867_v47 = vld [vmem:[#allocation2 + $0x324] sm:$0xf]  ;;  %v3005_v58 = vsel %vm13688_vm3, %v3003_v11, %v3004_v33  ;;  %v10178_v7 = vrot.slane %v2866_v45, 11  ;;  %v11141_v25 = vadd.f32 %v11140_v39, %v11139_v35  ;;  %v7148_v8 = vrot.slane %v7146_v9, 4  ;;  %v11264_v28 = vpop.f32.mrf.mxu1 }
 0x36f   : > { %v12451_v57 = vld [vmem:[#allocation3 + $0x2a8] ss:$36 sps:$4 sm:$0xff]   ;;  %3094 = vst [vmem:[#allocation3 + $0x314] sm:$0xf] %v3005_v58  ;;  %v3008_v32 = vrot.slane %v2867_v47, 7  ;;  %v11142_v10 = vpop.f32.mrf.mxu0  ;;  %v7149_v54 = vrot.slane %v7010_v15, 6  ;;  %v11256_v35 = vadd.f32 %v15847_v14, %v15834_v24  ;;  %v7147_v15 = vsel %vm13730_vm9, %v10490_v6, %v7146_v9 }
 0x370   : > { %7236 = vst [vmem:[#allocation3 + $0x2a8] sm:$0xf] %v7140_v5  ;;  %7237 = vst [vmem:[#allocation3 + $0x2cc] sm:$0xf] %v7143_v42  ;;  %v7012_v4 = vld [vmem:[#allocation2 + $0x3b8] sm:$0xf]  ;;  %11956 = vmatmul.mubr.bf16.gmra.mxu0 %v12451_v57  ;;  %v4957_v5 = vadd.f32 %v11141_v25, %v15374_v49  ;;  %v15889_v49 = vadd.f32 %v11264_v28, %v11263_v62  ;;  %v15897_v6 = vpop.f32.mrf.mxu1 }
 0x371   : > { %v7013_v1 = vld [vmem:[#allocation2 + $0x3bc] sm:$0x3]  ;;  %v3009_v27 = vsel %vm13688_vm3, %v10178_v7, %v3008_v32  ;;  %v3010_v33 = vrot.slane %v3008_v32, 4  ;;  %v7153_v63 = vrot.slane %v7012_v4, 6  ;;  %v11143_v42 = vpop.f32.mrf.mxu0  ;;  %v10491_v36 = vrot.slane %v7011_v60, 10 }
 0x372   : > { %3095 = vst [vmem:[#allocation3 + $0x338] sm:$0xf] %v3009_v27  ;;  %v7156_v11 = vrot.slane %v7013_v1, 6  ;;  %v12463_v45 = vld [vmem:[#allocation3 + $0x1f8] ss:$36 sps:$4 sm:$0xff]   ;;  %v11144_v47 = vadd.f32 %v11143_v42, %v11142_v10  ;;  %v15892_v32 = vadd.f32 %v15829_v17, %v4957_v5  ;;  %v7150_v60 = vsel %vm13730_vm9, %v7148_v8, %v7149_v54 }
 0x373   : > { %v3012_v39 = vsel %vm13688_vm3, %v3010_v33, %v3011_v20  ;;  %v12465_v57 = vld [vmem:[#allocation3 + $0x1fc] ss:$36 sps:$4 sm:$0xff]   ;;  %v2869_v58 = vld [vmem:[#allocation2 + $0x338] sm:$0x8]  ;;  %v7155_v20 = vrot.slane %v7153_v63, 4  ;;  %v11145_v54 = vpop.f32.mrf.mxu0  ;;  %v15901_v33 = vpop.f32.mrf.mxu1 }
 0x374   : > { %v2870_v7 = vld [vmem:[#allocation2 + $0x33c] sm:$0xf]  ;;  %3096 = vst [vmem:[#allocation3 + $0x35c] sm:$0xf] %v3012_v39  ;;  %v2871_v24 = vld [vmem:[#allocation2 + $0x340] sm:$0x7]  ;;  %v4960_v9 = vadd.f32 %v11144_v47, %v15383_v37  ;;  %8818 = vmatprep.mubr.bf16.mxu1 %v12465_v57 }
 0x375   : > { %v10179_v14 = vrot.slane %v2869_v58, 11  ;;  %v3015_v4 = vrot.slane %v2870_v7, 7  ;;  %v3018_v25 = vrot.slane %v2871_v24, 7  ;;  %v7014_v10 = vld [vmem:[#allocation2 + $0x3cc] sm:$0xc]  ;;  %8819 = vmatmul.mubr.bf16.gmra.mxu1 %v12463_v45  ;;  %v7154_v45 = vsel %vm13730_vm9, %v10491_v36, %v7153_v63  ;;  %v11146_v24 = vpop.f32.mrf.mxu0  ;;  %v11269_v36 = vpop.f32.mrf.mxu1 }
 0x376   : > { %v7015_v1 = vld [vmem:[#allocation2 + $0x3d0] sm:$0xf]  ;;  %v10492_v8 = vrot.slane %v7014_v10, 10  ;;  %v15903_v5 = vadd.f32 %v11256_v35, %v4960_v9  ;;  %v7016_v37 = vld [vmem:[#allocation2 + $0x3d4] sm:$0x3]  ;;  %v7157_v35 = vsel %vm13730_vm9, %v7155_v20, %v7156_v11 }
 0x377   : > { %v12459_v62 = vld [vmem:[#allocation3 + $0x2f0] ss:$36 sps:$4 sm:$0xff]   ;;  %v3016_v17 = vsel %vm13688_vm3, %v10179_v14, %v3015_v4  ;;  %v3017_v27 = vrot.slane %v3015_v4, 4  ;;  %v7160_v42 = vrot.slane %v7015_v1, 6  ;;  %v7163_v39 = vrot.slane %v7016_v37, 6  ;;  %v11148_v63 = vpop.f32.mrf.mxu0 }
 0x378   : > { %7238 = vst [vmem:[#allocation3 + $0x2f0] sm:$0xf] %v7147_v15  ;;  %7239 = vst [vmem:[#allocation3 + $0x314] sm:$0xf] %v7150_v60  ;;  %v2872_v47 = vld [vmem:[#allocation2 + $0x350] sm:$0x8]  ;;  %11959 = vmatprep.mubr.bf16.mxu0 %v12459_v62  ;;  %v11147_v1 = vadd.f32 %v11146_v24, %v11145_v54 }
 0x379   : > { %3097 = vst [vmem:[#allocation3 + $0x380] sm:$0xf] %v3016_v17  ;;  %v3019_v28 = vsel %vm13688_vm3, %v3017_v27, %v3018_v25  ;;  %v2873_v57 = vld [vmem:[#allocation2 + $0x354] sm:$0xf]  ;;  %v2874_v58 = vld [vmem:[#allocation2 + $0x358] sm:$0x7] }
 0x37a   : > { %v10180_v7 = vrot.slane %v2872_v47, 11  ;;  %3098 = vst [vmem:[#allocation3 + $0x3a4] sm:$0xf] %v3019_v28  ;;  %v7162_v15 = vrot.slane %v7160_v42, 4  ;;  %v3022_v60 = vrot.slane %v2873_v57, 7  ;;  %v3025_v14 = vrot.slane %v2874_v58, 7  ;;  %v11149_v47 = vpop.f32.mrf.mxu0  ;;  %v11270_v28 = vpop.f32.mrf.mxu1 }
 0x37b   : > { %v7017_v4 = vld [vmem:[#allocation2 + $0x3e4] sm:$0xc]  ;;  %v7018_v9 = vld [vmem:[#allocation2 + $0x3e8] sm:$0xf]  ;;  %v7019_v10 = vld [vmem:[#allocation2 + $0x3ec] sm:$0x3]  ;;  %v4965_v37 = vadd.f32 %v11147_v1, %v15387_v53  ;;  %v11262_v57 = vadd.f32 %v15876_v44, %v15866_v38  ;;  %v11150_v58 = vadd.f32 %v11149_v47, %v11148_v63 }
 0x37c   : > { %v12460_v62 = vld [vmem:[#allocation3 + $0x338] ss:$36 sps:$4 sm:$0xff]   ;;  %v3023_v25 = vsel %vm13688_vm3, %v10180_v7, %v3022_v60  ;;  %v3024_v17 = vrot.slane %v3022_v60, 4  ;;  %v10493_v27 = vrot.slane %v7017_v4, 10  ;;  %v7167_v11 = vrot.slane %v7018_v9, 6  ;;  %v15928_v4 = vpop.f32.mrf.mxu1  ;;  %v11151_v9 = vpop.f32.mrf.mxu0 }
 0x37d   : > { %7240 = vst [vmem:[#allocation3 + $0x338] sm:$0xf] %v7154_v45  ;;  %7241 = vst [vmem:[#allocation3 + $0x35c] sm:$0xf] %v7157_v35  ;;  %v7170_v20 = vrot.slane %v7019_v10, 6  ;;  %11960 = vmatmul.mubr.bf16.gmra.mxu0 %v12460_v62  ;;  %v15918_v7 = vadd.f32 %v11270_v28, %v11269_v36  ;;  %v7161_v45 = vsel %vm13730_vm9, %v10492_v8, %v7160_v42 }
 0x37e   : > { %3099 = vst [vmem:[#allocation3 + $0x3c8] sm:$0xf] %v3023_v25  ;;  %v3026_v54 = vsel %vm13688_vm3, %v3024_v17, %v3025_v14  ;;  %v7164_v24 = vsel %vm13730_vm9, %v7162_v15, %v7163_v39  ;;  %v7169_v53 = vrot.slane %v7167_v11, 4  ;;  %v15925_v35 = vadd.f32 %v15863_v23, %v4965_v37  ;;  %v12472_v60 = vld [vmem:[#allocation3 + $0x240] ss:$36 sps:$4 sm:$0xff]   ;;  %v11152_v36 = vpop.f32.mrf.mxu0  ;;  %v15936_v47 = vpop.f32.mrf.mxu1 }
 0x37f   : > { %3100 = vst [vmem:[#allocation3 + $0x3ec] sm:$0xf] %v3026_v54  ;;  %v4968_v14 = vadd.f32 %v11150_v58, %v15391_v31  ;;  %v12474_v44 = vld [vmem:[#allocation3 + $0x244] ss:$36 sps:$4 sm:$0xff]   ;;  %v2876_v8 = vld [vmem:[#allocation2 + $0x36c] sm:$0xf]  ;;  %v7168_v31 = vsel %vm13730_vm9, %v10493_v27, %v7167_v11  ;;  %v11153_v37 = vadd.f32 %v11152_v36, %v11151_v9 }
 0x380   : > { %v2875_v10 = vld [vmem:[#allocation2 + $0x368] sm:$0x8]  ;;  %v2877_v42 = vld [vmem:[#allocation2 + $0x370] sm:$0x7]  ;;  %8826 = vmatprep.mubr.bf16.mxu1 %v12474_v44  ;;  %v3029_v23 = vrot.slane %v2876_v8, 7  ;;  %v7171_v62 = vsel %vm13730_vm9, %v7169_v53, %v7170_v20  ;;  %v11268_v44 = vadd.f32 %v15901_v33, %v15897_v6 }
 0x381   : > { %v12466_v38 = vld [vmem:[#allocation3 + $0x380] ss:$36 sps:$4 sm:$0xff]   ;;  %v15930_v1 = vadd.f32 %v11262_v57, %v4968_v14  ;;  %v10181_v39 = vrot.slane %v2875_v10, 11  ;;  %v3032_v15 = vrot.slane %v2877_v42, 7  ;;  %v7020_v63 = vld [vmem:[#allocation2 + $0x3fc] sm:$0xc]  ;;  %8827 = vmatmul.mubr.bf16.gmra.mxu1 %v12472_v60  ;;  %v4973_v11 = vadd.f32 %v11153_v37, %v15395_v48 }
 0x382   : > { %7242 = vst [vmem:[#allocation3 + $0x380] sm:$0xf] %v7161_v45  ;;  %7243 = vst [vmem:[#allocation3 + $0x3a4] sm:$0xf] %v7164_v24  ;;  %11963 = vmatprep.mubr.bf16.mxu0 %v12466_v38  ;;  %v7021_v25 = vld [vmem:[#allocation2 + $0x400] sm:$0xf]  ;;  %v11154_v45 = vpop.f32.mrf.mxu0 }
 0x383   : > { %v7022_v17 = vld [vmem:[#allocation2 + $0x404] sm:$0x3]  ;;  %v3030_v28 = vsel %vm13688_vm3, %v10181_v39, %v3029_v23  ;;  %v3031_v54 = vrot.slane %v3029_v23, 4  ;;  %v7174_v57 = vrot.slane %v7021_v25, 6  ;;  %v2878_v58 = vld [vmem:[#allocation2 + $0x380] sm:$0x8]  ;;  %v11275_v23 = vpop.f32.mrf.mxu1 }
 0x384   : > { %3101 = vst [vmem:[#allocation3 + $0x410] sm:$0xf] %v3030_v28  ;;  %v10494_v14 = vrot.slane %v7020_v63, 10  ;;  %v10182_v27 = vrot.slane %v2878_v58, 11  ;;  %v7177_v53 = vrot.slane %v7022_v17, 6  ;;  %v11155_v9 = vpop.f32.mrf.mxu0  ;;  %v15948_v10 = vld [vmem:[%s16768_s6 + $0x238] sm:$0xff]   ;;  %v15951_v63 = vadd.f32 %v15889_v49, %v4973_v11 }
 0x385   : > { %v3033_v20 = vsel %vm13688_vm3, %v3031_v54, %v3032_v15  ;;  %v2879_v60 = vld [vmem:[#allocation2 + $0x384] sm:$0xf]  ;;  %v2880_v38 = vld [vmem:[#allocation2 + $0x388] sm:$0x7]  ;;  %v7023_v42 = vld [vmem:[#allocation2 + $0x414] sm:$0xc]  ;;  %v11156_v15 = vadd.f32 %v11155_v9, %v11154_v45  ;;  %11971 = vmatprep.subr.bf16.mxu1 %v15948_v10  ;;  %v11276_v17 = vpop.f32.mrf.mxu1 }
 0x386   : > { %v12467_v24 = vld [vmem:[#allocation3 + $0x3c8] ss:$36 sps:$4 sm:$0xff]   ;;  %3102 = vst [vmem:[#allocation3 + $0x434] sm:$0xf] %v3033_v20  ;;  %v3036_v48 = vrot.slane %v2879_v60, 7  ;;  %v3039_v8 = vrot.slane %v2880_v38, 7  ;;  %v15957_v54 = vadd.f32 %v11276_v17, %v11275_v23  ;;  %v11157_v60 = vpop.f32.mrf.mxu0 }
 0x387   : > { %7244 = vst [vmem:[#allocation3 + $0x3c8] sm:$0xf] %v7168_v31  ;;  %7245 = vst [vmem:[#allocation3 + $0x3ec] sm:$0xf] %v7171_v62  ;;  %11964 = vmatmul.mubr.bf16.gmra.mxu0 %v12467_v24  ;;  %v7024_v39 = vld [vmem:[#allocation2 + $0x418] sm:$0xf]  ;;  %v4976_v25 = vadd.f32 %v11156_v15, %v15399_v55  ;;  %v11278_v11 = vpop.f32.mrf.mxu1 }
 0x388   : > { %v7176_v36 = vrot.slane %v7174_v57, 4  ;;  %v7025_v31 = vld [vmem:[#allocation2 + $0x41c] sm:$0x3]  ;;  %v7181_v6 = vrot.slane %v7024_v39, 6  ;;  %v3037_v33 = vsel %vm13688_vm3, %v10182_v27, %v3036_v48  ;;  %v3038_v62 = vrot.slane %v3036_v48, 4  ;;  %v11158_v0 = vpop.f32.mrf.mxu0 }
 0x389   : > { %3103 = vst [vmem:[#allocation3 + $0x458] sm:$0xf] %v3037_v33  ;;  %v10495_v37 = vrot.slane %v7023_v42, 10  ;;  %v12479_v28 = vld [vmem:[#allocation3 + $0x288] ss:$36 sps:$4 sm:$0xff]   ;;  %v7184_v45 = vrot.slane %v7025_v31, 6  ;;  %v15961_v20 = vadd.f32 %v11268_v44, %v4976_v25  ;;  %v7175_v27 = vsel %vm13730_vm9, %v10494_v14, %v7174_v57  ;;  %v11279_v38 = vpop.f32.mrf.mxu1 }
 0x38a   : > { %v3040_v49 = vsel %vm13688_vm3, %v3038_v62, %v3039_v8  ;;  %v7183_v58 = vrot.slane %v7181_v6, 4  ;;  %v12481_v24 = vld [vmem:[#allocation3 + $0x28c] ss:$36 sps:$4 sm:$0xff]   ;;  %v7178_v55 = vsel %vm13730_vm9, %v7176_v36, %v7177_v53  ;;  %v12491_v48 = vld [vmem:[#allocation3 + $0x2d4] ss:$36 sps:$4 sm:$0xff]   ;;  %v11159_v8 = vadd.f32 %v11158_v0, %v11157_v60  ;;  %v11160_v53 = vpop.f32.mrf.mxu0 }
 0x38b   : > { %3104 = vst [vmem:[#allocation3 + $0x47c] sm:$0xf] %v3040_v49  ;;  %8834 = vmatprep.mubr.bf16.mxu1 %v12481_v24  ;;  %v7182_v44 = vsel %vm13730_vm9, %v10495_v37, %v7181_v6  ;;  %v12484_v14 = vld [vmem:[#allocation3 + $0xc] ss:$36 sps:$4 sm:$0xff]   ;;  %v11281_v42 = vpop.f32.mrf.mxu1  ;;  %v12497_v23 = vld [vmem:[#allocation3 + $0x31c] ss:$36 sps:$4 sm:$0xff]   ;;  %v11274_v62 = vadd.f32 %v15936_v47, %v15928_v4 }
 0x38c   : > { %8835 = vmatmul.mubr.bf16.gmra.mxu1 %v12479_v28  ;;  %v7185_v57 = vsel %vm13730_vm9, %v7183_v58, %v7184_v45  ;;  %v12489_v39 = vld [vmem:[#allocation3 + $0x2d0] ss:$36 sps:$4 sm:$0xff]   ;;  %v4981_v15 = vadd.f32 %v11159_v8, %v15405_v30  ;;  %v11161_v31 = vpop.f32.mrf.mxu0  ;;  %v12482_v28 = vld [vmem:[#allocation3 + $0x8] ss:$36 sps:$4 sm:$0xff]   ;;  %v12488_v49 = vld [vmem:[%s16768_s6 + $0x1b8] sm:$0xff]   ;;  %v11280_v8 = vadd.f32 %v11279_v38, %v11278_v11 }
 0x38d   : > { %v12475_v9 = vld [vmem:[#allocation3 + $0x410] ss:$36 sps:$4 sm:$0xff]   ;;  %8842 = vmatprep.mubr.bf16.mxu1 %v12491_v48  ;;  %v11282_v33 = vpop.f32.mrf.mxu1  ;;  %v11162_v6 = vadd.f32 %v11161_v31, %v11160_v53  ;;  %v12495_v24 = vld [vmem:[#allocation3 + $0x318] ss:$36 sps:$4 sm:$0xff]   ;;  %v12518_v48 = vld [vmem:[%s16768_s6 + $0x1e8] sm:$0xff]  }
 0x38e   : > { %7246 = vst [vmem:[#allocation3 + $0x410] sm:$0xf] %v7175_v27  ;;  %7247 = vst [vmem:[#allocation3 + $0x434] sm:$0xf] %v7178_v55  ;;  %11967 = vmatprep.mubr.bf16.mxu0 %v12475_v9  ;;  %v15974_v25 = vadd.f32 %v11282_v33, %v11281_v42  ;;  %v15977_v12 = vadd.f32 %v15918_v7, %v4981_v15  ;;  %v11163_v37 = vpop.f32.mrf.mxu0  ;;  %v12494_v4 = vld [vmem:[#allocation3 + $0x54] ss:$36 sps:$4 sm:$0xff]  }
 0x38f   : > { %v4984_v17 = vadd.f32 %v11162_v6, %v15409_v50  ;;  %v11284_v30 = vpop.f32.mrf.mxu1  ;;  %v12502_v27 = vld [vmem:[%s16768_s6 + $0x1f0] sm:$0xff]   ;;  %v12507_v55 = vld [vmem:[#allocation3 + $0x364] ss:$36 sps:$4 sm:$0xff]   ;;  %v12500_v53 = vld [vmem:[#allocation3 + $0x9c] ss:$36 sps:$4 sm:$0xff]  }
 0x390   : > { %v11164_v58 = vpop.f32.mrf.mxu0  ;;  %v12504_v0 = vld [vmem:[%s16768_s6 + $0x1b0] sm:$0xff]   ;;  %v12520_v42 = vld [vmem:[%s16768_s6 + $0x1a8] sm:$0xff]  }
 0x391   : > { %v15983_v47 = vadd.f32 %v11274_v62, %v4984_v17  ;;  %v11165_v45 = vadd.f32 %v11164_v58, %v11163_v37  ;;  %v11285_v7 = vpop.f32.mrf.mxu1  ;;  %v12513_v33 = vld [vmem:[#allocation3 + $0x3ac] ss:$36 sps:$4 sm:$0xff]   ;;  %v12498_v58 = vld [vmem:[#allocation3 + $0x98] ss:$36 sps:$4 sm:$0xff]  }
 0x392   : > { %v12476_v36 = vld [vmem:[#allocation3 + $0x458] ss:$36 sps:$4 sm:$0xff]   ;;  %v11166_v50 = vpop.f32.mrf.mxu0 }
 0x393   : > { %7248 = vst [vmem:[#allocation3 + $0x458] sm:$0xf] %v7182_v44  ;;  %7249 = vst [vmem:[#allocation3 + $0x47c] sm:$0xf] %v7185_v57  ;;  %11968 = vmatmul.mubr.bf16.gmra.mxu0 %v12476_v36  ;;  %v4989_v60 = vadd.f32 %v11165_v45, %v15413_v34  ;;  %v11287_v44 = vpop.f32.mrf.mxu1  ;;  %v12492_v34 = vld [vmem:[#allocation3 + $0x50] ss:$36 sps:$4 sm:$0xff]  }
 0x394   : > { %8923 = vmatprep.mubr.bf16.mxu0 %v12484_v14  ;;  %8843 = vmatmul.mubr.bf16.gmra.mxu1 %v12489_v39  ;;  %v11167_v9 = vpop.f32.mrf.mxu0  ;;  %v12537_v36 = vld [vmem:[%s16768_s6 + $0x1e0] sm:$0xff]  }
 0x395   : > { %8850 = vmatprep.mubr.bf16.mxu1 %v12497_v23  ;;  %v11168_v57 = vadd.f32 %v11167_v9, %v11166_v50  ;;  %v15996_v14 = vadd.f32 %v15957_v54, %v4989_v60  ;;  %v11288_v23 = vpop.f32.mrf.mxu1  ;;  %v12505_v54 = vld [vmem:[#allocation3 + $0x360] ss:$36 sps:$4 sm:$0xff]   ;;  %v12554_v50 = vld [vmem:[%s16768_s6 + $0x198] sm:$0xff]  }
 0x396   : > { %v16002_v15 = vadd.f32 %v11288_v23, %v11287_v44  ;;  %v11169_v31 = vpop.f32.mrf.mxu0  ;;  %v12510_v45 = vld [vmem:[#allocation3 + $0xe4] ss:$36 sps:$4 sm:$0xff]  }
 0x397   : > { %v4992_v39 = vadd.f32 %v11168_v57, %v15421_v18  ;;  %v11290_v11 = vpop.f32.mrf.mxu1  ;;  %v12539_v18 = vld [vmem:[%s16768_s6 + $0x1a0] sm:$0xff]  }
 0x398   : > { %v11170_v6 = vpop.f32.mrf.mxu0  ;;  %v12508_v23 = vld [vmem:[#allocation3 + $0xe0] ss:$36 sps:$4 sm:$0xff]  }
 0x399   : > { %v16004_v38 = vadd.f32 %v11280_v8, %v4992_v39  ;;  %v11291_v62 = vpop.f32.mrf.mxu1  ;;  %v11171_v17 = vadd.f32 %v11170_v6, %v11169_v31  ;;  %v12523_v8 = vld [vmem:[#allocation3 + $0x3f4] ss:$36 sps:$4 sm:$0xff]   ;;  %v12516_v31 = vld [vmem:[#allocation3 + $0x12c] ss:$36 sps:$4 sm:$0xff]  }
 0x39a   : > { %v11172_v37 = vpop.f32.mrf.mxu0  ;;  %v11292_v6 = vadd.f32 %v11291_v62, %v11290_v11 }
 0x39b   : > { %8924 = vmatmul.mubr.bf16.vlgmr.msra.gmra.mxu0 %v12482_v28  ;;  %v11293_v28 = vpop.f32.mrf.mxu1 }
 0x39c   : > { %11696 = vmatpush3.bf16.msra.mxu0 %v12488_v49  ;;  %8931 = vmatprep.mubr.bf16.mxu0 %v12494_v4  ;;  %v12553_v49 = vld [vmem:[%s16768_s6 + $0x1d8] sm:$0xff]   ;;  %v4997_v4 = vadd.f32 %v11171_v17, %v15425_v21  ;;  %v12567_v21 = vld [vmem:[%s16768_s6 + $0x1d0] sm:$0xff]  }
 0x39d   : > { %8851 = vmatmul.mubr.bf16.gmra.mxu1 %v12495_v24  ;;  %11697 = vmatprep.subr.bf16.mxu0 %v12502_v27  ;;  %v11173_v24 = vpop.f32.mrf.mxu0  ;;  %v11294_v27 = vpop.f32.mrf.mxu1 }
 0x39e   : > { %8858 = vmatprep.mubr.bf16.mxu1 %v12507_v55  ;;  %v11286_v55 = vadd.f32 %v11285_v7, %v11284_v30  ;;  %v11174_v60 = vadd.f32 %v11173_v24, %v11172_v37  ;;  %v16019_v9 = vadd.f32 %v11294_v27, %v11293_v28  ;;  %v12568_v30 = vld [vmem:[%s16768_s6 + $0x190] sm:$0xff]   ;;  %v12531_v28 = vld [vmem:[#allocation3 + $0x43c] ss:$36 sps:$4 sm:$0xff]   ;;  %v12514_v24 = vld [vmem:[#allocation3 + $0x128] ss:$36 sps:$4 sm:$0xff]  }
 0x39f   : > { %v11175_v57 = vpop.f32.mrf.mxu0  ;;  %v12526_v27 = vld [vmem:[#allocation3 + $0x174] ss:$36 sps:$4 sm:$0xff]  }
 0x3a0   : > { %11698 = vmatpush3.bf16.msra.mxu0 %v12504_v0  ;;  %v16022_v0 = vadd.f32 %v15974_v25, %v4997_v4  ;;  %v5000_v44 = vadd.f32 %v11174_v60, %v15433_v3  ;;  %v12581_v25 = vld [vmem:[%s16768_s6 + $0x1c8] sm:$0xff]  }
 0x3a1   : > { %11699 = vmatprep.subr.bf16.mxu0 %v12518_v48  ;;  %v12511_v48 = vld [vmem:[#allocation3 + $0x3a8] ss:$36 sps:$4 sm:$0xff]   ;;  %v11176_v7 = vpop.f32.mrf.mxu0 }
 0x3a3   : > { %8932 = vmatmul.mubr.bf16.gmra.mxu0 %v12492_v34  ;;  %v11296_v34 = vpop.f32.mrf.mxu1  ;;  %v11178_v39 = vpop.f32.mrf.mxu0 }
 0x3a4   : > { %8939 = vmatprep.mubr.bf16.mxu0 %v12500_v53  ;;  %11700 = vmatpush3.bf16.msra.mxu0 %v12520_v42  ;;  %v16034_v53 = vadd.f32 %v11286_v55, %v5000_v44  ;;  %v11177_v42 = vadd.f32 %v11176_v7, %v11175_v57  ;;  %v12529_v55 = vld [vmem:[#allocation3 + $0x438] ss:$36 sps:$4 sm:$0xff]  }
 0x3a5   : > { %8859 = vmatmul.mubr.bf16.gmra.mxu1 %v12505_v54  ;;  %11701 = vmatprep.subr.bf16.mxu0 %v12537_v36  ;;  %v11297_v3 = vpop.f32.mrf.mxu1  ;;  %v12583_v36 = vld [vmem:[%s16768_s6 + $0x188] sm:$0xff]  }
 0x3a6   : > { %8866 = vmatprep.mubr.bf16.mxu1 %v12513_v33  ;;  %v5005_v54 = vadd.f32 %v11177_v42, %v15437_v59  ;;  %v11179_v33 = vpop.f32.mrf.mxu0  ;;  %v12596_v59 = vld [vmem:[%s16768_s6 + $0x1c0] sm:$0xff]   ;;  %v16056_v42 = vld [vmem:[%s16769_s7 + $0x38] sm:$0xff]  }
 0x3a7   : > { %v11180_v17 = vadd.f32 %v11179_v33, %v11178_v39  ;;  %v11298_v39 = vadd.f32 %v11297_v3, %v11296_v34 }
 0x3a8   : > { %11702 = vmatpush3.bf16.msra.mxu0 %v12539_v18  ;;  %v12521_v18 = vld [vmem:[#allocation3 + $0x3f0] ss:$36 sps:$4 sm:$0xff]   ;;  %v16041_v37 = vadd.f32 %v16002_v15, %v5005_v54  ;;  %v12598_v15 = vld [vmem:[%s16768_s6 + $0x180] sm:$0xff]  }
 0x3a9   : > { %11703 = vmatprep.subr.bf16.mxu0 %v12553_v49  ;;  %v11299_v49 = vpop.f32.mrf.mxu1  ;;  %v5008_v4 = vadd.f32 %v11180_v17, %v15441_v41  ;;  %v11181_v41 = vpop.f32.mrf.mxu0  ;;  %v12541_v17 = vld [vmem:[#allocation3 + $0x10] ss:$36 sps:$4 sm:$0xff]  }
 0x3ab   : > { %8940 = vmatmul.mubr.bf16.gmra.mxu0 %v12498_v58  ;;  %v11300_v58 = vpop.f32.mrf.mxu1  ;;  %v16050_v11 = vadd.f32 %v11292_v6, %v5008_v4  ;;  %v11182_v60 = vpop.f32.mrf.mxu0 }
 0x3ac   : > { %8947 = vmatprep.mubr.bf16.mxu0 %v12510_v45  ;;  %11704 = vmatpush3.bf16.msra.mxu0 %v12554_v50  ;;  %v11301_v45 = vadd.f32 %v11300_v58, %v11299_v49  ;;  %v12549_v49 = vld [vmem:[#allocation3 + $0x5c] ss:$36 sps:$4 sm:$0xff]  }
 0x3ad   : > { %8867 = vmatmul.mubr.bf16.gmra.mxu1 %v12511_v48  ;;  %11705 = vmatprep.subr.bf16.mxu0 %v12567_v21  ;;  %v11302_v62 = vpop.f32.mrf.mxu1  ;;  %v12543_v21 = vld [vmem:[#allocation3 + $0x14] ss:$36 sps:$4 sm:$0xff]   ;;  %v11184_v44 = vpop.f32.mrf.mxu0 }
 0x3ae   : > { %8874 = vmatprep.mubr.bf16.mxu1 %v12523_v8  ;;  %v11183_v8 = vadd.f32 %v11182_v60, %v11181_v41  ;;  %v12547_v60 = vld [vmem:[#allocation3 + $0x58] ss:$36 sps:$4 sm:$0xff]  }
 0x3af   : > { %v11303_v50 = vpop.f32.mrf.mxu1 }
 0x3b0   : > { %11706 = vmatpush3.bf16.msra.mxu0 %v12568_v30  ;;  %v11304_v48 = vadd.f32 %v11303_v50, %v11302_v62  ;;  %v5013_v30 = vadd.f32 %v11183_v8, %v15445_v16  ;;  %v12536_v16 = vld [vmem:[#allocation3 + $0x1bc] ss:$36 sps:$4 sm:$0xff]  }
 0x3b1   : > { %11707 = vmatprep.subr.bf16.mxu0 %v12581_v25  ;;  %v11305_v57 = vpop.f32.mrf.mxu1  ;;  %v11185_v25 = vpop.f32.mrf.mxu0 }
 0x3b3   : > { %8948 = vmatmul.mubr.bf16.gmra.mxu0 %v12508_v23  ;;  %v11306_v7 = vpop.f32.mrf.mxu1  ;;  %v11186_v23 = vadd.f32 %v11185_v25, %v11184_v44  ;;  %v11187_v6 = vpop.f32.mrf.mxu0 }
 0x3b4   : > { %8955 = vmatprep.mubr.bf16.mxu0 %v12516_v31  ;;  %11708 = vmatpush3.bf16.msra.mxu0 %v12583_v36  ;;  %v16058_v54 = vadd.f32 %v11306_v7, %v11305_v57  ;;  %v16061_v36 = vadd.f32 %v16019_v9, %v5013_v30  ;;  %v12524_v31 = vld [vmem:[#allocation3 + $0x170] ss:$36 sps:$4 sm:$0xff]   ;;  %v12625_v57 = vld [vmem:[%s16768_s6 + $0x220] sm:$0xff]  }
 0x3b5   : > { %8875 = vmatmul.mubr.bf16.gmra.mxu1 %v12521_v18  ;;  %11709 = vmatprep.subr.bf16.mxu0 %v12596_v59  ;;  %v11308_v33 = vpop.f32.mrf.mxu1  ;;  %v5016_v18 = vadd.f32 %v11186_v23, %v15461_v22  ;;  %v11188_v4 = vpop.f32.mrf.mxu0  ;;  %v12597_v9 = vld [vmem:[%s16768_s6 + $0x230] sm:$0xff]   ;;  %v12544_v7 = vld [vmem:[#allocation3 + $0x200] ss:$36 sps:$4 sm:$0xff]   ;;  %v12639_v23 = vld [vmem:[%s16768_s6 + $0x218] sm:$0xff]  }
 0x3b6   : > { %8882 = vmatprep.mubr.bf16.mxu1 %v12531_v28  ;;  %v11189_v3 = vadd.f32 %v11188_v4, %v11187_v6  ;;  %v12563_v6 = vld [vmem:[#allocation3 + $0xec] ss:$36 sps:$4 sm:$0xff]  }
 0x3b7   : > { %v11309_v28 = vpop.f32.mrf.mxu1  ;;  %v16067_v34 = vadd.f32 %v11298_v39, %v5016_v18  ;;  %v11190_v58 = vpop.f32.mrf.mxu0  ;;  %v12647_v4 = vld [vmem:[%s16768_s6 + $0x210] sm:$0xff]  }
 0x3b8   : > { %11710 = vmatpush3.bf16.msra.mxu0 %v12598_v15  ;;  %v16065_v59 = vadd.f32 %v11309_v28, %v11308_v33  ;;  %v5021_v22 = vadd.f32 %v11189_v3, %v15472_v56  ;;  %v12534_v15 = vld [vmem:[#allocation3 + $0x1b8] ss:$36 sps:$4 sm:$0xff]   ;;  %v12557_v56 = vld [vmem:[#allocation3 + $0xa4] ss:$36 sps:$4 sm:$0xff]  }
 0x3b9   : > { %12019 = vmatprep.subr.bf16.mxu0 %v16056_v42  ;;  %v11191_v62 = vpop.f32.mrf.mxu0 }
 0x3ba   : > { %v11192_v41 = vadd.f32 %v11191_v62, %v11190_v58  ;;  %v16077_v50 = vadd.f32 %v11301_v45, %v5021_v22 }
 0x3bb   : > { %8956 = vmatmul.mubr.bf16.gmra.mxu0 %v12514_v24  ;;  %v11311_v24 = vpop.f32.mrf.mxu1 }
 0x3bc   : > { %8963 = vmatprep.mubr.bf16.mxu0 %v12526_v27  ;;  %v12611_v27 = vld [vmem:[%s16768_s6 + $0x228] sm:$0xff]  }
 0x3bd   : > { %8883 = vmatmul.mubr.bf16.gmra.mxu1 %v12529_v55  ;;  %v12546_v55 = vld [vmem:[#allocation3 + $0x204] ss:$36 sps:$4 sm:$0xff]   ;;  %v11312_v8 = vpop.f32.mrf.mxu1 }
 0x3be   : > { %9084 = vmatprep.mubr.bf16.mxu1 %v12543_v21  ;;  %v5024_v21 = vadd.f32 %v11192_v41, %v15481_v43  ;;  %v16080_v44 = vadd.f32 %v11312_v8, %v11311_v24  ;;  %v12651_v41 = vld [vmem:[%s16768_s6 + $0x208] sm:$0xff]   ;;  %v12571_v8 = vld [vmem:[#allocation3 + $0x134] ss:$36 sps:$4 sm:$0xff]  }
 0x3c0   : > { %v16085_v30 = vadd.f32 %v11304_v48, %v5024_v21 }
 0x3c3   : > { %8964 = vmatmul.mubr.bf16.gmra.mxu0 %v12524_v31  ;;  %v11193_v45 = vpop.f32.mrf.mxu0  ;;  %v12552_v31 = vld [vmem:[#allocation3 + $0x24c] ss:$36 sps:$4 sm:$0xff]  }
 0x3c4   : > { %8971 = vmatprep.mubr.bf16.mxu0 %v12536_v16  ;;  %v12555_v16 = vld [vmem:[#allocation3 + $0xa0] ss:$36 sps:$4 sm:$0xff]  }
 0x3c5   : > { %9085 = vmatmul.mubr.bf16.vlgmr.msra.gmra.mxu1 %v12541_v17  ;;  %v11194_v39 = vpop.f32.mrf.mxu0 }
 0x3c6   : > { %9092 = vmatprep.mubr.bf16.mxu1 %v12549_v49  ;;  %11972 = vmatpush3.bf16.msra.mxu1 %v15948_v10  ;;  %v11314_v10 = vpop.f32.mrf.mxu1  ;;  %v11195_v33 = vadd.f32 %v11194_v39, %v11193_v45 }
 0x3c7   : > { %11973 = vmatprep.subr.bf16.mxu1 %v12597_v9  ;;  %v11196_v48 = vpop.f32.mrf.mxu0 }
 0x3c8   : > { %v11315_v25 = vpop.f32.mrf.mxu1  ;;  %v5029_v17 = vadd.f32 %v11195_v33, %v15513_v51  ;;  %v16949_v33 = vld [vmem:[#allocation43_spill] sm:$0xff] }
 0x3c9   : > { %v16087_v43 = vadd.f32 %v11315_v25, %v11314_v10  ;;  %v11197_v28 = vpop.f32.mrf.mxu0  ;;  %v12656_v10 = vld [vmem:[%s16768_s6 + $0x200] sm:$0xff]   ;;  %v12558_v25 = vld [vmem:[#allocation3 + $0x290] ss:$36 sps:$4 sm:$0xff]  }
 0x3ca   : > { %11974 = vmatpush3.bf16.msra.mxu1 %v12597_v9  ;;  %v11317_v18 = vpop.f32.mrf.mxu1  ;;  %v11198_v3 = vadd.f32 %v11197_v28, %v11196_v48  ;;  %v16099_v58 = vadd.f32 %v16058_v54, %v5029_v17  ;;  %v12561_v54 = vld [vmem:[#allocation3 + $0xe8] ss:$36 sps:$4 sm:$0xff]  }
 0x3cb   : > { %8972 = vmatmul.mubr.bf16.gmra.mxu0 %v12534_v15  ;;  %11975 = vmatprep.subr.bf16.mxu1 %v12611_v27  ;;  %v12550_v15 = vld [vmem:[#allocation3 + $0x248] ss:$36 sps:$4 sm:$0xff]  }
 0x3cc   : > { %8979 = vmatprep.mubr.bf16.mxu0 %v12546_v55  ;;  %v11318_v49 = vpop.f32.mrf.mxu1  ;;  %v5032_v51 = vadd.f32 %v11198_v3, %v15526_v26 }
 0x3cd   : > { %9093 = vmatmul.mubr.bf16.gmra.mxu1 %v12547_v60  ;;  %v16096_v9 = vadd.f32 %v11318_v49, %v11317_v18  ;;  %v12577_v18 = vld [vmem:[#allocation3 + $0x17c] ss:$36 sps:$4 sm:$0xff]  }
 0x3ce   : > { %9100 = vmatprep.mubr.bf16.mxu1 %v12557_v56  ;;  %11976 = vmatpush3.bf16.msra.mxu1 %v12611_v27  ;;  %v11320_v22 = vpop.f32.mrf.mxu1  ;;  %v11199_v62 = vpop.f32.mrf.mxu0  ;;  %v12560_v27 = vld [vmem:[#allocation3 + $0x294] ss:$36 sps:$4 sm:$0xff]   ;;  %v16106_v60 = vadd.f32 %v16065_v59, %v5032_v51  ;;  %v12566_v59 = vld [vmem:[#allocation3 + $0x2dc] ss:$36 sps:$4 sm:$0xff]  }
 0x3cf   : > { %11977 = vmatprep.subr.bf16.mxu1 %v12625_v57 }
 0x3d0   : > { %v11321_v24 = vpop.f32.mrf.mxu1  ;;  %v11200_v21 = vpop.f32.mrf.mxu0 }
 0x3d1   : > { %v11322_v55 = vadd.f32 %v11321_v24, %v11320_v22  ;;  %v11201_v56 = vadd.f32 %v11200_v21, %v11199_v62  ;;  %v12574_v22 = vld [vmem:[#allocation3 + $0x324] ss:$36 sps:$4 sm:$0xff]   ;;  %v12575_v62 = vld [vmem:[#allocation3 + $0x178] ss:$36 sps:$4 sm:$0xff]  }
 0x3d2   : > { %11978 = vmatpush3.bf16.msra.mxu1 %v12625_v57  ;;  %v11202_v26 = vpop.f32.mrf.mxu0 }
 0x3d3   : > { %8980 = vmatmul.mubr.bf16.gmra.mxu0 %v12544_v7  ;;  %11979 = vmatprep.subr.bf16.mxu1 %v12639_v23  ;;  %v5037_v57 = vadd.f32 %v11201_v56, %v15552_v29 }
 0x3d4   : > { %8987 = vmatprep.mubr.bf16.mxu0 %v12552_v31  ;;  %v11203_v45 = vpop.f32.mrf.mxu0  ;;  %v12569_v31 = vld [vmem:[#allocation3 + $0x130] ss:$36 sps:$4 sm:$0xff]  }
 0x3d5   : > { %9101 = vmatmul.mubr.bf16.gmra.mxu1 %v12555_v16  ;;  %v11204_v39 = vadd.f32 %v11203_v45, %v11202_v26  ;;  %v12572_v45 = vld [vmem:[#allocation3 + $0x320] ss:$36 sps:$4 sm:$0xff]  }
 0x3d6   : > { %9108 = vmatprep.mubr.bf16.mxu1 %v12563_v6  ;;  %11980 = vmatpush3.bf16.msra.mxu1 %v12639_v23  ;;  %v16113_v23 = vadd.f32 %v16080_v44, %v5037_v57  ;;  %v12564_v44 = vld [vmem:[#allocation3 + $0x2d8] ss:$36 sps:$4 sm:$0xff]  }
 0x3d7   : > { %11981 = vmatprep.subr.bf16.mxu1 %v12647_v4  ;;  %v11323_v7 = vpop.f32.mrf.mxu1  ;;  %v5040_v16 = vadd.f32 %v11204_v39, %v16949_v33 }
 0x3d9   : > { %v11324_v48 = vpop.f32.mrf.mxu1  ;;  %v16117_v29 = vadd.f32 %v16087_v43, %v5040_v16 }
 0x3da   : > { %11982 = vmatpush3.bf16.msra.mxu1 %v12647_v4  ;;  %v11325_v6 = vadd.f32 %v11324_v48, %v11323_v7  ;;  %v12584_v7 = vld [vmem:[#allocation3 + $0x1c0] ss:$36 sps:$4 sm:$0xff]  }
 0x3db   : > { %8988 = vmatmul.mubr.bf16.gmra.mxu0 %v12550_v15  ;;  %11983 = vmatprep.subr.bf16.mxu1 %v12651_v41  ;;  %v11326_v17 = vpop.f32.mrf.mxu1 }
 0x3dc   : > { %8995 = vmatprep.mubr.bf16.mxu0 %v12560_v27 }
 0x3dd   : > { %9109 = vmatmul.mubr.bf16.gmra.mxu1 %v12561_v54  ;;  %v11205_v28 = vpop.f32.mrf.mxu0  ;;  %v11327_v49 = vpop.f32.mrf.mxu1 }
 0x3de   : > { %9116 = vmatprep.mubr.bf16.mxu1 %v12571_v8  ;;  %11984 = vmatpush3.bf16.msra.mxu1 %v12651_v41  ;;  %v11328_v3 = vadd.f32 %v11327_v49, %v11326_v17  ;;  %v12586_v41 = vld [vmem:[#allocation3 + $0x1c4] ss:$36 sps:$4 sm:$0xff]  }
 0x3df   : > { %11985 = vmatprep.subr.bf16.mxu1 %v12656_v10  ;;  %v11206_v4 = vpop.f32.mrf.mxu0  ;;  %v12578_v49 = vld [vmem:[#allocation3 + $0x368] ss:$36 sps:$4 sm:$0xff]  }
 0x3e0   : > { %v11207_v15 = vadd.f32 %v11206_v4, %v11205_v28 }
 0x3e1   : > { %v11208_v51 = vpop.f32.mrf.mxu0 }
 0x3e2   : > { %11986 = vmatpush3.bf16.msra.mxu1 %v12656_v10  ;;  %v5045_v24 = vadd.f32 %v11207_v15, %v15610_v19 }
 0x3e3   : > { %8996 = vmatmul.mubr.bf16.gmra.mxu0 %v12558_v25  ;;  %12067 = vmatprep.subr.bf16.mxu1 %v16056_v42  ;;  %v11209_v27 = vpop.f32.mrf.mxu0  ;;  %v12580_v25 = vld [vmem:[#allocation3 + $0x36c] ss:$36 sps:$4 sm:$0xff]  }
 0x3e4   : > { %9003 = vmatprep.mubr.bf16.mxu0 %v12566_v59  ;;  %v11329_v43 = vpop.f32.mrf.mxu1  ;;  %v11210_v54 = vadd.f32 %v11209_v27, %v11208_v51  ;;  %v16122_v21 = vadd.f32 %v16096_v9, %v5045_v24  ;;  %v12592_v9 = vld [vmem:[#allocation3 + $0x20c] ss:$36 sps:$4 sm:$0xff]   ;;  %v12601_v27 = vld [vmem:[#allocation3 + $0x254] ss:$36 sps:$4 sm:$0xff]  }
 0x3e5   : > { %9117 = vmatmul.mubr.bf16.gmra.mxu1 %v12569_v31  ;;  %v12590_v24 = vld [vmem:[#allocation3 + $0x208] ss:$36 sps:$4 sm:$0xff]  }
 0x3e6   : > { %9124 = vmatprep.mubr.bf16.mxu1 %v12577_v18  ;;  %v11330_v8 = vpop.f32.mrf.mxu1  ;;  %v5048_v56 = vadd.f32 %v11210_v54, %v15635_v2  ;;  %v16951_v54 = vld [vmem:[#allocation20_spill] sm:$0xff] }
 0x3e7   : > { %v11331_v26 = vadd.f32 %v11330_v8, %v11329_v43 }
 0x3e8   : > { %v11332_v10 = vpop.f32.mrf.mxu1  ;;  %v16125_v57 = vadd.f32 %v11322_v55, %v5048_v56  ;;  %v16950_v55 = vld [vmem:[#allocation44_spill] sm:$0xff] }
 0x3ea   : > { %v11333_v19 = vpop.f32.mrf.mxu1 }
 0x3eb   : > { %9004 = vmatmul.mubr.bf16.gmra.mxu0 %v12564_v44  ;;  %v11334_v59 = vadd.f32 %v11333_v19, %v11332_v10 }
 0x3ec   : > { %9011 = vmatprep.mubr.bf16.mxu0 %v12574_v22  ;;  %v11375_v31 = vpop.f32.mrf.mxu1  ;;  %v12589_v22 = vld [vmem:[#allocation3 + $0x3b4] ss:$36 sps:$4 sm:$0xff]  }
 0x3ed   : > { %9125 = vmatmul.mubr.bf16.gmra.mxu1 %v12575_v62 }
 0x3ee   : > { %9132 = vmatprep.mubr.bf16.mxu1 %v12586_v41  ;;  %v11211_v39 = vpop.f32.mrf.mxu0  ;;  %v11376_v16 = vpop.f32.mrf.mxu1 }
 0x3ef   : > { %v16127_v2 = vadd.f32 %v11376_v16, %v11375_v31  ;;  %v12587_v31 = vld [vmem:[#allocation3 + $0x3b0] ss:$36 sps:$4 sm:$0xff]   ;;  %v12595_v16 = vld [vmem:[#allocation3 + $0x3fc] ss:$36 sps:$4 sm:$0xff]  }
 0x3f0   : > { %v11212_v33 = vpop.f32.mrf.mxu0  ;;  %v11378_v17 = vpop.f32.mrf.mxu1 }
 0x3f1   : > { %v11213_v48 = vadd.f32 %v11212_v33, %v11211_v39 }
 0x3f2   : > { %v11214_v18 = vpop.f32.mrf.mxu0  ;;  %v11379_v4 = vpop.f32.mrf.mxu1 }
 0x3f3   : > { %9012 = vmatmul.mubr.bf16.gmra.mxu0 %v12572_v45  ;;  %v5053_v28 = vadd.f32 %v11213_v48, %v16950_v55  ;;  %v16130_v51 = vadd.f32 %v11379_v4, %v11378_v17  ;;  %v12599_v55 = vld [vmem:[#allocation3 + $0x250] ss:$36 sps:$4 sm:$0xff]  }
 0x3f4   : > { %9019 = vmatprep.mubr.bf16.mxu0 %v12580_v25  ;;  %v11215_v44 = vpop.f32.mrf.mxu0 }
 0x3f5   : > { %9133 = vmatmul.mubr.bf16.gmra.mxu1 %v12584_v7  ;;  %v11216_v15 = vadd.f32 %v11215_v44, %v11214_v18  ;;  %v16132_v62 = vadd.f32 %v11325_v6, %v5053_v28  ;;  %v11381_v43 = vpop.f32.mrf.mxu1  ;;  %v16952_v44 = vld [vmem:[#allocation21_spill] sm:$0xff] }
 0x3f6   : > { %9140 = vmatprep.mubr.bf16.mxu1 %v12592_v9 }
 0x3f7   : > { %v5056_v8 = vadd.f32 %v11216_v15, %v16951_v54  ;;  %v11382_v10 = vpop.f32.mrf.mxu1 }
 0x3f8   : > { %v16135_v19 = vadd.f32 %v11382_v10, %v11381_v43 }
 0x3f9   : > { %v16137_v25 = vadd.f32 %v11328_v3, %v5056_v8  ;;  %v11384_v39 = vpop.f32.mrf.mxu1  ;;  %v12607_v3 = vld [vmem:[#allocation3 + $0x29c] ss:$36 sps:$4 sm:$0xff]  }
 0x3fa   : > { %v11217_v41 = vpop.f32.mrf.mxu0 }
 0x3fb   : > { %9020 = vmatmul.mubr.bf16.gmra.mxu0 %v12578_v49  ;;  %v11385_v33 = vpop.f32.mrf.mxu1 }
 0x3fc   : > { %v11218_v56 = vpop.f32.mrf.mxu0  ;;  %9027 = vmatprep.mubr.bf16.mxu0 %v12589_v22  ;;  %v16140_v18 = vadd.f32 %v11385_v33, %v11384_v39 }
 0x3fd   : > { %v11219_v45 = vadd.f32 %v11218_v56, %v11217_v41  ;;  %9141 = vmatmul.mubr.bf16.gmra.mxu1 %v12590_v24  ;;  %v11387_v49 = vpop.f32.mrf.mxu1  ;;  %v12593_v56 = vld [vmem:[#allocation3 + $0x3f8] ss:$36 sps:$4 sm:$0xff]  }
 0x3fe   : > { %v11220_v7 = vpop.f32.mrf.mxu0  ;;  %9148 = vmatprep.mubr.bf16.mxu1 %v12601_v27 }
 0x3ff   : > { %v5061_v6 = vadd.f32 %v11219_v45, %v15774_v40  ;;  %v11388_v15 = vpop.f32.mrf.mxu1 }
 0x400   : > { %v11221_v9 = vpop.f32.mrf.mxu0  ;;  %v16147_v43 = vadd.f32 %v11388_v15, %v11387_v49  ;;  %v12610_v15 = vld [vmem:[#allocation3 + $0x1c] ss:$36 sps:$4 sm:$0xff]  }
 0x401   : > { %v11222_v48 = vadd.f32 %v11221_v9, %v11220_v7  ;;  %v16142_v17 = vadd.f32 %v11331_v26, %v5061_v6  ;;  %v11390_v54 = vpop.f32.mrf.mxu1  ;;  %v12604_v7 = vld [vmem:[#allocation3 + $0x444] ss:$36 sps:$4 sm:$0xff]   ;;  %v12605_v6 = vld [vmem:[#allocation3 + $0x298] ss:$36 sps:$4 sm:$0xff]  }
 0x402   : > { %v11941_v28 = vpop.f32.mrf.mxu0  ;;  %v12615_v9 = vld [vmem:[#allocation3 + $0x2e4] ss:$36 sps:$4 sm:$0xff]  }
 0x403   : > { %v5064_v4 = vadd.f32 %v11222_v48, %v16952_v44  ;;  %v5271_v22 = vadd.f32 %v11941_v28, %v15861_v46  ;;  %9028 = vmatmul.mubr.bf16.gmra.mxu0 %v12587_v31  ;;  %v11391_v45 = vpop.f32.mrf.mxu1 }
 0x404   : > { %v5262_v40 = vpop.f32.mrf.mxu0  ;;  %9035 = vmatprep.mubr.bf16.mxu0 %v12595_v16 }
 0x405   : > { %v5391_v24 = vmax.f32 %v5271_v22, 0.0  ;;  %v5263_v41 = vadd.f32 %v5262_v40, %v15827_v61  ;;  %v16149_v26 = vadd.f32 %v11334_v59, %v5064_v4  ;;  %9149 = vmatmul.mubr.bf16.gmra.mxu1 %v12599_v55  ;;  %v16155_v59 = vadd.f32 %v11391_v45, %v11390_v54  ;;  %v12602_v4 = vld [vmem:[#allocation3 + $0x440] ss:$36 sps:$4 sm:$0xff]  }
 0x406   : > { %v11942_v27 = vpop.f32.mrf.mxu0  ;;  %9156 = vmatprep.mubr.bf16.mxu1 %v12607_v3  ;;  %v11393_v31 = vpop.f32.mrf.mxu1 }
 0x407   : > { %5423 = vst [vmem:[%s14439_s27 + $0x60] sm:$0xff] %v5391_v24  ;;  %v5389_v8 = vmax.f32 %v5263_v41, 0.0  ;;  %v5274_v46 = vadd.f32 %v11942_v27, %v15870_v52  ;;  %v12613_v27 = vld [vmem:[#allocation3 + $0x2e0] ss:$36 sps:$4 sm:$0xff]  }
 0x408   : > { %v5265_v10 = vpop.f32.mrf.mxu0  ;;  %v11394_v48 = vpop.f32.mrf.mxu1 }
 0x409   : > { %5421 = vst [vmem:[%s14439_s27 + $0x10] sm:$0xff] %v5389_v8  ;;  %v5392_v61 = vmax.f32 %v5274_v46, 0.0  ;;  %v5266_v39 = vadd.f32 %v5265_v10, %v15843_v13  ;;  %v16160_v28 = vadd.f32 %v11394_v48, %v11393_v31  ;;  %v12621_v46 = vld [vmem:[#allocation3 + $0x32c] ss:$36 sps:$4 sm:$0xff]  }
 0x40a   : > { %v11396_v3 = vpop.f32.mrf.mxu1 }
 0x40b   : > { %5424 = vst [vmem:[%s14439_s27 + $0x88] sm:$0xff] %v5392_v61  ;;  %v5390_v33 = vmax.f32 %v5266_v39, 0.0  ;;  %v11945_v16 = vpop.f32.mrf.mxu0  ;;  %9036 = vmatmul.mubr.bf16.gmra.mxu0 %v12593_v56 }
 0x40c   : > { %v5287_v52 = vadd.f32 %v11945_v16, %v15925_v35  ;;  %9043 = vmatprep.mubr.bf16.mxu0 %v12604_v7  ;;  %v11397_v40 = vpop.f32.mrf.mxu1  ;;  %v12608_v7 = vld [vmem:[#allocation3 + $0x18] ss:$36 sps:$4 sm:$0xff]  }
 0x40d   : > { %5422 = vst [vmem:[%s14439_s27 + $0x38] sm:$0xff] %v5390_v33  ;;  %v5278_v55 = vpop.f32.mrf.mxu0  ;;  %9157 = vmatmul.mubr.bf16.gmra.mxu1 %v12605_v6  ;;  %v16165_v41 = vadd.f32 %v11397_v40, %v11396_v3  ;;  %v12618_v6 = vld [vmem:[#allocation3 + $0x64] ss:$36 sps:$4 sm:$0xff]   ;;  %v16179_v33 = vld [vmem:[%s16769_s7 + $0x30] sm:$0xff]  }
 0x40e   : > { %v5395_v13 = vmax.f32 %v5287_v52, 0.0  ;;  %v5279_v49 = vadd.f32 %v5278_v55, %v15892_v32  ;;  %9164 = vmatprep.mubr.bf16.mxu1 %v12615_v9  ;;  %v12619_v9 = vld [vmem:[#allocation3 + $0x328] ss:$36 sps:$4 sm:$0xff]   ;;  %v12629_v55 = vld [vmem:[#allocation3 + $0x374] ss:$36 sps:$4 sm:$0xff]  }
 0x40f   : > { %v11946_v44 = vpop.f32.mrf.mxu0 }
 0x410   : > { %5427 = vst [vmem:[%s14439_s27 + $0x100] sm:$0xff] %v5395_v13  ;;  %v5393_v22 = vmax.f32 %v5279_v49, 0.0  ;;  %v5290_v35 = vadd.f32 %v11946_v44, %v15930_v1 }
 0x411   : > { %v5281_v24 = vpop.f32.mrf.mxu0 }
 0x412   : > { %5425 = vst [vmem:[%s14439_s27 + $0xb0] sm:$0xff] %v5393_v22  ;;  %v5396_v54 = vmax.f32 %v5290_v35, 0.0  ;;  %v5282_v32 = vadd.f32 %v5281_v24, %v15903_v5  ;;  %v12616_v35 = vld [vmem:[#allocation3 + $0x60] ss:$36 sps:$4 sm:$0xff]  }
 0x413   : > { %v11399_v8 = vpop.f32.mrf.mxu1  ;;  %9044 = vmatmul.mubr.bf16.gmra.mxu0 %v12602_v4 }
 0x414   : > { %5428 = vst [vmem:[%s14439_s27 + $0x128] sm:$0xff] %v5396_v54  ;;  %v5394_v56 = vmax.f32 %v5282_v32, 0.0  ;;  %9245 = vmatprep.mubr.bf16.mxu0 %v12610_v15  ;;  %v16201_v32 = vld [vmem:[%s16769_s7 + $0x20] sm:$0xff]  }
 0x415   : > { %v11400_v10 = vpop.f32.mrf.mxu1  ;;  %9165 = vmatmul.mubr.bf16.gmra.mxu1 %v12613_v27  ;;  %v12627_v27 = vld [vmem:[#allocation3 + $0x370] ss:$36 sps:$4 sm:$0xff]  }
 0x416   : > { %v16170_v45 = vadd.f32 %v11400_v10, %v11399_v8  ;;  %5426 = vst [vmem:[%s14439_s27 + $0xd8] sm:$0xff] %v5394_v56  ;;  %9172 = vmatprep.mubr.bf16.mxu1 %v12621_v46  ;;  %v12635_v8 = vld [vmem:[#allocation3 + $0x3bc] ss:$36 sps:$4 sm:$0xff]  }
 0x417   : > { %v11402_v1 = vpop.f32.mrf.mxu1 }
 0x419   : > { %v11403_v39 = vpop.f32.mrf.mxu1 }
 0x41a   : > { %v11949_v61 = vpop.f32.mrf.mxu0  ;;  %v16174_v31 = vadd.f32 %v11403_v39, %v11402_v1 }
 0x41b   : > { %v5303_v5 = vadd.f32 %v11949_v61, %v15977_v12  ;;  %9246 = vmatmul.mubr.bf16.vlgmr.msra.gmra.mxu0 %v12608_v7 }
 0x41c   : > { %v5294_v16 = vpop.f32.mrf.mxu0  ;;  %12020 = vmatpush3.bf16.msra.mxu0 %v16056_v42  ;;  %9253 = vmatprep.mubr.bf16.mxu0 %v12618_v6 }
 0x41d   : > { %v5399_v52 = vmax.f32 %v5303_v5, 0.0  ;;  %v5295_v48 = vadd.f32 %v5294_v16, %v15951_v63  ;;  %9173 = vmatmul.mubr.bf16.gmra.mxu1 %v12619_v9  ;;  %12021 = vmatprep.subr.bf16.mxu0 %v16179_v33  ;;  %v16189_v63 = vld [vmem:[%s16769_s7 + $0x28] sm:$0xff]  }
 0x41e   : > { %v11950_v13 = vpop.f32.mrf.mxu0  ;;  %9180 = vmatprep.mubr.bf16.mxu1 %v12629_v55  ;;  %v12622_v5 = vld [vmem:[#allocation3 + $0xa8] ss:$36 sps:$4 sm:$0xff]  }
 0x41f   : > { %5431 = vst [vmem:[%s14439_s27 + $0x1a0] sm:$0xff] %v5399_v52  ;;  %v5397_v12 = vmax.f32 %v5295_v48, 0.0  ;;  %v5306_v49 = vadd.f32 %v11950_v13, %v15983_v47  ;;  %v11405_v3 = vpop.f32.mrf.mxu1  ;;  %v12624_v47 = vld [vmem:[#allocation3 + $0xac] ss:$36 sps:$4 sm:$0xff]   ;;  %v12633_v48 = vld [vmem:[#allocation3 + $0x3b8] ss:$36 sps:$4 sm:$0xff]  }
 0x420   : > { %v5297_v44 = vpop.f32.mrf.mxu0  ;;  %12022 = vmatpush3.bf16.msra.mxu0 %v16179_v33  ;;  %v16224_v13 = vld [vmem:[%s16769_s7 + $0x10] sm:$0xff]  }
 0x421   : > { %5429 = vst [vmem:[%s14439_s27 + $0x150] sm:$0xff] %v5397_v12  ;;  %v5400_v4 = vmax.f32 %v5306_v49, 0.0  ;;  %v5298_v42 = vadd.f32 %v5297_v44, %v15961_v20  ;;  %v11406_v22 = vpop.f32.mrf.mxu1  ;;  %12023 = vmatprep.subr.bf16.mxu0 %v16189_v63  ;;  %v12643_v12 = vld [vmem:[#allocation3 + $0x404] ss:$36 sps:$4 sm:$0xff]  }
 0x422   : > { %v16193_v40 = vadd.f32 %v11406_v22, %v11405_v3  ;;  %v16235_v44 = vld [vmem:[%s16769_s7 + $0x8] sm:$0xff]  }
 0x423   : > { %5432 = vst [vmem:[%s14439_s27 + $0x1c8] sm:$0xff] %v5400_v4  ;;  %v5398_v15 = vmax.f32 %v5298_v42, 0.0  ;;  %v11408_v24 = vpop.f32.mrf.mxu1  ;;  %9254 = vmatmul.mubr.bf16.gmra.mxu0 %v12616_v35  ;;  %v12630_v42 = vld [vmem:[#allocation3 + $0xf0] ss:$36 sps:$4 sm:$0xff]  }
 0x424   : > { %v11953_v54 = vpop.f32.mrf.mxu0  ;;  %9261 = vmatprep.mubr.bf16.mxu0 %v12624_v47  ;;  %12024 = vmatpush3.bf16.msra.mxu0 %v16189_v63  ;;  %v12638_v47 = vld [vmem:[#allocation3 + $0x13c] ss:$36 sps:$4 sm:$0xff]  }
 0x425   : > { %5430 = vst [vmem:[%s14439_s27 + $0x178] sm:$0xff] %v5398_v15  ;;  %v5319_v20 = vadd.f32 %v11953_v54, %v16022_v0  ;;  %v11409_v46 = vpop.f32.mrf.mxu1  ;;  %9181 = vmatmul.mubr.bf16.gmra.mxu1 %v12627_v27  ;;  %12025 = vmatprep.subr.bf16.mxu0 %v16201_v32  ;;  %v16213_v0 = vld [vmem:[%s16769_s7 + $0x18] sm:$0xff]  }
 0x426   : > { %v5310_v56 = vpop.f32.mrf.mxu0  ;;  %v16205_v10 = vadd.f32 %v11409_v46, %v11408_v24  ;;  %9188 = vmatprep.mubr.bf16.mxu1 %v12635_v8  ;;  %v16246_v8 = vld [vmem:[%s16769_s7] sm:$0xff]   ;;  %v12650_v46 = vld [vmem:[#allocation3 + $0x44c] ss:$36 sps:$4 sm:$0xff]  }
 0x427   : > { %v5403_v1 = vmax.f32 %v5319_v20, 0.0  ;;  %v5311_v7 = vadd.f32 %v5310_v56, %v15996_v14  ;;  %v12632_v14 = vld [vmem:[#allocation3 + $0xf4] ss:$36 sps:$4 sm:$0xff]   ;;  %v12641_v20 = vld [vmem:[#allocation3 + $0x400] ss:$36 sps:$4 sm:$0xff]  }
 0x428   : > { %v11954_v61 = vpop.f32.mrf.mxu0  ;;  %12026 = vmatpush3.bf16.msra.mxu0 %v16201_v32 }
 0x429   : > { %5435 = vst [vmem:[%s14439_s27 + $0x240] sm:$0xff] %v5403_v1  ;;  %v5401_v39 = vmax.f32 %v5311_v7, 0.0  ;;  %v5322_v6 = vadd.f32 %v11954_v61, %v16034_v53  ;;  %12027 = vmatprep.subr.bf16.mxu0 %v16213_v0 }
 0x42a   : > { %v5313_v9 = vpop.f32.mrf.mxu0  ;;  %v11411_v55 = vpop.f32.mrf.mxu1 }
 0x42b   : > { %5433 = vst [vmem:[%s14439_s27 + $0x1f0] sm:$0xff] %v5401_v39  ;;  %v5404_v16 = vmax.f32 %v5322_v6, 0.0  ;;  %v5314_v52 = vadd.f32 %v5313_v9, %v16004_v38  ;;  %9262 = vmatmul.mubr.bf16.gmra.mxu0 %v12622_v5  ;;  %v12636_v5 = vld [vmem:[#allocation3 + $0x138] ss:$36 sps:$4 sm:$0xff]  }
 0x42c   : > { %v11412_v49 = vpop.f32.mrf.mxu1  ;;  %9269 = vmatprep.mubr.bf16.mxu0 %v12632_v14  ;;  %12028 = vmatpush3.bf16.msra.mxu0 %v16213_v0 }
 0x42d   : > { %5436 = vst [vmem:[%s14439_s27 + $0x268] sm:$0xff] %v5404_v16  ;;  %v5402_v53 = vmax.f32 %v5314_v52, 0.0  ;;  %v16228_v3 = vadd.f32 %v11412_v49, %v11411_v55  ;;  %9189 = vmatmul.mubr.bf16.gmra.mxu1 %v12633_v48  ;;  %12029 = vmatprep.subr.bf16.mxu0 %v16224_v13  ;;  %v12648_v52 = vld [vmem:[#allocation3 + $0x448] ss:$36 sps:$4 sm:$0xff]   ;;  %v12657_v55 = vld [vmem:[#allocation3 + $0x20] ss:$36 sps:$4 sm:$0xff]  }
 0x42e   : > { %v11414_v38 = vpop.f32.mrf.mxu1  ;;  %9196 = vmatprep.mubr.bf16.mxu1 %v12643_v12 }
 0x42f   : > { %5434 = vst [vmem:[%s14439_s27 + $0x218] sm:$0xff] %v5402_v53 }
 0x430   : > { %v11957_v4 = vpop.f32.mrf.mxu0  ;;  %v11415_v35 = vpop.f32.mrf.mxu1  ;;  %12030 = vmatpush3.bf16.msra.mxu0 %v16224_v13 }
 0x431   : > { %v5335_v22 = vadd.f32 %v11957_v4, %v16061_v36  ;;  %v16238_v24 = vadd.f32 %v11415_v35, %v11414_v38  ;;  %12031 = vmatprep.subr.bf16.mxu0 %v16235_v44 }
 0x432   : > { %v5326_v15 = vpop.f32.mrf.mxu0 }
 0x433   : > { %v5407_v27 = vmax.f32 %v5335_v22, 0.0  ;;  %v5327_v54 = vadd.f32 %v5326_v15, %v16041_v37  ;;  %9270 = vmatmul.mubr.bf16.gmra.mxu0 %v12630_v42  ;;  %v12644_v42 = vld [vmem:[#allocation3 + $0x180] ss:$36 sps:$4 sm:$0xff]   ;;  %v12654_v15 = vld [vmem:[#allocation3 + $0x1cc] ss:$36 sps:$4 sm:$0xff]  }
 0x434   : > { %v11958_v36 = vpop.f32.mrf.mxu0  ;;  %9277 = vmatprep.mubr.bf16.mxu0 %v12638_v47  ;;  %12032 = vmatpush3.bf16.msra.mxu0 %v16235_v44 }
 0x435   : > { %5439 = vst [vmem:[%s14439_s27 + $0x2e0] sm:$0xff] %v5407_v27  ;;  %v5405_v56 = vmax.f32 %v5327_v54, 0.0  ;;  %v5338_v1 = vadd.f32 %v11958_v36, %v16067_v34  ;;  %v11417_v61 = vpop.f32.mrf.mxu1  ;;  %9197 = vmatmul.mubr.bf16.gmra.mxu1 %v12641_v20  ;;  %12033 = vmatprep.subr.bf16.mxu0 %v16246_v8  ;;  %v12646_v34 = vld [vmem:[#allocation3 + $0x184] ss:$36 sps:$4 sm:$0xff]  }
 0x436   : > { %v5329_v7 = vpop.f32.mrf.mxu0  ;;  %9204 = vmatprep.mubr.bf16.mxu1 %v12650_v46  ;;  %v12658_v20 = vld [vmem:[#allocation3 + $0x68] ss:$36 sps:$4 sm:$0xff]   ;;  %v12662_v46 = vld [vmem:[#allocation3 + $0xb0] ss:$36 sps:$4 sm:$0xff]  }
 0x437   : > { %5437 = vst [vmem:[%s14439_s27 + $0x290] sm:$0xff] %v5405_v56  ;;  %v5408_v37 = vmax.f32 %v5338_v1, 0.0  ;;  %v5330_v39 = vadd.f32 %v5329_v7, %v16050_v11  ;;  %v11418_v6 = vpop.f32.mrf.mxu1 }
 0x438   : > { %v16255_v14 = vadd.f32 %v11418_v6, %v11417_v61  ;;  %12034 = vmatpush3.bf16.msra.mxu0 %v16246_v8 }
 0x439   : > { %5440 = vst [vmem:[%s14439_s27 + $0x308] sm:$0xff] %v5408_v37  ;;  %v5406_v9 = vmax.f32 %v5330_v39, 0.0  ;;  %v11420_v16 = vpop.f32.mrf.mxu1  ;;  %v12652_v37 = vld [vmem:[#allocation3 + $0x1c8] ss:$36 sps:$4 sm:$0xff]  }
 0x43b   : > { %5438 = vst [vmem:[%s14439_s27 + $0x2b8] sm:$0xff] %v5406_v9  ;;  %v11421_v48 = vpop.f32.mrf.mxu1  ;;  %9278 = vmatmul.mubr.bf16.gmra.mxu0 %v12636_v5 }
 0x43c   : > { %v16259_v53 = vadd.f32 %v11421_v48, %v11420_v16  ;;  %9285 = vmatprep.mubr.bf16.mxu0 %v12646_v34  ;;  %v12661_v34 = vld [vmem:[#allocation3 + $0x214] ss:$36 sps:$4 sm:$0xff]  }
 0x43d   : > { %v11961_v11 = vpop.f32.mrf.mxu0  ;;  %9205 = vmatmul.mubr.bf16.gmra.mxu1 %v12648_v52 }
 0x43e   : > { %v5351_v12 = vadd.f32 %v11961_v11, %v16099_v58  ;;  %11987 = vmatprep.mubr.bf16.mxu1 %v12657_v55  ;;  %v12668_v11 = vld [vmem:[#allocation3 + $0x140] ss:$36 sps:$4 sm:$0xff]  }
 0x43f   : > { %v5342_v49 = vpop.f32.mrf.mxu0 }
 0x440   : > { %v5411_v38 = vmax.f32 %v5351_v12, 0.0  ;;  %v5343_v4 = vadd.f32 %v5342_v49, %v16077_v50 }
 0x441   : > { %v11962_v22 = vpop.f32.mrf.mxu0  ;;  %v11423_v54 = vpop.f32.mrf.mxu1 }
 0x442   : > { %5443 = vst [vmem:[%s14439_s27 + $0x380] sm:$0xff] %v5411_v38  ;;  %v5409_v35 = vmax.f32 %v5343_v4, 0.0  ;;  %v5354_v47 = vadd.f32 %v11962_v22, %v16106_v60  ;;  %v12666_v22 = vld [vmem:[#allocation3 + $0x25c] ss:$36 sps:$4 sm:$0xff]  }
 0x443   : > { %v5345_v27 = vpop.f32.mrf.mxu0  ;;  %9286 = vmatmul.mubr.bf16.gmra.mxu0 %v12644_v42  ;;  %v11424_v50 = vpop.f32.mrf.mxu1 }
 0x444   : > { %5441 = vst [vmem:[%s14439_s27 + $0x330] sm:$0xff] %v5409_v35  ;;  %v5412_v58 = vmax.f32 %v5354_v47, 0.0  ;;  %v5346_v36 = vadd.f32 %v5345_v27, %v16085_v30  ;;  %9293 = vmatprep.mubr.bf16.mxu0 %v12654_v15  ;;  %v16268_v1 = vadd.f32 %v11424_v50, %v11423_v54  ;;  %v12711_v30 = vld [vmem:[%s16769_s7 + $0x38] sm:$0xff]   ;;  %v12669_v47 = vld [vmem:[#allocation3 + $0x188] ss:$36 sps:$4 sm:$0xff]  }
 0x445   : > { %11988 = vmatmul.mubr.bf16.vlgmr.msra.gmra.mxu1 %v12658_v20  ;;  %v11426_v60 = vpop.f32.mrf.mxu1 }
 0x446   : > { %5444 = vst [vmem:[%s14439_s27 + $0x3a8] sm:$0xff] %v5412_v58  ;;  %v5410_v56 = vmax.f32 %v5346_v36, 0.0  ;;  %11991 = vmatprep.mubr.bf16.mxu1 %v12662_v46  ;;  %12075 = vmatpush3.bf16.msra.mxu1 %v12711_v30 }
 0x447   : > { %v11965_v7 = vpop.f32.mrf.mxu0  ;;  %v11427_v6 = vpop.f32.mrf.mxu1  ;;  %12068 = vmatprep.subr.bf16.mxu1 %v16179_v33 }
 0x448   : > { %5442 = vst [vmem:[%s14439_s27 + $0x358] sm:$0xff] %v5410_v56  ;;  %v5367_v61 = vadd.f32 %v11965_v7, %v16122_v21  ;;  %v16277_v16 = vadd.f32 %v11427_v6, %v11426_v60  ;;  %v12663_v21 = vld [vmem:[#allocation3 + $0xf8] ss:$36 sps:$4 sm:$0xff]  }
 0x449   : > { %v5358_v39 = vpop.f32.mrf.mxu0  ;;  %v12664_v56 = vld [vmem:[#allocation3 + $0x258] ss:$36 sps:$4 sm:$0xff]  }
 0x44a   : > { %v5415_v5 = vmax.f32 %v5367_v61, 0.0  ;;  %v5359_v9 = vadd.f32 %v5358_v39, %v16113_v23  ;;  %12076 = vmatpush3.bf16.msra.mxu1 %v16179_v33  ;;  %v12672_v61 = vld [vmem:[#allocation3 + $0x2a4] ss:$36 sps:$4 sm:$0xff]   ;;  %v12674_v39 = vld [vmem:[#allocation3 + $0x218] ss:$36 sps:$4 sm:$0xff]  }
 0x44b   : > { %v11966_v52 = vpop.f32.mrf.mxu0  ;;  %9294 = vmatmul.mubr.bf16.gmra.mxu0 %v12652_v37  ;;  %12069 = vmatprep.subr.bf16.mxu1 %v16189_v63 }
 0x44c   : > { %5447 = vst [vmem:[%s14439_s27 + $0x420] sm:$0xff] %v5415_v5  ;;  %v5413_v48 = vmax.f32 %v5359_v9, 0.0  ;;  %v5370_v55 = vadd.f32 %v11966_v52, %v16125_v57  ;;  %9301 = vmatprep.mubr.bf16.mxu0 %v12661_v34  ;;  %v11429_v38 = vpop.f32.mrf.mxu1  ;;  %v12659_v57 = vld [vmem:[#allocation3 + $0x210] ss:$36 sps:$4 sm:$0xff]   ;;  %v12679_v5 = vld [vmem:[#allocation3 + $0x260] ss:$36 sps:$4 sm:$0xff]  }
 0x44d   : > { %v5361_v12 = vpop.f32.mrf.mxu0  ;;  %11992 = vmatmul.mubr.bf16.gmra.mxu1 %v12663_v21  ;;  %v16306_v9 = vld [vmem:[#allocation12 + $0x1] ss:$0 sm:$0xff] }
 0x44e   : > { %5445 = vst [vmem:[%s14439_s27 + $0x3d0] sm:$0xff] %v5413_v48  ;;  %v5416_v23 = vmax.f32 %v5370_v55, 0.0  ;;  %v5362_v49 = vadd.f32 %v5361_v12, %v16117_v29  ;;  %v11430_v42 = vpop.f32.mrf.mxu1  ;;  %11995 = vmatprep.mubr.bf16.mxu1 %v12668_v11  ;;  %12077 = vmatpush3.bf16.msra.mxu1 %v16189_v63  ;;  %v12673_v29 = vld [vmem:[#allocation3 + $0x1d0] ss:$36 sps:$4 sm:$0xff]   ;;  %v12670_v11 = vld [vmem:[#allocation3 + $0x2a0] ss:$36 sps:$4 sm:$0xff]  }
 0x44f   : > { %v16287_v33 = vadd.f32 %v11430_v42, %v11429_v38  ;;  %12070 = vmatprep.subr.bf16.mxu1 %v16201_v32  ;;  %v12677_v38 = vld [vmem:[#allocation3 + $0x2ec] ss:$36 sps:$4 sm:$0xff]  }
 0x450   : > { %5448 = vst [vmem:[%s14439_s27 + $0x448] sm:$0xff] %v5416_v23  ;;  %v5414_v4 = vmax.f32 %v5362_v49, 0.0  ;;  %v11432_v35 = vpop.f32.mrf.mxu1 }
 0x452   : > { %5446 = vst [vmem:[%s14439_s27 + $0x3f8] sm:$0xff] %v5414_v4  ;;  %v11433_v15 = vpop.f32.mrf.mxu1  ;;  %12078 = vmatpush3.bf16.msra.mxu1 %v16201_v32 }
 0x453   : > { %v11969_v27 = vpop.f32.mrf.mxu0  ;;  %9302 = vmatmul.mubr.bf16.gmra.mxu0 %v12659_v57  ;;  %v16292_v54 = vadd.f32 %v11433_v15, %v11432_v35  ;;  %12071 = vmatprep.subr.bf16.mxu1 %v16213_v0  ;;  %v12680_v57 = vld [vmem:[#allocation3 + $0x2a8] ss:$36 sps:$4 sm:$0xff]   ;;  %v12684_v35 = vld [vmem:[#allocation3 + $0x2f0] ss:$36 sps:$4 sm:$0xff]  }
 0x454   : > { %v5383_v63 = vadd.f32 %v11969_v27, %v16142_v17  ;;  %9309 = vmatprep.mubr.bf16.mxu0 %v12666_v22  ;;  %v11435_v20 = vpop.f32.mrf.mxu1 }
 0x455   : > { %v5374_v58 = vpop.f32.mrf.mxu0  ;;  %11996 = vmatmul.mubr.bf16.gmra.mxu1 %v12669_v47 }
 0x456   : > { %v5419_v36 = vmax.f32 %v5383_v63, 0.0  ;;  %v5375_v46 = vadd.f32 %v5374_v58, %v16132_v62  ;;  %v11436_v50 = vpop.f32.mrf.mxu1  ;;  %11999 = vmatprep.mubr.bf16.mxu1 %v12673_v29  ;;  %12079 = vmatpush3.bf16.msra.mxu1 %v16213_v0 }
 0x457   : > { %v11970_v32 = vpop.f32.mrf.mxu0  ;;  %v16298_v7 = vadd.f32 %v11436_v50, %v11435_v20  ;;  %12072 = vmatprep.subr.bf16.mxu1 %v16224_v13  ;;  %v8773_v20 = vadd.f32 %v16135_v19, %v16306_v9 }
 0x458   : > { %5451 = vst [vmem:[%s14439_s27 + $0x4c0] sm:$0xff] %v5419_v36  ;;  %v5417_v17 = vmax.f32 %v5375_v46, 0.0  ;;  %v5386_v60 = vadd.f32 %v11970_v32, %v16149_v26  ;;  %v11438_v30 = vpop.f32.mrf.mxu1  ;;  %v12675_v36 = vld [vmem:[#allocation3 + $0x2e8] ss:$36 sps:$4 sm:$0xff]   ;;  %v12683_v32 = vld [vmem:[#allocation3 + $0x334] ss:$36 sps:$4 sm:$0xff]  }
 0x459   : > { %v5377_v37 = vpop.f32.mrf.mxu0 }
 0x45a   : > { %5449 = vst [vmem:[%s14439_s27 + $0x470] sm:$0xff] %v5417_v17  ;;  %v5420_v62 = vmax.f32 %v5386_v60, 0.0  ;;  %v5378_v6 = vadd.f32 %v5377_v37, %v16137_v25  ;;  %v11439_v0 = vpop.f32.mrf.mxu1  ;;  %12080 = vmatpush3.bf16.msra.mxu1 %v16224_v13  ;;  %v8765_v25 = vadd.f32 %v16127_v2, %v16306_v9  ;;  %v8768_v2 = vadd.f32 %v16130_v51, %v16306_v9  ;;  %v12685_v60 = vld [vmem:[#allocation3 + $0x338] ss:$36 sps:$4 sm:$0xff]   ;;  %v12690_v37 = vld [vmem:[#allocation3 + $0x380] ss:$36 sps:$4 sm:$0xff]  }
 0x45b   : > { %v11487_v34 = vpop.f32.mrf.mxu0  ;;  %9310 = vmatmul.mubr.bf16.gmra.mxu0 %v12664_v56  ;;  %v16308_v52 = vadd.f32 %v11439_v0, %v11438_v30  ;;  %12073 = vmatprep.subr.bf16.mxu1 %v16235_v44 }
 0x45c   : > { %5452 = vst [vmem:[%s14439_s27 + $0x4e8] sm:$0xff] %v5420_v62  ;;  %v5418_v26 = vmax.f32 %v5378_v6, 0.0  ;;  %9317 = vmatprep.mubr.bf16.mxu0 %v12672_v61  ;;  %v8776_v61 = vadd.f32 %v16140_v18, %v16306_v9  ;;  %v12681_v18 = vld [vmem:[#allocation3 + $0x330] ss:$36 sps:$4 sm:$0xff]  }
 0x45d   : > { %v11488_v21 = vpop.f32.mrf.mxu0  ;;  %v11441_v48 = vpop.f32.mrf.mxu1  ;;  %12000 = vmatmul.mubr.bf16.gmra.mxu1 %v12674_v39 }
 0x45e   : > { %5450 = vst [vmem:[%s14439_s27 + $0x498] sm:$0xff] %v5418_v26  ;;  %v11489_v55 = vadd.f32 %v11488_v21, %v11487_v34  ;;  %12003 = vmatprep.mubr.bf16.mxu1 %v12679_v5  ;;  %12081 = vmatpush3.bf16.msra.mxu1 %v16235_v44  ;;  %v8781_v34 = vadd.f32 %v16147_v43, %v16306_v9 }
 0x45f   : > { %v11490_v13 = vpop.f32.mrf.mxu0  ;;  %v11442_v12 = vpop.f32.mrf.mxu1  ;;  %12074 = vmatprep.subr.bf16.mxu1 %v16246_v8 }
 0x460   : > { %v16317_v23 = vadd.f32 %v11489_v55, %v8765_v25  ;;  %v16319_v49 = vadd.f32 %v11442_v12, %v11441_v48 }
 0x461   : > { %v11491_v4 = vpop.f32.mrf.mxu0  ;;  %v11444_v42 = vpop.f32.mrf.mxu1 }
 0x462   : > { %v11492_v22 = vadd.f32 %v11491_v4, %v11490_v13  ;;  %12082 = vmatpush3.bf16.msra.mxu1 %v16246_v8  ;;  %v12688_v13 = vld [vmem:[#allocation3 + $0x37c] ss:$36 sps:$4 sm:$0xff]   ;;  %v8784_v4 = vadd.f32 %v16155_v59, %v16306_v9 }
 0x463   : > { %v11493_v44 = vpop.f32.mrf.mxu0  ;;  %9318 = vmatmul.mubr.bf16.gmra.mxu0 %v12670_v11  ;;  %v11445_v47 = vpop.f32.mrf.mxu1  ;;  %v12686_v59 = vld [vmem:[#allocation3 + $0x378] ss:$36 sps:$4 sm:$0xff]  }
 0x464   : > { %v16324_v15 = vadd.f32 %v11492_v22, %v8768_v2  ;;  %9325 = vmatprep.mubr.bf16.mxu0 %v12677_v38  ;;  %v16326_v29 = vadd.f32 %v11445_v47, %v11444_v42  ;;  %v12691_v38 = vld [vmem:[#allocation3 + $0x3c8] ss:$36 sps:$4 sm:$0xff]  }
 0x465   : > { %v11494_v27 = vpop.f32.mrf.mxu0  ;;  %v11447_v63 = vpop.f32.mrf.mxu1  ;;  %12004 = vmatmul.mubr.bf16.gmra.mxu1 %v12680_v57  ;;  %v12699_v57 = vld [vmem:[#allocation3 + $0x410] ss:$36 sps:$4 sm:$0xff]  }
 0x466   : > { %v11495_v58 = vadd.f32 %v11494_v27, %v11493_v44  ;;  %12007 = vmatprep.mubr.bf16.mxu1 %v12684_v35  ;;  %v8789_v27 = vadd.f32 %v16160_v28, %v16306_v9 }
 0x467   : > { %v11496_v51 = vpop.f32.mrf.mxu0  ;;  %v11448_v46 = vpop.f32.mrf.mxu1 }
 0x468   : > { %v16330_v8 = vadd.f32 %v11495_v58, %v8773_v20  ;;  %v16332_v50 = vadd.f32 %v11448_v46, %v11447_v63  ;;  %v12694_v46 = vld [vmem:[#allocation3 + $0x3c4] ss:$36 sps:$4 sm:$0xff]  }
 0x469   : > { %v11497_v56 = vpop.f32.mrf.mxu0  ;;  %v11450_v17 = vpop.f32.mrf.mxu1 }
 0x46a   : > { %v11498_v30 = vadd.f32 %v11497_v56, %v11496_v51 }
 0x46b   : > { %v11499_v39 = vpop.f32.mrf.mxu0  ;;  %9326 = vmatmul.mubr.bf16.gmra.mxu0 %v12675_v36  ;;  %v11451_v19 = vpop.f32.mrf.mxu1 }
 0x46c   : > { %v16336_v62 = vadd.f32 %v11498_v30, %v8776_v61  ;;  %9333 = vmatprep.mubr.bf16.mxu0 %v12683_v32  ;;  %v16338_v6 = vadd.f32 %v11451_v19, %v11450_v17  ;;  %v12700_v17 = vld [vmem:[#allocation3 + $0x458] ss:$36 sps:$4 sm:$0xff]  }
 0x46d   : > { %v11500_v0 = vpop.f32.mrf.mxu0  ;;  %v11453_v5 = vpop.f32.mrf.mxu1  ;;  %12008 = vmatmul.mubr.bf16.gmra.mxu1 %v12685_v60  ;;  %v8792_v60 = vadd.f32 %v16165_v41, %v16306_v9  ;;  %v12692_v41 = vld [vmem:[#allocation3 + $0x3c0] ss:$36 sps:$4 sm:$0xff]  }
 0x46e   : > { %v11501_v26 = vadd.f32 %v11500_v0, %v11499_v39  ;;  %12011 = vmatprep.mubr.bf16.mxu1 %v12690_v37 }
 0x46f   : > { %v11502_v21 = vpop.f32.mrf.mxu0  ;;  %v11454_v48 = vpop.f32.mrf.mxu1 }
 0x470   : > { %v16342_v25 = vadd.f32 %v11501_v26, %v8781_v34  ;;  %v16344_v55 = vadd.f32 %v11454_v48, %v11453_v5  ;;  %v8797_v5 = vadd.f32 %v16170_v45, %v16306_v9  ;;  %v12712_v26 = vld [vmem:[#allocation2 + $0x2a8] sm:$0xff] }
 0x471   : > { %v11503_v11 = vpop.f32.mrf.mxu0  ;;  %v11456_v12 = vpop.f32.mrf.mxu1 }
 0x472   : > { %v11504_v42 = vadd.f32 %v11503_v11, %v11502_v21  ;;  %v12697_v11 = vld [vmem:[#allocation3 + $0x40c] ss:$36 sps:$4 sm:$0xff]  }
 0x473   : > { %v11505_v2 = vpop.f32.mrf.mxu0  ;;  %9334 = vmatmul.mubr.bf16.gmra.mxu0 %v12681_v18  ;;  %v11457_v43 = vpop.f32.mrf.mxu1 }
 0x474   : > { %v16348_v22 = vadd.f32 %v11504_v42, %v8784_v4  ;;  %9341 = vmatprep.mubr.bf16.mxu0 %v12688_v13  ;;  %v16350_v35 = vadd.f32 %v11457_v43, %v11456_v12  ;;  %v8800_v4 = vadd.f32 %v16174_v31, %v16306_v9 }
 0x475   : > { %v11506_v44 = vpop.f32.mrf.mxu0  ;;  %v11459_v47 = vpop.f32.mrf.mxu1  ;;  %12012 = vmatmul.mubr.bf16.gmra.mxu1 %v12691_v38 }
 0x476   : > { %v11507_v63 = vadd.f32 %v11506_v44, %v11505_v2  ;;  %12015 = vmatprep.mubr.bf16.mxu1 %v12699_v57 }
 0x477   : > { %v11508_v20 = vpop.f32.mrf.mxu0  ;;  %v11460_v58 = vpop.f32.mrf.mxu1 }
 0x478   : > { %v16354_v51 = vadd.f32 %v11507_v63, %v8789_v27  ;;  %v16356_v36 = vadd.f32 %v11460_v58, %v11459_v47  ;;  %v12713_v27 = vld [vmem:[#allocation2 + $0x2c0] sm:$0xff]  ;;  %v8805_v63 = vadd.f32 %v16193_v40, %v16306_v9  ;;  %v12695_v58 = vld [vmem:[#allocation3 + $0x408] ss:$36 sps:$4 sm:$0xff]  }
 0x479   : > { %v11509_v32 = vpop.f32.mrf.mxu0  ;;  %v11462_v56 = vpop.f32.mrf.mxu1 }
 0x47a   : > { %v11510_v61 = vadd.f32 %v11509_v32, %v11508_v20 }
 0x47b   : > { %v11511_v30 = vpop.f32.mrf.mxu0  ;;  %9342 = vmatmul.mubr.bf16.gmra.mxu0 %v12686_v59  ;;  %v11463_v28 = vpop.f32.mrf.mxu1  ;;  %v12714_v59 = vld [vmem:[#allocation2 + $0x2d8] sm:$0xff] }
 0x47c   : > { %v16360_v37 = vadd.f32 %v11510_v61, %v8792_v60  ;;  %9349 = vmatprep.mubr.bf16.mxu0 %v12694_v46  ;;  %v16362_v39 = vadd.f32 %v11463_v28, %v11462_v56 }
 0x47d   : > { %v11512_v19 = vpop.f32.mrf.mxu0  ;;  %v11465_v0 = vpop.f32.mrf.mxu1  ;;  %12016 = vmatmul.mubr.bf16.gmra.mxu1 %v12700_v17  ;;  %v12703_v17 = vld [vmem:[#allocation3 + $0x454] ss:$36 sps:$4 sm:$0xff]  }
 0x47e   : > { %v11513_v34 = vadd.f32 %v11512_v19, %v11511_v30  ;;  %12059 = vmatprep.mubr.bf16.mxu1 %v12712_v26  ;;  %v8808_v30 = vadd.f32 %v16205_v10, %v16306_v9 }
 0x47f   : > { %v11514_v21 = vpop.f32.mrf.mxu0  ;;  %v11466_v18 = vpop.f32.mrf.mxu1 }
 0x480   : > { %v16366_v48 = vadd.f32 %v11513_v34, %v8797_v5  ;;  %v16368_v13 = vadd.f32 %v11466_v18, %v11465_v0  ;;  %v8813_v18 = vadd.f32 %v16228_v3, %v16306_v9 }
 0x481   : > { %v11515_v12 = vpop.f32.mrf.mxu0  ;;  %v11468_v38 = vpop.f32.mrf.mxu1 }
 0x482   : > { %v11516_v42 = vadd.f32 %v11515_v12, %v11514_v21  ;;  %v12701_v12 = vld [vmem:[#allocation3 + $0x450] ss:$36 sps:$4 sm:$0xff]  }
 0x483   : > { %v11517_v57 = vpop.f32.mrf.mxu0  ;;  %9350 = vmatmul.mubr.bf16.gmra.mxu0 %v12692_v41  ;;  %v11469_v45 = vpop.f32.mrf.mxu1  ;;  %v12715_v41 = vld [vmem:[#allocation2 + $0x2f0] sm:$0xff] }
 0x484   : > { %v16372_v2 = vadd.f32 %v11516_v42, %v8800_v4  ;;  %9357 = vmatprep.mubr.bf16.mxu0 %v12697_v11  ;;  %v16374_v43 = vadd.f32 %v11469_v45, %v11468_v38 }
 0x485   : > { %v11518_v44 = vpop.f32.mrf.mxu0  ;;  %v11599_v47 = vpop.f32.mrf.mxu1  ;;  %12060 = vmatmul.mubr.bf16.vlgmr.msra.gmra.mxu1 %v12713_v27 }
 0x486   : > { %v11519_v20 = vadd.f32 %v11518_v44, %v11517_v57  ;;  %12063 = vmatprep.mubr.bf16.mxu1 %v12714_v59  ;;  %v8816_v44 = vadd.f32 %v16238_v24, %v16306_v9 }
 0x487   : > { %v11520_v31 = vpop.f32.mrf.mxu0  ;;  %v11600_v46 = vpop.f32.mrf.mxu1 }
 0x488   : > { %v16378_v32 = vadd.f32 %v11519_v20, %v8805_v63  ;;  %v11601_v56 = vadd.f32 %v11600_v46, %v11599_v47  ;;  %v12716_v20 = vld [vmem:[#allocation2 + $0x188] sm:$0xff]  ;;  %v8821_v46 = vadd.f32 %v16255_v14, %v16306_v9  ;;  %v12717_v14 = vld [vmem:[#allocation2 + $0x1a0] sm:$0xff] }
 0x489   : > { %v11521_v60 = vpop.f32.mrf.mxu0  ;;  %v11602_v61 = vpop.f32.mrf.mxu1 }
 0x48a   : > { %v11522_v28 = vadd.f32 %v11521_v60, %v11520_v31  ;;  %v16383_v19 = vadd.f32 %v11601_v56, %v16317_v23 }
 0x48b   : > { %v11523_v40 = vpop.f32.mrf.mxu0  ;;  %9358 = vmatmul.mubr.bf16.gmra.mxu0 %v12695_v58  ;;  %v11603_v0 = vpop.f32.mrf.mxu1 }
 0x48c   : > { %v16385_v5 = vadd.f32 %v11522_v28, %v8808_v30  ;;  %9365 = vmatprep.mubr.bf16.mxu0 %v12703_v17  ;;  %v11604_v34 = vadd.f32 %v11603_v0, %v11602_v61 }
 0x48d   : > { %v11524_v26 = vpop.f32.mrf.mxu0  ;;  %v11605_v21 = vpop.f32.mrf.mxu1  ;;  %12064 = vmatmul.mubr.bf16.gmra.mxu1 %v12715_v41  ;;  %v12718_v41 = vld [vmem:[#allocation2 + $0x1b8] sm:$0xff] }
 0x48e   : > { %v11525_v11 = vadd.f32 %v11524_v26, %v11523_v40  ;;  %v16390_v10 = vadd.f32 %v11604_v34, %v16324_v15  ;;  %v8824_v40 = vadd.f32 %v16259_v53, %v16306_v9 }
 0x48f   : > { %v11526_v23 = vpop.f32.mrf.mxu0  ;;  %v11606_v38 = vpop.f32.mrf.mxu1 }
 0x490   : > { %v16392_v4 = vadd.f32 %v11525_v11, %v8813_v18  ;;  %v11607_v42 = vadd.f32 %v11606_v38, %v11605_v21 }
 0x491   : > { %v11527_v57 = vpop.f32.mrf.mxu0  ;;  %v11608_v45 = vpop.f32.mrf.mxu1 }
 0x492   : > { %v11528_v47 = vadd.f32 %v11527_v57, %v11526_v23  ;;  %v16397_v27 = vadd.f32 %v11607_v42, %v16330_v8 }
 0x493   : > { %v11529_v3 = vpop.f32.mrf.mxu0  ;;  %9366 = vmatmul.mubr.bf16.gmra.mxu0 %v12701_v12  ;;  %v11609_v63 = vpop.f32.mrf.mxu1  ;;  %v8829_v12 = vadd.f32 %v16268_v1, %v16306_v9  ;;  %v12719_v1 = vld [vmem:[#allocation2 + $0x1d0] sm:$0xff] }
 0x494   : > { %v16399_v15 = vadd.f32 %v11528_v47, %v8816_v44  ;;  %12035 = vmatprep.mubr.bf16.mxu0 %v12716_v20  ;;  %v11610_v59 = vadd.f32 %v11609_v63, %v11608_v45 }
 0x495   : > { %v11530_v31 = vpop.f32.mrf.mxu0  ;;  %v11611_v58 = vpop.f32.mrf.mxu1 }
 0x496   : > { %v11531_v56 = vadd.f32 %v11530_v31, %v11529_v3  ;;  %v16404_v24 = vadd.f32 %v11610_v59, %v16336_v62  ;;  %v8832_v3 = vadd.f32 %v16277_v16, %v16306_v9 }
 0x497   : > { %v11532_v17 = vpop.f32.mrf.mxu0  ;;  %v11612_v8 = vpop.f32.mrf.mxu1 }
 0x498   : > { %v16406_v60 = vadd.f32 %v11531_v56, %v8821_v46  ;;  %v11613_v61 = vadd.f32 %v11612_v8, %v11611_v58  ;;  %v12720_v58 = vld [vmem:[#allocation2 + $0x1e8] sm:$0xff]  ;;  %v8837_v8 = vadd.f32 %v16287_v33, %v16306_v9  ;;  %v12721_v33 = vld [vmem:[#allocation2 + $0x200] sm:$0xff] }
 0x499   : > { %v11533_v30 = vpop.f32.mrf.mxu0  ;;  %v11614_v28 = vpop.f32.mrf.mxu1 }
 0x49a   : > { %v11534_v0 = vadd.f32 %v11533_v30, %v11532_v17  ;;  %v16411_v34 = vadd.f32 %v11613_v61, %v16342_v25 }
 0x49b   : > { %v11535_v26 = vpop.f32.mrf.mxu0  ;;  %12036 = vmatmul.mubr.bf16.vlgmr.msra.gmra.mxu0 %v12717_v14  ;;  %v11615_v21 = vpop.f32.mrf.mxu1  ;;  %v8840_v14 = vadd.f32 %v16292_v54, %v16306_v9 }
 0x49c   : > { %v16413_v62 = vadd.f32 %v11534_v0, %v8824_v40  ;;  %12039 = vmatprep.mubr.bf16.mxu0 %v12718_v41  ;;  %v11616_v18 = vadd.f32 %v11615_v21, %v11614_v28 }
 0x49d   : > { %v11536_v11 = vpop.f32.mrf.mxu0  ;;  %v11617_v23 = vpop.f32.mrf.mxu1 }
 0x49e   : > { %v11537_v38 = vadd.f32 %v11536_v11, %v11535_v26  ;;  %v16418_v53 = vadd.f32 %v11616_v18, %v16348_v22 }
 0x49f   : > { %v11538_v25 = vpop.f32.mrf.mxu0  ;;  %v11618_v42 = vpop.f32.mrf.mxu1 }
 0x4a0   : > { %v16420_v57 = vadd.f32 %v11537_v38, %v8829_v12  ;;  %v11619_v45 = vadd.f32 %v11618_v42, %v11617_v23  ;;  %v12722_v23 = vld [vmem:[#allocation2 + $0x218] sm:$0xff]  ;;  %v8845_v42 = vadd.f32 %v16298_v7, %v16306_v9  ;;  %v12723_v7 = vld [vmem:[#allocation2 + $0x230] sm:$0xff] }
 0x4a1   : > { %v11539_v44 = vpop.f32.mrf.mxu0  ;;  %v11620_v47 = vpop.f32.mrf.mxu1 }
 0x4a2   : > { %v11540_v63 = vadd.f32 %v11539_v44, %v11538_v25  ;;  %v16425_v20 = vadd.f32 %v11619_v45, %v16354_v51 }
 0x4a3   : > { %v11541_v59 = vpop.f32.mrf.mxu0  ;;  %12040 = vmatmul.mubr.bf16.gmra.mxu0 %v12719_v1  ;;  %v11621_v31 = vpop.f32.mrf.mxu1  ;;  %v8848_v1 = vadd.f32 %v16308_v52, %v16306_v9 }
 0x4a4   : > { %v16427_v22 = vadd.f32 %v11540_v63, %v8832_v3  ;;  %12043 = vmatprep.mubr.bf16.mxu0 %v12720_v58  ;;  %v11622_v46 = vadd.f32 %v11621_v31, %v11620_v47 }
 0x4a5   : > { %v11542_v56 = vpop.f32.mrf.mxu0  ;;  %v11623_v17 = vpop.f32.mrf.mxu1 }
 0x4a6   : > { %v11543_v61 = vadd.f32 %v11542_v56, %v11541_v59  ;;  %v16432_v16 = vadd.f32 %v11622_v46, %v16360_v37 }
 0x4a7   : > { %v11544_v51 = vpop.f32.mrf.mxu0  ;;  %v11624_v30 = vpop.f32.mrf.mxu1 }
 0x4a8   : > { %v16434_v28 = vadd.f32 %v11543_v61, %v8837_v8  ;;  %v11625_v40 = vadd.f32 %v11624_v30, %v11623_v17  ;;  %v12724_v17 = vld [vmem:[#allocation2 + $0x248] sm:$0xff]  ;;  %v8853_v30 = vadd.f32 %v16319_v49, %v16306_v9  ;;  %v12725_v49 = vld [vmem:[#allocation2 + $0x260] sm:$0xff] }
 0x4a9   : > { %v11545_v0 = vpop.f32.mrf.mxu0  ;;  %v11626_v26 = vpop.f32.mrf.mxu1 }
 0x4aa   : > { %v11546_v21 = vadd.f32 %v11545_v0, %v11544_v51  ;;  %v16439_v41 = vadd.f32 %v11625_v40, %v16366_v48 }
 0x4ab   : > { %v11547_v18 = vpop.f32.mrf.mxu0  ;;  %12044 = vmatmul.mubr.bf16.gmra.mxu0 %v12721_v33  ;;  %v11627_v11 = vpop.f32.mrf.mxu1  ;;  %v8856_v33 = vadd.f32 %v16326_v29, %v16306_v9 }
 0x4ac   : > { %v16441_v37 = vadd.f32 %v11546_v21, %v8840_v14  ;;  %12047 = vmatprep.mubr.bf16.mxu0 %v12722_v23  ;;  %v11628_v12 = vadd.f32 %v11627_v11, %v11626_v26 }
 0x4ad   : > { %v11548_v38 = vpop.f32.mrf.mxu0  ;;  %v11629_v25 = vpop.f32.mrf.mxu1 }
 0x4ae   : > { %v11549_v45 = vadd.f32 %v11548_v38, %v11547_v18  ;;  %v16446_v54 = vadd.f32 %v11628_v12, %v16372_v2 }
 0x4af   : > { %v11550_v48 = vpop.f32.mrf.mxu0  ;;  %v11630_v44 = vpop.f32.mrf.mxu1 }
 0x4b0   : > { %v16448_v47 = vadd.f32 %v11549_v45, %v8845_v42  ;;  %v11631_v3 = vadd.f32 %v11630_v44, %v11629_v25  ;;  %v12726_v25 = vld [vmem:[#allocation2 + $0x278] sm:$0xff]  ;;  %v8861_v44 = vadd.f32 %v16332_v50, %v16306_v9  ;;  %v12727_v50 = vld [vmem:[#allocation2 + $0x290] sm:$0xff] }
 0x4b1   : > { %v11551_v63 = vpop.f32.mrf.mxu0  ;;  %v11632_v59 = vpop.f32.mrf.mxu1 }
 0x4b2   : > { %v11552_v31 = vadd.f32 %v11551_v63, %v11550_v48  ;;  %v16453_v58 = vadd.f32 %v11631_v3, %v16378_v32 }
 0x4b3   : > { %v11553_v46 = vpop.f32.mrf.mxu0  ;;  %12048 = vmatmul.mubr.bf16.gmra.mxu0 %v12723_v7  ;;  %v11633_v56 = vpop.f32.mrf.mxu1  ;;  %v8864_v7 = vadd.f32 %v16338_v6, %v16306_v9 }
 0x4b4   : > { %v16455_v2 = vadd.f32 %v11552_v31, %v8848_v1  ;;  %12051 = vmatprep.mubr.bf16.mxu0 %v12724_v17  ;;  %v11634_v8 = vadd.f32 %v11633_v56, %v11632_v59 }
 0x4b5   : > { %v11554_v61 = vpop.f32.mrf.mxu0  ;;  %v11635_v51 = vpop.f32.mrf.mxu1 }
 0x4b6   : > { %v11555_v40 = vadd.f32 %v11554_v61, %v11553_v46  ;;  %v16460_v52 = vadd.f32 %v11634_v8, %v16385_v5 }
 0x4b7   : > { %v11556_v32 = vpop.f32.mrf.mxu0  ;;  %v11636_v0 = vpop.f32.mrf.mxu1 }
 0x4b8   : > { %v16462_v26 = vadd.f32 %v11555_v40, %v8853_v30  ;;  %v11637_v14 = vadd.f32 %v11636_v0, %v11635_v51 }
 0x4b9   : > { %v11557_v21 = vpop.f32.mrf.mxu0  ;;  %v11638_v18 = vpop.f32.mrf.mxu1 }
 0x4ba   : > { %v11558_v11 = vadd.f32 %v11557_v21, %v11556_v32  ;;  %v16467_v23 = vadd.f32 %v11637_v14, %v16392_v4  ;;  %v8869_v32 = vadd.f32 %v16344_v55, %v16306_v9 }
 0x4bb   : > { %v11559_v12 = vpop.f32.mrf.mxu0  ;;  %12052 = vmatmul.mubr.bf16.gmra.mxu0 %v12725_v49  ;;  %v11639_v38 = vpop.f32.mrf.mxu1 }
 0x4bc   : > { %v16469_v5 = vadd.f32 %v11558_v11, %v8856_v33  ;;  %12055 = vmatprep.mubr.bf16.mxu0 %v12726_v25  ;;  %v11640_v42 = vadd.f32 %v11639_v38, %v11638_v18 }
 0x4bd   : > { %v11560_v45 = vpop.f32.mrf.mxu0  ;;  %v11641_v48 = vpop.f32.mrf.mxu1 }
 0x4be   : > { %v11561_v3 = vadd.f32 %v11560_v45, %v11559_v12  ;;  %v16474_v29 = vadd.f32 %v11640_v42, %v16399_v15  ;;  %v8872_v12 = vadd.f32 %v16350_v35, %v16306_v9 }
 0x4bf   : > { %v11562_v4 = vpop.f32.mrf.mxu0  ;;  %v11642_v63 = vpop.f32.mrf.mxu1 }
 0x4c0   : > { %v16476_v59 = vadd.f32 %v11561_v3, %v8861_v44  ;;  %v11643_v1 = vadd.f32 %v11642_v63, %v11641_v48  ;;  %v8877_v44 = vadd.f32 %v16356_v36, %v16306_v9 }
 0x4c1   : > { %v11563_v31 = vpop.f32.mrf.mxu0  ;;  %v11644_v46 = vpop.f32.mrf.mxu1 }
 0x4c2   : > { %v11564_v56 = vadd.f32 %v11563_v31, %v11562_v4  ;;  %v16481_v17 = vadd.f32 %v11643_v1, %v16406_v60 }
 0x4c3   : > { %v11565_v8 = vpop.f32.mrf.mxu0  ;;  %12056 = vmatmul.mubr.bf16.gmra.mxu0 %v12727_v50  ;;  %v11645_v61 = vpop.f32.mrf.mxu1 }
 0x4c4   : > { %v16483_v15 = vadd.f32 %v11564_v56, %v8864_v7  ;;  %v11646_v51 = vadd.f32 %v11645_v61, %v11644_v46  ;;  %v8880_v7 = vadd.f32 %v16362_v39, %v16306_v9 }
 0x4c5   : > { %v11566_v30 = vpop.f32.mrf.mxu0  ;;  %v11647_v40 = vpop.f32.mrf.mxu1 }
 0x4c6   : > { %v11567_v0 = vadd.f32 %v11566_v30, %v11565_v8  ;;  %v16488_v14 = vadd.f32 %v11646_v51, %v16413_v62 }
 0x4c7   : > { %v11568_v6 = vpop.f32.mrf.mxu0  ;;  %v11648_v21 = vpop.f32.mrf.mxu1 }
 0x4c8   : > { %v16490_v60 = vadd.f32 %v11567_v0, %v8869_v32  ;;  %v11649_v18 = vadd.f32 %v11648_v21, %v11647_v40  ;;  %v8885_v40 = vadd.f32 %v16368_v13, %v16306_v9 }
 0x4c9   : > { %v11569_v33 = vpop.f32.mrf.mxu0  ;;  %v11650_v11 = vpop.f32.mrf.mxu1 }
 0x4ca   : > { %v11570_v49 = vadd.f32 %v11569_v33, %v11568_v6  ;;  %v16495_v38 = vadd.f32 %v11649_v18, %v16420_v57 }
 0x4cb   : > { %v11571_v25 = vpop.f32.mrf.mxu0  ;;  %v11651_v55 = vpop.f32.mrf.mxu1 }
 0x4cc   : > { %v16497_v42 = vadd.f32 %v11570_v49, %v8872_v12  ;;  %v11652_v62 = vadd.f32 %v11651_v55, %v11650_v11  ;;  %v8888_v11 = vadd.f32 %v16374_v43, %v16306_v9 }
 0x4cd   : > { %v11572_v45 = vpop.f32.mrf.mxu0  ;;  %v11653_v48 = vpop.f32.mrf.mxu1 }
 0x4ce   : > { %v11573_v3 = vadd.f32 %v11572_v45, %v11571_v25  ;;  %v16502_v4 = vadd.f32 %v11652_v62, %v16427_v22 }
 0x4cf   : > { %v11574_v63 = vpop.f32.mrf.mxu0  ;;  %v11654_v35 = vpop.f32.mrf.mxu1 }
 0x4d0   : > { %v16504_v1 = vadd.f32 %v11573_v3, %v8877_v44  ;;  %v11655_v57 = vadd.f32 %v11654_v35, %v11653_v48 }
 0x4d1   : > { %v11575_v31 = vpop.f32.mrf.mxu0  ;;  %v11656_v46 = vpop.f32.mrf.mxu1 }
 0x4d2   : > { %v11576_v56 = vadd.f32 %v11575_v31, %v11574_v63  ;;  %v16509_v8 = vadd.f32 %v11655_v57, %v16434_v28 }
 0x4d3   : > { %v11577_v50 = vpop.f32.mrf.mxu0  ;;  %v11657_v36 = vpop.f32.mrf.mxu1 }
 0x4d4   : > { %v16511_v61 = vadd.f32 %v11576_v56, %v8880_v7  ;;  %v11658_v22 = vadd.f32 %v11657_v36, %v11656_v46 }
 0x4d5   : > { %v11578_v51 = vpop.f32.mrf.mxu0  ;;  %v11659_v30 = vpop.f32.mrf.mxu1 }
 0x4d6   : > { %v11579_v32 = vadd.f32 %v11578_v51, %v11577_v50  ;;  %v16516_v0 = vadd.f32 %v11658_v22, %v16441_v37 }
 0x4d7   : > { %v11580_v6 = vpop.f32.mrf.mxu0  ;;  %v11660_v39 = vpop.f32.mrf.mxu1 }
 0x4d8   : > { %v16518_v21 = vadd.f32 %v11579_v32, %v8885_v40  ;;  %v11661_v28 = vadd.f32 %v11660_v39, %v11659_v30 }
 0x4d9   : > { %v11581_v18 = vpop.f32.mrf.mxu0  ;;  %v11662_v33 = vpop.f32.mrf.mxu1 }
 0x4da   : > { %v11582_v12 = vadd.f32 %v11581_v18, %v11580_v6  ;;  %v16523_v49 = vadd.f32 %v11661_v28, %v16448_v47 }
 0x4db   : > { %v11711_v25 = vpop.f32.mrf.mxu0  ;;  %v11663_v13 = vpop.f32.mrf.mxu1 }
 0x4dc   : > { %v16525_v55 = vadd.f32 %v11582_v12, %v8888_v11  ;;  %v11664_v37 = vadd.f32 %v11663_v13, %v11662_v33 }
 0x4dd   : > { %v11712_v62 = vpop.f32.mrf.mxu0  ;;  %v11665_v45 = vpop.f32.mrf.mxu1 }
 0x4de   : > { %v16528_v48 = vadd.f32 %v11664_v37, %v16455_v2 }
 0x4df   : > { %v16530_v44 = vpop.f32.mrf.mxu0  ;;  %v11666_v3 = vpop.f32.mrf.mxu1 }
 0x4e0   : > { %v11667_v63 = vadd.f32 %v11666_v3, %v11665_v45 }
 0x4e1   : > { %v11715_v35 = vpop.f32.mrf.mxu0  ;;  %v11668_v9 = vpop.f32.mrf.mxu1 }
 0x4e2   : > { %v16533_v43 = vadd.f32 %v11667_v63, %v16462_v26 }
 0x4e3   : > { %v11717_v47 = vpop.f32.mrf.mxu0  ;;  %v11669_v57 = vpop.f32.mrf.mxu1 }
 0x4e4   : > { %v11670_v31 = vadd.f32 %v11669_v57, %v11668_v9 }
 0x4e5   : > { %v11718_v46 = vpop.f32.mrf.mxu0  ;;  %v11671_v7 = vpop.f32.mrf.mxu1 }
 0x4e6   : > { %v16536_v56 = vadd.f32 %v11670_v31, %v16469_v5 }
 0x4e7   : > { %v11720_v50 = vpop.f32.mrf.mxu0  ;;  %v11672_v2 = vpop.f32.mrf.mxu1 }
 0x4e8   : > { %v11673_v36 = vadd.f32 %v11672_v2, %v11671_v7 }
 0x4e9   : > { %v11721_v22 = vpop.f32.mrf.mxu0  ;;  %v11674_v51 = vpop.f32.mrf.mxu1 }
 0x4ea   : > { %v16539_v30 = vadd.f32 %v11673_v36, %v16476_v59 }
 0x4eb   : > { %v11723_v40 = vpop.f32.mrf.mxu0  ;;  %v11675_v32 = vpop.f32.mrf.mxu1 }
 0x4ec   : > { %v11676_v26 = vadd.f32 %v11675_v32, %v11674_v51 }
 0x4ed   : > { %v11724_v6 = vpop.f32.mrf.mxu0  ;;  %v11677_v39 = vpop.f32.mrf.mxu1 }
 0x4ee   : > { %v16542_v28 = vadd.f32 %v11676_v26, %v16483_v15 }
 0x4ef   : > { %v16544_v18 = vpop.f32.mrf.mxu0  ;;  %v11678_v5 = vpop.f32.mrf.mxu1 }
 0x4f0   : > { %v11679_v33 = vadd.f32 %v11678_v5, %v11677_v39 }
 0x4f1   : > { %v11727_v11 = vpop.f32.mrf.mxu0  ;;  %v11680_v12 = vpop.f32.mrf.mxu1 }
 0x4f2   : > { %v16547_v13 = vadd.f32 %v11679_v33, %v16490_v60 }
 0x4f3   : > { %v11729_v37 = vpop.f32.mrf.mxu0  ;;  %v11681_v59 = vpop.f32.mrf.mxu1 }
 0x4f4   : > { %v11682_v45 = vadd.f32 %v11681_v59, %v11680_v12  ;;  %v11719_v12 = vadd.f32 %v11718_v46, %v11717_v47 }
 0x4f5   : > { %v11730_v3 = vpop.f32.mrf.mxu0  ;;  %v11683_v63 = vpop.f32.mrf.mxu1 }
 0x4f6   : > { %v16550_v9 = vadd.f32 %v11682_v45, %v16497_v42 }
 0x4f7   : > { %v11732_v57 = vpop.f32.mrf.mxu0  ;;  %v11684_v15 = vpop.f32.mrf.mxu1 }
 0x4f8   : > { %16953 = vst [vmem:[#allocation45_spill] sm:$0xff] %v16550_v9  ;;  %v11685_v31 = vadd.f32 %v11684_v15, %v11683_v63  ;;  %v11713_v15 = vadd.f32 %v11712_v62, %v11711_v25  ;;  %v9256_v9 = vadd.f32 %v11719_v12, %v16397_v27  ;;  %v11725_v12 = vadd.f32 %v11724_v6, %v11723_v40 }
 0x4f9   : > { %v11733_v7 = vpop.f32.mrf.mxu0  ;;  %v11686_v2 = vpop.f32.mrf.mxu1 }
 0x4fa   : > { %v16553_v36 = vadd.f32 %v11685_v31, %v16504_v1  ;;  %v9248_v25 = vadd.f32 %v11713_v15, %v16383_v19  ;;  %v11734_v19 = vadd.f32 %v11733_v7, %v11732_v57 }
 0x4fb   : > { %v11735_v51 = vpop.f32.mrf.mxu0  ;;  %v11687_v32 = vpop.f32.mrf.mxu1 }
 0x4fc   : > { %16954 = vst [vmem:[#allocation46_spill] sm:$0xff] %v16553_v36  ;;  %v11688_v60 = vadd.f32 %v11687_v32, %v11686_v2  ;;  %v11722_v2 = vadd.f32 %v11721_v22, %v11720_v50 }
 0x4fd   : > { %v11736_v26 = vpop.f32.mrf.mxu0  ;;  %v11689_v39 = vpop.f32.mrf.mxu1 }
 0x4fe   : > { %v16556_v5 = vadd.f32 %v11688_v60, %v16511_v61  ;;  %v9259_v22 = vadd.f32 %v11722_v2, %v16404_v24  ;;  %v11728_v2 = vadd.f32 %v11727_v11, %v16544_v18 }
 0x4ff   : > { %v16558_v33 = vpop.f32.mrf.mxu0  ;;  %v11690_v42 = vpop.f32.mrf.mxu1 }
 0x500   : > { %16955 = vst [vmem:[#allocation47_spill] sm:$0xff] %v16556_v5  ;;  %v11691_v59 = vadd.f32 %v11690_v42, %v11689_v39  ;;  %v11716_v5 = vadd.f32 %v11715_v35, %v16530_v44  ;;  %v11731_v39 = vadd.f32 %v11730_v3, %v11729_v37 }
 0x501   : > { %v16560_v45 = vpop.f32.mrf.mxu0  ;;  %v11692_v63 = vpop.f32.mrf.mxu1 }
 0x502   : > { %v16563_v1 = vadd.f32 %v11691_v59, %v16518_v21  ;;  %v9272_v3 = vadd.f32 %v11731_v39, %v16425_v20  ;;  %v9267_v39 = vadd.f32 %v11728_v2, %v16418_v53 }
 0x503   : > { %v11741_v31 = vpop.f32.mrf.mxu0  ;;  %v11693_v36 = vpop.f32.mrf.mxu1 }
 0x504   : > { %v11694_v32 = vadd.f32 %v11693_v36, %v11692_v63 }
 0x505   : > { %v11742_v61 = vpop.f32.mrf.mxu0  ;;  %v11989_v60 = vpop.f32.mrf.mxu1 }
 0x506   : > { %v16568_v47 = vadd.f32 %v11694_v32, %v16525_v55  ;;  %v9417_v46 = vadd.f32 %v11989_v60, %v9256_v9  ;;  %v9251_v55 = vadd.f32 %v11716_v5, %v16390_v10  ;;  %v9264_v32 = vadd.f32 %v11725_v12, %v16411_v34 }
 0x507   : > { %v11744_v62 = vpop.f32.mrf.mxu0  ;;  %v9408_v21 = vpop.f32.mrf.mxu1  ;;  %v11743_v60 = vadd.f32 %v11742_v61, %v11741_v31 }
 0x508   : > { %v9537_v42 = vmax.f32 %v9417_v46, 0.0  ;;  %v9409_v50 = vadd.f32 %v9408_v21, %v9248_v25  ;;  %v9275_v46 = vadd.f32 %v11734_v19, %v16432_v16  ;;  %v11737_v21 = vadd.f32 %v11736_v26, %v11735_v51 }
 0x509   : > { %v11745_v27 = vpop.f32.mrf.mxu0  ;;  %v11990_v36 = vpop.f32.mrf.mxu1  ;;  %v11740_v51 = vadd.f32 %v16560_v45, %v16558_v33 }
 0x50a   : > { %9569 = vst [vmem:[%s14439_s27 + $0x68] sm:$0xff] %v9537_v42  ;;  %v9535_v44 = vmax.f32 %v9409_v50, 0.0  ;;  %v9420_v35 = vadd.f32 %v11990_v36, %v9259_v22  ;;  %v11746_v50 = vadd.f32 %v11745_v27, %v11744_v62  ;;  %v9288_v22 = vadd.f32 %v11743_v60, %v16453_v58 }
 0x50b   : > { %v11747_v9 = vpop.f32.mrf.mxu0  ;;  %v9411_v59 = vpop.f32.mrf.mxu1  ;;  %v9280_v53 = vadd.f32 %v11737_v21, %v16439_v41 }
 0x50c   : > { %9567 = vst [vmem:[%s14439_s27 + $0x18] sm:$0xff] %v9535_v44  ;;  %v9538_v63 = vmax.f32 %v9420_v35, 0.0  ;;  %v9412_v37 = vadd.f32 %v9411_v59, %v9251_v55  ;;  %v9291_v58 = vadd.f32 %v11746_v50, %v16460_v52 }
 0x50d   : > { %v11748_v15 = vpop.f32.mrf.mxu0  ;;  %v11993_v24 = vpop.f32.mrf.mxu1 }
 0x50e   : > { %9570 = vst [vmem:[%s14439_s27 + $0x90] sm:$0xff] %v9538_v63  ;;  %v9536_v40 = vmax.f32 %v9412_v37, 0.0  ;;  %v9433_v6 = vadd.f32 %v11993_v24, %v9272_v3  ;;  %v11749_v63 = vadd.f32 %v11748_v15, %v11747_v9  ;;  %v9283_v37 = vadd.f32 %v11740_v51, %v16446_v54 }
 0x50f   : > { %v11750_v10 = vpop.f32.mrf.mxu0  ;;  %v9424_v5 = vpop.f32.mrf.mxu1 }
 0x510   : > { %9568 = vst [vmem:[%s14439_s27 + $0x40] sm:$0xff] %v9536_v40  ;;  %v9541_v57 = vmax.f32 %v9433_v6, 0.0  ;;  %v9425_v7 = vadd.f32 %v9424_v5, %v9264_v32  ;;  %v9296_v60 = vadd.f32 %v11749_v63, %v16467_v23 }
 0x511   : > { %v11751_v20 = vpop.f32.mrf.mxu0  ;;  %v11994_v25 = vpop.f32.mrf.mxu1 }
 0x512   : > { %9573 = vst [vmem:[%s14439_s27 + $0x108] sm:$0xff] %v9541_v57  ;;  %v9539_v18 = vmax.f32 %v9425_v7, 0.0  ;;  %v9436_v11 = vadd.f32 %v11994_v25, %v9275_v46  ;;  %v11752_v5 = vadd.f32 %v11751_v20, %v11750_v10 }
 0x513   : > { %v11753_v42 = vpop.f32.mrf.mxu0  ;;  %v9427_v34 = vpop.f32.mrf.mxu1 }
 0x514   : > { %9571 = vst [vmem:[%s14439_s27 + $0xb8] sm:$0xff] %v9539_v18  ;;  %v9542_v31 = vmax.f32 %v9436_v11, 0.0  ;;  %v9428_v61 = vadd.f32 %v9427_v34, %v9267_v39  ;;  %v9299_v20 = vadd.f32 %v11752_v5, %v16474_v29 }
 0x515   : > { %v11754_v36 = vpop.f32.mrf.mxu0  ;;  %v11997_v16 = vpop.f32.mrf.mxu1 }
 0x516   : > { %9574 = vst [vmem:[%s14439_s27 + $0x130] sm:$0xff] %v9542_v31  ;;  %v9540_v26 = vmax.f32 %v9428_v61, 0.0  ;;  %v9449_v12 = vadd.f32 %v11997_v16, %v9288_v22  ;;  %v11755_v62 = vadd.f32 %v11754_v36, %v11753_v42 }
 0x517   : > { %v11756_v44 = vpop.f32.mrf.mxu0  ;;  %v9440_v35 = vpop.f32.mrf.mxu1 }
 0x518   : > { %9572 = vst [vmem:[%s14439_s27 + $0xe0] sm:$0xff] %v9540_v26  ;;  %v9545_v27 = vmax.f32 %v9449_v12, 0.0  ;;  %v9441_v55 = vadd.f32 %v9440_v35, %v9280_v53  ;;  %v9304_v6 = vadd.f32 %v11755_v62, %v16481_v17 }
 0x519   : > { %v11757_v59 = vpop.f32.mrf.mxu0  ;;  %v11998_v19 = vpop.f32.mrf.mxu1 }
 0x51a   : > { %9577 = vst [vmem:[%s14439_s27 + $0x1a8] sm:$0xff] %v9545_v27  ;;  %v9543_v33 = vmax.f32 %v9441_v55, 0.0  ;;  %v9452_v45 = vadd.f32 %v11998_v19, %v9291_v58  ;;  %v11758_v24 = vadd.f32 %v11757_v59, %v11756_v44 }
 0x51b   : > { %v11759_v3 = vpop.f32.mrf.mxu0  ;;  %v9443_v41 = vpop.f32.mrf.mxu1 }
 0x51c   : > { %9575 = vst [vmem:[%s14439_s27 + $0x158] sm:$0xff] %v9543_v33  ;;  %v9546_v2 = vmax.f32 %v9452_v45, 0.0  ;;  %v9444_v40 = vadd.f32 %v9443_v41, %v9283_v37  ;;  %v9307_v25 = vadd.f32 %v11758_v24, %v16488_v14 }
 0x51d   : > { %v11760_v32 = vpop.f32.mrf.mxu0  ;;  %v12001_v52 = vpop.f32.mrf.mxu1 }
 0x51e   : > { %9578 = vst [vmem:[%s14439_s27 + $0x1d0] sm:$0xff] %v9546_v2  ;;  %v9544_v9 = vmax.f32 %v9444_v40, 0.0  ;;  %v9465_v15 = vadd.f32 %v12001_v52, %v9304_v6  ;;  %v11761_v18 = vadd.f32 %v11760_v32, %v11759_v3 }
 0x51f   : > { %v11762_v54 = vpop.f32.mrf.mxu0  ;;  %v9456_v57 = vpop.f32.mrf.mxu1 }
 0x520   : > { %9576 = vst [vmem:[%s14439_s27 + $0x180] sm:$0xff] %v9544_v9  ;;  %v9549_v7 = vmax.f32 %v9465_v15, 0.0  ;;  %v9457_v46 = vadd.f32 %v9456_v57, %v9296_v60  ;;  %v9312_v36 = vadd.f32 %v11761_v18, %v16495_v38 }
 0x521   : > { %v11763_v21 = vpop.f32.mrf.mxu0  ;;  %v12002_v17 = vpop.f32.mrf.mxu1 }
 0x522   : > { %9581 = vst [vmem:[%s14439_s27 + $0x248] sm:$0xff] %v9549_v7  ;;  %v9547_v11 = vmax.f32 %v9457_v46, 0.0  ;;  %v9468_v10 = vadd.f32 %v12002_v17, %v9307_v25  ;;  %v11764_v61 = vadd.f32 %v11763_v21, %v11762_v54 }
 0x523   : > { %v11765_v39 = vpop.f32.mrf.mxu0  ;;  %v9459_v23 = vpop.f32.mrf.mxu1 }
 0x524   : > { %9579 = vst [vmem:[%s14439_s27 + $0x1f8] sm:$0xff] %v9547_v11  ;;  %v9550_v42 = vmax.f32 %v9468_v10, 0.0  ;;  %v9460_v34 = vadd.f32 %v9459_v23, %v9299_v20  ;;  %v9315_v27 = vadd.f32 %v11764_v61, %v16502_v4 }
 0x525   : > { %v11766_v50 = vpop.f32.mrf.mxu0  ;;  %v12005_v31 = vpop.f32.mrf.mxu1 }
 0x526   : > { %v11767_v22 = vadd.f32 %v11766_v50, %v11765_v39  ;;  %9582 = vst [vmem:[%s14439_s27 + $0x270] sm:$0xff] %v9550_v42  ;;  %v9548_v14 = vmax.f32 %v9460_v34, 0.0 }
 0x527   : > { %v11768_v16 = vpop.f32.mrf.mxu0  ;;  %v9472_v51 = vpop.f32.mrf.mxu1 }
 0x528   : > { %9580 = vst [vmem:[%s14439_s27 + $0x220] sm:$0xff] %v9548_v14  ;;  %v9320_v26 = vadd.f32 %v11767_v22, %v16509_v8  ;;  %v9473_v29 = vadd.f32 %v9472_v51, %v9312_v36 }
 0x529   : > { %v11769_v12 = vpop.f32.mrf.mxu0  ;;  %v12006_v53 = vpop.f32.mrf.mxu1 }
 0x52a   : > { %v11770_v44 = vadd.f32 %v11769_v12, %v11768_v16  ;;  %v9481_v35 = vadd.f32 %v12005_v31, %v9320_v26  ;;  %v9551_v62 = vmax.f32 %v9473_v29, 0.0 }
 0x52b   : > { %v11771_v55 = vpop.f32.mrf.mxu0  ;;  %v9475_v58 = vpop.f32.mrf.mxu1 }
 0x52c   : > { %v9553_v59 = vmax.f32 %v9481_v35, 0.0  ;;  %9583 = vst [vmem:[%s14439_s27 + $0x298] sm:$0xff] %v9551_v62  ;;  %v9323_v38 = vadd.f32 %v11770_v44, %v16516_v0  ;;  %v9476_v19 = vadd.f32 %v9475_v58, %v9315_v27  ;;  %v16628_v44 = vld [vmem:[#allocation12 + $0x2] ss:$0 sm:$0xff] }
 0x52d   : > { %v11772_v63 = vpop.f32.mrf.mxu0  ;;  %v12009_v8 = vpop.f32.mrf.mxu1 }
 0x52e   : > { %v11773_v33 = vadd.f32 %v11772_v63, %v11771_v55  ;;  %9585 = vst [vmem:[%s14439_s27 + $0x2e8] sm:$0xff] %v9553_v59  ;;  %v9484_v45 = vadd.f32 %v12006_v53, %v9323_v38  ;;  %v9552_v37 = vmax.f32 %v9476_v19, 0.0 }
 0x52f   : > { %v11774_v3 = vpop.f32.mrf.mxu0  ;;  %v9488_v41 = vpop.f32.mrf.mxu1 }
 0x530   : > { %v9554_v24 = vmax.f32 %v9484_v45, 0.0  ;;  %9584 = vst [vmem:[%s14439_s27 + $0x2c0] sm:$0xff] %v9552_v37  ;;  %v9328_v4 = vadd.f32 %v11773_v33, %v16523_v49 }
 0x531   : > { %v11775_v2 = vpop.f32.mrf.mxu0  ;;  %v12010_v40 = vpop.f32.mrf.mxu1 }
 0x532   : > { %v11776_v6 = vadd.f32 %v11775_v2, %v11774_v3  ;;  %9586 = vst [vmem:[%s14439_s27 + $0x310] sm:$0xff] %v9554_v24  ;;  %v9489_v0 = vadd.f32 %v9488_v41, %v9328_v4 }
 0x533   : > { %v11777_v32 = vpop.f32.mrf.mxu0  ;;  %v9491_v52 = vpop.f32.mrf.mxu1 }
 0x534   : > { %v9555_v5 = vmax.f32 %v9489_v0, 0.0  ;;  %v9331_v9 = vadd.f32 %v11776_v6, %v16528_v48 }
 0x535   : > { %v11778_v15 = vpop.f32.mrf.mxu0  ;;  %v12013_v60 = vpop.f32.mrf.mxu1 }
 0x536   : > { %v11779_v54 = vadd.f32 %v11778_v15, %v11777_v32  ;;  %9587 = vst [vmem:[%s14439_s27 + $0x338] sm:$0xff] %v9555_v5  ;;  %v9492_v57 = vadd.f32 %v9491_v52, %v9331_v9 }
 0x537   : > { %v11780_v7 = vpop.f32.mrf.mxu0  ;;  %v9504_v46 = vpop.f32.mrf.mxu1 }
 0x538   : > { %v9336_v49 = vadd.f32 %v11779_v54, %v16533_v43  ;;  %v9556_v25 = vmax.f32 %v9492_v57, 0.0 }
 0x539   : > { %v11781_v21 = vpop.f32.mrf.mxu0  ;;  %v12014_v17 = vpop.f32.mrf.mxu1 }
 0x53a   : > { %v9497_v18 = vadd.f32 %v12009_v8, %v9336_v49  ;;  %v11782_v11 = vadd.f32 %v11781_v21, %v11780_v7  ;;  %9588 = vst [vmem:[%s14439_s27 + $0x360] sm:$0xff] %v9556_v25  ;;  %v16957_v7 = vld [vmem:[#allocation46_spill] sm:$0xff] }
 0x53b   : > { %v11783_v10 = vpop.f32.mrf.mxu0  ;;  %v9507_v20 = vpop.f32.mrf.mxu1 }
 0x53c   : > { %v9557_v48 = vmax.f32 %v9497_v18, 0.0  ;;  %v9339_v39 = vadd.f32 %v11782_v11, %v16536_v56 }
 0x53d   : > { %v11784_v23 = vpop.f32.mrf.mxu0  ;;  %v16618_v42 = vpop.f32.mrf.mxu1 }
 0x53e   : > { %9589 = vst [vmem:[%s14439_s27 + $0x388] sm:$0xff] %v9557_v48  ;;  %v9500_v34 = vadd.f32 %v12010_v40, %v9339_v39  ;;  %v11785_v50 = vadd.f32 %v11784_v23, %v11783_v10 }
 0x53f   : > { %v11786_v31 = vpop.f32.mrf.mxu0  ;;  %v9520_v43 = vpop.f32.mrf.mxu1 }
 0x540   : > { %v9558_v61 = vmax.f32 %v9500_v34, 0.0  ;;  %v9344_v22 = vadd.f32 %v11785_v50, %v16539_v30  ;;  %v16958_v34 = vld [vmem:[#allocation47_spill] sm:$0xff] }
 0x541   : > { %v11787_v14 = vpop.f32.mrf.mxu0  ;;  %v16622_v36 = vpop.f32.mrf.mxu1 }
 0x542   : > { %9590 = vst [vmem:[%s14439_s27 + $0x3b0] sm:$0xff] %v9558_v61  ;;  %v11788_v16 = vadd.f32 %v11787_v14, %v11786_v31  ;;  %v9505_v51 = vadd.f32 %v9504_v46, %v9344_v22 }
 0x543   : > { %v11789_v26 = vpop.f32.mrf.mxu0  ;;  %v16625_v56 = vpop.f32.mrf.mxu1 }
 0x544   : > { %v9559_v29 = vmax.f32 %v9505_v51, 0.0  ;;  %v9347_v12 = vadd.f32 %v11788_v16, %v16542_v28 }
 0x545   : > { %v11790_v53 = vpop.f32.mrf.mxu0  ;;  %v12061_v35 = vpop.f32.mrf.mxu1 }
 0x546   : > { %9591 = vst [vmem:[%s14439_s27 + $0x3d8] sm:$0xff] %v9559_v29  ;;  %v11791_v30 = vadd.f32 %v11790_v53, %v11789_v26  ;;  %v9508_v62 = vadd.f32 %v9507_v20, %v9347_v12  ;;  %v9810_v27 = vadd.f32 %v12061_v35, %v16628_v44 }
 0x547   : > { %v11792_v55 = vpop.f32.mrf.mxu0  ;;  %v9801_v58 = vpop.f32.mrf.mxu1 }
 0x548   : > { %v9352_v59 = vadd.f32 %v11791_v30, %v16547_v13  ;;  %v9560_v38 = vmax.f32 %v9508_v62, 0.0  ;;  %v9858_v19 = vmax.f32 %v9810_v27, 0.0  ;;  %v9802_v28 = vadd.f32 %v16628_v44, %v9801_v58  ;;  %v16956_v13 = vld [vmem:[#allocation45_spill] sm:$0xff] }
 0x549   : > { %v11793_v63 = vpop.f32.mrf.mxu0  ;;  %v12062_v8 = vpop.f32.mrf.mxu1 }
 0x54a   : > { %v9513_v33 = vadd.f32 %v12013_v60, %v9352_v59  ;;  %9592 = vst [vmem:[%s14439_s27 + $0x400] sm:$0xff] %v9560_v38  ;;  %v11794_v45 = vadd.f32 %v11793_v63, %v11792_v55  ;;  %9890 = vst [vmem:[%s14439_s27 + $0x430] sm:$0xff] %v9858_v19  ;;  %v9856_v37 = vmax.f32 %v9802_v28, 0.0  ;;  %v9813_v3 = vadd.f32 %v12062_v8, %v16628_v44 }
 0x54b   : > { %v11795_v41 = vpop.f32.mrf.mxu0  ;;  %v9804_v24 = vpop.f32.mrf.mxu1 }
 0x54c   : > { %v9561_v4 = vmax.f32 %v9513_v33, 0.0  ;;  %v9355_v2 = vadd.f32 %v11794_v45, %v16956_v13  ;;  %9888 = vst [vmem:[%s14439_s27 + $0x3e0] sm:$0xff] %v9856_v37  ;;  %v9859_v40 = vmax.f32 %v9813_v3, 0.0  ;;  %v9805_v6 = vadd.f32 %v16628_v44, %v9804_v24 }
 0x54d   : > { %v11796_v0 = vpop.f32.mrf.mxu0  ;;  %v12065_v32 = vpop.f32.mrf.mxu1 }
 0x54e   : > { %9593 = vst [vmem:[%s14439_s27 + $0x428] sm:$0xff] %v9561_v4  ;;  %v9516_v52 = vadd.f32 %v12014_v17, %v9355_v2  ;;  %v11797_v5 = vadd.f32 %v11796_v0, %v11795_v41  ;;  %9891 = vst [vmem:[%s14439_s27 + $0x458] sm:$0xff] %v9859_v40  ;;  %v9857_v9 = vmax.f32 %v9805_v6, 0.0  ;;  %v9826_v15 = vadd.f32 %v12065_v32, %v16628_v44 }
 0x54f   : > { %v11798_v60 = vpop.f32.mrf.mxu0  ;;  %v9817_v54 = vpop.f32.mrf.mxu1 }
 0x550   : > { %v9562_v57 = vmax.f32 %v9516_v52, 0.0  ;;  %v9360_v46 = vadd.f32 %v11797_v5, %v16957_v7  ;;  %9889 = vst [vmem:[%s14439_s27 + $0x408] sm:$0xff] %v9857_v9  ;;  %v9862_v49 = vmax.f32 %v9826_v15, 0.0  ;;  %v9818_v25 = vadd.f32 %v16628_v44, %v9817_v54 }
 0x551   : > { %v11799_v21 = vpop.f32.mrf.mxu0  ;;  %v12066_v18 = vpop.f32.mrf.mxu1 }
 0x552   : > { %9594 = vst [vmem:[%s14439_s27 + $0x450] sm:$0xff] %v9562_v57  ;;  %v11800_v17 = vadd.f32 %v11799_v21, %v11798_v60  ;;  %v9521_v11 = vadd.f32 %v9520_v43, %v9360_v46  ;;  %9894 = vst [vmem:[%s14439_s27 + $0x4d0] sm:$0xff] %v9862_v49  ;;  %v9860_v10 = vmax.f32 %v9818_v25, 0.0  ;;  %v9829_v20 = vadd.f32 %v12066_v18, %v16628_v44 }
 0x553   : > { %v11801_v48 = vpop.f32.mrf.mxu0  ;;  %v9820_v39 = vpop.f32.mrf.mxu1 }
 0x554   : > { %v9563_v23 = vmax.f32 %v9521_v11, 0.0  ;;  %v9363_v50 = vadd.f32 %v11800_v17, %v16958_v34  ;;  %9892 = vst [vmem:[%s14439_s27 + $0x480] sm:$0xff] %v9860_v10  ;;  %v9863_v31 = vmax.f32 %v9829_v20, 0.0  ;;  %v9821_v61 = vadd.f32 %v16628_v44, %v9820_v39 }
 0x555   : > { %v11802_v22 = vpop.f32.mrf.mxu0 }
 0x556   : > { %9595 = vst [vmem:[%s14439_s27 + $0x478] sm:$0xff] %v9563_v23  ;;  %v11803_v14 = vadd.f32 %v11802_v22, %v11801_v48  ;;  %v9524_v43 = vadd.f32 %v16625_v56, %v9363_v50  ;;  %9895 = vst [vmem:[%s14439_s27 + $0x4f8] sm:$0xff] %v9863_v31  ;;  %v9861_v16 = vmax.f32 %v9821_v61, 0.0 }
 0x557   : > { %v11804_v51 = vpop.f32.mrf.mxu0 }
 0x558   : > { %v9368_v26 = vadd.f32 %v11803_v14, %v16563_v1  ;;  %v9564_v29 = vmax.f32 %v9524_v43, 0.0  ;;  %9893 = vst [vmem:[%s14439_s27 + $0x4a8] sm:$0xff] %v9861_v16 }
 0x559   : > { %v11805_v12 = vpop.f32.mrf.mxu0 }
 0x55a   : > { %v9529_v53 = vadd.f32 %v16618_v42, %v9368_v26  ;;  %9596 = vst [vmem:[%s14439_s27 + $0x4a0] sm:$0xff] %v9564_v29  ;;  %v11806_v35 = vadd.f32 %v11805_v12, %v11804_v51 }
 0x55b   : > { %v12037_v30 = vpop.f32.mrf.mxu0 }
 0x55c   : > { %v9565_v62 = vmax.f32 %v9529_v53, 0.0  ;;  %v9371_v56 = vadd.f32 %v11806_v35, %v16568_v47  ;;  %v9714_v27 = vadd.f32 %v12037_v30, %v16628_v44 }
 0x55d   : > { %v9705_v55 = vpop.f32.mrf.mxu0 }
 0x55e   : > { %9597 = vst [vmem:[%s14439_s27 + $0x4c8] sm:$0xff] %v9565_v62  ;;  %v9532_v1 = vadd.f32 %v16622_v36, %v9371_v56  ;;  %v9834_v58 = vmax.f32 %v9714_v27, 0.0  ;;  %v9706_v59 = vadd.f32 %v16628_v44, %v9705_v55 }
 0x55f   : > { %v12038_v42 = vpop.f32.mrf.mxu0 }
 0x560   : > { %v9566_v38 = vmax.f32 %v9532_v1, 0.0  ;;  %9866 = vst [vmem:[%s14439_s27 + $0x70] sm:$0xff] %v9834_v58  ;;  %v9832_v19 = vmax.f32 %v9706_v59, 0.0  ;;  %v9717_v28 = vadd.f32 %v12038_v42, %v16628_v44 }
 0x561   : > { %v9708_v63 = vpop.f32.mrf.mxu0 }
 0x562   : > { %9598 = vst [vmem:[%s14439_s27 + $0x4f0] sm:$0xff] %v9566_v38  ;;  %9864 = vst [vmem:[%s14439_s27 + $0x20] sm:$0xff] %v9832_v19  ;;  %v9835_v47 = vmax.f32 %v9717_v28, 0.0  ;;  %v9709_v8 = vadd.f32 %v16628_v44, %v9708_v63 }
 0x563   : > { %v12041_v33 = vpop.f32.mrf.mxu0 }
 0x564   : > { %9867 = vst [vmem:[%s14439_s27 + $0x98] sm:$0xff] %v9835_v47  ;;  %v9833_v36 = vmax.f32 %v9709_v8, 0.0  ;;  %v9730_v45 = vadd.f32 %v12041_v33, %v16628_v44 }
 0x565   : > { %v9721_v37 = vpop.f32.mrf.mxu0 }
 0x566   : > { %9865 = vst [vmem:[%s14439_s27 + $0x48] sm:$0xff] %v9833_v36  ;;  %v9838_v3 = vmax.f32 %v9730_v45, 0.0  ;;  %v9722_v41 = vadd.f32 %v16628_v44, %v9721_v37 }
 0x567   : > { %v12042_v24 = vpop.f32.mrf.mxu0 }
 0x568   : > { %9870 = vst [vmem:[%s14439_s27 + $0x110] sm:$0xff] %v9838_v3  ;;  %v9836_v4 = vmax.f32 %v9722_v41, 0.0  ;;  %v9733_v13 = vadd.f32 %v12042_v24, %v16628_v44 }
 0x569   : > { %v9724_v2 = vpop.f32.mrf.mxu0 }
 0x56a   : > { %9868 = vst [vmem:[%s14439_s27 + $0xc0] sm:$0xff] %v9836_v4  ;;  %v9839_v40 = vmax.f32 %v9733_v13, 0.0  ;;  %v9725_v6 = vadd.f32 %v16628_v44, %v9724_v2 }
 0x56b   : > { %v12045_v0 = vpop.f32.mrf.mxu0 }
 0x56c   : > { %9871 = vst [vmem:[%s14439_s27 + $0x138] sm:$0xff] %v9839_v40  ;;  %v9837_v32 = vmax.f32 %v9725_v6, 0.0  ;;  %v9746_v52 = vadd.f32 %v12045_v0, %v16628_v44 }
 0x56d   : > { %v9737_v5 = vpop.f32.mrf.mxu0 }
 0x56e   : > { %9869 = vst [vmem:[%s14439_s27 + $0xe8] sm:$0xff] %v9837_v32  ;;  %v9842_v9 = vmax.f32 %v9746_v52, 0.0  ;;  %v9738_v15 = vadd.f32 %v16628_v44, %v9737_v5 }
 0x56f   : > { %v12046_v60 = vpop.f32.mrf.mxu0 }
 0x570   : > { %9874 = vst [vmem:[%s14439_s27 + $0x1b0] sm:$0xff] %v9842_v9  ;;  %v9840_v54 = vmax.f32 %v9738_v15, 0.0  ;;  %v9749_v57 = vadd.f32 %v12046_v60, %v16628_v44 }
 0x571   : > { %v9740_v7 = vpop.f32.mrf.mxu0 }
 0x572   : > { %9872 = vst [vmem:[%s14439_s27 + $0x160] sm:$0xff] %v9840_v54  ;;  %v9843_v46 = vmax.f32 %v9749_v57, 0.0  ;;  %v9741_v49 = vadd.f32 %v16628_v44, %v9740_v7 }
 0x573   : > { %v12049_v25 = vpop.f32.mrf.mxu0 }
 0x574   : > { %9875 = vst [vmem:[%s14439_s27 + $0x1d8] sm:$0xff] %v9843_v46  ;;  %v9841_v21 = vmax.f32 %v9741_v49, 0.0  ;;  %v9762_v18 = vadd.f32 %v12049_v25, %v16628_v44 }
 0x575   : > { %v9753_v17 = vpop.f32.mrf.mxu0 }
 0x576   : > { %9873 = vst [vmem:[%s14439_s27 + $0x188] sm:$0xff] %v9841_v21  ;;  %v9846_v11 = vmax.f32 %v9762_v18, 0.0  ;;  %v9754_v10 = vadd.f32 %v16628_v44, %v9753_v17 }
 0x577   : > { %v12050_v20 = vpop.f32.mrf.mxu0 }
 0x578   : > { %9878 = vst [vmem:[%s14439_s27 + $0x250] sm:$0xff] %v9846_v11  ;;  %v9844_v48 = vmax.f32 %v9754_v10, 0.0  ;;  %v9765_v39 = vadd.f32 %v12050_v20, %v16628_v44 }
 0x579   : > { %v9756_v23 = vpop.f32.mrf.mxu0 }
 0x57a   : > { %9876 = vst [vmem:[%s14439_s27 + $0x200] sm:$0xff] %v9844_v48  ;;  %v9847_v34 = vmax.f32 %v9765_v39, 0.0  ;;  %v9757_v50 = vadd.f32 %v16628_v44, %v9756_v23 }
 0x57b   : > { %v12053_v31 = vpop.f32.mrf.mxu0 }
 0x57c   : > { %9879 = vst [vmem:[%s14439_s27 + $0x278] sm:$0xff] %v9847_v34  ;;  %v9845_v61 = vmax.f32 %v9757_v50, 0.0  ;;  %v9778_v22 = vadd.f32 %v12053_v31, %v16628_v44 }
 0x57d   : > { %v9769_v14 = vpop.f32.mrf.mxu0 }
 0x57e   : > { %9877 = vst [vmem:[%s14439_s27 + $0x228] sm:$0xff] %v9845_v61  ;;  %v9850_v43 = vmax.f32 %v9778_v22, 0.0  ;;  %v9770_v16 = vadd.f32 %v16628_v44, %v9769_v14 }
 0x57f   : > { %v12054_v51 = vpop.f32.mrf.mxu0 }
 0x580   : > { %9882 = vst [vmem:[%s14439_s27 + $0x2f0] sm:$0xff] %v9850_v43  ;;  %v9848_v26 = vmax.f32 %v9770_v16, 0.0  ;;  %v9781_v29 = vadd.f32 %v12054_v51, %v16628_v44 }
 0x581   : > { %v9772_v12 = vpop.f32.mrf.mxu0 }
 0x582   : > { %9880 = vst [vmem:[%s14439_s27 + $0x2a0] sm:$0xff] %v9848_v26  ;;  %v9851_v53 = vmax.f32 %v9781_v29, 0.0  ;;  %v9773_v35 = vadd.f32 %v16628_v44, %v9772_v12 }
 0x583   : > { %v12057_v30 = vpop.f32.mrf.mxu0 }
 0x584   : > { %9883 = vst [vmem:[%s14439_s27 + $0x318] sm:$0xff] %v9851_v53  ;;  %v9849_v62 = vmax.f32 %v9773_v35, 0.0  ;;  %v9794_v56 = vadd.f32 %v12057_v30, %v16628_v44 }
 0x585   : > { %v9785_v27 = vpop.f32.mrf.mxu0 }
 0x586   : > { %9881 = vst [vmem:[%s14439_s27 + $0x2c8] sm:$0xff] %v9849_v62  ;;  %v9854_v55 = vmax.f32 %v9794_v56, 0.0  ;;  %v9786_v1 = vadd.f32 %v16628_v44, %v9785_v27 }
 0x587   : > { %v12058_v58 = vpop.f32.mrf.mxu0 }
 0x588   : > { %9886 = vst [vmem:[%s14439_s27 + $0x390] sm:$0xff] %v9854_v55  ;;  %v9852_v59 = vmax.f32 %v9786_v1, 0.0  ;;  %v9797_v42 = vadd.f32 %v12058_v58, %v16628_v44 }
 0x589   : > { %v9788_v38 = vpop.f32.mrf.mxu0 }
 0x58a   : > { %9884 = vst [vmem:[%s14439_s27 + $0x340] sm:$0xff] %v9852_v59  ;;  %v9855_v19 = vmax.f32 %v9797_v42, 0.0  ;;  %v9789_v28 = vadd.f32 %v16628_v44, %v9788_v38 }
 0x58c   : > { %9887 = vst [vmem:[%s14439_s27 + $0x3b8] sm:$0xff] %v9855_v19  ;;  %v9853_v63 = vmax.f32 %v9789_v28, 0.0 }
 0x58e   : > { %9885 = vst [vmem:[%s14439_s27 + $0x368] sm:$0xff] %v9853_v63 }
 0x58f   : > { %12871 = shalt.err (!%p12868_p13)
}
 0x590   : > { %s12872_s24 = scalar_lea.hbm %s16714_s16, 20480  ;;  %s12876_s29 = scalar_lea.hbm %s16771_s9, 40960 }
 0x591   : > { %p12873_p0 = scmp.ne.s32.totalorder %s16714_s16, %s12872_s24  ;;  %p12877_p9 = scmp.lt.s32.totalorder %s16714_s16, %s16771_s9 }
 0x592   : > { %p12878_p12 = scmp.lt.s32.totalorder %s12876_s29, %s12872_s24 }
 0x593   : > { %p12874_p1 = pnand %p12873_p0, %p16959_p7 }
 0x594   : > { %p12879_p3 = por %p12878_p12, %p12877_p9 }
 0x595   : > { %p12875_p2 = pneg %p12874_p1 }
 0x597   : > { %p12880_p4 = pnand %p12879_p3, %p12875_p2 }
 0x599   : > { %12883 = shalt.err (!%p12880_p4)
}
 0x59a   : > { %s12945_s4 = smov 640   ;;  %s12946_s25 = smov 40  }
 0x59b   : > { %12105 = dma.vmem_to_hbm [thread:$0]  (%p16959_p7), %s16716_s28, 20480, %s16714_s16, %s16722_s13, %s12945_s4, %s12945_s4, %s12946_s25  }
 0x59c PF: > { %p12137_p5 = scmp.ge.s32.totalorder %s12930_s12, 2  ;;  %s9925_s23 = sand.u32 1, %s12918_s30  }
 0x59d   : > { %p16960_p6 = scmp.ne.s32.totalorder %s16807_s20, 0  ;;  %s9926_s17 = scalar_lea.sflag [#allocation6], %s9925_s23 }
 0x59f   : > { %p12124_p10 = pnand %p12137_p5, %p16960_p6 }
 0x5a1   : > { %p12125_p8 = pneg %p12124_p10 }
 0x5a3   : > { %12913 = dma.done.wait (%p12125_p8), %s9926_s17, 20480  }
 0x5a4   : > { %12915 = vsyncadd (%p12125_p8), %s9926_s17, 4294946816  ;;  %p22_p11 = scmp.ge.s32.totalorder %s13022_s15, 4   ;;  %s16961_s30 = smov %s12922_s10 }
 0x5a5   : > { %s16962_s10 = smov %s12926_s11  ;;  %s16963_s11 = smov %s13033_s18 }
 0x5a6   : > { %s16964_s12 = smov %s13022_s15  ;;  %24 = sbr.rel (!%p22_p11) target bundleno = 9 (0x9), region = 120 }
 0x5ab   :  { %9931 = vsyncpa [#allocation5], 1 }
 0x5ac   :  { %9933 = vsyncpa [#allocation5 + $0x1], 1 }
 0x5ad   :  { %9934 = vsyncpa [#allocation8], 1 }
 0x5ae   :  { %9935 = vsyncpa [#allocation11], 1 }
 0x5af   :  { %9936 = vsyncpa [#allocation6], 1 }
 0x5b0   :  { %9938 = vsyncpa [#allocation6 + $0x1], 1 }

</bundles_post_ra>
